<compile_context>
chip_gen: v7x
topology: tpu7x:2x2x1
jax: 0.10.0
libtpu: 0.0.40
codegen_flags: <defaults>
</compile_context>

<pallas_src>
import functools

import jax
import jax.numpy as jnp
from jax.experimental import pallas as pl
from jax.experimental.pallas import tpu as pltpu

EPS = 1e-5  # PyTorch InstanceNorm2d default (affine=False, eps=1e-5, biased var)


def _round_up(x, m):
    return ((x + m - 1) // m) * m


# ---------------------------------------------------------------------------
# Pallas kernels
# ---------------------------------------------------------------------------
def _gemm_bias_kernel(a_ref, b_ref, bias_ref, o_ref, acc_ref, *, activation):
    """Tiled GEMM with K-accumulation; bias + optional activation in epilogue."""
    @pl.when(pl.program_id(2) == 0)
    def _():
        acc_ref[...] = jnp.zeros_like(acc_ref)

    acc_ref[...] += jnp.dot(a_ref[...], b_ref[...],
                            preferred_element_type=jnp.float32)

    @pl.when(pl.program_id(2) == pl.num_programs(2) - 1)
    def _():
        y = acc_ref[...] + bias_ref[...]          # bias added exactly once
        if activation == "relu":
            y = jnp.maximum(y, 0.0)
        elif activation == "tanh":
            y = jnp.tanh(y)                       # EUP slot, free vs MXU
        o_ref[...] = y.astype(o_ref.dtype)


def _in_stats_kernel(x_ref, mean_ref, rstd_ref, *, inv_hw):
    """Pass 1: accumulate per-(n,c) sum and sum-of-squares over HW tiles."""
    h = pl.program_id(1)

    @pl.when(h == 0)
    def _():
        mean_ref[...] = jnp.zeros_like(mean_ref)
        rstd_ref[...] = jnp.zeros_like(rstd_ref)

    x = x_ref[...]                                # (1, hw_tile, C) f32
    mean_ref[...] += jnp.sum(x, axis=1, keepdims=True)
    rstd_ref[...] += jnp.sum(x * x, axis=1, keepdims=True)

    @pl.when(h == pl.num_programs(1) - 1)
    def _():
        m = mean_ref[...] * inv_hw
        var = jnp.maximum(rstd_ref[...] * inv_hw - m * m, 0.0)  # biased var
        mean_ref[...] = m
        rstd_ref[...] = jax.lax.rsqrt(var + EPS)


def _in_apply_kernel(x_ref, mean_ref, rstd_ref, o_ref, *, relu):
    """Pass 2: normalize (+ optional fused ReLU)."""
    y = (x_ref[...] - mean_ref[...]) * rstd_ref[...]
    if relu:
        y = jnp.maximum(y, 0.0)
    o_ref[...] = y


def _in_apply_skip_kernel(x_ref, mean_ref, rstd_ref, s_ref, o_ref):
    """Pass 2 (residual tail): normalize + fused residual skip-add."""
    o_ref[...] = (x_ref[...] - mean_ref[...]) * rstd_ref[...] + s_ref[...]


# ---------------------------------------------------------------------------
# GEMM wrapper (tiled, bf16 MXU operands, f32 accumulation)
# ---------------------------------------------------------------------------
def _pallas_gemm_bias(a, b, bias, activation=None,
                      tm_cap=512, tn_cap=256, tk_cap=1152):
    """a: (M, K), b: (K, N), bias: (N,) -> (M, N) f32."""
    M, K = a.shape
    K2, N = b.shape
    assert K == K2 and bias.shape == (N,)

    # Tile sizes: sublane-bearing dims multiples of 8, lane-bearing multiples
    # of 128 (or full), capped to fit comfortably in scoped VMEM on v5e/v6e/v7x.
    tm = min(tm_cap, _round_up(M, 8))
    tn = min(tn_cap, _round_up(N, 128))
    tk = min(tk_cap, _round_up(K, 128))
    Mp, Kp, Np = _round_up(M, tm), _round_up(K, tk), _round_up(N, tn)

    a_p = jnp.pad(a.astype(jnp.bfloat16), ((0, Mp - M), (0, Kp - K)))
    b_p = jnp.pad(b.astype(jnp.bfloat16), ((0, Kp - K), (0, Np - N)))
    bias_p = jnp.pad(bias.astype(jnp.float32), (0, Np - N)).reshape(1, Np)

    grid = (Mp // tm, Np // tn, Kp // tk)
    cost = pl.CostEstimate(
        flops=2 * Mp * Np * Kp,
        transcendentals=Mp * Np if activation == "tanh" else 0,
        bytes_accessed=Mp * Kp * 2 + Kp * Np * 2 + Mp * Np * 4 + Np * 4,
    )

    out = pl.pallas_call(
        functools.partial(_gemm_bias_kernel, activation=activation),
        out_shape=jax.ShapeDtypeStruct((Mp, Np), jnp.float32),
        grid_spec=pltpu.PrefetchScalarGridSpec(
            num_scalar_prefetch=0,
            grid=grid,
            in_specs=[
                pl.BlockSpec((tm, tk), lambda i, j, k: (i, k)),
                pl.BlockSpec((tk, tn), lambda i, j, k: (k, j)),
                pl.BlockSpec((1, tn), lambda i, j, k: (0, j)),
            ],
            out_specs=pl.BlockSpec((tm, tn), lambda i, j, k: (i, j)),
            scratch_shapes=[pltpu.VMEM((tm, tn), jnp.float32)],
        ),
        compiler_params=pltpu.CompilerParams(
            dimension_semantics=("parallel", "parallel", "arbitrary"),
            vmem_limit_bytes=48 * 1024 * 1024,
        ),
        cost_estimate=cost,
    )(a_p, b_p, bias_p)

    if Mp != M or Np != N:
        out = out[:M, :N]
    return out


# ---------------------------------------------------------------------------
# Layer wrappers (glue + pallas_call)
# ---------------------------------------------------------------------------
def conv2d(x, w, b, stride=1, pad=0, pad_mode="zero", activation=None):
    """x: (N, H, W, Cin) NHWC.  w: (Cout, Cin, kh, kw) PyTorch layout.  b: (Cout,)."""
    N, H, W, Cin = x.shape
    Cout, Cin2, kh, kw = w.shape
    assert Cin == Cin2
    if pad > 0:
        mode = "reflect" if pad_mode == "reflect" else "constant"
        x = jnp.pad(x, ((0, 0), (pad, pad), (pad, pad), (0, 0)), mode=mode)
    x = x.astype(jnp.bfloat16)  # MXU operand dtype; halves im2col HBM bytes
    Hp, Wp = x.shape[1], x.shape[2]
    Hout = (Hp - kh) // stride + 1
    Wout = (Wp - kw) // stride + 1

    # TODO(synk): fold the kh*kw taps into the GEMM K grid axis (index_map over
    # the padded activation) to avoid materializing im2col patches in HBM.
    patches = []
    for i in range(kh):
        for j in range(kw):
            patches.append(
                x[:, i:i + (Hout - 1) * stride + 1:stride,
                     j:j + (Wout - 1) * stride + 1:stride, :]
            )
    patches = jnp.stack(patches, axis=3)                     # (N,Hout,Wout,kh*kw,Cin) bf16
    a = patches.reshape(N * Hout * Wout, kh * kw * Cin)
    wmat = jnp.transpose(w, (2, 3, 1, 0)).reshape(kh * kw * Cin, Cout)
    out = _pallas_gemm_bias(a, wmat, b, activation=activation)
    return out.reshape(N, Hout, Wout, Cout)


def _pick_hw_tile(hw, cap=2048):
    """Largest multiple-of-8 divisor of hw not exceeding cap (or hw itself)."""
    if hw <= cap:
        return hw
    t = (cap // 8) * 8
    while t >= 8:
        if hw % t == 0:
            return t
        t -= 8
    return hw


def instance_norm(x, relu=False, skip=None):
    """InstanceNorm2d (affine=False), two-pass tiled, fused ReLU / residual add."""
    N, H, W, C = x.shape
    HW = H * W
    xf = x.reshape(N, HW, C).astype(jnp.float32)
    hw_tile = _pick_hw_tile(HW)
    grid = (N, HW // hw_tile)

    x_spec = pl.BlockSpec((1, hw_tile, C), lambda n, h: (n, h, 0))
    stat_spec = pl.BlockSpec((1, 1, C), lambda n, h: (n, 0, 0))
    stat_shape = jax.ShapeDtypeStruct((N, 1, C), jnp.float32)

    # Pass 1: per-(n, c) mean / rsqrt(var + eps); outputs double as accumulators
    # resident across the 'arbitrary' HW grid axis.
    mean, rstd = pl.pallas_call(
        functools.partial(_in_stats_kernel, inv_hw=1.0 / HW),
        grid=grid,
        in_specs=[x_spec],
        out_specs=(stat_spec, stat_spec),
        out_shape=(stat_shape, stat_shape),
        compiler_params=pltpu.CompilerParams(
            dimension_semantics=("parallel", "arbitrary")),
    )(xf)

    # Pass 2: normalize (+ fused ReLU or fused residual skip-add), tiled over HW.
    if skip is None:
        out = pl.pallas_call(
            functools.partial(_in_apply_kernel, relu=relu),
            grid=grid,
            in_specs=[x_spec, stat_spec, stat_spec],
            out_specs=x_spec,
            out_shape=jax.ShapeDtypeStruct((N, HW, C), jnp.float32),
            compiler_params=pltpu.CompilerParams(
                dimension_semantics=("parallel", "parallel")),
        )(xf, mean, rstd)
    else:
        sf = skip.reshape(N, HW, C).astype(jnp.float32)
        out = pl.pallas_call(
            _in_apply_skip_kernel,
            grid=grid,
            in_specs=[x_spec, stat_spec, stat_spec, x_spec],
            out_specs=x_spec,
            out_shape=jax.ShapeDtypeStruct((N, HW, C), jnp.float32),
            compiler_params=pltpu.CompilerParams(
                dimension_semantics=("parallel", "parallel")),
        )(xf, mean, rstd, sf)
    return out.reshape(N, H, W, C)


def upsample_nearest_2x(x):
    # nn.Upsample(scale_factor=2), default mode='nearest' (data movement glue).
    return jnp.repeat(jnp.repeat(x, 2, axis=1), 2, axis=2)


# ---------------------------------------------------------------------------
# Parameters (deterministic synthetic init; shapes from the module __init__)
# ---------------------------------------------------------------------------
def _init_conv(key, cout, cin, k):
    kw_, kb_ = jax.random.split(key)
    fan_in = cin * k * k
    w = jax.random.normal(kw_, (cout, cin, k, k), jnp.float32) / jnp.sqrt(fan_in)
    b = jax.random.normal(kb_, (cout,), jnp.float32) * 0.01
    return w, b


def init_generator_params(key):
    specs = [("c1", 64, 3, 7), ("c2", 128, 64, 3), ("c3", 256, 128, 3)]
    for i in range(9):
        specs.append((f"r{i}a", 256, 256, 3))
        specs.append((f"r{i}b", 256, 256, 3))
    specs += [("c4", 128, 256, 3), ("c5", 64, 128, 3), ("c6", 3, 64, 7)]
    keys = jax.random.split(key, len(specs))
    return {
        name: _init_conv(k, cout, cin, kk)
        for (name, cout, cin, kk), k in zip(specs, keys)
    }


# ---------------------------------------------------------------------------
# Generator forward
# ---------------------------------------------------------------------------
def residual_block(x, wa, ba, wb, bb):
    h = conv2d(x, wa, ba, stride=1, pad=1, pad_mode="reflect")
    h = instance_norm(h, relu=True)
    h = conv2d(h, wb, bb, stride=1, pad=1, pad_mode="reflect")
    return instance_norm(h, relu=False, skip=x)   # x + res(x), skip fused in IN


def generator_forward(x_nchw, params):
    x = jnp.transpose(x_nchw, (0, 2, 3, 1)).astype(jnp.float32)  # NCHW -> NHWC

    w, b = params["c1"]
    x = conv2d(x, w, b, pad=3, pad_mode="reflect")     # ReflectionPad2d(3) + Conv(3,64,7)
    x = instance_norm(x, relu=True)

    w, b = params["c2"]
    x = conv2d(x, w, b, stride=2, pad=1)               # Conv(64,128,3,s=2,p=1)
    x = instance_norm(x, relu=True)

    w, b = params["c3"]
    x = conv2d(x, w, b, stride=2, pad=1)               # Conv(128,256,3,s=2,p=1)
    x = instance_norm(x, relu=True)

    for i in range(9):
        wa, ba = params[f"r{i}a"]
        wb, bb = params[f"r{i}b"]
        x = residual_block(x, wa, ba, wb, bb)

    w, b = params["c4"]
    x = conv2d(x, w, b, pad=1)                         # Conv(256,128,3,p=1)
    x = upsample_nearest_2x(x)                         # nn.Upsample(scale_factor=2)
    x = instance_norm(x, relu=True)

    w, b = params["c5"]
    x = conv2d(x, w, b, pad=1)                         # Conv(128,64,3,p=1)
    x = upsample_nearest_2x(x)
    x = instance_norm(x, relu=True)

    w, b = params["c6"]
    # ReflectionPad2d(3) + Conv(64,3,7) with Tanh fused into the GEMM epilogue.
    x = conv2d(x, w, b, pad=3, pad_mode="reflect", activation="tanh")

    return jnp.transpose(x, (0, 3, 1, 2))              # back to NCHW


# ---------------------------------------------------------------------------
if __name__ == "__main__":
    key = jax.random.PRNGKey(0)
    pkey, xkey = jax.random.split(key)
    params = init_generator_params(pkey)
    x = jax.random.normal(xkey, (2, 3, 16, 16), jnp.float32)  # NCHW like PyTorch
    y = jax.jit(generator_forward)(x, params)
    y = jax.block_until_ready(y)
    assert y.shape == (2, 3, 16, 16), y.shape
    assert bool(jnp.all(jnp.isfinite(y)))
    assert bool(jnp.all(jnp.abs(y) <= 1.0 + 1e-6))  # tanh bound
    print("KERNEL_OK")
</pallas_src>

<mosaic_0001>
module attributes {stable_mosaic.version = 11 : i64} {
  func.func @_gemm_bias_kernel(%arg0: i32, %arg1: i32, %arg2: i32, %arg3: memref<512x256xbf16, #tpu.memory_space<vmem>>, %arg4: memref<256x128xbf16, #tpu.memory_space<vmem>>, %arg5: memref<1x128xf32, #tpu.memory_space<vmem>>, %arg6: memref<512x128xf32, #tpu.memory_space<vmem>>, %arg7: memref<512x128xf32, #tpu.memory_space<vmem>>) attributes {dimension_semantics = [#tpu.dimension_semantics<parallel>, #tpu.dimension_semantics<parallel>, #tpu.dimension_semantics<arbitrary>], iteration_bounds = array<i64: 1, 1, 1>, scalar_prefetch = 0 : i64, scratch_operands = 1 : i64, tpu.core_type = #tpu.core_type<tc>, window_params = [{transform_indices = @transform_0, window_bounds = array<i64: 512, 256>}, {transform_indices = @transform_1, window_bounds = array<i64: 256, 128>}, {transform_indices = @transform_2, window_bounds = array<i64: 1, 128>}, {transform_indices = @transform_3, window_bounds = array<i64: 512, 128>}]} {
    %c0_i32 = arith.constant 0 : i32
    %0 = arith.cmpi eq, %arg2, %c0_i32 : i32
    %1 = arith.extui %0 : i1 to i32
    %c0_i32_0 = arith.constant 0 : i32
    %2 = arith.cmpi ne, %1, %c0_i32_0 : i32
    scf.if %2 {
      %cst_10 = arith.constant 0.000000e+00 : f32
      %12 = vector.broadcast %cst_10 : f32 to vector<512x128xf32>
      %c0_11 = arith.constant 0 : index
      %c0_12 = arith.constant 0 : index
      %13 = vector.load %arg7[%c0_11, %c0_12] : memref<512x128xf32, #tpu.memory_space<vmem>>, vector<512x128xf32>
      tpu.vector_store %arg7[%c0_11, %c0_12], %12 {strides = array<i32>} : memref<512x128xf32, #tpu.memory_space<vmem>>, vector<512x128xf32>,
    } else {
    }
    %c0 = arith.constant 0 : index
    %c0_1 = arith.constant 0 : index
    %3 = vector.load %arg7[%c0, %c0_1] : memref<512x128xf32, #tpu.memory_space<vmem>>, vector<512x128xf32>
    %c0_2 = arith.constant 0 : index
    %c0_3 = arith.constant 0 : index
    %4 = vector.load %arg3[%c0_2, %c0_3] : memref<512x256xbf16, #tpu.memory_space<vmem>>, vector<512x256xbf16>
    %c0_4 = arith.constant 0 : index
    %c0_5 = arith.constant 0 : index
    %5 = vector.load %arg4[%c0_4, %c0_5] : memref<256x128xbf16, #tpu.memory_space<vmem>>, vector<256x128xbf16>
    %cst = arith.constant dense<0.000000e+00> : vector<512x128xf32>
    %6 = tpu.matmul %4, %5, %cst {dimension_numbers = #tpu.dot_dimension_numbers<[1], [0], [0], [1], [0, 0, 1, 1], [], []>} : vector<512x256xbf16>, vector<256x128xbf16>, vector<512x128xf32> -> vector<512x128xf32>
    %7 = arith.addf %3, %6 : vector<512x128xf32>
    %c0_6 = arith.constant 0 : index
    %c0_7 = arith.constant 0 : index
    %8 = vector.load %arg7[%c0_6, %c0_7] : memref<512x128xf32, #tpu.memory_space<vmem>>, vector<512x128xf32>
    tpu.vector_store %arg7[%c0_6, %c0_7], %7 {strides = array<i32>} : memref<512x128xf32, #tpu.memory_space<vmem>>, vector<512x128xf32>,
    %c0_i32_8 = arith.constant 0 : i32
    %9 = arith.cmpi eq, %arg2, %c0_i32_8 : i32
    %10 = arith.extui %9 : i1 to i32
    %c0_i32_9 = arith.constant 0 : i32
    %11 = arith.cmpi ne, %10, %c0_i32_9 : i32
    scf.if %11 {
      %c0_10 = arith.constant 0 : index
      %c0_11 = arith.constant 0 : index
      %12 = vector.load %arg7[%c0_10, %c0_11] : memref<512x128xf32, #tpu.memory_space<vmem>>, vector<512x128xf32>
      %c0_12 = arith.constant 0 : index
      %c0_13 = arith.constant 0 : index
      %13 = vector.load %arg5[%c0_12, %c0_13] : memref<1x128xf32, #tpu.memory_space<vmem>>, vector<1x128xf32>
      %14 = vector.broadcast %13 : vector<1x128xf32> to vector<512x128xf32>
      %15 = arith.addf %12, %14 : vector<512x128xf32>
      %c0_14 = arith.constant 0 : index
      %c0_15 = arith.constant 0 : index
      %16 = vector.load %arg6[%c0_14, %c0_15] : memref<512x128xf32, #tpu.memory_space<vmem>>, vector<512x128xf32>
      tpu.vector_store %arg6[%c0_14, %c0_15], %15 {strides = array<i32>} : memref<512x128xf32, #tpu.memory_space<vmem>>, vector<512x128xf32>,
    } else {
    }
    return
  }
  func.func @transform_0(%arg0: i32, %arg1: i32, %arg2: i32) -> (i32, i32) {
    %c0_i32 = arith.constant 0 : i32
    return %arg0, %arg2 : i32, i32
  }
  func.func @transform_1(%arg0: i32, %arg1: i32, %arg2: i32) -> (i32, i32) {
    %c0_i32 = arith.constant 0 : i32
    return %arg2, %arg1 : i32, i32
  }
  func.func @transform_2(%arg0: i32, %arg1: i32, %arg2: i32) -> (i32, i32) {
    %c0_i32 = arith.constant 0 : i32
    %c0_i32_0 = arith.constant 0 : i32
    return %c0_i32, %arg1 : i32, i32
  }
  func.func @transform_3(%arg0: i32, %arg1: i32, %arg2: i32) -> (i32, i32) {
    %c0_i32 = arith.constant 0 : i32
    return %arg0, %arg1 : i32, i32
  }
}

module attributes {stable_mosaic.version = 11 : i64} {
  func.func @_in_stats_kernel(%arg0: i32, %arg1: i32, %arg2: memref<1x256x64xf32, #tpu.memory_space<vmem>>, %arg3: memref<1x1x64xf32, #tpu.memory_space<vmem>>, %arg4: memref<1x1x64xf32, #tpu.memory_space<vmem>>) attributes {dimension_semantics = [#tpu.dimension_semantics<parallel>, #tpu.dimension_semantics<arbitrary>], iteration_bounds = array<i64: 2, 1>, scalar_prefetch = 0 : i64, scratch_operands = 0 : i64, tpu.core_type = #tpu.core_type<tc>, window_params = [{transform_indices = @transform_0, window_bounds = array<i64: 1, 256, 64>}, {transform_indices = @transform_1, window_bounds = array<i64: 1, 1, 64>}, {transform_indices = @transform_2, window_bounds = array<i64: 1, 1, 64>}]} {
    %c0_i32 = arith.constant 0 : i32
    %0 = arith.cmpi eq, %arg1, %c0_i32 : i32
    %1 = arith.extui %0 : i1 to i32
    %c0_i32_0 = arith.constant 0 : i32
    %2 = arith.cmpi ne, %1, %c0_i32_0 : i32
    scf.if %2 {
      %cst_18 = arith.constant 0.000000e+00 : f32
      %18 = vector.broadcast %cst_18 : f32 to vector<1x1x64xf32>
      %c0_19 = arith.constant 0 : index
      %c0_20 = arith.constant 0 : index
      %c0_21 = arith.constant 0 : index
      %19 = vector.load %arg3[%c0_19, %c0_20, %c0_21] : memref<1x1x64xf32, #tpu.memory_space<vmem>>, vector<1x1x64xf32>
      tpu.vector_store %arg3[%c0_19, %c0_20, %c0_21], %18 {strides = array<i32>} : memref<1x1x64xf32, #tpu.memory_space<vmem>>, vector<1x1x64xf32>,
      %cst_22 = arith.constant 0.000000e+00 : f32
      %20 = vector.broadcast %cst_22 : f32 to vector<1x1x64xf32>
      %c0_23 = arith.constant 0 : index
      %c0_24 = arith.constant 0 : index
      %c0_25 = arith.constant 0 : index
      %21 = vector.load %arg4[%c0_23, %c0_24, %c0_25] : memref<1x1x64xf32, #tpu.memory_space<vmem>>, vector<1x1x64xf32>
      tpu.vector_store %arg4[%c0_23, %c0_24, %c0_25], %20 {strides = array<i32>} : memref<1x1x64xf32, #tpu.memory_space<vmem>>, vector<1x1x64xf32>,
    } else {
    }
    %c0 = arith.constant 0 : index
    %c0_1 = arith.constant 0 : index
    %c0_2 = arith.constant 0 : index
    %3 = vector.load %arg2[%c0, %c0_1, %c0_2] : memref<1x256x64xf32, #tpu.memory_space<vmem>>, vector<1x256x64xf32>
    %c0_3 = arith.constant 0 : index
    %c0_4 = arith.constant 0 : index
    %c0_5 = arith.constant 0 : index
    %4 = vector.load %arg3[%c0_3, %c0_4, %c0_5] : memref<1x1x64xf32, #tpu.memory_space<vmem>>, vector<1x1x64xf32>
    %cst = arith.constant dense<0.000000e+00> : vector<1x64xf32>
    %5 = vector.multi_reduction <add>, %3, %cst [1] : vector<1x256x64xf32> to vector<1x64xf32>
    %6 = vector.shape_cast %5 : vector<1x64xf32> to vector<1x1x64xf32>
    %7 = arith.addf %4, %6 : vector<1x1x64xf32>
    %c0_6 = arith.constant 0 : index
    %c0_7 = arith.constant 0 : index
    %c0_8 = arith.constant 0 : index
    %8 = vector.load %arg3[%c0_6, %c0_7, %c0_8] : memref<1x1x64xf32, #tpu.memory_space<vmem>>, vector<1x1x64xf32>
    tpu.vector_store %arg3[%c0_6, %c0_7, %c0_8], %7 {strides = array<i32>} : memref<1x1x64xf32, #tpu.memory_space<vmem>>, vector<1x1x64xf32>,
    %c0_9 = arith.constant 0 : index
    %c0_10 = arith.constant 0 : index
    %c0_11 = arith.constant 0 : index
    %9 = vector.load %arg4[%c0_9, %c0_10, %c0_11] : memref<1x1x64xf32, #tpu.memory_space<vmem>>, vector<1x1x64xf32>
    %10 = arith.mulf %3, %3 : vector<1x256x64xf32>
    %cst_12 = arith.constant dense<0.000000e+00> : vector<1x64xf32>
    %11 = vector.multi_reduction <add>, %10, %cst_12 [1] : vector<1x256x64xf32> to vector<1x64xf32>
    %12 = vector.shape_cast %11 : vector<1x64xf32> to vector<1x1x64xf32>
    %13 = arith.addf %9, %12 : vector<1x1x64xf32>
    %c0_13 = arith.constant 0 : index
    %c0_14 = arith.constant 0 : index
    %c0_15 = arith.constant 0 : index
    %14 = vector.load %arg4[%c0_13, %c0_14, %c0_15] : memref<1x1x64xf32, #tpu.memory_space<vmem>>, vector<1x1x64xf32>
    tpu.vector_store %arg4[%c0_13, %c0_14, %c0_15], %13 {strides = array<i32>} : memref<1x1x64xf32, #tpu.memory_space<vmem>>, vector<1x1x64xf32>,
    %c0_i32_16 = arith.constant 0 : i32
    %15 = arith.cmpi eq, %arg1, %c0_i32_16 : i32
    %16 = arith.extui %15 : i1 to i32
    %c0_i32_17 = arith.constant 0 : i32
    %17 = arith.cmpi ne, %16, %c0_i32_17 : i32
    scf.if %17 {
      %c0_18 = arith.constant 0 : index
      %c0_19 = arith.constant 0 : index
      %c0_20 = arith.constant 0 : index
      %18 = vector.load %arg3[%c0_18, %c0_19, %c0_20] : memref<1x1x64xf32, #tpu.memory_space<vmem>>, vector<1x1x64xf32>
      %cst_21 = arith.constant 3.906250e-03 : f32
      %19 = vector.broadcast %cst_21 : f32 to vector<1x1x64xf32>
      %20 = arith.mulf %18, %19 : vector<1x1x64xf32>
      %c0_22 = arith.constant 0 : index
      %c0_23 = arith.constant 0 : index
      %c0_24 = arith.constant 0 : index
      %21 = vector.load %arg4[%c0_22, %c0_23, %c0_24] : memref<1x1x64xf32, #tpu.memory_space<vmem>>, vector<1x1x64xf32>
      %cst_25 = arith.constant 3.906250e-03 : f32
      %22 = vector.broadcast %cst_25 : f32 to vector<1x1x64xf32>
      %23 = arith.mulf %21, %22 : vector<1x1x64xf32>
      %24 = arith.mulf %20, %20 : vector<1x1x64xf32>
      %25 = arith.subf %23, %24 : vector<1x1x64xf32>
      %cst_26 = arith.constant 0.000000e+00 : f32
      %26 = vector.broadcast %cst_26 : f32 to vector<1x1x64xf32>
      %27 = arith.maximumf %25, %26 : vector<1x1x64xf32>
      %c0_27 = arith.constant 0 : index
      %c0_28 = arith.constant 0 : index
      %c0_29 = arith.constant 0 : index
      %28 = vector.load %arg3[%c0_27, %c0_28, %c0_29] : memref<1x1x64xf32, #tpu.memory_space<vmem>>, vector<1x1x64xf32>
      tpu.vector_store %arg3[%c0_27, %c0_28, %c0_29], %20 {strides = array<i32>} : memref<1x1x64xf32, #tpu.memory_space<vmem>>, vector<1x1x64xf32>,
      %cst_30 = arith.constant 9.99999974E-6 : f32
      %29 = vector.broadcast %cst_30 : f32 to vector<1x1x64xf32>
      %30 = arith.addf %27, %29 : vector<1x1x64xf32>
      %31 = math.rsqrt %30 : vector<1x1x64xf32>
      %c0_31 = arith.constant 0 : index
      %c0_32 = arith.constant 0 : index
      %c0_33 = arith.constant 0 : index
      %32 = vector.load %arg4[%c0_31, %c0_32, %c0_33] : memref<1x1x64xf32, #tpu.memory_space<vmem>>, vector<1x1x64xf32>
      tpu.vector_store %arg4[%c0_31, %c0_32, %c0_33], %31 {strides = array<i32>} : memref<1x1x64xf32, #tpu.memory_space<vmem>>, vector<1x1x64xf32>,
    } else {
    }
    return
  }
  func.func @transform_0(%arg0: i32, %arg1: i32) -> (i32, i32, i32) {
    %c0_i32 = arith.constant 0 : i32
    %c0_i32_0 = arith.constant 0 : i32
    return %arg0, %arg1, %c0_i32 : i32, i32, i32
  }
  func.func @transform_1(%arg0: i32, %arg1: i32) -> (i32, i32, i32) {
    %c0_i32 = arith.constant 0 : i32
    %c0_i32_0 = arith.constant 0 : i32
    %c0_i32_1 = arith.constant 0 : i32
    return %arg0, %c0_i32, %c0_i32_0 : i32, i32, i32
  }
  func.func @transform_2(%arg0: i32, %arg1: i32) -> (i32, i32, i32) {
    %c0_i32 = arith.constant 0 : i32
    %c0_i32_0 = arith.constant 0 : i32
    %c0_i32_1 = arith.constant 0 : i32
    return %arg0, %c0_i32, %c0_i32_0 : i32, i32, i32
  }
}

module attributes {stable_mosaic.version = 11 : i64} {
  func.func @_in_apply_kernel(%arg0: i32, %arg1: i32, %arg2: memref<1x256x64xf32, #tpu.memory_space<vmem>>, %arg3: memref<1x1x64xf32, #tpu.memory_space<vmem>>, %arg4: memref<1x1x64xf32, #tpu.memory_space<vmem>>, %arg5: memref<1x256x64xf32, #tpu.memory_space<vmem>>) attributes {dimension_semantics = [#tpu.dimension_semantics<parallel>, #tpu.dimension_semantics<parallel>], iteration_bounds = array<i64: 2, 1>, scalar_prefetch = 0 : i64, scratch_operands = 0 : i64, tpu.core_type = #tpu.core_type<tc>, window_params = [{transform_indices = @transform_0, window_bounds = array<i64: 1, 256, 64>}, {transform_indices = @transform_1, window_bounds = array<i64: 1, 1, 64>}, {transform_indices = @transform_2, window_bounds = array<i64: 1, 1, 64>}, {transform_indices = @transform_3, window_bounds = array<i64: 1, 256, 64>}]} {
    %c0 = arith.constant 0 : index
    %c0_0 = arith.constant 0 : index
    %c0_1 = arith.constant 0 : index
    %0 = vector.load %arg2[%c0, %c0_0, %c0_1] : memref<1x256x64xf32, #tpu.memory_space<vmem>>, vector<1x256x64xf32>
    %c0_2 = arith.constant 0 : index
    %c0_3 = arith.constant 0 : index
    %c0_4 = arith.constant 0 : index
    %1 = vector.load %arg3[%c0_2, %c0_3, %c0_4] : memref<1x1x64xf32, #tpu.memory_space<vmem>>, vector<1x1x64xf32>
    %2 = vector.broadcast %1 : vector<1x1x64xf32> to vector<1x256x64xf32>
    %3 = arith.subf %0, %2 : vector<1x256x64xf32>
    %c0_5 = arith.constant 0 : index
    %c0_6 = arith.constant 0 : index
    %c0_7 = arith.constant 0 : index
    %4 = vector.load %arg4[%c0_5, %c0_6, %c0_7] : memref<1x1x64xf32, #tpu.memory_space<vmem>>, vector<1x1x64xf32>
    %5 = vector.broadcast %4 : vector<1x1x64xf32> to vector<1x256x64xf32>
    %6 = arith.mulf %3, %5 : vector<1x256x64xf32>
    %cst = arith.constant 0.000000e+00 : f32
    %7 = vector.broadcast %cst : f32 to vector<1x256x64xf32>
    %8 = arith.maximumf %6, %7 : vector<1x256x64xf32>
    %c0_8 = arith.constant 0 : index
    %c0_9 = arith.constant 0 : index
    %c0_10 = arith.constant 0 : index
    %9 = vector.load %arg5[%c0_8, %c0_9, %c0_10] : memref<1x256x64xf32, #tpu.memory_space<vmem>>, vector<1x256x64xf32>
    tpu.vector_store %arg5[%c0_8, %c0_9, %c0_10], %8 {strides = array<i32>} : memref<1x256x64xf32, #tpu.memory_space<vmem>>, vector<1x256x64xf32>,
    return
  }
  func.func @transform_0(%arg0: i32, %arg1: i32) -> (i32, i32, i32) {
    %c0_i32 = arith.constant 0 : i32
    %c0_i32_0 = arith.constant 0 : i32
    return %arg0, %arg1, %c0_i32 : i32, i32, i32
  }
  func.func @transform_1(%arg0: i32, %arg1: i32) -> (i32, i32, i32) {
    %c0_i32 = arith.constant 0 : i32
    %c0_i32_0 = arith.constant 0 : i32
    %c0_i32_1 = arith.constant 0 : i32
    return %arg0, %c0_i32, %c0_i32_0 : i32, i32, i32
  }
  func.func @transform_2(%arg0: i32, %arg1: i32) -> (i32, i32, i32) {
    %c0_i32 = arith.constant 0 : i32
    %c0_i32_0 = arith.constant 0 : i32
    %c0_i32_1 = arith.constant 0 : i32
    return %arg0, %c0_i32, %c0_i32_0 : i32, i32, i32
  }
  func.func @transform_3(%arg0: i32, %arg1: i32) -> (i32, i32, i32) {
    %c0_i32 = arith.constant 0 : i32
    %c0_i32_0 = arith.constant 0 : i32
    return %arg0, %arg1, %c0_i32 : i32, i32, i32
  }
}

module attributes {stable_mosaic.version = 11 : i64} {
  func.func @_gemm_bias_kernel(%arg0: i32, %arg1: i32, %arg2: i32, %arg3: memref<128x640xbf16, #tpu.memory_space<vmem>>, %arg4: memref<640x128xbf16, #tpu.memory_space<vmem>>, %arg5: memref<1x128xf32, #tpu.memory_space<vmem>>, %arg6: memref<128x128xf32, #tpu.memory_space<vmem>>, %arg7: memref<128x128xf32, #tpu.memory_space<vmem>>) attributes {dimension_semantics = [#tpu.dimension_semantics<parallel>, #tpu.dimension_semantics<parallel>, #tpu.dimension_semantics<arbitrary>], iteration_bounds = array<i64: 1, 1, 1>, scalar_prefetch = 0 : i64, scratch_operands = 1 : i64, tpu.core_type = #tpu.core_type<tc>, window_params = [{transform_indices = @transform_0, window_bounds = array<i64: 128, 640>}, {transform_indices = @transform_1, window_bounds = array<i64: 640, 128>}, {transform_indices = @transform_2, window_bounds = array<i64: 1, 128>}, {transform_indices = @transform_3, window_bounds = array<i64: 128, 128>}]} {
    %c0_i32 = arith.constant 0 : i32
    %0 = arith.cmpi eq, %arg2, %c0_i32 : i32
    %1 = arith.extui %0 : i1 to i32
    %c0_i32_0 = arith.constant 0 : i32
    %2 = arith.cmpi ne, %1, %c0_i32_0 : i32
    scf.if %2 {
      %cst_10 = arith.constant 0.000000e+00 : f32
      %12 = vector.broadcast %cst_10 : f32 to vector<128x128xf32>
      %c0_11 = arith.constant 0 : index
      %c0_12 = arith.constant 0 : index
      %13 = vector.load %arg7[%c0_11, %c0_12] : memref<128x128xf32, #tpu.memory_space<vmem>>, vector<128x128xf32>
      tpu.vector_store %arg7[%c0_11, %c0_12], %12 {strides = array<i32>} : memref<128x128xf32, #tpu.memory_space<vmem>>, vector<128x128xf32>,
    } else {
    }
    %c0 = arith.constant 0 : index
    %c0_1 = arith.constant 0 : index
    %3 = vector.load %arg7[%c0, %c0_1] : memref<128x128xf32, #tpu.memory_space<vmem>>, vector<128x128xf32>
    %c0_2 = arith.constant 0 : index
    %c0_3 = arith.constant 0 : index
    %4 = vector.load %arg3[%c0_2, %c0_3] : memref<128x640xbf16, #tpu.memory_space<vmem>>, vector<128x640xbf16>
    %c0_4 = arith.constant 0 : index
    %c0_5 = arith.constant 0 : index
    %5 = vector.load %arg4[%c0_4, %c0_5] : memref<640x128xbf16, #tpu.memory_space<vmem>>, vector<640x128xbf16>
    %cst = arith.constant dense<0.000000e+00> : vector<128x128xf32>
    %6 = tpu.matmul %4, %5, %cst {dimension_numbers = #tpu.dot_dimension_numbers<[1], [0], [0], [1], [0, 0, 1, 1], [], []>} : vector<128x640xbf16>, vector<640x128xbf16>, vector<128x128xf32> -> vector<128x128xf32>
    %7 = arith.addf %3, %6 : vector<128x128xf32>
    %c0_6 = arith.constant 0 : index
    %c0_7 = arith.constant 0 : index
    %8 = vector.load %arg7[%c0_6, %c0_7] : memref<128x128xf32, #tpu.memory_space<vmem>>, vector<128x128xf32>
    tpu.vector_store %arg7[%c0_6, %c0_7], %7 {strides = array<i32>} : memref<128x128xf32, #tpu.memory_space<vmem>>, vector<128x128xf32>,
    %c0_i32_8 = arith.constant 0 : i32
    %9 = arith.cmpi eq, %arg2, %c0_i32_8 : i32
    %10 = arith.extui %9 : i1 to i32
    %c0_i32_9 = arith.constant 0 : i32
    %11 = arith.cmpi ne, %10, %c0_i32_9 : i32
    scf.if %11 {
      %c0_10 = arith.constant 0 : index
      %c0_11 = arith.constant 0 : index
      %12 = vector.load %arg7[%c0_10, %c0_11] : memref<128x128xf32, #tpu.memory_space<vmem>>, vector<128x128xf32>
      %c0_12 = arith.constant 0 : index
      %c0_13 = arith.constant 0 : index
      %13 = vector.load %arg5[%c0_12, %c0_13] : memref<1x128xf32, #tpu.memory_space<vmem>>, vector<1x128xf32>
      %14 = vector.broadcast %13 : vector<1x128xf32> to vector<128x128xf32>
      %15 = arith.addf %12, %14 : vector<128x128xf32>
      %c0_14 = arith.constant 0 : index
      %c0_15 = arith.constant 0 : index
      %16 = vector.load %arg6[%c0_14, %c0_15] : memref<128x128xf32, #tpu.memory_space<vmem>>, vector<128x128xf32>
      tpu.vector_store %arg6[%c0_14, %c0_15], %15 {strides = array<i32>} : memref<128x128xf32, #tpu.memory_space<vmem>>, vector<128x128xf32>,
    } else {
    }
    return
  }
  func.func @transform_0(%arg0: i32, %arg1: i32, %arg2: i32) -> (i32, i32) {
    %c0_i32 = arith.constant 0 : i32
    return %arg0, %arg2 : i32, i32
  }
  func.func @transform_1(%arg0: i32, %arg1: i32, %arg2: i32) -> (i32, i32) {
    %c0_i32 = arith.constant 0 : i32
    return %arg2, %arg1 : i32, i32
  }
  func.func @transform_2(%arg0: i32, %arg1: i32, %arg2: i32) -> (i32, i32) {
    %c0_i32 = arith.constant 0 : i32
    %c0_i32_0 = arith.constant 0 : i32
    return %c0_i32, %arg1 : i32, i32
  }
  func.func @transform_3(%arg0: i32, %arg1: i32, %arg2: i32) -> (i32, i32) {
    %c0_i32 = arith.constant 0 : i32
    return %arg0, %arg1 : i32, i32
  }
}

module attributes {stable_mosaic.version = 11 : i64} {
  func.func @_in_stats_kernel(%arg0: i32, %arg1: i32, %arg2: memref<1x64x128xf32, #tpu.memory_space<vmem>>, %arg3: memref<1x1x128xf32, #tpu.memory_space<vmem>>, %arg4: memref<1x1x128xf32, #tpu.memory_space<vmem>>) attributes {dimension_semantics = [#tpu.dimension_semantics<parallel>, #tpu.dimension_semantics<arbitrary>], iteration_bounds = array<i64: 2, 1>, scalar_prefetch = 0 : i64, scratch_operands = 0 : i64, tpu.core_type = #tpu.core_type<tc>, window_params = [{transform_indices = @transform_0, window_bounds = array<i64: 1, 64, 128>}, {transform_indices = @transform_1, window_bounds = array<i64: 1, 1, 128>}, {transform_indices = @transform_2, window_bounds = array<i64: 1, 1, 128>}]} {
    %c0_i32 = arith.constant 0 : i32
    %0 = arith.cmpi eq, %arg1, %c0_i32 : i32
    %1 = arith.extui %0 : i1 to i32
    %c0_i32_0 = arith.constant 0 : i32
    %2 = arith.cmpi ne, %1, %c0_i32_0 : i32
    scf.if %2 {
      %cst_18 = arith.constant 0.000000e+00 : f32
      %18 = vector.broadcast %cst_18 : f32 to vector<1x1x128xf32>
      %c0_19 = arith.constant 0 : index
      %c0_20 = arith.constant 0 : index
      %c0_21 = arith.constant 0 : index
      %19 = vector.load %arg3[%c0_19, %c0_20, %c0_21] : memref<1x1x128xf32, #tpu.memory_space<vmem>>, vector<1x1x128xf32>
      tpu.vector_store %arg3[%c0_19, %c0_20, %c0_21], %18 {strides = array<i32>} : memref<1x1x128xf32, #tpu.memory_space<vmem>>, vector<1x1x128xf32>,
      %cst_22 = arith.constant 0.000000e+00 : f32
      %20 = vector.broadcast %cst_22 : f32 to vector<1x1x128xf32>
      %c0_23 = arith.constant 0 : index
      %c0_24 = arith.constant 0 : index
      %c0_25 = arith.constant 0 : index
      %21 = vector.load %arg4[%c0_23, %c0_24, %c0_25] : memref<1x1x128xf32, #tpu.memory_space<vmem>>, vector<1x1x128xf32>
      tpu.vector_store %arg4[%c0_23, %c0_24, %c0_25], %20 {strides = array<i32>} : memref<1x1x128xf32, #tpu.memory_space<vmem>>, vector<1x1x128xf32>,
    } else {
    }
    %c0 = arith.constant 0 : index
    %c0_1 = arith.constant 0 : index
    %c0_2 = arith.constant 0 : index
    %3 = vector.load %arg2[%c0, %c0_1, %c0_2] : memref<1x64x128xf32, #tpu.memory_space<vmem>>, vector<1x64x128xf32>
    %c0_3 = arith.constant 0 : index
    %c0_4 = arith.constant 0 : index
    %c0_5 = arith.constant 0 : index
    %4 = vector.load %arg3[%c0_3, %c0_4, %c0_5] : memref<1x1x128xf32, #tpu.memory_space<vmem>>, vector<1x1x128xf32>
    %cst = arith.constant dense<0.000000e+00> : vector<1x128xf32>
    %5 = vector.multi_reduction <add>, %3, %cst [1] : vector<1x64x128xf32> to vector<1x128xf32>
    %6 = vector.shape_cast %5 : vector<1x128xf32> to vector<1x1x128xf32>
    %7 = arith.addf %4, %6 : vector<1x1x128xf32>
    %c0_6 = arith.constant 0 : index
    %c0_7 = arith.constant 0 : index
    %c0_8 = arith.constant 0 : index
    %8 = vector.load %arg3[%c0_6, %c0_7, %c0_8] : memref<1x1x128xf32, #tpu.memory_space<vmem>>, vector<1x1x128xf32>
    tpu.vector_store %arg3[%c0_6, %c0_7, %c0_8], %7 {strides = array<i32>} : memref<1x1x128xf32, #tpu.memory_space<vmem>>, vector<1x1x128xf32>,
    %c0_9 = arith.constant 0 : index
    %c0_10 = arith.constant 0 : index
    %c0_11 = arith.constant 0 : index
    %9 = vector.load %arg4[%c0_9, %c0_10, %c0_11] : memref<1x1x128xf32, #tpu.memory_space<vmem>>, vector<1x1x128xf32>
    %10 = arith.mulf %3, %3 : vector<1x64x128xf32>
    %cst_12 = arith.constant dense<0.000000e+00> : vector<1x128xf32>
    %11 = vector.multi_reduction <add>, %10, %cst_12 [1] : vector<1x64x128xf32> to vector<1x128xf32>
    %12 = vector.shape_cast %11 : vector<1x128xf32> to vector<1x1x128xf32>
    %13 = arith.addf %9, %12 : vector<1x1x128xf32>
    %c0_13 = arith.constant 0 : index
    %c0_14 = arith.constant 0 : index
    %c0_15 = arith.constant 0 : index
    %14 = vector.load %arg4[%c0_13, %c0_14, %c0_15] : memref<1x1x128xf32, #tpu.memory_space<vmem>>, vector<1x1x128xf32>
    tpu.vector_store %arg4[%c0_13, %c0_14, %c0_15], %13 {strides = array<i32>} : memref<1x1x128xf32, #tpu.memory_space<vmem>>, vector<1x1x128xf32>,
    %c0_i32_16 = arith.constant 0 : i32
    %15 = arith.cmpi eq, %arg1, %c0_i32_16 : i32
    %16 = arith.extui %15 : i1 to i32
    %c0_i32_17 = arith.constant 0 : i32
    %17 = arith.cmpi ne, %16, %c0_i32_17 : i32
    scf.if %17 {
      %c0_18 = arith.constant 0 : index
      %c0_19 = arith.constant 0 : index
      %c0_20 = arith.constant 0 : index
      %18 = vector.load %arg3[%c0_18, %c0_19, %c0_20] : memref<1x1x128xf32, #tpu.memory_space<vmem>>, vector<1x1x128xf32>
      %cst_21 = arith.constant 1.562500e-02 : f32
      %19 = vector.broadcast %cst_21 : f32 to vector<1x1x128xf32>
      %20 = arith.mulf %18, %19 : vector<1x1x128xf32>
      %c0_22 = arith.constant 0 : index
      %c0_23 = arith.constant 0 : index
      %c0_24 = arith.constant 0 : index
      %21 = vector.load %arg4[%c0_22, %c0_23, %c0_24] : memref<1x1x128xf32, #tpu.memory_space<vmem>>, vector<1x1x128xf32>
      %cst_25 = arith.constant 1.562500e-02 : f32
      %22 = vector.broadcast %cst_25 : f32 to vector<1x1x128xf32>
      %23 = arith.mulf %21, %22 : vector<1x1x128xf32>
      %24 = arith.mulf %20, %20 : vector<1x1x128xf32>
      %25 = arith.subf %23, %24 : vector<1x1x128xf32>
      %cst_26 = arith.constant 0.000000e+00 : f32
      %26 = vector.broadcast %cst_26 : f32 to vector<1x1x128xf32>
      %27 = arith.maximumf %25, %26 : vector<1x1x128xf32>
      %c0_27 = arith.constant 0 : index
      %c0_28 = arith.constant 0 : index
      %c0_29 = arith.constant 0 : index
      %28 = vector.load %arg3[%c0_27, %c0_28, %c0_29] : memref<1x1x128xf32, #tpu.memory_space<vmem>>, vector<1x1x128xf32>
      tpu.vector_store %arg3[%c0_27, %c0_28, %c0_29], %20 {strides = array<i32>} : memref<1x1x128xf32, #tpu.memory_space<vmem>>, vector<1x1x128xf32>,
      %cst_30 = arith.constant 9.99999974E-6 : f32
      %29 = vector.broadcast %cst_30 : f32 to vector<1x1x128xf32>
      %30 = arith.addf %27, %29 : vector<1x1x128xf32>
      %31 = math.rsqrt %30 : vector<1x1x128xf32>
      %c0_31 = arith.constant 0 : index
      %c0_32 = arith.constant 0 : index
      %c0_33 = arith.constant 0 : index
      %32 = vector.load %arg4[%c0_31, %c0_32, %c0_33] : memref<1x1x128xf32, #tpu.memory_space<vmem>>, vector<1x1x128xf32>
      tpu.vector_store %arg4[%c0_31, %c0_32, %c0_33], %31 {strides = array<i32>} : memref<1x1x128xf32, #tpu.memory_space<vmem>>, vector<1x1x128xf32>,
    } else {
    }
    return
  }
  func.func @transform_0(%arg0: i32, %arg1: i32) -> (i32, i32, i32) {
    %c0_i32 = arith.constant 0 : i32
    %c0_i32_0 = arith.constant 0 : i32
    return %arg0, %arg1, %c0_i32 : i32, i32, i32
  }
  func.func @transform_1(%arg0: i32, %arg1: i32) -> (i32, i32, i32) {
    %c0_i32 = arith.constant 0 : i32
    %c0_i32_0 = arith.constant 0 : i32
    %c0_i32_1 = arith.constant 0 : i32
    return %arg0, %c0_i32, %c0_i32_0 : i32, i32, i32
  }
  func.func @transform_2(%arg0: i32, %arg1: i32) -> (i32, i32, i32) {
    %c0_i32 = arith.constant 0 : i32
    %c0_i32_0 = arith.constant 0 : i32
    %c0_i32_1 = arith.constant 0 : i32
    return %arg0, %c0_i32, %c0_i32_0 : i32, i32, i32
  }
}

module attributes {stable_mosaic.version = 11 : i64} {
  func.func @_in_apply_kernel(%arg0: i32, %arg1: i32, %arg2: memref<1x64x128xf32, #tpu.memory_space<vmem>>, %arg3: memref<1x1x128xf32, #tpu.memory_space<vmem>>, %arg4: memref<1x1x128xf32, #tpu.memory_space<vmem>>, %arg5: memref<1x64x128xf32, #tpu.memory_space<vmem>>) attributes {dimension_semantics = [#tpu.dimension_semantics<parallel>, #tpu.dimension_semantics<parallel>], iteration_bounds = array<i64: 2, 1>, scalar_prefetch = 0 : i64, scratch_operands = 0 : i64, tpu.core_type = #tpu.core_type<tc>, window_params = [{transform_indices = @transform_0, window_bounds = array<i64: 1, 64, 128>}, {transform_indices = @transform_1, window_bounds = array<i64: 1, 1, 128>}, {transform_indices = @transform_2, window_bounds = array<i64: 1, 1, 128>}, {transform_indices = @transform_3, window_bounds = array<i64: 1, 64, 128>}]} {
    %c0 = arith.constant 0 : index
    %c0_0 = arith.constant 0 : index
    %c0_1 = arith.constant 0 : index
    %0 = vector.load %arg2[%c0, %c0_0, %c0_1] : memref<1x64x128xf32, #tpu.memory_space<vmem>>, vector<1x64x128xf32>
    %c0_2 = arith.constant 0 : index
    %c0_3 = arith.constant 0 : index
    %c0_4 = arith.constant 0 : index
    %1 = vector.load %arg3[%c0_2, %c0_3, %c0_4] : memref<1x1x128xf32, #tpu.memory_space<vmem>>, vector<1x1x128xf32>
    %2 = vector.broadcast %1 : vector<1x1x128xf32> to vector<1x64x128xf32>
    %3 = arith.subf %0, %2 : vector<1x64x128xf32>
    %c0_5 = arith.constant 0 : index
    %c0_6 = arith.constant 0 : index
    %c0_7 = arith.constant 0 : index
    %4 = vector.load %arg4[%c0_5, %c0_6, %c0_7] : memref<1x1x128xf32, #tpu.memory_space<vmem>>, vector<1x1x128xf32>
    %5 = vector.broadcast %4 : vector<1x1x128xf32> to vector<1x64x128xf32>
    %6 = arith.mulf %3, %5 : vector<1x64x128xf32>
    %cst = arith.constant 0.000000e+00 : f32
    %7 = vector.broadcast %cst : f32 to vector<1x64x128xf32>
    %8 = arith.maximumf %6, %7 : vector<1x64x128xf32>
    %c0_8 = arith.constant 0 : index
    %c0_9 = arith.constant 0 : index
    %c0_10 = arith.constant 0 : index
    %9 = vector.load %arg5[%c0_8, %c0_9, %c0_10] : memref<1x64x128xf32, #tpu.memory_space<vmem>>, vector<1x64x128xf32>
    tpu.vector_store %arg5[%c0_8, %c0_9, %c0_10], %8 {strides = array<i32>} : memref<1x64x128xf32, #tpu.memory_space<vmem>>, vector<1x64x128xf32>,
    return
  }
  func.func @transform_0(%arg0: i32, %arg1: i32) -> (i32, i32, i32) {
    %c0_i32 = arith.constant 0 : i32
    %c0_i32_0 = arith.constant 0 : i32
    return %arg0, %arg1, %c0_i32 : i32, i32, i32
  }
  func.func @transform_1(%arg0: i32, %arg1: i32) -> (i32, i32, i32) {
    %c0_i32 = arith.constant 0 : i32
    %c0_i32_0 = arith.constant 0 : i32
    %c0_i32_1 = arith.constant 0 : i32
    return %arg0, %c0_i32, %c0_i32_0 : i32, i32, i32
  }
  func.func @transform_2(%arg0: i32, %arg1: i32) -> (i32, i32, i32) {
    %c0_i32 = arith.constant 0 : i32
    %c0_i32_0 = arith.constant 0 : i32
    %c0_i32_1 = arith.constant 0 : i32
    return %arg0, %c0_i32, %c0_i32_0 : i32, i32, i32
  }
  func.func @transform_3(%arg0: i32, %arg1: i32) -> (i32, i32, i32) {
    %c0_i32 = arith.constant 0 : i32
    %c0_i32_0 = arith.constant 0 : i32
    return %arg0, %arg1, %c0_i32 : i32, i32, i32
  }
}

module attributes {stable_mosaic.version = 11 : i64} {
  func.func @_gemm_bias_kernel(%arg0: i32, %arg1: i32, %arg2: i32, %arg3: memref<32x1152xbf16, #tpu.memory_space<vmem>>, %arg4: memref<1152x256xbf16, #tpu.memory_space<vmem>>, %arg5: memref<1x256xf32, #tpu.memory_space<vmem>>, %arg6: memref<32x256xf32, #tpu.memory_space<vmem>>, %arg7: memref<32x256xf32, #tpu.memory_space<vmem>>) attributes {dimension_semantics = [#tpu.dimension_semantics<parallel>, #tpu.dimension_semantics<parallel>, #tpu.dimension_semantics<arbitrary>], iteration_bounds = array<i64: 1, 1, 1>, scalar_prefetch = 0 : i64, scratch_operands = 1 : i64, tpu.core_type = #tpu.core_type<tc>, window_params = [{transform_indices = @transform_0, window_bounds = array<i64: 32, 1152>}, {transform_indices = @transform_1, window_bounds = array<i64: 1152, 256>}, {transform_indices = @transform_2, window_bounds = array<i64: 1, 256>}, {transform_indices = @transform_3, window_bounds = array<i64: 32, 256>}]} {
    %c0_i32 = arith.constant 0 : i32
    %0 = arith.cmpi eq, %arg2, %c0_i32 : i32
    %1 = arith.extui %0 : i1 to i32
    %c0_i32_0 = arith.constant 0 : i32
    %2 = arith.cmpi ne, %1, %c0_i32_0 : i32
    scf.if %2 {
      %cst_10 = arith.constant 0.000000e+00 : f32
      %12 = vector.broadcast %cst_10 : f32 to vector<32x256xf32>
      %c0_11 = arith.constant 0 : index
      %c0_12 = arith.constant 0 : index
      %13 = vector.load %arg7[%c0_11, %c0_12] : memref<32x256xf32, #tpu.memory_space<vmem>>, vector<32x256xf32>
      tpu.vector_store %arg7[%c0_11, %c0_12], %12 {strides = array<i32>} : memref<32x256xf32, #tpu.memory_space<vmem>>, vector<32x256xf32>,
    } else {
    }
    %c0 = arith.constant 0 : index
    %c0_1 = arith.constant 0 : index
    %3 = vector.load %arg7[%c0, %c0_1] : memref<32x256xf32, #tpu.memory_space<vmem>>, vector<32x256xf32>
    %c0_2 = arith.constant 0 : index
    %c0_3 = arith.constant 0 : index
    %4 = vector.load %arg3[%c0_2, %c0_3] : memref<32x1152xbf16, #tpu.memory_space<vmem>>, vector<32x1152xbf16>
    %c0_4 = arith.constant 0 : index
    %c0_5 = arith.constant 0 : index
    %5 = vector.load %arg4[%c0_4, %c0_5] : memref<1152x256xbf16, #tpu.memory_space<vmem>>, vector<1152x256xbf16>
    %cst = arith.constant dense<0.000000e+00> : vector<32x256xf32>
    %6 = tpu.matmul %4, %5, %cst {dimension_numbers = #tpu.dot_dimension_numbers<[1], [0], [0], [1], [0, 0, 1, 1], [], []>} : vector<32x1152xbf16>, vector<1152x256xbf16>, vector<32x256xf32> -> vector<32x256xf32>
    %7 = arith.addf %3, %6 : vector<32x256xf32>
    %c0_6 = arith.constant 0 : index
    %c0_7 = arith.constant 0 : index
    %8 = vector.load %arg7[%c0_6, %c0_7] : memref<32x256xf32, #tpu.memory_space<vmem>>, vector<32x256xf32>
    tpu.vector_store %arg7[%c0_6, %c0_7], %7 {strides = array<i32>} : memref<32x256xf32, #tpu.memory_space<vmem>>, vector<32x256xf32>,
    %c0_i32_8 = arith.constant 0 : i32
    %9 = arith.cmpi eq, %arg2, %c0_i32_8 : i32
    %10 = arith.extui %9 : i1 to i32
    %c0_i32_9 = arith.constant 0 : i32
    %11 = arith.cmpi ne, %10, %c0_i32_9 : i32
    scf.if %11 {
      %c0_10 = arith.constant 0 : index
      %c0_11 = arith.constant 0 : index
      %12 = vector.load %arg7[%c0_10, %c0_11] : memref<32x256xf32, #tpu.memory_space<vmem>>, vector<32x256xf32>
      %c0_12 = arith.constant 0 : index
      %c0_13 = arith.constant 0 : index
      %13 = vector.load %arg5[%c0_12, %c0_13] : memref<1x256xf32, #tpu.memory_space<vmem>>, vector<1x256xf32>
      %14 = vector.broadcast %13 : vector<1x256xf32> to vector<32x256xf32>
      %15 = arith.addf %12, %14 : vector<32x256xf32>
      %c0_14 = arith.constant 0 : index
      %c0_15 = arith.constant 0 : index
      %16 = vector.load %arg6[%c0_14, %c0_15] : memref<32x256xf32, #tpu.memory_space<vmem>>, vector<32x256xf32>
      tpu.vector_store %arg6[%c0_14, %c0_15], %15 {strides = array<i32>} : memref<32x256xf32, #tpu.memory_space<vmem>>, vector<32x256xf32>,
    } else {
    }
    return
  }
  func.func @transform_0(%arg0: i32, %arg1: i32, %arg2: i32) -> (i32, i32) {
    %c0_i32 = arith.constant 0 : i32
    return %arg0, %arg2 : i32, i32
  }
  func.func @transform_1(%arg0: i32, %arg1: i32, %arg2: i32) -> (i32, i32) {
    %c0_i32 = arith.constant 0 : i32
    return %arg2, %arg1 : i32, i32
  }
  func.func @transform_2(%arg0: i32, %arg1: i32, %arg2: i32) -> (i32, i32) {
    %c0_i32 = arith.constant 0 : i32
    %c0_i32_0 = arith.constant 0 : i32
    return %c0_i32, %arg1 : i32, i32
  }
  func.func @transform_3(%arg0: i32, %arg1: i32, %arg2: i32) -> (i32, i32) {
    %c0_i32 = arith.constant 0 : i32
    return %arg0, %arg1 : i32, i32
  }
}

module attributes {stable_mosaic.version = 11 : i64} {
  func.func @_in_stats_kernel(%arg0: i32, %arg1: i32, %arg2: memref<1x16x256xf32, #tpu.memory_space<vmem>>, %arg3: memref<1x1x256xf32, #tpu.memory_space<vmem>>, %arg4: memref<1x1x256xf32, #tpu.memory_space<vmem>>) attributes {dimension_semantics = [#tpu.dimension_semantics<parallel>, #tpu.dimension_semantics<arbitrary>], iteration_bounds = array<i64: 2, 1>, scalar_prefetch = 0 : i64, scratch_operands = 0 : i64, tpu.core_type = #tpu.core_type<tc>, window_params = [{transform_indices = @transform_0, window_bounds = array<i64: 1, 16, 256>}, {transform_indices = @transform_1, window_bounds = array<i64: 1, 1, 256>}, {transform_indices = @transform_2, window_bounds = array<i64: 1, 1, 256>}]} {
    %c0_i32 = arith.constant 0 : i32
    %0 = arith.cmpi eq, %arg1, %c0_i32 : i32
    %1 = arith.extui %0 : i1 to i32
    %c0_i32_0 = arith.constant 0 : i32
    %2 = arith.cmpi ne, %1, %c0_i32_0 : i32
    scf.if %2 {
      %cst_18 = arith.constant 0.000000e+00 : f32
      %18 = vector.broadcast %cst_18 : f32 to vector<1x1x256xf32>
      %c0_19 = arith.constant 0 : index
      %c0_20 = arith.constant 0 : index
      %c0_21 = arith.constant 0 : index
      %19 = vector.load %arg3[%c0_19, %c0_20, %c0_21] : memref<1x1x256xf32, #tpu.memory_space<vmem>>, vector<1x1x256xf32>
      tpu.vector_store %arg3[%c0_19, %c0_20, %c0_21], %18 {strides = array<i32>} : memref<1x1x256xf32, #tpu.memory_space<vmem>>, vector<1x1x256xf32>,
      %cst_22 = arith.constant 0.000000e+00 : f32
      %20 = vector.broadcast %cst_22 : f32 to vector<1x1x256xf32>
      %c0_23 = arith.constant 0 : index
      %c0_24 = arith.constant 0 : index
      %c0_25 = arith.constant 0 : index
      %21 = vector.load %arg4[%c0_23, %c0_24, %c0_25] : memref<1x1x256xf32, #tpu.memory_space<vmem>>, vector<1x1x256xf32>
      tpu.vector_store %arg4[%c0_23, %c0_24, %c0_25], %20 {strides = array<i32>} : memref<1x1x256xf32, #tpu.memory_space<vmem>>, vector<1x1x256xf32>,
    } else {
    }
    %c0 = arith.constant 0 : index
    %c0_1 = arith.constant 0 : index
    %c0_2 = arith.constant 0 : index
    %3 = vector.load %arg2[%c0, %c0_1, %c0_2] : memref<1x16x256xf32, #tpu.memory_space<vmem>>, vector<1x16x256xf32>
    %c0_3 = arith.constant 0 : index
    %c0_4 = arith.constant 0 : index
    %c0_5 = arith.constant 0 : index
    %4 = vector.load %arg3[%c0_3, %c0_4, %c0_5] : memref<1x1x256xf32, #tpu.memory_space<vmem>>, vector<1x1x256xf32>
    %cst = arith.constant dense<0.000000e+00> : vector<1x256xf32>
    %5 = vector.multi_reduction <add>, %3, %cst [1] : vector<1x16x256xf32> to vector<1x256xf32>
    %6 = vector.shape_cast %5 : vector<1x256xf32> to vector<1x1x256xf32>
    %7 = arith.addf %4, %6 : vector<1x1x256xf32>
    %c0_6 = arith.constant 0 : index
    %c0_7 = arith.constant 0 : index
    %c0_8 = arith.constant 0 : index
    %8 = vector.load %arg3[%c0_6, %c0_7, %c0_8] : memref<1x1x256xf32, #tpu.memory_space<vmem>>, vector<1x1x256xf32>
    tpu.vector_store %arg3[%c0_6, %c0_7, %c0_8], %7 {strides = array<i32>} : memref<1x1x256xf32, #tpu.memory_space<vmem>>, vector<1x1x256xf32>,
    %c0_9 = arith.constant 0 : index
    %c0_10 = arith.constant 0 : index
    %c0_11 = arith.constant 0 : index
    %9 = vector.load %arg4[%c0_9, %c0_10, %c0_11] : memref<1x1x256xf32, #tpu.memory_space<vmem>>, vector<1x1x256xf32>
    %10 = arith.mulf %3, %3 : vector<1x16x256xf32>
    %cst_12 = arith.constant dense<0.000000e+00> : vector<1x256xf32>
    %11 = vector.multi_reduction <add>, %10, %cst_12 [1] : vector<1x16x256xf32> to vector<1x256xf32>
    %12 = vector.shape_cast %11 : vector<1x256xf32> to vector<1x1x256xf32>
    %13 = arith.addf %9, %12 : vector<1x1x256xf32>
    %c0_13 = arith.constant 0 : index
    %c0_14 = arith.constant 0 : index
    %c0_15 = arith.constant 0 : index
    %14 = vector.load %arg4[%c0_13, %c0_14, %c0_15] : memref<1x1x256xf32, #tpu.memory_space<vmem>>, vector<1x1x256xf32>
    tpu.vector_store %arg4[%c0_13, %c0_14, %c0_15], %13 {strides = array<i32>} : memref<1x1x256xf32, #tpu.memory_space<vmem>>, vector<1x1x256xf32>,
    %c0_i32_16 = arith.constant 0 : i32
    %15 = arith.cmpi eq, %arg1, %c0_i32_16 : i32
    %16 = arith.extui %15 : i1 to i32
    %c0_i32_17 = arith.constant 0 : i32
    %17 = arith.cmpi ne, %16, %c0_i32_17 : i32
    scf.if %17 {
      %c0_18 = arith.constant 0 : index
      %c0_19 = arith.constant 0 : index
      %c0_20 = arith.constant 0 : index
      %18 = vector.load %arg3[%c0_18, %c0_19, %c0_20] : memref<1x1x256xf32, #tpu.memory_space<vmem>>, vector<1x1x256xf32>
      %cst_21 = arith.constant 6.250000e-02 : f32
      %19 = vector.broadcast %cst_21 : f32 to vector<1x1x256xf32>
      %20 = arith.mulf %18, %19 : vector<1x1x256xf32>
      %c0_22 = arith.constant 0 : index
      %c0_23 = arith.constant 0 : index
      %c0_24 = arith.constant 0 : index
      %21 = vector.load %arg4[%c0_22, %c0_23, %c0_24] : memref<1x1x256xf32, #tpu.memory_space<vmem>>, vector<1x1x256xf32>
      %cst_25 = arith.constant 6.250000e-02 : f32
      %22 = vector.broadcast %cst_25 : f32 to vector<1x1x256xf32>
      %23 = arith.mulf %21, %22 : vector<1x1x256xf32>
      %24 = arith.mulf %20, %20 : vector<1x1x256xf32>
      %25 = arith.subf %23, %24 : vector<1x1x256xf32>
      %cst_26 = arith.constant 0.000000e+00 : f32
      %26 = vector.broadcast %cst_26 : f32 to vector<1x1x256xf32>
      %27 = arith.maximumf %25, %26 : vector<1x1x256xf32>
      %c0_27 = arith.constant 0 : index
      %c0_28 = arith.constant 0 : index
      %c0_29 = arith.constant 0 : index
      %28 = vector.load %arg3[%c0_27, %c0_28, %c0_29] : memref<1x1x256xf32, #tpu.memory_space<vmem>>, vector<1x1x256xf32>
      tpu.vector_store %arg3[%c0_27, %c0_28, %c0_29], %20 {strides = array<i32>} : memref<1x1x256xf32, #tpu.memory_space<vmem>>, vector<1x1x256xf32>,
      %cst_30 = arith.constant 9.99999974E-6 : f32
      %29 = vector.broadcast %cst_30 : f32 to vector<1x1x256xf32>
      %30 = arith.addf %27, %29 : vector<1x1x256xf32>
      %31 = math.rsqrt %30 : vector<1x1x256xf32>
      %c0_31 = arith.constant 0 : index
      %c0_32 = arith.constant 0 : index
      %c0_33 = arith.constant 0 : index
      %32 = vector.load %arg4[%c0_31, %c0_32, %c0_33] : memref<1x1x256xf32, #tpu.memory_space<vmem>>, vector<1x1x256xf32>
      tpu.vector_store %arg4[%c0_31, %c0_32, %c0_33], %31 {strides = array<i32>} : memref<1x1x256xf32, #tpu.memory_space<vmem>>, vector<1x1x256xf32>,
    } else {
    }
    return
  }
  func.func @transform_0(%arg0: i32, %arg1: i32) -> (i32, i32, i32) {
    %c0_i32 = arith.constant 0 : i32
    %c0_i32_0 = arith.constant 0 : i32
    return %arg0, %arg1, %c0_i32 : i32, i32, i32
  }
  func.func @transform_1(%arg0: i32, %arg1: i32) -> (i32, i32, i32) {
    %c0_i32 = arith.constant 0 : i32
    %c0_i32_0 = arith.constant 0 : i32
    %c0_i32_1 = arith.constant 0 : i32
    return %arg0, %c0_i32, %c0_i32_0 : i32, i32, i32
  }
  func.func @transform_2(%arg0: i32, %arg1: i32) -> (i32, i32, i32) {
    %c0_i32 = arith.constant 0 : i32
    %c0_i32_0 = arith.constant 0 : i32
    %c0_i32_1 = arith.constant 0 : i32
    return %arg0, %c0_i32, %c0_i32_0 : i32, i32, i32
  }
}

module attributes {stable_mosaic.version = 11 : i64} {
  func.func @_in_apply_kernel(%arg0: i32, %arg1: i32, %arg2: memref<1x16x256xf32, #tpu.memory_space<vmem>>, %arg3: memref<1x1x256xf32, #tpu.memory_space<vmem>>, %arg4: memref<1x1x256xf32, #tpu.memory_space<vmem>>, %arg5: memref<1x16x256xf32, #tpu.memory_space<vmem>>) attributes {dimension_semantics = [#tpu.dimension_semantics<parallel>, #tpu.dimension_semantics<parallel>], iteration_bounds = array<i64: 2, 1>, scalar_prefetch = 0 : i64, scratch_operands = 0 : i64, tpu.core_type = #tpu.core_type<tc>, window_params = [{transform_indices = @transform_0, window_bounds = array<i64: 1, 16, 256>}, {transform_indices = @transform_1, window_bounds = array<i64: 1, 1, 256>}, {transform_indices = @transform_2, window_bounds = array<i64: 1, 1, 256>}, {transform_indices = @transform_3, window_bounds = array<i64: 1, 16, 256>}]} {
    %c0 = arith.constant 0 : index
    %c0_0 = arith.constant 0 : index
    %c0_1 = arith.constant 0 : index
    %0 = vector.load %arg2[%c0, %c0_0, %c0_1] : memref<1x16x256xf32, #tpu.memory_space<vmem>>, vector<1x16x256xf32>
    %c0_2 = arith.constant 0 : index
    %c0_3 = arith.constant 0 : index
    %c0_4 = arith.constant 0 : index
    %1 = vector.load %arg3[%c0_2, %c0_3, %c0_4] : memref<1x1x256xf32, #tpu.memory_space<vmem>>, vector<1x1x256xf32>
    %2 = vector.broadcast %1 : vector<1x1x256xf32> to vector<1x16x256xf32>
    %3 = arith.subf %0, %2 : vector<1x16x256xf32>
    %c0_5 = arith.constant 0 : index
    %c0_6 = arith.constant 0 : index
    %c0_7 = arith.constant 0 : index
    %4 = vector.load %arg4[%c0_5, %c0_6, %c0_7] : memref<1x1x256xf32, #tpu.memory_space<vmem>>, vector<1x1x256xf32>
    %5 = vector.broadcast %4 : vector<1x1x256xf32> to vector<1x16x256xf32>
    %6 = arith.mulf %3, %5 : vector<1x16x256xf32>
    %cst = arith.constant 0.000000e+00 : f32
    %7 = vector.broadcast %cst : f32 to vector<1x16x256xf32>
    %8 = arith.maximumf %6, %7 : vector<1x16x256xf32>
    %c0_8 = arith.constant 0 : index
    %c0_9 = arith.constant 0 : index
    %c0_10 = arith.constant 0 : index
    %9 = vector.load %arg5[%c0_8, %c0_9, %c0_10] : memref<1x16x256xf32, #tpu.memory_space<vmem>>, vector<1x16x256xf32>
    tpu.vector_store %arg5[%c0_8, %c0_9, %c0_10], %8 {strides = array<i32>} : memref<1x16x256xf32, #tpu.memory_space<vmem>>, vector<1x16x256xf32>,
    return
  }
  func.func @transform_0(%arg0: i32, %arg1: i32) -> (i32, i32, i32) {
    %c0_i32 = arith.constant 0 : i32
    %c0_i32_0 = arith.constant 0 : i32
    return %arg0, %arg1, %c0_i32 : i32, i32, i32
  }
  func.func @transform_1(%arg0: i32, %arg1: i32) -> (i32, i32, i32) {
    %c0_i32 = arith.constant 0 : i32
    %c0_i32_0 = arith.constant 0 : i32
    %c0_i32_1 = arith.constant 0 : i32
    return %arg0, %c0_i32, %c0_i32_0 : i32, i32, i32
  }
  func.func @transform_2(%arg0: i32, %arg1: i32) -> (i32, i32, i32) {
    %c0_i32 = arith.constant 0 : i32
    %c0_i32_0 = arith.constant 0 : i32
    %c0_i32_1 = arith.constant 0 : i32
    return %arg0, %c0_i32, %c0_i32_0 : i32, i32, i32
  }
  func.func @transform_3(%arg0: i32, %arg1: i32) -> (i32, i32, i32) {
    %c0_i32 = arith.constant 0 : i32
    %c0_i32_0 = arith.constant 0 : i32
    return %arg0, %arg1, %c0_i32 : i32, i32, i32
  }
}

module attributes {stable_mosaic.version = 11 : i64} {
  func.func @_in_apply_skip_kernel(%arg0: i32, %arg1: i32, %arg2: memref<1x16x256xf32, #tpu.memory_space<vmem>>, %arg3: memref<1x1x256xf32, #tpu.memory_space<vmem>>, %arg4: memref<1x1x256xf32, #tpu.memory_space<vmem>>, %arg5: memref<1x16x256xf32, #tpu.memory_space<vmem>>, %arg6: memref<1x16x256xf32, #tpu.memory_space<vmem>>) attributes {dimension_semantics = [#tpu.dimension_semantics<parallel>, #tpu.dimension_semantics<parallel>], iteration_bounds = array<i64: 2, 1>, scalar_prefetch = 0 : i64, scratch_operands = 0 : i64, tpu.core_type = #tpu.core_type<tc>, window_params = [{transform_indices = @transform_0, window_bounds = array<i64: 1, 16, 256>}, {transform_indices = @transform_1, window_bounds = array<i64: 1, 1, 256>}, {transform_indices = @transform_2, window_bounds = array<i64: 1, 1, 256>}, {transform_indices = @transform_3, window_bounds = array<i64: 1, 16, 256>}, {transform_indices = @transform_4, window_bounds = array<i64: 1, 16, 256>}]} {
    %c0 = arith.constant 0 : index
    %c0_0 = arith.constant 0 : index
    %c0_1 = arith.constant 0 : index
    %0 = vector.load %arg2[%c0, %c0_0, %c0_1] : memref<1x16x256xf32, #tpu.memory_space<vmem>>, vector<1x16x256xf32>
    %c0_2 = arith.constant 0 : index
    %c0_3 = arith.constant 0 : index
    %c0_4 = arith.constant 0 : index
    %1 = vector.load %arg3[%c0_2, %c0_3, %c0_4] : memref<1x1x256xf32, #tpu.memory_space<vmem>>, vector<1x1x256xf32>
    %2 = vector.broadcast %1 : vector<1x1x256xf32> to vector<1x16x256xf32>
    %3 = arith.subf %0, %2 : vector<1x16x256xf32>
    %c0_5 = arith.constant 0 : index
    %c0_6 = arith.constant 0 : index
    %c0_7 = arith.constant 0 : index
    %4 = vector.load %arg4[%c0_5, %c0_6, %c0_7] : memref<1x1x256xf32, #tpu.memory_space<vmem>>, vector<1x1x256xf32>
    %5 = vector.broadcast %4 : vector<1x1x256xf32> to vector<1x16x256xf32>
    %6 = arith.mulf %3, %5 : vector<1x16x256xf32>
    %c0_8 = arith.constant 0 : index
    %c0_9 = arith.constant 0 : index
    %c0_10 = arith.constant 0 : index
    %7 = vector.load %arg5[%c0_8, %c0_9, %c0_10] : memref<1x16x256xf32, #tpu.memory_space<vmem>>, vector<1x16x256xf32>
    %8 = arith.addf %6, %7 : vector<1x16x256xf32>
    %c0_11 = arith.constant 0 : index
    %c0_12 = arith.constant 0 : index
    %c0_13 = arith.constant 0 : index
    %9 = vector.load %arg6[%c0_11, %c0_12, %c0_13] : memref<1x16x256xf32, #tpu.memory_space<vmem>>, vector<1x16x256xf32>
    tpu.vector_store %arg6[%c0_11, %c0_12, %c0_13], %8 {strides = array<i32>} : memref<1x16x256xf32, #tpu.memory_space<vmem>>, vector<1x16x256xf32>,
    return
  }
  func.func @transform_0(%arg0: i32, %arg1: i32) -> (i32, i32, i32) {
    %c0_i32 = arith.constant 0 : i32
    %c0_i32_0 = arith.constant 0 : i32
    return %arg0, %arg1, %c0_i32 : i32, i32, i32
  }
  func.func @transform_1(%arg0: i32, %arg1: i32) -> (i32, i32, i32) {
    %c0_i32 = arith.constant 0 : i32
    %c0_i32_0 = arith.constant 0 : i32
    %c0_i32_1 = arith.constant 0 : i32
    return %arg0, %c0_i32, %c0_i32_0 : i32, i32, i32
  }
  func.func @transform_2(%arg0: i32, %arg1: i32) -> (i32, i32, i32) {
    %c0_i32 = arith.constant 0 : i32
    %c0_i32_0 = arith.constant 0 : i32
    %c0_i32_1 = arith.constant 0 : i32
    return %arg0, %c0_i32, %c0_i32_0 : i32, i32, i32
  }
  func.func @transform_3(%arg0: i32, %arg1: i32) -> (i32, i32, i32) {
    %c0_i32 = arith.constant 0 : i32
    %c0_i32_0 = arith.constant 0 : i32
    return %arg0, %arg1, %c0_i32 : i32, i32, i32
  }
  func.func @transform_4(%arg0: i32, %arg1: i32) -> (i32, i32, i32) {
    %c0_i32 = arith.constant 0 : i32
    %c0_i32_0 = arith.constant 0 : i32
    return %arg0, %arg1, %c0_i32 : i32, i32, i32
  }
}

module attributes {stable_mosaic.version = 11 : i64} {
  func.func @_gemm_bias_kernel(%arg0: i32, %arg1: i32, %arg2: i32, %arg3: memref<32x1152xbf16, #tpu.memory_space<vmem>>, %arg4: memref<1152x256xbf16, #tpu.memory_space<vmem>>, %arg5: memref<1x256xf32, #tpu.memory_space<vmem>>, %arg6: memref<32x256xf32, #tpu.memory_space<vmem>>, %arg7: memref<32x256xf32, #tpu.memory_space<vmem>>) attributes {dimension_semantics = [#tpu.dimension_semantics<parallel>, #tpu.dimension_semantics<parallel>, #tpu.dimension_semantics<arbitrary>], iteration_bounds = array<i64: 1, 1, 2>, scalar_prefetch = 0 : i64, scratch_operands = 1 : i64, tpu.core_type = #tpu.core_type<tc>, window_params = [{transform_indices = @transform_0, window_bounds = array<i64: 32, 1152>}, {transform_indices = @transform_1, window_bounds = array<i64: 1152, 256>}, {transform_indices = @transform_2, window_bounds = array<i64: 1, 256>}, {transform_indices = @transform_3, window_bounds = array<i64: 32, 256>}]} {
    %c0_i32 = arith.constant 0 : i32
    %0 = arith.cmpi eq, %arg2, %c0_i32 : i32
    %1 = arith.extui %0 : i1 to i32
    %c0_i32_0 = arith.constant 0 : i32
    %2 = arith.cmpi ne, %1, %c0_i32_0 : i32
    scf.if %2 {
      %cst_9 = arith.constant 0.000000e+00 : f32
      %12 = vector.broadcast %cst_9 : f32 to vector<32x256xf32>
      %c0_10 = arith.constant 0 : index
      %c0_11 = arith.constant 0 : index
      %13 = vector.load %arg7[%c0_10, %c0_11] : memref<32x256xf32, #tpu.memory_space<vmem>>, vector<32x256xf32>
      tpu.vector_store %arg7[%c0_10, %c0_11], %12 {strides = array<i32>} : memref<32x256xf32, #tpu.memory_space<vmem>>, vector<32x256xf32>,
    } else {
    }
    %c0 = arith.constant 0 : index
    %c0_1 = arith.constant 0 : index
    %3 = vector.load %arg7[%c0, %c0_1] : memref<32x256xf32, #tpu.memory_space<vmem>>, vector<32x256xf32>
    %c0_2 = arith.constant 0 : index
    %c0_3 = arith.constant 0 : index
    %4 = vector.load %arg3[%c0_2, %c0_3] : memref<32x1152xbf16, #tpu.memory_space<vmem>>, vector<32x1152xbf16>
    %c0_4 = arith.constant 0 : index
    %c0_5 = arith.constant 0 : index
    %5 = vector.load %arg4[%c0_4, %c0_5] : memref<1152x256xbf16, #tpu.memory_space<vmem>>, vector<1152x256xbf16>
    %cst = arith.constant dense<0.000000e+00> : vector<32x256xf32>
    %6 = tpu.matmul %4, %5, %cst {dimension_numbers = #tpu.dot_dimension_numbers<[1], [0], [0], [1], [0, 0, 1, 1], [], []>} : vector<32x1152xbf16>, vector<1152x256xbf16>, vector<32x256xf32> -> vector<32x256xf32>
    %7 = arith.addf %3, %6 : vector<32x256xf32>
    %c0_6 = arith.constant 0 : index
    %c0_7 = arith.constant 0 : index
    %8 = vector.load %arg7[%c0_6, %c0_7] : memref<32x256xf32, #tpu.memory_space<vmem>>, vector<32x256xf32>
    tpu.vector_store %arg7[%c0_6, %c0_7], %7 {strides = array<i32>} : memref<32x256xf32, #tpu.memory_space<vmem>>, vector<32x256xf32>,
    %c1_i32 = arith.constant 1 : i32
    %9 = arith.cmpi eq, %arg2, %c1_i32 : i32
    %10 = arith.extui %9 : i1 to i32
    %c0_i32_8 = arith.constant 0 : i32
    %11 = arith.cmpi ne, %10, %c0_i32_8 : i32
    scf.if %11 {
      %c0_9 = arith.constant 0 : index
      %c0_10 = arith.constant 0 : index
      %12 = vector.load %arg7[%c0_9, %c0_10] : memref<32x256xf32, #tpu.memory_space<vmem>>, vector<32x256xf32>
      %c0_11 = arith.constant 0 : index
      %c0_12 = arith.constant 0 : index
      %13 = vector.load %arg5[%c0_11, %c0_12] : memref<1x256xf32, #tpu.memory_space<vmem>>, vector<1x256xf32>
      %14 = vector.broadcast %13 : vector<1x256xf32> to vector<32x256xf32>
      %15 = arith.addf %12, %14 : vector<32x256xf32>
      %c0_13 = arith.constant 0 : index
      %c0_14 = arith.constant 0 : index
      %16 = vector.load %arg6[%c0_13, %c0_14] : memref<32x256xf32, #tpu.memory_space<vmem>>, vector<32x256xf32>
      tpu.vector_store %arg6[%c0_13, %c0_14], %15 {strides = array<i32>} : memref<32x256xf32, #tpu.memory_space<vmem>>, vector<32x256xf32>,
    } else {
    }
    return
  }
  func.func @transform_0(%arg0: i32, %arg1: i32, %arg2: i32) -> (i32, i32) {
    %c0_i32 = arith.constant 0 : i32
    return %arg0, %arg2 : i32, i32
  }
  func.func @transform_1(%arg0: i32, %arg1: i32, %arg2: i32) -> (i32, i32) {
    %c0_i32 = arith.constant 0 : i32
    return %arg2, %arg1 : i32, i32
  }
  func.func @transform_2(%arg0: i32, %arg1: i32, %arg2: i32) -> (i32, i32) {
    %c0_i32 = arith.constant 0 : i32
    %c0_i32_0 = arith.constant 0 : i32
    return %c0_i32, %arg1 : i32, i32
  }
  func.func @transform_3(%arg0: i32, %arg1: i32, %arg2: i32) -> (i32, i32) {
    %c0_i32 = arith.constant 0 : i32
    return %arg0, %arg1 : i32, i32
  }
}

module attributes {stable_mosaic.version = 11 : i64} {
  func.func @_gemm_bias_kernel(%arg0: i32, %arg1: i32, %arg2: i32, %arg3: memref<32x1152xbf16, #tpu.memory_space<vmem>>, %arg4: memref<1152x128xbf16, #tpu.memory_space<vmem>>, %arg5: memref<1x128xf32, #tpu.memory_space<vmem>>, %arg6: memref<32x128xf32, #tpu.memory_space<vmem>>, %arg7: memref<32x128xf32, #tpu.memory_space<vmem>>) attributes {dimension_semantics = [#tpu.dimension_semantics<parallel>, #tpu.dimension_semantics<parallel>, #tpu.dimension_semantics<arbitrary>], iteration_bounds = array<i64: 1, 1, 2>, scalar_prefetch = 0 : i64, scratch_operands = 1 : i64, tpu.core_type = #tpu.core_type<tc>, window_params = [{transform_indices = @transform_0, window_bounds = array<i64: 32, 1152>}, {transform_indices = @transform_1, window_bounds = array<i64: 1152, 128>}, {transform_indices = @transform_2, window_bounds = array<i64: 1, 128>}, {transform_indices = @transform_3, window_bounds = array<i64: 32, 128>}]} {
    %c0_i32 = arith.constant 0 : i32
    %0 = arith.cmpi eq, %arg2, %c0_i32 : i32
    %1 = arith.extui %0 : i1 to i32
    %c0_i32_0 = arith.constant 0 : i32
    %2 = arith.cmpi ne, %1, %c0_i32_0 : i32
    scf.if %2 {
      %cst_9 = arith.constant 0.000000e+00 : f32
      %12 = vector.broadcast %cst_9 : f32 to vector<32x128xf32>
      %c0_10 = arith.constant 0 : index
      %c0_11 = arith.constant 0 : index
      %13 = vector.load %arg7[%c0_10, %c0_11] : memref<32x128xf32, #tpu.memory_space<vmem>>, vector<32x128xf32>
      tpu.vector_store %arg7[%c0_10, %c0_11], %12 {strides = array<i32>} : memref<32x128xf32, #tpu.memory_space<vmem>>, vector<32x128xf32>,
    } else {
    }
    %c0 = arith.constant 0 : index
    %c0_1 = arith.constant 0 : index
    %3 = vector.load %arg7[%c0, %c0_1] : memref<32x128xf32, #tpu.memory_space<vmem>>, vector<32x128xf32>
    %c0_2 = arith.constant 0 : index
    %c0_3 = arith.constant 0 : index
    %4 = vector.load %arg3[%c0_2, %c0_3] : memref<32x1152xbf16, #tpu.memory_space<vmem>>, vector<32x1152xbf16>
    %c0_4 = arith.constant 0 : index
    %c0_5 = arith.constant 0 : index
    %5 = vector.load %arg4[%c0_4, %c0_5] : memref<1152x128xbf16, #tpu.memory_space<vmem>>, vector<1152x128xbf16>
    %cst = arith.constant dense<0.000000e+00> : vector<32x128xf32>
    %6 = tpu.matmul %4, %5, %cst {dimension_numbers = #tpu.dot_dimension_numbers<[1], [0], [0], [1], [0, 0, 1, 1], [], []>} : vector<32x1152xbf16>, vector<1152x128xbf16>, vector<32x128xf32> -> vector<32x128xf32>
    %7 = arith.addf %3, %6 : vector<32x128xf32>
    %c0_6 = arith.constant 0 : index
    %c0_7 = arith.constant 0 : index
    %8 = vector.load %arg7[%c0_6, %c0_7] : memref<32x128xf32, #tpu.memory_space<vmem>>, vector<32x128xf32>
    tpu.vector_store %arg7[%c0_6, %c0_7], %7 {strides = array<i32>} : memref<32x128xf32, #tpu.memory_space<vmem>>, vector<32x128xf32>,
    %c1_i32 = arith.constant 1 : i32
    %9 = arith.cmpi eq, %arg2, %c1_i32 : i32
    %10 = arith.extui %9 : i1 to i32
    %c0_i32_8 = arith.constant 0 : i32
    %11 = arith.cmpi ne, %10, %c0_i32_8 : i32
    scf.if %11 {
      %c0_9 = arith.constant 0 : index
      %c0_10 = arith.constant 0 : index
      %12 = vector.load %arg7[%c0_9, %c0_10] : memref<32x128xf32, #tpu.memory_space<vmem>>, vector<32x128xf32>
      %c0_11 = arith.constant 0 : index
      %c0_12 = arith.constant 0 : index
      %13 = vector.load %arg5[%c0_11, %c0_12] : memref<1x128xf32, #tpu.memory_space<vmem>>, vector<1x128xf32>
      %14 = vector.broadcast %13 : vector<1x128xf32> to vector<32x128xf32>
      %15 = arith.addf %12, %14 : vector<32x128xf32>
      %c0_13 = arith.constant 0 : index
      %c0_14 = arith.constant 0 : index
      %16 = vector.load %arg6[%c0_13, %c0_14] : memref<32x128xf32, #tpu.memory_space<vmem>>, vector<32x128xf32>
      tpu.vector_store %arg6[%c0_13, %c0_14], %15 {strides = array<i32>} : memref<32x128xf32, #tpu.memory_space<vmem>>, vector<32x128xf32>,
    } else {
    }
    return
  }
  func.func @transform_0(%arg0: i32, %arg1: i32, %arg2: i32) -> (i32, i32) {
    %c0_i32 = arith.constant 0 : i32
    return %arg0, %arg2 : i32, i32
  }
  func.func @transform_1(%arg0: i32, %arg1: i32, %arg2: i32) -> (i32, i32) {
    %c0_i32 = arith.constant 0 : i32
    return %arg2, %arg1 : i32, i32
  }
  func.func @transform_2(%arg0: i32, %arg1: i32, %arg2: i32) -> (i32, i32) {
    %c0_i32 = arith.constant 0 : i32
    %c0_i32_0 = arith.constant 0 : i32
    return %c0_i32, %arg1 : i32, i32
  }
  func.func @transform_3(%arg0: i32, %arg1: i32, %arg2: i32) -> (i32, i32) {
    %c0_i32 = arith.constant 0 : i32
    return %arg0, %arg1 : i32, i32
  }
}

module attributes {stable_mosaic.version = 11 : i64} {
  func.func @_gemm_bias_kernel(%arg0: i32, %arg1: i32, %arg2: i32, %arg3: memref<128x1152xbf16, #tpu.memory_space<vmem>>, %arg4: memref<1152x128xbf16, #tpu.memory_space<vmem>>, %arg5: memref<1x128xf32, #tpu.memory_space<vmem>>, %arg6: memref<128x128xf32, #tpu.memory_space<vmem>>, %arg7: memref<128x128xf32, #tpu.memory_space<vmem>>) attributes {dimension_semantics = [#tpu.dimension_semantics<parallel>, #tpu.dimension_semantics<parallel>, #tpu.dimension_semantics<arbitrary>], iteration_bounds = array<i64: 1, 1, 1>, scalar_prefetch = 0 : i64, scratch_operands = 1 : i64, tpu.core_type = #tpu.core_type<tc>, window_params = [{transform_indices = @transform_0, window_bounds = array<i64: 128, 1152>}, {transform_indices = @transform_1, window_bounds = array<i64: 1152, 128>}, {transform_indices = @transform_2, window_bounds = array<i64: 1, 128>}, {transform_indices = @transform_3, window_bounds = array<i64: 128, 128>}]} {
    %c0_i32 = arith.constant 0 : i32
    %0 = arith.cmpi eq, %arg2, %c0_i32 : i32
    %1 = arith.extui %0 : i1 to i32
    %c0_i32_0 = arith.constant 0 : i32
    %2 = arith.cmpi ne, %1, %c0_i32_0 : i32
    scf.if %2 {
      %cst_10 = arith.constant 0.000000e+00 : f32
      %12 = vector.broadcast %cst_10 : f32 to vector<128x128xf32>
      %c0_11 = arith.constant 0 : index
      %c0_12 = arith.constant 0 : index
      %13 = vector.load %arg7[%c0_11, %c0_12] : memref<128x128xf32, #tpu.memory_space<vmem>>, vector<128x128xf32>
      tpu.vector_store %arg7[%c0_11, %c0_12], %12 {strides = array<i32>} : memref<128x128xf32, #tpu.memory_space<vmem>>, vector<128x128xf32>,
    } else {
    }
    %c0 = arith.constant 0 : index
    %c0_1 = arith.constant 0 : index
    %3 = vector.load %arg7[%c0, %c0_1] : memref<128x128xf32, #tpu.memory_space<vmem>>, vector<128x128xf32>
    %c0_2 = arith.constant 0 : index
    %c0_3 = arith.constant 0 : index
    %4 = vector.load %arg3[%c0_2, %c0_3] : memref<128x1152xbf16, #tpu.memory_space<vmem>>, vector<128x1152xbf16>
    %c0_4 = arith.constant 0 : index
    %c0_5 = arith.constant 0 : index
    %5 = vector.load %arg4[%c0_4, %c0_5] : memref<1152x128xbf16, #tpu.memory_space<vmem>>, vector<1152x128xbf16>
    %cst = arith.constant dense<0.000000e+00> : vector<128x128xf32>
    %6 = tpu.matmul %4, %5, %cst {dimension_numbers = #tpu.dot_dimension_numbers<[1], [0], [0], [1], [0, 0, 1, 1], [], []>} : vector<128x1152xbf16>, vector<1152x128xbf16>, vector<128x128xf32> -> vector<128x128xf32>
    %7 = arith.addf %3, %6 : vector<128x128xf32>
    %c0_6 = arith.constant 0 : index
    %c0_7 = arith.constant 0 : index
    %8 = vector.load %arg7[%c0_6, %c0_7] : memref<128x128xf32, #tpu.memory_space<vmem>>, vector<128x128xf32>
    tpu.vector_store %arg7[%c0_6, %c0_7], %7 {strides = array<i32>} : memref<128x128xf32, #tpu.memory_space<vmem>>, vector<128x128xf32>,
    %c0_i32_8 = arith.constant 0 : i32
    %9 = arith.cmpi eq, %arg2, %c0_i32_8 : i32
    %10 = arith.extui %9 : i1 to i32
    %c0_i32_9 = arith.constant 0 : i32
    %11 = arith.cmpi ne, %10, %c0_i32_9 : i32
    scf.if %11 {
      %c0_10 = arith.constant 0 : index
      %c0_11 = arith.constant 0 : index
      %12 = vector.load %arg7[%c0_10, %c0_11] : memref<128x128xf32, #tpu.memory_space<vmem>>, vector<128x128xf32>
      %c0_12 = arith.constant 0 : index
      %c0_13 = arith.constant 0 : index
      %13 = vector.load %arg5[%c0_12, %c0_13] : memref<1x128xf32, #tpu.memory_space<vmem>>, vector<1x128xf32>
      %14 = vector.broadcast %13 : vector<1x128xf32> to vector<128x128xf32>
      %15 = arith.addf %12, %14 : vector<128x128xf32>
      %c0_14 = arith.constant 0 : index
      %c0_15 = arith.constant 0 : index
      %16 = vector.load %arg6[%c0_14, %c0_15] : memref<128x128xf32, #tpu.memory_space<vmem>>, vector<128x128xf32>
      tpu.vector_store %arg6[%c0_14, %c0_15], %15 {strides = array<i32>} : memref<128x128xf32, #tpu.memory_space<vmem>>, vector<128x128xf32>,
    } else {
    }
    return
  }
  func.func @transform_0(%arg0: i32, %arg1: i32, %arg2: i32) -> (i32, i32) {
    %c0_i32 = arith.constant 0 : i32
    return %arg0, %arg2 : i32, i32
  }
  func.func @transform_1(%arg0: i32, %arg1: i32, %arg2: i32) -> (i32, i32) {
    %c0_i32 = arith.constant 0 : i32
    return %arg2, %arg1 : i32, i32
  }
  func.func @transform_2(%arg0: i32, %arg1: i32, %arg2: i32) -> (i32, i32) {
    %c0_i32 = arith.constant 0 : i32
    %c0_i32_0 = arith.constant 0 : i32
    return %c0_i32, %arg1 : i32, i32
  }
  func.func @transform_3(%arg0: i32, %arg1: i32, %arg2: i32) -> (i32, i32) {
    %c0_i32 = arith.constant 0 : i32
    return %arg0, %arg1 : i32, i32
  }
}

module attributes {stable_mosaic.version = 11 : i64} {
  func.func @_gemm_bias_kernel(%arg0: i32, %arg1: i32, %arg2: i32, %arg3: memref<512x1152xbf16, #tpu.memory_space<vmem>>, %arg4: memref<1152x128xbf16, #tpu.memory_space<vmem>>, %arg5: memref<1x128xf32, #tpu.memory_space<vmem>>, %arg6: memref<512x128xf32, #tpu.memory_space<vmem>>, %arg7: memref<512x128xf32, #tpu.memory_space<vmem>>) attributes {dimension_semantics = [#tpu.dimension_semantics<parallel>, #tpu.dimension_semantics<parallel>, #tpu.dimension_semantics<arbitrary>], iteration_bounds = array<i64: 1, 1, 3>, scalar_prefetch = 0 : i64, scratch_operands = 1 : i64, tpu.core_type = #tpu.core_type<tc>, window_params = [{transform_indices = @transform_0, window_bounds = array<i64: 512, 1152>}, {transform_indices = @transform_1, window_bounds = array<i64: 1152, 128>}, {transform_indices = @transform_2, window_bounds = array<i64: 1, 128>}, {transform_indices = @transform_3, window_bounds = array<i64: 512, 128>}]} {
    %c0_i32 = arith.constant 0 : i32
    %0 = arith.cmpi eq, %arg2, %c0_i32 : i32
    %1 = arith.extui %0 : i1 to i32
    %c0_i32_0 = arith.constant 0 : i32
    %2 = arith.cmpi ne, %1, %c0_i32_0 : i32
    scf.if %2 {
      %cst_9 = arith.constant 0.000000e+00 : f32
      %12 = vector.broadcast %cst_9 : f32 to vector<512x128xf32>
      %c0_10 = arith.constant 0 : index
      %c0_11 = arith.constant 0 : index
      %13 = vector.load %arg7[%c0_10, %c0_11] : memref<512x128xf32, #tpu.memory_space<vmem>>, vector<512x128xf32>
      tpu.vector_store %arg7[%c0_10, %c0_11], %12 {strides = array<i32>} : memref<512x128xf32, #tpu.memory_space<vmem>>, vector<512x128xf32>,
    } else {
    }
    %c0 = arith.constant 0 : index
    %c0_1 = arith.constant 0 : index
    %3 = vector.load %arg7[%c0, %c0_1] : memref<512x128xf32, #tpu.memory_space<vmem>>, vector<512x128xf32>
    %c0_2 = arith.constant 0 : index
    %c0_3 = arith.constant 0 : index
    %4 = vector.load %arg3[%c0_2, %c0_3] : memref<512x1152xbf16, #tpu.memory_space<vmem>>, vector<512x1152xbf16>
    %c0_4 = arith.constant 0 : index
    %c0_5 = arith.constant 0 : index
    %5 = vector.load %arg4[%c0_4, %c0_5] : memref<1152x128xbf16, #tpu.memory_space<vmem>>, vector<1152x128xbf16>
    %cst = arith.constant dense<0.000000e+00> : vector<512x128xf32>
    %6 = tpu.matmul %4, %5, %cst {dimension_numbers = #tpu.dot_dimension_numbers<[1], [0], [0], [1], [0, 0, 1, 1], [], []>} : vector<512x1152xbf16>, vector<1152x128xbf16>, vector<512x128xf32> -> vector<512x128xf32>
    %7 = arith.addf %3, %6 : vector<512x128xf32>
    %c0_6 = arith.constant 0 : index
    %c0_7 = arith.constant 0 : index
    %8 = vector.load %arg7[%c0_6, %c0_7] : memref<512x128xf32, #tpu.memory_space<vmem>>, vector<512x128xf32>
    tpu.vector_store %arg7[%c0_6, %c0_7], %7 {strides = array<i32>} : memref<512x128xf32, #tpu.memory_space<vmem>>, vector<512x128xf32>,
    %c2_i32 = arith.constant 2 : i32
    %9 = arith.cmpi eq, %arg2, %c2_i32 : i32
    %10 = arith.extui %9 : i1 to i32
    %c0_i32_8 = arith.constant 0 : i32
    %11 = arith.cmpi ne, %10, %c0_i32_8 : i32
    scf.if %11 {
      %c0_9 = arith.constant 0 : index
      %c0_10 = arith.constant 0 : index
      %12 = vector.load %arg7[%c0_9, %c0_10] : memref<512x128xf32, #tpu.memory_space<vmem>>, vector<512x128xf32>
      %c0_11 = arith.constant 0 : index
      %c0_12 = arith.constant 0 : index
      %13 = vector.load %arg5[%c0_11, %c0_12] : memref<1x128xf32, #tpu.memory_space<vmem>>, vector<1x128xf32>
      %14 = vector.broadcast %13 : vector<1x128xf32> to vector<512x128xf32>
      %15 = arith.addf %12, %14 : vector<512x128xf32>
      %16 = math.tanh %15 : vector<512x128xf32>
      %c0_13 = arith.constant 0 : index
      %c0_14 = arith.constant 0 : index
      %17 = vector.load %arg6[%c0_13, %c0_14] : memref<512x128xf32, #tpu.memory_space<vmem>>, vector<512x128xf32>
      tpu.vector_store %arg6[%c0_13, %c0_14], %16 {strides = array<i32>} : memref<512x128xf32, #tpu.memory_space<vmem>>, vector<512x128xf32>,
    } else {
    }
    return
  }
  func.func @transform_0(%arg0: i32, %arg1: i32, %arg2: i32) -> (i32, i32) {
    %c0_i32 = arith.constant 0 : i32
    return %arg0, %arg2 : i32, i32
  }
  func.func @transform_1(%arg0: i32, %arg1: i32, %arg2: i32) -> (i32, i32) {
    %c0_i32 = arith.constant 0 : i32
    return %arg2, %arg1 : i32, i32
  }
  func.func @transform_2(%arg0: i32, %arg1: i32, %arg2: i32) -> (i32, i32) {
    %c0_i32 = arith.constant 0 : i32
    %c0_i32_0 = arith.constant 0 : i32
    return %c0_i32, %arg1 : i32, i32
  }
  func.func @transform_3(%arg0: i32, %arg1: i32, %arg2: i32) -> (i32, i32) {
    %c0_i32 = arith.constant 0 : i32
    return %arg0, %arg1 : i32, i32
  }
}

</mosaic_0001>

<bundles_post_ra>
// kernel: generator_forward.71
= control target key start
LH: loop header
LB: loop body
LE: loop exit
PB: predicated region body
PF: predicated region fallthrough
CT: control target
= control target key end

     0   :  { %s571_s9 = smov 0   ;;  %s573_s10 = smov 0   ;;  %s725_s0 = inlined_call_operand.vmem [shape: f32[2,256,64], index: 0, kind: input, shape index: {}]   ;;  %s726_s1 = inlined_call_operand.vmem [shape: f32[2,1,64], index: 1, kind: output, shape index: {0}]   ;;  %s727_s2 = inlined_call_operand.vmem [shape: f32[2,1,64], index: 2, kind: output, shape index: {1}]  }
   0x1   :  { %s575_s11 = smov 0  }
   0x2 LB: > { %s25_s12 = sadd.s32 1, %s549_s10  ;;  %p498_p0 = scmp.ge.s32.totalorder %s553_s11, 1  ;;  %s553_s11 = sphi %s575_s11, %s13_s11   ;;  %s549_s10 = sphi %s573_s10, %s729_s10   ;;  %s545_s9 = sphi %s571_s9, %s728_s9  }
   0x3   : > { %p27_p1 = scmp.ge.s32.totalorder %s25_s12, 2  ;;  %p134_p2 = scmp.lt.s32.totalorder %s553_s11, 3 }
   0x5   : > { %s731_s12 = smov (%p27_p1, %s25_s12), 0  ;;  %p135_p3 = pnand %p498_p0, %p134_p2 }
   0x6   : > { %p162_p4 = scmp.lt.s32.totalorder (!%p135_p3), %s545_s9, 1  ;;  %vm181_vm0 = vcmask (!%p135_p3), 516096   ;;  %vm217_vm1 = vcmask (!%p135_p3), 523264   ;;  %v555_v0 = vmov (!%p135_p3), 0.0  }
   0x7   : > { %138 = sbr.rel (%p135_p3) target bundleno = 128 (0x80), region = 24 }
   0xe   : > { %s733_s9 = smov (!%p162_p4, %s545_s9), 1 }
   0xf   : > { %s503_s13 = sshll.u32 %s733_s9, 8  ;;  %s592_s16 = scalar_lea.vmem %s726_s1, %s733_s9 }
  0x10   : > { %s597_s19 = scalar_lea.vmem %s725_s0, %s503_s13  ;;  %182 = vst.msk [vmem:[%s592_s16] sm:$0x1] %vm181_vm0, %v555_v0  ;;  %s604_s22 = scalar_lea.vmem %s727_s2, %s733_s9 }
  0x11   : > { %183 = vst.msk [vmem:[%s604_s22] sm:$0x1] %vm181_vm0, %v555_v0  ;;  %v184_v1 = vld [vmem:[%s597_s19] sm:$0xff]  ;;  %v185_v2 = vld [vmem:[%s597_s19 + $0x8] sm:$0xff]  ;;  %v186_v3 = vld [vmem:[%s597_s19 + $0x10] sm:$0xff] }
  0x12   : > { %v187_v4 = vld [vmem:[%s597_s19 + $0x18] sm:$0xff]  ;;  %v218_v5 = vsel %vm217_vm1, %v184_v1, 0.0  ;;  %v219_v6 = vsel %vm217_vm1, %v185_v2, 0.0  ;;  %v221_v7 = vsel %vm217_vm1, %v186_v3, 0.0  ;;  %v188_v8 = vld [vmem:[%s597_s19 + $0x20] sm:$0xff]  ;;  %v189_v11 = vld [vmem:[%s597_s19 + $0x28] sm:$0xff]  ;;  %v291_v30 = vmul.f32 %v184_v1, %v184_v1 }
  0x13   : > { %v220_v9 = vadd.f32 %v219_v6, %v218_v5  ;;  %v223_v10 = vsel %vm217_vm1, %v187_v4, 0.0  ;;  %v225_v13 = vsel %vm217_vm1, %v188_v8, 0.0  ;;  %v190_v14 = vld [vmem:[%s597_s19 + $0x30] sm:$0xff]  ;;  %v227_v16 = vsel %vm217_vm1, %v189_v11, 0.0  ;;  %v191_v17 = vld [vmem:[%s597_s19 + $0x38] sm:$0xff]  ;;  %v192_v20 = vld [vmem:[%s597_s19 + $0x40] sm:$0xff] }
  0x14   : > { %v229_v19 = vsel %vm217_vm1, %v190_v14, 0.0  ;;  %v231_v22 = vsel %vm217_vm1, %v191_v17, 0.0  ;;  %v193_v23 = vld [vmem:[%s597_s19 + $0x48] sm:$0xff]  ;;  %v233_v25 = vsel %vm217_vm1, %v192_v20, 0.0  ;;  %v194_v26 = vld [vmem:[%s597_s19 + $0x50] sm:$0xff]  ;;  %v195_v28 = vld [vmem:[%s597_s19 + $0x58] sm:$0xff]  ;;  %v292_v31 = vmul.f32 %v185_v2, %v185_v2 }
  0x15   : > { %v222_v12 = vadd.f32 %v221_v7, %v220_v9  ;;  %v235_v29 = vsel %vm217_vm1, %v193_v23, 0.0  ;;  %v293_v32 = vmul.f32 %v186_v3, %v186_v3  ;;  %v237_v34 = vsel %vm217_vm1, %v194_v26, 0.0  ;;  %v196_v36 = vld [vmem:[%s597_s19 + $0x60] sm:$0xff]  ;;  %v197_v43 = vld [vmem:[%s597_s19 + $0x68] sm:$0xff]  ;;  %v198_v49 = vld [vmem:[%s597_s19 + $0x70] sm:$0xff] }
  0x16   : > { %v294_v35 = vmul.f32 %v187_v4, %v187_v4  ;;  %v239_v38 = vsel %vm217_vm1, %v195_v28, 0.0  ;;  %v295_v39 = vmul.f32 %v188_v8, %v188_v8  ;;  %v323_v40 = vsel %vm217_vm1, %v291_v30, 0.0  ;;  %v199_v55 = vld [vmem:[%s597_s19 + $0x78] sm:$0xff]  ;;  %v200_v61 = vld [vmem:[%s597_s19 + $0x80] sm:$0xff]  ;;  %v201_v3 = vld [vmem:[%s597_s19 + $0x88] sm:$0xff] }
  0x17   : > { %v224_v15 = vadd.f32 %v223_v10, %v222_v12  ;;  %v324_v41 = vsel %vm217_vm1, %v292_v31, 0.0  ;;  %v326_v42 = vsel %vm217_vm1, %v293_v32, 0.0  ;;  %v241_v46 = vsel %vm217_vm1, %v196_v36, 0.0  ;;  %v202_v9 = vld [vmem:[%s597_s19 + $0x90] sm:$0xff] }
  0x18   : > { %v325_v45 = vadd.f32 %v324_v41, %v323_v40  ;;  %v296_v47 = vmul.f32 %v189_v11, %v189_v11  ;;  %v328_v48 = vsel %vm217_vm1, %v294_v35, 0.0  ;;  %v243_v52 = vsel %vm217_vm1, %v197_v43, 0.0 }
  0x19   : > { %v226_v18 = vadd.f32 %v225_v13, %v224_v15  ;;  %v297_v53 = vmul.f32 %v190_v14, %v190_v14  ;;  %v330_v54 = vsel %vm217_vm1, %v295_v39, 0.0  ;;  %v245_v58 = vsel %vm217_vm1, %v198_v49, 0.0  ;;  %v203_v15 = vld [vmem:[%s597_s19 + $0x98] sm:$0xff] }
  0x1a   : > { %v327_v51 = vadd.f32 %v326_v42, %v325_v45  ;;  %v298_v59 = vmul.f32 %v191_v17, %v191_v17  ;;  %v332_v60 = vsel %vm217_vm1, %v296_v47, 0.0  ;;  %v247_v0 = vsel %vm217_vm1, %v199_v55, 0.0  ;;  %v207_v39 = vld [vmem:[%s597_s19 + $0xb8] sm:$0xff]  ;;  %v208_v45 = vld [vmem:[%s597_s19 + $0xc0] sm:$0xff] }
  0x1b   : > { %v228_v21 = vadd.f32 %v227_v16, %v226_v18  ;;  %v299_v1 = vmul.f32 %v192_v20, %v192_v20  ;;  %v334_v2 = vsel %vm217_vm1, %v297_v53, 0.0  ;;  %v249_v6 = vsel %vm217_vm1, %v200_v61, 0.0 }
  0x1c   : > { %v329_v57 = vadd.f32 %v328_v48, %v327_v51  ;;  %v300_v7 = vmul.f32 %v193_v23, %v193_v23  ;;  %v336_v8 = vsel %vm217_vm1, %v298_v59, 0.0  ;;  %v251_v12 = vsel %vm217_vm1, %v201_v3, 0.0  ;;  %v209_v51 = vld [vmem:[%s597_s19 + $0xc8] sm:$0xff] }
  0x1d   : > { %v230_v24 = vadd.f32 %v229_v19, %v228_v21  ;;  %v301_v13 = vmul.f32 %v194_v26, %v194_v26  ;;  %v338_v14 = vsel %vm217_vm1, %v299_v1, 0.0  ;;  %v253_v18 = vsel %vm217_vm1, %v202_v9, 0.0  ;;  %v204_v21 = vld [vmem:[%s597_s19 + $0xa0] sm:$0xff] }
  0x1e   : > { %v331_v63 = vadd.f32 %v330_v54, %v329_v57  ;;  %v302_v19 = vmul.f32 %v195_v28, %v195_v28  ;;  %v340_v20 = vsel %vm217_vm1, %v300_v7, 0.0  ;;  %v257_v31 = vsel %vm217_vm1, %v204_v21, 0.0  ;;  %v210_v57 = vld [vmem:[%s597_s19 + $0xd0] sm:$0xff] }
  0x1f   : > { %v232_v27 = vadd.f32 %v231_v22, %v230_v24  ;;  %v255_v24 = vsel %vm217_vm1, %v203_v15, 0.0  ;;  %v342_v26 = vsel %vm217_vm1, %v301_v13, 0.0  ;;  %v304_v32 = vmul.f32 %v197_v43, %v197_v43 }
  0x20   : > { %v333_v5 = vadd.f32 %v332_v60, %v331_v63  ;;  %v344_v28 = vsel %vm217_vm1, %v302_v19, 0.0  ;;  %v263_v48 = vsel %vm217_vm1, %v207_v39, 0.0  ;;  %v265_v54 = vsel %vm217_vm1, %v208_v45, 0.0  ;;  %v211_v63 = vld [vmem:[%s597_s19 + $0xd8] sm:$0xff] }
  0x21   : > { %v234_v33 = vadd.f32 %v233_v25, %v232_v27  ;;  %v303_v25 = vmul.f32 %v196_v36, %v196_v36  ;;  %v205_v27 = vld [vmem:[%s597_s19 + $0xa8] sm:$0xff]  ;;  %v348_v43 = vsel %vm217_vm1, %v304_v32, 0.0  ;;  %v267_v60 = vsel %vm217_vm1, %v209_v51, 0.0 }
  0x22   : > { %v335_v11 = vadd.f32 %v334_v2, %v333_v5  ;;  %v269_v2 = vsel %vm217_vm1, %v210_v57, 0.0  ;;  %v212_v5 = vld [vmem:[%s597_s19 + $0xe0] sm:$0xff] }
  0x23   : > { %v236_v37 = vadd.f32 %v235_v29, %v234_v33  ;;  %v206_v33 = vld [vmem:[%s597_s19 + $0xb0] sm:$0xff]  ;;  %v346_v36 = vsel %vm217_vm1, %v303_v25, 0.0 }
  0x24   : > { %v337_v17 = vadd.f32 %v336_v8, %v335_v11  ;;  %v261_v42 = vsel %vm217_vm1, %v206_v33, 0.0  ;;  %v271_v8 = vsel %vm217_vm1, %v211_v63, 0.0  ;;  %v213_v11 = vld [vmem:[%s597_s19 + $0xe8] sm:$0xff] }
  0x25   : > { %v238_v44 = vadd.f32 %v237_v34, %v236_v37  ;;  %v259_v37 = vsel %vm217_vm1, %v205_v27, 0.0 }
  0x26   : > { %v339_v23 = vadd.f32 %v338_v14, %v337_v17  ;;  %v273_v14 = vsel %vm217_vm1, %v212_v5, 0.0 }
  0x27   : > { %v240_v50 = vadd.f32 %v239_v38, %v238_v44  ;;  %v305_v38 = vmul.f32 %v198_v49, %v198_v49  ;;  %v306_v44 = vmul.f32 %v199_v55, %v199_v55 }
  0x28   : > { %v341_v30 = vadd.f32 %v340_v20, %v339_v23  ;;  %v275_v20 = vsel %vm217_vm1, %v213_v11, 0.0 }
  0x29   : > { %v242_v56 = vadd.f32 %v241_v46, %v240_v50  ;;  %v307_v50 = vmul.f32 %v200_v61, %v200_v61  ;;  %v350_v49 = vsel %vm217_vm1, %v305_v38, 0.0  ;;  %v352_v55 = vsel %vm217_vm1, %v306_v44, 0.0 }
  0x2a   : > { %v343_v35 = vadd.f32 %v342_v26, %v341_v30 }
  0x2b   : > { %v244_v62 = vadd.f32 %v243_v52, %v242_v56  ;;  %v308_v56 = vmul.f32 %v201_v3, %v201_v3  ;;  %v354_v61 = vsel %vm217_vm1, %v307_v50, 0.0 }
  0x2c   : > { %v345_v41 = vadd.f32 %v344_v28, %v343_v35  ;;  %v315_v28 = vmul.f32 %v208_v45, %v208_v45 }
  0x2d   : > { %v246_v4 = vadd.f32 %v245_v58, %v244_v62  ;;  %v309_v62 = vmul.f32 %v202_v9, %v202_v9  ;;  %v356_v3 = vsel %vm217_vm1, %v308_v56, 0.0 }
  0x2e   : > { %v347_v47 = vadd.f32 %v346_v36, %v345_v41  ;;  %v317_v41 = vmul.f32 %v210_v57, %v210_v57 }
  0x2f   : > { %v248_v10 = vadd.f32 %v247_v0, %v246_v4  ;;  %v310_v4 = vmul.f32 %v203_v15, %v203_v15  ;;  %v358_v9 = vsel %vm217_vm1, %v309_v62, 0.0  ;;  %v214_v15 = vld [vmem:[%s597_s19 + $0xf0] sm:$0xff] }
  0x30   : > { %v349_v53 = vadd.f32 %v348_v43, %v347_v47  ;;  %v277_v26 = vsel %vm217_vm1, %v214_v15, 0.0  ;;  %v318_v43 = vmul.f32 %v211_v63, %v211_v63  ;;  %v374_v50 = vsel %vm217_vm1, %v317_v41, 0.0 }
  0x31   : > { %v250_v16 = vadd.f32 %v249_v6, %v248_v10  ;;  %v311_v10 = vmul.f32 %v204_v21, %v204_v21  ;;  %v360_v17 = vsel %vm217_vm1, %v310_v4, 0.0 }
  0x32   : > { %v351_v59 = vadd.f32 %v350_v49, %v349_v53  ;;  %v376_v53 = vsel %vm217_vm1, %v318_v43, 0.0 }
  0x33   : > { %v252_v22 = vadd.f32 %v251_v12, %v250_v16  ;;  %v312_v16 = vmul.f32 %v205_v27, %v205_v27  ;;  %v362_v23 = vsel %vm217_vm1, %v311_v10, 0.0 }
  0x34   : > { %v353_v1 = vadd.f32 %v352_v55, %v351_v59  ;;  %v321_v55 = vmul.f32 %v214_v15, %v214_v15 }
  0x35   : > { %v254_v29 = vadd.f32 %v253_v18, %v252_v22  ;;  %v313_v22 = vmul.f32 %v206_v33, %v206_v33  ;;  %v364_v30 = vsel %vm217_vm1, %v312_v16, 0.0  ;;  %v316_v33 = vmul.f32 %v209_v51, %v209_v51 }
  0x36   : > { %v355_v7 = vadd.f32 %v354_v61, %v353_v1  ;;  %v382_v1 = vsel %vm217_vm1, %v321_v55, 0.0 }
  0x37   : > { %v256_v34 = vadd.f32 %v255_v24, %v254_v29  ;;  %v215_v24 = vld [vmem:[%s597_s19 + $0xf8] sm:$0xff]  ;;  %v314_v29 = vmul.f32 %v207_v39, %v207_v39 }
  0x38   : > { %v357_v13 = vadd.f32 %v356_v3, %v355_v7  ;;  %v279_v32 = vsel %vm217_vm1, %v215_v24, 0.0  ;;  %v322_v62 = vmul.f32 %v215_v24, %v215_v24 }
  0x39   : > { %v258_v40 = vadd.f32 %v257_v31, %v256_v34  ;;  %v366_v34 = vsel %vm217_vm1, %v313_v22, 0.0  ;;  %v368_v38 = vsel %vm217_vm1, %v314_v29, 0.0 }
  0x3a   : > { %v359_v19 = vadd.f32 %v358_v9, %v357_v13  ;;  %v384_v3 = vsel %vm217_vm1, %v322_v62, 0.0 }
  0x3b   : > { %v260_v46 = vadd.f32 %v259_v37, %v258_v40 }
  0x3c   : > { %v361_v25 = vadd.f32 %v360_v17, %v359_v19 }
  0x3d   : > { %v262_v52 = vadd.f32 %v261_v42, %v260_v46  ;;  %v370_v42 = vsel %vm217_vm1, %v315_v28, 0.0  ;;  %v372_v46 = vsel %vm217_vm1, %v316_v33, 0.0 }
  0x3e   : > { %v363_v27 = vadd.f32 %v362_v23, %v361_v25 }
  0x3f   : > { %v264_v58 = vadd.f32 %v263_v48, %v262_v52  ;;  %v319_v48 = vmul.f32 %v212_v5, %v212_v5  ;;  %v320_v52 = vmul.f32 %v213_v11, %v213_v11 }
  0x40   : > { %v365_v37 = vadd.f32 %v364_v30, %v363_v27 }
  0x41   : > { %v266_v0 = vadd.f32 %v265_v54, %v264_v58  ;;  %v378_v57 = vsel %vm217_vm1, %v319_v48, 0.0  ;;  %v380_v61 = vsel %vm217_vm1, %v320_v52, 0.0 }
  0x42   : > { %v367_v40 = vadd.f32 %v366_v34, %v365_v37 }
  0x43   : > { %v268_v6 = vadd.f32 %v267_v60, %v266_v0  ;;  %v216_v60 = vld [vmem:[%s592_s16] sm:$0x1] }
  0x44   : > { %v369_v44 = vadd.f32 %v368_v38, %v367_v40 }
  0x45   : > { %v270_v12 = vadd.f32 %v269_v2, %v268_v6 }
  0x46   : > { %v371_v45 = vadd.f32 %v370_v42, %v369_v44 }
  0x47   : > { %v272_v18 = vadd.f32 %v271_v8, %v270_v12 }
  0x48   : > { %v373_v51 = vadd.f32 %v372_v46, %v371_v45 }
  0x49   : > { %v274_v21 = vadd.f32 %v273_v14, %v272_v18  ;;  %v290_v14 = vld [vmem:[%s604_s22] sm:$0x1] }
  0x4a   : > { %v375_v56 = vadd.f32 %v374_v50, %v373_v51 }
  0x4b   : > { %v276_v31 = vadd.f32 %v275_v20, %v274_v21 }
  0x4c   : > { %v377_v59 = vadd.f32 %v376_v53, %v375_v56 }
  0x4d   : > { %v278_v35 = vadd.f32 %v277_v26, %v276_v31 }
  0x4e   : > { %v379_v0 = vadd.f32 %v378_v57, %v377_v59 }
  0x4f   : > { %v280_v36 = vadd.f32 %v279_v32, %v278_v35 }
  0x50   : > { %v381_v4 = vadd.f32 %v380_v61, %v379_v0 }
  0x51   : > { %v281_v39 = vrot.slane %v280_v36, 4 }
  0x52   : > { %v383_v5 = vadd.f32 %v382_v1, %v381_v4 }
  0x53   : > { %v282_v47 = vadd.f32 %v281_v39, %v280_v36 }
  0x54   : > { %v385_v6 = vadd.f32 %v384_v3, %v383_v5 }
  0x55   : > { %v283_v49 = vrot.slane %v282_v47, 2 }
  0x56   : > { %v386_v7 = vrot.slane %v385_v6, 4 }
  0x57   : > { %v284_v54 = vadd.f32 %v283_v49, %v282_v47 }
  0x58   : > { %v387_v8 = vadd.f32 %v386_v7, %v385_v6 }
  0x59   : > { %v285_v58 = vrot.slane %v284_v54, 1 }
  0x5a   : > { %v388_v9 = vrot.slane %v387_v8, 2 }
  0x5b   : > { %v286_v63 = vadd.f32 %v285_v58, %v284_v54 }
  0x5c   : > { %v389_v12 = vadd.f32 %v388_v9, %v387_v8 }
  0x5d   : > { %v287_v2 = vadd.f32 %v286_v63, %v216_v60 }
  0x5e   : > { %v390_v13 = vrot.slane %v389_v12, 1 }
  0x5f   : > { %289 = vst.msk [vmem:[%s592_s16] sm:$0x1] %vm181_vm0, %v287_v2 }
  0x60   : > { %v391_v16 = vadd.f32 %v390_v13, %v389_v12 }
  0x62   : > { %v392_v17 = vadd.f32 %v391_v16, %v290_v14 }
  0x64   : > { %393 = vst.msk [vmem:[%s604_s22] sm:$0x1] %vm181_vm0, %v392_v17 }
  0x66   : > { %v397_v10 = vld [vmem:[%s592_s16] sm:$0x1] }
  0x67   : > { %v398_v11 = vmul.f32 0.00390625, %v397_v10 }
  0x69   : > { %404 = vst.msk [vmem:[%s592_s16] sm:$0x1] %vm181_vm0, %v398_v11  ;;  %v401_v15 = vmul.f32 %v398_v11, %v398_v11 }
  0x6b   : > { %v399_v18 = vld [vmem:[%s604_s22] sm:$0x1] }
  0x6c   : > { %v400_v19 = vmul.f32 0.00390625, %v399_v18 }
  0x6e   : > { %v402_v20 = vsub.f32 %v400_v19, %v401_v15 }
  0x70   : > { %v403_v22 = vmax.f32 %v402_v20, 0.0 }
  0x72   : > { %v405_v23 = vadd.f32 1e-05, %v403_v22 }
  0x74   : > { %529 = vrsqrt.f32 %v405_v23 }
  0x7e   : > { %v530_v24 = vpop.eup %529 }
  0x7f   : > { %407 = vst.msk [vmem:[%s604_s22] sm:$0x1] %vm181_vm0, %v530_v24 }
  0x80 PF: > { %s13_s11 = sadd.s32 1, %s553_s11   ;;  %s728_s9 = smov %s549_s10 }
  0x81   : > { %p10_p5 = scmp.ge.s32.totalorder %s13_s11, 4   ;;  %s729_s10 = smov %s731_s12 }
  0x83   :  { %12 = sbr.rel (!%p10_p5) target bundleno = 2 (0x2), region = 74 }

// kernel: generator_forward.72
= control target key start
LH: loop header
LB: loop body
LE: loop exit
PB: predicated region body
PF: predicated region fallthrough
CT: control target
= control target key end

     0   :  { %s601_s12 = smov 0   ;;  %s603_s13 = smov 0   ;;  %s808_s0 = inlined_call_operand.vmem [shape: f32[2,256,64], index: 0, kind: input, shape index: {}]   ;;  %s809_s1 = inlined_call_operand.vmem [shape: f32[2,1,64], index: 1, kind: input, shape index: {}]   ;;  %s810_s2 = inlined_call_operand.vmem [shape: f32[2,1,64], index: 2, kind: input, shape index: {}]   ;;  %s811_s3 = inlined_call_operand.vmem [shape: f32[2,256,64], index: 3, kind: output, shape index: {}]  }
   0x1   :  { %s605_s14 = smov 0  }
   0x2 LB: > { %s25_s15 = sadd.s32 1, %s575_s13  ;;  %p522_p0 = scmp.ge.s32.totalorder %s579_s14, 1  ;;  %s579_s14 = sphi %s605_s14, %s13_s14   ;;  %s575_s13 = sphi %s603_s13, %s813_s13   ;;  %s571_s12 = sphi %s601_s12, %s812_s12  }
   0x3   : > { %p27_p1 = scmp.ge.s32.totalorder %s25_s15, 2  ;;  %p174_p2 = scmp.lt.s32.totalorder %s579_s14, 3 }
   0x5   : > { %s815_s15 = smov (%p27_p1, %s25_s15), 0  ;;  %p175_p3 = pnand %p522_p0, %p174_p2 }
   0x6   : > { %p213_p4 = scmp.lt.s32.totalorder (!%p175_p3), %s571_s12, 1  ;;  %vm380_vm0 = vcmask (!%p175_p3), 523264  }
   0x7   : > { %178 = sbr.rel (%p175_p3) target bundleno = 47 (0x2f), region = 32 }
   0xe   : > { %s817_s12 = smov (!%p213_p4, %s571_s12), 1 }
   0xf   : > { %s531_s16 = sshll.u32 %s817_s12, 8  ;;  %s224_s19 = scalar_lea.vmem %s809_s1, %s817_s12 }
  0x10   : > { %s625_s22 = scalar_lea.vmem %s808_s0, %s531_s16  ;;  %s227_s25 = scalar_lea.vmem %s810_s2, %s817_s12  ;;  %v630_v0 = vld [vmem:[%s224_s19] ss:$0 sm:$0xff] }
  0x11   : > { %v238_v1 = vld [vmem:[%s625_s22] sm:$0xff]  ;;  %v239_v3 = vld [vmem:[%s625_s22 + $0x8] sm:$0xff]  ;;  %v240_v6 = vld [vmem:[%s625_s22 + $0x10] sm:$0xff]  ;;  %s654_s28 = scalar_lea.vmem %s811_s3, %s531_s16 }
  0x12   : > { %v633_v2 = vld [vmem:[%s227_s25] ss:$0 sm:$0xff]  ;;  %v277_v4 = vsub.f32 %v238_v1, %v630_v0  ;;  %v278_v5 = vsub.f32 %v239_v3, %v630_v0  ;;  %v241_v7 = vld [vmem:[%s625_s22 + $0x18] sm:$0xff]  ;;  %v279_v9 = vsub.f32 %v240_v6, %v630_v0  ;;  %v243_v12 = vld [vmem:[%s625_s22 + $0x28] sm:$0xff] }
  0x13   : > { %v242_v8 = vld [vmem:[%s625_s22 + $0x20] sm:$0xff]  ;;  %v280_v10 = vsub.f32 %v241_v7, %v630_v0  ;;  %v244_v13 = vld [vmem:[%s625_s22 + $0x30] sm:$0xff]  ;;  %v245_v14 = vld [vmem:[%s625_s22 + $0x38] sm:$0xff]  ;;  %v282_v17 = vsub.f32 %v243_v12, %v630_v0 }
  0x14   : > { %v281_v11 = vsub.f32 %v242_v8, %v630_v0  ;;  %v316_v15 = vmul.f32 %v633_v2, %v277_v4  ;;  %v317_v16 = vmul.f32 %v633_v2, %v278_v5  ;;  %v283_v18 = vsub.f32 %v244_v13, %v630_v0  ;;  %v246_v23 = vld [vmem:[%s625_s22 + $0x40] sm:$0xff]  ;;  %v247_v24 = vld [vmem:[%s625_s22 + $0x48] sm:$0xff]  ;;  %v248_v29 = vld [vmem:[%s625_s22 + $0x50] sm:$0xff] }
  0x15   : > { %v318_v19 = vmul.f32 %v633_v2, %v279_v9  ;;  %v319_v20 = vmul.f32 %v633_v2, %v280_v10  ;;  %v284_v22 = vsub.f32 %v245_v14, %v630_v0  ;;  %v321_v27 = vmul.f32 %v633_v2, %v282_v17  ;;  %v249_v30 = vld [vmem:[%s625_s22 + $0x58] sm:$0xff]  ;;  %v250_v31 = vld [vmem:[%s625_s22 + $0x60] sm:$0xff]  ;;  %v251_v36 = vld [vmem:[%s625_s22 + $0x68] sm:$0xff] }
  0x16   : > { %v320_v21 = vmul.f32 %v633_v2, %v281_v11  ;;  %v348_v25 = vmax.f32 %v316_v15, 0.0  ;;  %v349_v26 = vmax.f32 %v317_v16, 0.0  ;;  %v322_v28 = vmul.f32 %v633_v2, %v283_v18  ;;  %v252_v37 = vld [vmem:[%s625_s22 + $0x70] sm:$0xff]  ;;  %v253_v42 = vld [vmem:[%s625_s22 + $0x78] sm:$0xff]  ;;  %v254_v55 = vld [vmem:[%s625_s22 + $0x80] sm:$0xff] }
  0x17   : > { %v350_v32 = vmax.f32 %v318_v19, 0.0  ;;  %v351_v33 = vmax.f32 %v319_v20, 0.0  ;;  %v323_v35 = vmul.f32 %v633_v2, %v284_v22  ;;  %v353_v38 = vmax.f32 %v321_v27, 0.0  ;;  %v255_v56 = vld [vmem:[%s625_s22 + $0x88] sm:$0xff]  ;;  %v256_v61 = vld [vmem:[%s625_s22 + $0x90] sm:$0xff]  ;;  %v257_v62 = vld [vmem:[%s625_s22 + $0x98] sm:$0xff] }
  0x18   : > { %v352_v34 = vmax.f32 %v320_v21, 0.0  ;;  %381 = vst.msk [vmem:[%s654_s28] sm:$0xff] %vm380_vm0, %v348_v25  ;;  %382 = vst.msk [vmem:[%s654_s28 + $0x8] sm:$0xff] %vm380_vm0, %v349_v26  ;;  %v354_v39 = vmax.f32 %v322_v28, 0.0  ;;  %v285_v40 = vsub.f32 %v246_v23, %v630_v0  ;;  %v286_v41 = vsub.f32 %v247_v24, %v630_v0  ;;  %v258_v63 = vld [vmem:[%s625_s22 + $0xa0] sm:$0xff]  ;;  %v259_v6 = vld [vmem:[%s625_s22 + $0xa8] sm:$0xff] }
  0x19   : > { %383 = vst.msk [vmem:[%s654_s28 + $0x10] sm:$0xff] %vm380_vm0, %v350_v32  ;;  %384 = vst.msk [vmem:[%s654_s28 + $0x18] sm:$0xff] %vm380_vm0, %v351_v33  ;;  %v355_v43 = vmax.f32 %v323_v35, 0.0  ;;  %v287_v44 = vsub.f32 %v248_v29, %v630_v0  ;;  %v288_v45 = vsub.f32 %v249_v30, %v630_v0  ;;  %v289_v46 = vsub.f32 %v250_v31, %v630_v0  ;;  %v260_v7 = vld [vmem:[%s625_s22 + $0xb0] sm:$0xff]  ;;  %v261_v12 = vld [vmem:[%s625_s22 + $0xb8] sm:$0xff] }
  0x1a   : > { %385 = vst.msk [vmem:[%s654_s28 + $0x20] sm:$0xff] %vm380_vm0, %v352_v34  ;;  %386 = vst.msk [vmem:[%s654_s28 + $0x28] sm:$0xff] %vm380_vm0, %v353_v38  ;;  %v324_v47 = vmul.f32 %v633_v2, %v285_v40  ;;  %v325_v48 = vmul.f32 %v633_v2, %v286_v41  ;;  %v290_v49 = vsub.f32 %v251_v36, %v630_v0  ;;  %v262_v25 = vld [vmem:[%s625_s22 + $0xc0] sm:$0xff]  ;;  %v263_v26 = vld [vmem:[%s625_s22 + $0xc8] sm:$0xff] }
  0x1b   : > { %387 = vst.msk [vmem:[%s654_s28 + $0x30] sm:$0xff] %vm380_vm0, %v354_v39  ;;  %v291_v50 = vsub.f32 %v252_v37, %v630_v0  ;;  %388 = vst.msk [vmem:[%s654_s28 + $0x38] sm:$0xff] %vm380_vm0, %v355_v43  ;;  %v326_v51 = vmul.f32 %v633_v2, %v287_v44  ;;  %v327_v52 = vmul.f32 %v633_v2, %v288_v45  ;;  %v264_v31 = vld [vmem:[%s625_s22 + $0xd0] sm:$0xff]  ;;  %v265_v32 = vld [vmem:[%s625_s22 + $0xd8] sm:$0xff] }
  0x1c   : > { %v328_v53 = vmul.f32 %v633_v2, %v289_v46  ;;  %v292_v54 = vsub.f32 %v253_v42, %v630_v0  ;;  %v356_v57 = vmax.f32 %v324_v47, 0.0  ;;  %v357_v58 = vmax.f32 %v325_v48, 0.0  ;;  %v266_v33 = vld [vmem:[%s625_s22 + $0xe0] sm:$0xff]  ;;  %v267_v38 = vld [vmem:[%s625_s22 + $0xe8] sm:$0xff]  ;;  %v268_v39 = vld [vmem:[%s625_s22 + $0xf0] sm:$0xff] }
  0x1d   : > { %v329_v59 = vmul.f32 %v633_v2, %v290_v49  ;;  %v330_v60 = vmul.f32 %v633_v2, %v291_v50  ;;  %v358_v1 = vmax.f32 %v326_v51, 0.0  ;;  %v359_v3 = vmax.f32 %v327_v52, 0.0  ;;  %v269_v44 = vld [vmem:[%s625_s22 + $0xf8] sm:$0xff] }
  0x1e   : > { %v360_v4 = vmax.f32 %v328_v53, 0.0  ;;  %v331_v5 = vmul.f32 %v633_v2, %v292_v54  ;;  %389 = vst.msk [vmem:[%s654_s28 + $0x40] sm:$0xff] %vm380_vm0, %v356_v57  ;;  %390 = vst.msk [vmem:[%s654_s28 + $0x48] sm:$0xff] %vm380_vm0, %v357_v58  ;;  %v293_v10 = vsub.f32 %v254_v55, %v630_v0  ;;  %v294_v11 = vsub.f32 %v255_v56, %v630_v0 }
  0x1f   : > { %v361_v8 = vmax.f32 %v329_v59, 0.0  ;;  %v362_v9 = vmax.f32 %v330_v60, 0.0  ;;  %391 = vst.msk [vmem:[%s654_s28 + $0x50] sm:$0xff] %vm380_vm0, %v358_v1  ;;  %392 = vst.msk [vmem:[%s654_s28 + $0x58] sm:$0xff] %vm380_vm0, %v359_v3  ;;  %v295_v14 = vsub.f32 %v256_v61, %v630_v0  ;;  %v296_v15 = vsub.f32 %v257_v62, %v630_v0 }
  0x20   : > { %393 = vst.msk [vmem:[%s654_s28 + $0x60] sm:$0xff] %vm380_vm0, %v360_v4  ;;  %v363_v13 = vmax.f32 %v331_v5, 0.0  ;;  %v297_v16 = vsub.f32 %v258_v63, %v630_v0  ;;  %v332_v17 = vmul.f32 %v633_v2, %v293_v10  ;;  %v333_v18 = vmul.f32 %v633_v2, %v294_v11 }
  0x21   : > { %394 = vst.msk [vmem:[%s654_s28 + $0x68] sm:$0xff] %vm380_vm0, %v361_v8  ;;  %395 = vst.msk [vmem:[%s654_s28 + $0x70] sm:$0xff] %vm380_vm0, %v362_v9  ;;  %v298_v19 = vsub.f32 %v259_v6, %v630_v0  ;;  %v299_v20 = vsub.f32 %v260_v7, %v630_v0  ;;  %v334_v21 = vmul.f32 %v633_v2, %v295_v14 }
  0x22   : > { %396 = vst.msk [vmem:[%s654_s28 + $0x78] sm:$0xff] %vm380_vm0, %v363_v13  ;;  %v335_v22 = vmul.f32 %v633_v2, %v296_v15  ;;  %v336_v23 = vmul.f32 %v633_v2, %v297_v16  ;;  %v300_v24 = vsub.f32 %v261_v12, %v630_v0  ;;  %v364_v27 = vmax.f32 %v332_v17, 0.0 }
  0x23   : > { %v365_v28 = vmax.f32 %v333_v18, 0.0  ;;  %v337_v29 = vmul.f32 %v633_v2, %v298_v19  ;;  %v338_v30 = vmul.f32 %v633_v2, %v299_v20  ;;  %v366_v34 = vmax.f32 %v334_v21, 0.0 }
  0x24   : > { %v367_v35 = vmax.f32 %v335_v22, 0.0  ;;  %v368_v36 = vmax.f32 %v336_v23, 0.0  ;;  %v339_v37 = vmul.f32 %v633_v2, %v300_v24  ;;  %397 = vst.msk [vmem:[%s654_s28 + $0x80] sm:$0xff] %vm380_vm0, %v364_v27  ;;  %v301_v42 = vsub.f32 %v262_v25, %v630_v0 }
  0x25   : > { %398 = vst.msk [vmem:[%s654_s28 + $0x88] sm:$0xff] %vm380_vm0, %v365_v28  ;;  %v369_v40 = vmax.f32 %v337_v29, 0.0  ;;  %v370_v41 = vmax.f32 %v338_v30, 0.0  ;;  %v302_v43 = vsub.f32 %v263_v26, %v630_v0  ;;  %399 = vst.msk [vmem:[%s654_s28 + $0x90] sm:$0xff] %vm380_vm0, %v366_v34  ;;  %v303_v46 = vsub.f32 %v264_v31, %v630_v0 }
  0x26   : > { %400 = vst.msk [vmem:[%s654_s28 + $0x98] sm:$0xff] %vm380_vm0, %v367_v35  ;;  %401 = vst.msk [vmem:[%s654_s28 + $0xa0] sm:$0xff] %vm380_vm0, %v368_v36  ;;  %v371_v45 = vmax.f32 %v339_v37, 0.0  ;;  %v304_v47 = vsub.f32 %v265_v32, %v630_v0  ;;  %v305_v48 = vsub.f32 %v266_v33, %v630_v0  ;;  %v340_v49 = vmul.f32 %v633_v2, %v301_v42 }
  0x27   : > { %402 = vst.msk [vmem:[%s654_s28 + $0xa8] sm:$0xff] %vm380_vm0, %v369_v40  ;;  %403 = vst.msk [vmem:[%s654_s28 + $0xb0] sm:$0xff] %vm380_vm0, %v370_v41  ;;  %v341_v50 = vmul.f32 %v633_v2, %v302_v43  ;;  %v306_v51 = vsub.f32 %v267_v38, %v630_v0  ;;  %v307_v52 = vsub.f32 %v268_v39, %v630_v0 }
  0x28   : > { %404 = vst.msk [vmem:[%s654_s28 + $0xb8] sm:$0xff] %vm380_vm0, %v371_v45  ;;  %v342_v53 = vmul.f32 %v633_v2, %v303_v46  ;;  %v343_v54 = vmul.f32 %v633_v2, %v304_v47  ;;  %v344_v55 = vmul.f32 %v633_v2, %v305_v48  ;;  %v308_v56 = vsub.f32 %v269_v44, %v630_v0 }
  0x29   : > { %v372_v57 = vmax.f32 %v340_v49, 0.0  ;;  %v373_v58 = vmax.f32 %v341_v50, 0.0  ;;  %v345_v59 = vmul.f32 %v633_v2, %v306_v51  ;;  %v346_v60 = vmul.f32 %v633_v2, %v307_v52 }
  0x2a   : > { %v374_v61 = vmax.f32 %v342_v53, 0.0  ;;  %v375_v62 = vmax.f32 %v343_v54, 0.0  ;;  %v376_v63 = vmax.f32 %v344_v55, 0.0  ;;  %v347_v1 = vmul.f32 %v633_v2, %v308_v56 }
  0x2b   : > { %405 = vst.msk [vmem:[%s654_s28 + $0xc0] sm:$0xff] %vm380_vm0, %v372_v57  ;;  %406 = vst.msk [vmem:[%s654_s28 + $0xc8] sm:$0xff] %vm380_vm0, %v373_v58  ;;  %v377_v3 = vmax.f32 %v345_v59, 0.0  ;;  %v378_v0 = vmax.f32 %v346_v60, 0.0 }
  0x2c   : > { %407 = vst.msk [vmem:[%s654_s28 + $0xd0] sm:$0xff] %vm380_vm0, %v374_v61  ;;  %408 = vst.msk [vmem:[%s654_s28 + $0xd8] sm:$0xff] %vm380_vm0, %v375_v62  ;;  %v379_v4 = vmax.f32 %v347_v1, 0.0 }
  0x2d   : > { %409 = vst.msk [vmem:[%s654_s28 + $0xe0] sm:$0xff] %vm380_vm0, %v376_v63  ;;  %410 = vst.msk [vmem:[%s654_s28 + $0xe8] sm:$0xff] %vm380_vm0, %v377_v3 }
  0x2e   : > { %411 = vst.msk [vmem:[%s654_s28 + $0xf0] sm:$0xff] %vm380_vm0, %v378_v0  ;;  %412 = vst.msk [vmem:[%s654_s28 + $0xf8] sm:$0xff] %vm380_vm0, %v379_v4 }
  0x2f PF: > { %s13_s14 = sadd.s32 1, %s579_s14   ;;  %s812_s12 = smov %s575_s13 }
  0x30   : > { %p10_p5 = scmp.ge.s32.totalorder %s13_s14, 4   ;;  %s813_s13 = smov %s815_s15 }
  0x32   :  { %12 = sbr.rel (!%p10_p5) target bundleno = 2 (0x2), region = 68 }

// kernel: generator_forward.70
= control target key start
LH: loop header
LB: loop body
LE: loop exit
PB: predicated region body
PF: predicated region fallthrough
CT: control target
= control target key end

     0   :  { %v1508_v0 = vmov 0   ;;  %s2062_s1 = inlined_call_operand.vmem [shape: bf16[256,128], index: 1, kind: input, shape index: {}]   ;;  %s2063_s0 = inlined_call_operand.vmem [shape: bf16[512,256], index: 0, kind: input, shape index: {}]   ;;  %s2064_s2 = inlined_call_operand.vmem [shape: f32[1,128], index: 2, kind: input, shape index: {}]   ;;  %s2065_s3 = inlined_call_operand.vmem [shape: f32[512,128], index: 3, kind: output, shape index: {}]  }
   0x1   :  { %659 = vmatprep.subr.bf16.mxu0 %v1508_v0  ;;  %1363 = vmatprep.subr.bf16.mxu1 %v1508_v0  ;;  %v1396_v1 = vld [vmem:[%s2062_s1] sm:$0xff]   ;;  %v1397_v2 = vld [vmem:[%s2062_s1 + $0x8] sm:$0xff]   ;;  %v1398_v3 = vld [vmem:[%s2062_s1 + $0x10] sm:$0xff]  }
   0x2   :  { %660 = vmatpush1.bf16.msra.mxu0 %v1396_v1  ;;  %1379 = vmatpush1.bf16.msra.mxu1 %v1396_v1  ;;  %v1399_v4 = vld [vmem:[%s2062_s1 + $0x18] sm:$0xff]   ;;  %v1400_v5 = vld [vmem:[%s2062_s1 + $0x20] sm:$0xff]   ;;  %v1401_v7 = vld [vmem:[%s2062_s1 + $0x28] sm:$0xff]  }
   0x3   :  { %661 = vmatprep.subr.bf16.mxu0 %v1508_v0  ;;  %1364 = vmatprep.subr.bf16.mxu1 %v1508_v0  ;;  %v1414_v6 = vld [vmem:[%s2063_s0 + $0x4] ss:$8 sps:$4 sm:$0xff]   ;;  %v1402_v9 = vld [vmem:[%s2062_s1 + $0x30] sm:$0xff]   ;;  %v1403_v10 = vld [vmem:[%s2062_s1 + $0x38] sm:$0xff]  }
   0x4   :  { %v1417_v8 = vld [vmem:[%s2063_s0 + $0x104] ss:$8 sps:$4 sm:$0xff]   ;;  %691 = vmatprep.mubr.bf16.mxu0 %v1414_v6  ;;  %v1406_v13 = vld [vmem:[%s2062_s1 + $0x50] sm:$0xff]   ;;  %v1407_v14 = vld [vmem:[%s2062_s1 + $0x58] sm:$0xff]  }
   0x5   :  { %819 = vmatprep.mubr.bf16.mxu1 %v1417_v8  ;;  %v1404_v11 = vld [vmem:[%s2062_s1 + $0x40] sm:$0xff]   ;;  %v1405_v12 = vld [vmem:[%s2062_s1 + $0x48] sm:$0xff]   ;;  %v1410_v17 = vld [vmem:[%s2062_s1 + $0x70] sm:$0xff]  }
   0x6   :  { %662 = vmatpush1.bf16.msra.mxu0 %v1397_v2  ;;  %1380 = vmatpush1.bf16.msra.mxu1 %v1397_v2  ;;  %v1408_v15 = vld [vmem:[%s2062_s1 + $0x60] sm:$0xff]   ;;  %v1409_v16 = vld [vmem:[%s2062_s1 + $0x68] sm:$0xff]   ;;  %v1411_v18 = vld [vmem:[%s2062_s1 + $0x78] sm:$0xff]  }
   0x7   :  { %663 = vmatprep.subr.bf16.mxu0 %v1508_v0  ;;  %1365 = vmatprep.subr.bf16.mxu1 %v1508_v0  ;;  %v1412_v19 = vld [vmem:[%s2063_s0] ss:$8 sps:$4 sm:$0xff]   ;;  %v1418_v21 = vld [vmem:[%s2063_s0 + $0x14] ss:$8 sps:$4 sm:$0xff]   ;;  %v1422_v23 = vld [vmem:[%s2063_s0 + $0x10] ss:$8 sps:$4 sm:$0xff]  }
   0x8   :  { %v1415_v20 = vld [vmem:[%s2063_s0 + $0x100] ss:$8 sps:$4 sm:$0xff]   ;;  %v1420_v22 = vld [vmem:[%s2063_s0 + $0x114] ss:$8 sps:$4 sm:$0xff]   ;;  %v1423_v24 = vld [vmem:[%s2063_s0 + $0x110] ss:$8 sps:$4 sm:$0xff]  }
   0x9   :  { %v1424_v25 = vld [vmem:[%s2063_s0 + $0x24] ss:$8 sps:$4 sm:$0xff]   ;;  %v1428_v27 = vld [vmem:[%s2063_s0 + $0x20] ss:$8 sps:$4 sm:$0xff]   ;;  %v1430_v29 = vld [vmem:[%s2063_s0 + $0x34] ss:$8 sps:$4 sm:$0xff]  }
   0xa   :  { %664 = vmatpush1.bf16.msra.mxu0 %v1398_v3  ;;  %1381 = vmatpush1.bf16.msra.mxu1 %v1398_v3  ;;  %v1426_v26 = vld [vmem:[%s2063_s0 + $0x124] ss:$8 sps:$4 sm:$0xff]   ;;  %v1429_v28 = vld [vmem:[%s2063_s0 + $0x120] ss:$8 sps:$4 sm:$0xff]   ;;  %v1432_v30 = vld [vmem:[%s2063_s0 + $0x134] ss:$8 sps:$4 sm:$0xff]  }
   0xb   :  { %665 = vmatprep.subr.bf16.mxu0 %v1508_v0  ;;  %1366 = vmatprep.subr.bf16.mxu1 %v1508_v0  ;;  %v1434_v31 = vld [vmem:[%s2063_s0 + $0x30] ss:$8 sps:$4 sm:$0xff]   ;;  %v1436_v33 = vld [vmem:[%s2063_s0 + $0x44] ss:$8 sps:$4 sm:$0xff]   ;;  %v1440_v35 = vld [vmem:[%s2063_s0 + $0x40] ss:$8 sps:$4 sm:$0xff]  }
   0xc   :  { %v1435_v32 = vld [vmem:[%s2063_s0 + $0x130] ss:$8 sps:$4 sm:$0xff]   ;;  %v1438_v34 = vld [vmem:[%s2063_s0 + $0x144] ss:$8 sps:$4 sm:$0xff]   ;;  %v1441_v36 = vld [vmem:[%s2063_s0 + $0x140] ss:$8 sps:$4 sm:$0xff]  }
   0xd   :  { %v1442_v37 = vld [vmem:[%s2063_s0 + $0x54] ss:$8 sps:$4 sm:$0xff]   ;;  %v1446_v39 = vld [vmem:[%s2063_s0 + $0x50] ss:$8 sps:$4 sm:$0xff]   ;;  %v1448_v41 = vld [vmem:[%s2063_s0 + $0x64] ss:$8 sps:$4 sm:$0xff]  }
   0xe   :  { %666 = vmatpush1.bf16.msra.mxu0 %v1399_v4  ;;  %1382 = vmatpush1.bf16.msra.mxu1 %v1399_v4  ;;  %v1444_v38 = vld [vmem:[%s2063_s0 + $0x154] ss:$8 sps:$4 sm:$0xff]   ;;  %v1447_v40 = vld [vmem:[%s2063_s0 + $0x150] ss:$8 sps:$4 sm:$0xff]   ;;  %v1450_v42 = vld [vmem:[%s2063_s0 + $0x164] ss:$8 sps:$4 sm:$0xff]  }
   0xf   :  { %667 = vmatprep.subr.bf16.mxu0 %v1508_v0  ;;  %1367 = vmatprep.subr.bf16.mxu1 %v1508_v0  ;;  %v1452_v43 = vld [vmem:[%s2063_s0 + $0x60] ss:$8 sps:$4 sm:$0xff]   ;;  %v1454_v45 = vld [vmem:[%s2063_s0 + $0x74] ss:$8 sps:$4 sm:$0xff]   ;;  %v1458_v47 = vld [vmem:[%s2063_s0 + $0x70] ss:$8 sps:$4 sm:$0xff]  }
  0x10   :  { %v1453_v44 = vld [vmem:[%s2063_s0 + $0x160] ss:$8 sps:$4 sm:$0xff]   ;;  %v1456_v46 = vld [vmem:[%s2063_s0 + $0x174] ss:$8 sps:$4 sm:$0xff]   ;;  %v1459_v48 = vld [vmem:[%s2063_s0 + $0x170] ss:$8 sps:$4 sm:$0xff]  }
  0x11   :  { %v1460_v49 = vld [vmem:[%s2063_s0 + $0x84] ss:$8 sps:$4 sm:$0xff]   ;;  %v1464_v51 = vld [vmem:[%s2063_s0 + $0x80] ss:$8 sps:$4 sm:$0xff]   ;;  %v1466_v53 = vld [vmem:[%s2063_s0 + $0x94] ss:$8 sps:$4 sm:$0xff]  }
  0x12   :  { %668 = vmatpush1.bf16.msra.mxu0 %v1400_v5  ;;  %1383 = vmatpush1.bf16.msra.mxu1 %v1400_v5  ;;  %v1462_v50 = vld [vmem:[%s2063_s0 + $0x184] ss:$8 sps:$4 sm:$0xff]   ;;  %v1465_v52 = vld [vmem:[%s2063_s0 + $0x180] ss:$8 sps:$4 sm:$0xff]   ;;  %v1468_v54 = vld [vmem:[%s2063_s0 + $0x194] ss:$8 sps:$4 sm:$0xff]  }
  0x13   :  { %669 = vmatprep.subr.bf16.mxu0 %v1508_v0  ;;  %1368 = vmatprep.subr.bf16.mxu1 %v1508_v0  ;;  %v1470_v55 = vld [vmem:[%s2063_s0 + $0x90] ss:$8 sps:$4 sm:$0xff]   ;;  %v1472_v57 = vld [vmem:[%s2063_s0 + $0xa4] ss:$8 sps:$4 sm:$0xff]   ;;  %v1476_v59 = vld [vmem:[%s2063_s0 + $0xa0] ss:$8 sps:$4 sm:$0xff]  }
  0x14   :  { %v1471_v56 = vld [vmem:[%s2063_s0 + $0x190] ss:$8 sps:$4 sm:$0xff]   ;;  %v1474_v58 = vld [vmem:[%s2063_s0 + $0x1a4] ss:$8 sps:$4 sm:$0xff]   ;;  %v1477_v60 = vld [vmem:[%s2063_s0 + $0x1a0] ss:$8 sps:$4 sm:$0xff]  }
  0x15   :  { %v1478_v61 = vld [vmem:[%s2063_s0 + $0xb4] ss:$8 sps:$4 sm:$0xff]   ;;  %v1482_v63 = vld [vmem:[%s2063_s0 + $0xb0] ss:$8 sps:$4 sm:$0xff]   ;;  %v1484_v1 = vld [vmem:[%s2063_s0 + $0xc4] ss:$8 sps:$4 sm:$0xff]  }
  0x16   :  { %670 = vmatpush1.bf16.msra.mxu0 %v1401_v7  ;;  %1384 = vmatpush1.bf16.msra.mxu1 %v1401_v7  ;;  %v1480_v62 = vld [vmem:[%s2063_s0 + $0x1b4] ss:$8 sps:$4 sm:$0xff]   ;;  %v1486_v2 = vld [vmem:[%s2063_s0 + $0x1c4] ss:$8 sps:$4 sm:$0xff]   ;;  %v1488_v3 = vld [vmem:[%s2063_s0 + $0xc0] ss:$8 sps:$4 sm:$0xff]  }
  0x17   :  { %671 = vmatprep.subr.bf16.mxu0 %v1508_v0  ;;  %1369 = vmatprep.subr.bf16.mxu1 %v1508_v0  ;;  %v1489_v4 = vld [vmem:[%s2063_s0 + $0x1c0] ss:$8 sps:$4 sm:$0xff]   ;;  %v1490_v5 = vld [vmem:[%s2063_s0 + $0xd4] ss:$8 sps:$4 sm:$0xff]   ;;  %v1494_v7 = vld [vmem:[%s2063_s0 + $0xd0] ss:$8 sps:$4 sm:$0xff]  }
  0x18   :  { %v1492_v6 = vld [vmem:[%s2063_s0 + $0x1d4] ss:$8 sps:$4 sm:$0xff]   ;;  %v1495_v8 = vld [vmem:[%s2063_s0 + $0x1d0] ss:$8 sps:$4 sm:$0xff]  }
  0x1a   :  { %672 = vmatpush1.bf16.msra.mxu0 %v1402_v9  ;;  %1385 = vmatpush1.bf16.msra.mxu1 %v1402_v9  ;;  %v1496_v9 = vld [vmem:[%s2063_s0 + $0xe4] ss:$8 sps:$4 sm:$0xff]  }
  0x1b   :  { %673 = vmatprep.subr.bf16.mxu0 %v1508_v0  ;;  %1370 = vmatprep.subr.bf16.mxu1 %v1508_v0 }
  0x1e   :  { %674 = vmatpush1.bf16.msra.mxu0 %v1403_v10  ;;  %1386 = vmatpush1.bf16.msra.mxu1 %v1403_v10  ;;  %v1498_v10 = vld [vmem:[%s2063_s0 + $0x1e4] ss:$8 sps:$4 sm:$0xff]  }
  0x1f   :  { %675 = vmatprep.subr.bf16.mxu0 %v1508_v0  ;;  %1371 = vmatprep.subr.bf16.mxu1 %v1508_v0 }
  0x22   :  { %676 = vmatpush1.bf16.msra.mxu0 %v1404_v11  ;;  %1387 = vmatpush1.bf16.msra.mxu1 %v1404_v11  ;;  %v1500_v11 = vld [vmem:[%s2063_s0 + $0xe0] ss:$8 sps:$4 sm:$0xff]  }
  0x23   :  { %677 = vmatprep.subr.bf16.mxu0 %v1508_v0  ;;  %1372 = vmatprep.subr.bf16.mxu1 %v1508_v0 }
  0x26   :  { %678 = vmatpush1.bf16.msra.mxu0 %v1405_v12  ;;  %1388 = vmatpush1.bf16.msra.mxu1 %v1405_v12  ;;  %v1501_v12 = vld [vmem:[%s2063_s0 + $0x1e0] ss:$8 sps:$4 sm:$0xff]  }
  0x27   :  { %679 = vmatprep.subr.bf16.mxu0 %v1508_v0  ;;  %1373 = vmatprep.subr.bf16.mxu1 %v1508_v0 }
  0x2a   :  { %680 = vmatpush1.bf16.msra.mxu0 %v1406_v13  ;;  %1389 = vmatpush1.bf16.msra.mxu1 %v1406_v13  ;;  %v1502_v13 = vld [vmem:[%s2063_s0 + $0xf4] ss:$8 sps:$4 sm:$0xff]  }
  0x2b   :  { %681 = vmatprep.subr.bf16.mxu0 %v1508_v0  ;;  %1374 = vmatprep.subr.bf16.mxu1 %v1508_v0 }
  0x2e   :  { %682 = vmatpush1.bf16.msra.mxu0 %v1407_v14  ;;  %1390 = vmatpush1.bf16.msra.mxu1 %v1407_v14  ;;  %v1504_v14 = vld [vmem:[%s2063_s0 + $0x1f4] ss:$8 sps:$4 sm:$0xff]  }
  0x2f   :  { %683 = vmatprep.subr.bf16.mxu0 %v1508_v0  ;;  %1375 = vmatprep.subr.bf16.mxu1 %v1508_v0 }
  0x32   :  { %684 = vmatpush1.bf16.msra.mxu0 %v1408_v15  ;;  %1391 = vmatpush1.bf16.msra.mxu1 %v1408_v15  ;;  %v1506_v15 = vld [vmem:[%s2063_s0 + $0xf0] ss:$8 sps:$4 sm:$0xff]  }
  0x33   :  { %685 = vmatprep.subr.bf16.mxu0 %v1508_v0  ;;  %1376 = vmatprep.subr.bf16.mxu1 %v1508_v0 }
  0x36   :  { %686 = vmatpush1.bf16.msra.mxu0 %v1409_v16  ;;  %1392 = vmatpush1.bf16.msra.mxu1 %v1409_v16  ;;  %v1507_v16 = vld [vmem:[%s2063_s0 + $0x1f0] ss:$8 sps:$4 sm:$0xff]  }
  0x37   :  { %687 = vmatprep.subr.bf16.mxu0 %v1508_v0  ;;  %1377 = vmatprep.subr.bf16.mxu1 %v1508_v0 }
  0x3a   :  { %688 = vmatpush1.bf16.msra.mxu0 %v1410_v17  ;;  %1393 = vmatpush1.bf16.msra.mxu1 %v1410_v17  ;;  %v1804_v17 = vld [vmem:[%s2064_s2] ss:$0 sm:$0xff] }
  0x3b   :  { %689 = vmatprep.subr.bf16.mxu0 %v1508_v0  ;;  %1378 = vmatprep.subr.bf16.mxu1 %v1508_v0  ;;  %v1483_v0 = vld [vmem:[%s2063_s0 + $0x1b0] ss:$8 sps:$4 sm:$0xff]  }
  0x3e   :  { %690 = vmatpush1.bf16.msra.mxu0 %v1411_v18  ;;  %1394 = vmatpush1.bf16.msra.mxu1 %v1411_v18 }
  0x41   :  { %692 = vmatmul.mubr.bf16.vlgmr.msra.gmra.mrb[0].mxu0 %v1412_v19  ;;  %820 = vmatmul.mubr.bf16.vlgmr.msra.gmra.mrb[0].mxu1 %v1415_v20 }
  0x42   :  { %699 = vmatprep.mubr.bf16.mxu0 %v1418_v21  ;;  %827 = vmatprep.mubr.bf16.mxu1 %v1420_v22 }
  0x49   :  { %700 = vmatmul.mubr.bf16.gmra.mrb[4].mxu0 %v1422_v23  ;;  %828 = vmatmul.mubr.bf16.gmra.mrb[4].mxu1 %v1423_v24 }
  0x4a   :  { %707 = vmatprep.mubr.bf16.mxu0 %v1424_v25  ;;  %835 = vmatprep.mubr.bf16.mxu1 %v1426_v26 }
  0x51   :  { %708 = vmatmul.mubr.bf16.gmra.mrb[8].mxu0 %v1428_v27  ;;  %836 = vmatmul.mubr.bf16.gmra.mrb[8].mxu1 %v1429_v28 }
  0x52   :  { %715 = vmatprep.mubr.bf16.mxu0 %v1430_v29  ;;  %843 = vmatprep.mubr.bf16.mxu1 %v1432_v30 }
  0x59   :  { %716 = vmatmul.mubr.bf16.gmra.mrb[12].mxu0 %v1434_v31  ;;  %844 = vmatmul.mubr.bf16.gmra.mrb[12].mxu1 %v1435_v32 }
  0x5a   :  { %723 = vmatprep.mubr.bf16.mxu0 %v1436_v33  ;;  %851 = vmatprep.mubr.bf16.mxu1 %v1438_v34 }
  0x61   :  { %724 = vmatmul.mubr.bf16.gmra.mrb[16].mxu0 %v1440_v35  ;;  %852 = vmatmul.mubr.bf16.gmra.mrb[16].mxu1 %v1441_v36 }
  0x62   :  { %731 = vmatprep.mubr.bf16.mxu0 %v1442_v37  ;;  %859 = vmatprep.mubr.bf16.mxu1 %v1444_v38 }
  0x69   :  { %732 = vmatmul.mubr.bf16.gmra.mrb[20].mxu0 %v1446_v39  ;;  %860 = vmatmul.mubr.bf16.gmra.mrb[20].mxu1 %v1447_v40 }
  0x6a   :  { %739 = vmatprep.mubr.bf16.mxu0 %v1448_v41  ;;  %867 = vmatprep.mubr.bf16.mxu1 %v1450_v42 }
  0x71   :  { %740 = vmatmul.mubr.bf16.gmra.mrb[24].mxu0 %v1452_v43  ;;  %868 = vmatmul.mubr.bf16.gmra.mrb[24].mxu1 %v1453_v44 }
  0x72   :  { %747 = vmatprep.mubr.bf16.mxu0 %v1454_v45  ;;  %875 = vmatprep.mubr.bf16.mxu1 %v1456_v46 }
  0x79   :  { %748 = vmatmul.mubr.bf16.gmra.mrb[28].mxu0 %v1458_v47  ;;  %876 = vmatmul.mubr.bf16.gmra.mrb[28].mxu1 %v1459_v48 }
  0x7a   :  { %755 = vmatprep.mubr.bf16.mxu0 %v1460_v49  ;;  %883 = vmatprep.mubr.bf16.mxu1 %v1462_v50 }
  0x81   :  { %756 = vmatmul.mubr.bf16.gmra.mrb[32].mxu0 %v1464_v51  ;;  %884 = vmatmul.mubr.bf16.gmra.mrb[32].mxu1 %v1465_v52 }
  0x82   :  { %763 = vmatprep.mubr.bf16.mxu0 %v1466_v53  ;;  %891 = vmatprep.mubr.bf16.mxu1 %v1468_v54 }
  0x89   :  { %764 = vmatmul.mubr.bf16.gmra.mrb[36].mxu0 %v1470_v55  ;;  %892 = vmatmul.mubr.bf16.gmra.mrb[36].mxu1 %v1471_v56 }
  0x8a   :  { %771 = vmatprep.mubr.bf16.mxu0 %v1472_v57  ;;  %899 = vmatprep.mubr.bf16.mxu1 %v1474_v58 }
  0x91   :  { %772 = vmatmul.mubr.bf16.gmra.mrb[40].mxu0 %v1476_v59  ;;  %900 = vmatmul.mubr.bf16.gmra.mrb[40].mxu1 %v1477_v60 }
  0x92   :  { %779 = vmatprep.mubr.bf16.mxu0 %v1478_v61  ;;  %907 = vmatprep.mubr.bf16.mxu1 %v1480_v62 }
  0x99   :  { %780 = vmatmul.mubr.bf16.gmra.mrb[44].mxu0 %v1482_v63  ;;  %908 = vmatmul.mubr.bf16.gmra.mrb[44].mxu1 %v1483_v0 }
  0x9a   :  { %787 = vmatprep.mubr.bf16.mxu0 %v1484_v1  ;;  %915 = vmatprep.mubr.bf16.mxu1 %v1486_v2 }
  0xa1   :  { %788 = vmatmul.mubr.bf16.gmra.mrb[48].mxu0 %v1488_v3  ;;  %916 = vmatmul.mubr.bf16.gmra.mrb[48].mxu1 %v1489_v4 }
  0xa2   :  { %795 = vmatprep.mubr.bf16.mxu0 %v1490_v5  ;;  %923 = vmatprep.mubr.bf16.mxu1 %v1492_v6 }
  0xa9   :  { %796 = vmatmul.mubr.bf16.gmra.mrb[52].mxu0 %v1494_v7  ;;  %924 = vmatmul.mubr.bf16.gmra.mrb[52].mxu1 %v1495_v8 }
  0xaa   :  { %803 = vmatprep.mubr.bf16.mxu0 %v1496_v9  ;;  %931 = vmatprep.mubr.bf16.mxu1 %v1498_v10 }
  0xb1   :  { %804 = vmatmul.mubr.bf16.gmra.mrb[56].mxu0 %v1500_v11  ;;  %932 = vmatmul.mubr.bf16.gmra.mrb[56].mxu1 %v1501_v12 }
  0xb2   :  { %811 = vmatprep.mubr.bf16.mxu0 %v1502_v13  ;;  %939 = vmatprep.mubr.bf16.mxu1 %v1504_v14 }
  0xb9   :  { %812 = vmatmul.mubr.bf16.gmra.mrb[60].mxu0 %v1506_v15  ;;  %940 = vmatmul.mubr.bf16.gmra.mrb[60].mxu1 %v1507_v16 }
 0x114   :  { %v693_v18 = vpop.f32.mrb[0].mxu0  ;;  %v821_v19 = vpop.f32.mrb[0].mxu1 }
 0x115   :  { %v1150_v20 = vadd.f32 %v1804_v17, %v693_v18  ;;  %v1182_v21 = vadd.f32 %v1804_v17, %v821_v19  ;;  %v695_v22 = vpop.f32.mrb[1].mxu0  ;;  %v823_v23 = vpop.f32.mrb[1].mxu1 }
 0x116   :  { %v696_v24 = vpop.f32.mrb[2].mxu0  ;;  %v824_v25 = vpop.f32.mrb[2].mxu1 }
 0x117   :  { %1214 = vst [vmem:[%s2065_s3] sm:$0xff] %v1150_v20  ;;  %1246 = vst [vmem:[%s2065_s3 + $0x100] sm:$0xff] %v1182_v21  ;;  %v1151_v26 = vadd.f32 %v1804_v17, %v696_v24  ;;  %v1183_v27 = vadd.f32 %v1804_v17, %v824_v25  ;;  %v698_v28 = vpop.f32.mrb[3].mxu0  ;;  %v826_v29 = vpop.f32.mrb[3].mxu1 }
 0x119   :  { %1215 = vst [vmem:[%s2065_s3 + $0x8] sm:$0xff] %v1151_v26  ;;  %1247 = vst [vmem:[%s2065_s3 + $0x108] sm:$0xff] %v1183_v27 }
 0x11c   :  { %v701_v30 = vpop.f32.mrb[4].mxu0  ;;  %v829_v31 = vpop.f32.mrb[4].mxu1 }
 0x11d   :  { %v1152_v32 = vadd.f32 %v1804_v17, %v701_v30  ;;  %v1184_v33 = vadd.f32 %v1804_v17, %v829_v31  ;;  %v703_v34 = vpop.f32.mrb[5].mxu0  ;;  %v831_v35 = vpop.f32.mrb[5].mxu1 }
 0x11e   :  { %v704_v36 = vpop.f32.mrb[6].mxu0  ;;  %v832_v37 = vpop.f32.mrb[6].mxu1 }
 0x11f   :  { %1216 = vst [vmem:[%s2065_s3 + $0x10] sm:$0xff] %v1152_v32  ;;  %1248 = vst [vmem:[%s2065_s3 + $0x110] sm:$0xff] %v1184_v33  ;;  %v1153_v38 = vadd.f32 %v1804_v17, %v704_v36  ;;  %v1185_v39 = vadd.f32 %v1804_v17, %v832_v37  ;;  %v706_v40 = vpop.f32.mrb[7].mxu0  ;;  %v834_v41 = vpop.f32.mrb[7].mxu1 }
 0x121   :  { %1217 = vst [vmem:[%s2065_s3 + $0x18] sm:$0xff] %v1153_v38  ;;  %1249 = vst [vmem:[%s2065_s3 + $0x118] sm:$0xff] %v1185_v39 }
 0x124   :  { %v709_v42 = vpop.f32.mrb[8].mxu0  ;;  %v837_v43 = vpop.f32.mrb[8].mxu1 }
 0x125   :  { %v1154_v44 = vadd.f32 %v1804_v17, %v709_v42  ;;  %v1186_v45 = vadd.f32 %v1804_v17, %v837_v43  ;;  %v711_v46 = vpop.f32.mrb[9].mxu0  ;;  %v839_v47 = vpop.f32.mrb[9].mxu1 }
 0x126   :  { %v712_v48 = vpop.f32.mrb[10].mxu0  ;;  %v840_v49 = vpop.f32.mrb[10].mxu1 }
 0x127   :  { %1218 = vst [vmem:[%s2065_s3 + $0x20] sm:$0xff] %v1154_v44  ;;  %1250 = vst [vmem:[%s2065_s3 + $0x120] sm:$0xff] %v1186_v45  ;;  %v1155_v50 = vadd.f32 %v1804_v17, %v712_v48  ;;  %v1187_v51 = vadd.f32 %v1804_v17, %v840_v49  ;;  %v714_v52 = vpop.f32.mrb[11].mxu0  ;;  %v842_v53 = vpop.f32.mrb[11].mxu1 }
 0x129   :  { %1219 = vst [vmem:[%s2065_s3 + $0x28] sm:$0xff] %v1155_v50  ;;  %1251 = vst [vmem:[%s2065_s3 + $0x128] sm:$0xff] %v1187_v51 }
 0x12c   :  { %v717_v54 = vpop.f32.mrb[12].mxu0  ;;  %v845_v55 = vpop.f32.mrb[12].mxu1 }
 0x12d   :  { %v1156_v56 = vadd.f32 %v1804_v17, %v717_v54  ;;  %v1188_v57 = vadd.f32 %v1804_v17, %v845_v55  ;;  %v719_v58 = vpop.f32.mrb[13].mxu0  ;;  %v847_v59 = vpop.f32.mrb[13].mxu1 }
 0x12e   :  { %v720_v60 = vpop.f32.mrb[14].mxu0  ;;  %v848_v61 = vpop.f32.mrb[14].mxu1 }
 0x12f   :  { %1220 = vst [vmem:[%s2065_s3 + $0x30] sm:$0xff] %v1156_v56  ;;  %1252 = vst [vmem:[%s2065_s3 + $0x130] sm:$0xff] %v1188_v57  ;;  %v1157_v62 = vadd.f32 %v1804_v17, %v720_v60  ;;  %v1189_v63 = vadd.f32 %v1804_v17, %v848_v61  ;;  %v722_v0 = vpop.f32.mrb[15].mxu0  ;;  %v850_v1 = vpop.f32.mrb[15].mxu1 }
 0x131   :  { %1221 = vst [vmem:[%s2065_s3 + $0x38] sm:$0xff] %v1157_v62  ;;  %1253 = vst [vmem:[%s2065_s3 + $0x138] sm:$0xff] %v1189_v63 }
 0x134   :  { %v725_v2 = vpop.f32.mrb[16].mxu0  ;;  %v853_v3 = vpop.f32.mrb[16].mxu1 }
 0x135   :  { %v1158_v4 = vadd.f32 %v1804_v17, %v725_v2  ;;  %v1190_v5 = vadd.f32 %v1804_v17, %v853_v3  ;;  %v727_v6 = vpop.f32.mrb[17].mxu0  ;;  %v855_v7 = vpop.f32.mrb[17].mxu1 }
 0x136   :  { %v728_v8 = vpop.f32.mrb[18].mxu0  ;;  %v856_v9 = vpop.f32.mrb[18].mxu1 }
 0x137   :  { %1222 = vst [vmem:[%s2065_s3 + $0x40] sm:$0xff] %v1158_v4  ;;  %1254 = vst [vmem:[%s2065_s3 + $0x140] sm:$0xff] %v1190_v5  ;;  %v1159_v10 = vadd.f32 %v1804_v17, %v728_v8  ;;  %v1191_v11 = vadd.f32 %v1804_v17, %v856_v9  ;;  %v730_v12 = vpop.f32.mrb[19].mxu0  ;;  %v858_v13 = vpop.f32.mrb[19].mxu1 }
 0x139   :  { %1223 = vst [vmem:[%s2065_s3 + $0x48] sm:$0xff] %v1159_v10  ;;  %1255 = vst [vmem:[%s2065_s3 + $0x148] sm:$0xff] %v1191_v11 }
 0x13c   :  { %v733_v14 = vpop.f32.mrb[20].mxu0  ;;  %v861_v15 = vpop.f32.mrb[20].mxu1 }
 0x13d   :  { %v1160_v16 = vadd.f32 %v1804_v17, %v733_v14  ;;  %v1192_v18 = vadd.f32 %v1804_v17, %v861_v15  ;;  %v735_v19 = vpop.f32.mrb[21].mxu0  ;;  %v863_v20 = vpop.f32.mrb[21].mxu1 }
 0x13e   :  { %v736_v21 = vpop.f32.mrb[22].mxu0  ;;  %v864_v22 = vpop.f32.mrb[22].mxu1 }
 0x13f   :  { %1224 = vst [vmem:[%s2065_s3 + $0x50] sm:$0xff] %v1160_v16  ;;  %1256 = vst [vmem:[%s2065_s3 + $0x150] sm:$0xff] %v1192_v18  ;;  %v1161_v23 = vadd.f32 %v1804_v17, %v736_v21  ;;  %v1193_v24 = vadd.f32 %v1804_v17, %v864_v22  ;;  %v738_v25 = vpop.f32.mrb[23].mxu0  ;;  %v866_v26 = vpop.f32.mrb[23].mxu1 }
 0x141   :  { %1225 = vst [vmem:[%s2065_s3 + $0x58] sm:$0xff] %v1161_v23  ;;  %1257 = vst [vmem:[%s2065_s3 + $0x158] sm:$0xff] %v1193_v24 }
 0x144   :  { %v741_v27 = vpop.f32.mrb[24].mxu0  ;;  %v869_v28 = vpop.f32.mrb[24].mxu1 }
 0x145   :  { %v1162_v29 = vadd.f32 %v1804_v17, %v741_v27  ;;  %v1194_v30 = vadd.f32 %v1804_v17, %v869_v28  ;;  %v743_v31 = vpop.f32.mrb[25].mxu0  ;;  %v871_v32 = vpop.f32.mrb[25].mxu1 }
 0x146   :  { %v744_v33 = vpop.f32.mrb[26].mxu0  ;;  %v872_v34 = vpop.f32.mrb[26].mxu1 }
 0x147   :  { %1226 = vst [vmem:[%s2065_s3 + $0x60] sm:$0xff] %v1162_v29  ;;  %1258 = vst [vmem:[%s2065_s3 + $0x160] sm:$0xff] %v1194_v30  ;;  %v1163_v35 = vadd.f32 %v1804_v17, %v744_v33  ;;  %v1195_v36 = vadd.f32 %v1804_v17, %v872_v34  ;;  %v746_v37 = vpop.f32.mrb[27].mxu0  ;;  %v874_v38 = vpop.f32.mrb[27].mxu1 }
 0x149   :  { %1227 = vst [vmem:[%s2065_s3 + $0x68] sm:$0xff] %v1163_v35  ;;  %1259 = vst [vmem:[%s2065_s3 + $0x168] sm:$0xff] %v1195_v36 }
 0x14c   :  { %v749_v39 = vpop.f32.mrb[28].mxu0  ;;  %v877_v40 = vpop.f32.mrb[28].mxu1 }
 0x14d   :  { %v1164_v41 = vadd.f32 %v1804_v17, %v749_v39  ;;  %v1196_v42 = vadd.f32 %v1804_v17, %v877_v40  ;;  %v751_v43 = vpop.f32.mrb[29].mxu0  ;;  %v879_v44 = vpop.f32.mrb[29].mxu1 }
 0x14e   :  { %v752_v45 = vpop.f32.mrb[30].mxu0  ;;  %v880_v46 = vpop.f32.mrb[30].mxu1 }
 0x14f   :  { %1228 = vst [vmem:[%s2065_s3 + $0x70] sm:$0xff] %v1164_v41  ;;  %1260 = vst [vmem:[%s2065_s3 + $0x170] sm:$0xff] %v1196_v42  ;;  %v1165_v47 = vadd.f32 %v1804_v17, %v752_v45  ;;  %v1197_v48 = vadd.f32 %v1804_v17, %v880_v46  ;;  %v754_v49 = vpop.f32.mrb[31].mxu0  ;;  %v882_v50 = vpop.f32.mrb[31].mxu1 }
 0x151   :  { %1229 = vst [vmem:[%s2065_s3 + $0x78] sm:$0xff] %v1165_v47  ;;  %1261 = vst [vmem:[%s2065_s3 + $0x178] sm:$0xff] %v1197_v48 }
 0x154   :  { %v757_v51 = vpop.f32.mrb[32].mxu0  ;;  %v885_v52 = vpop.f32.mrb[32].mxu1 }
 0x155   :  { %v1166_v53 = vadd.f32 %v1804_v17, %v757_v51  ;;  %v1198_v54 = vadd.f32 %v1804_v17, %v885_v52  ;;  %v759_v55 = vpop.f32.mrb[33].mxu0  ;;  %v887_v56 = vpop.f32.mrb[33].mxu1 }
 0x156   :  { %v760_v57 = vpop.f32.mrb[34].mxu0  ;;  %v888_v58 = vpop.f32.mrb[34].mxu1 }
 0x157   :  { %1230 = vst [vmem:[%s2065_s3 + $0x80] sm:$0xff] %v1166_v53  ;;  %1262 = vst [vmem:[%s2065_s3 + $0x180] sm:$0xff] %v1198_v54  ;;  %v1167_v59 = vadd.f32 %v1804_v17, %v760_v57  ;;  %v1199_v60 = vadd.f32 %v1804_v17, %v888_v58  ;;  %v762_v61 = vpop.f32.mrb[35].mxu0  ;;  %v890_v62 = vpop.f32.mrb[35].mxu1 }
 0x159   :  { %1231 = vst [vmem:[%s2065_s3 + $0x88] sm:$0xff] %v1167_v59  ;;  %1263 = vst [vmem:[%s2065_s3 + $0x188] sm:$0xff] %v1199_v60 }
 0x15c   :  { %v765_v63 = vpop.f32.mrb[36].mxu0  ;;  %v893_v0 = vpop.f32.mrb[36].mxu1 }
 0x15d   :  { %v1168_v1 = vadd.f32 %v1804_v17, %v765_v63  ;;  %v1200_v2 = vadd.f32 %v1804_v17, %v893_v0  ;;  %v767_v3 = vpop.f32.mrb[37].mxu0  ;;  %v895_v4 = vpop.f32.mrb[37].mxu1 }
 0x15e   :  { %v768_v5 = vpop.f32.mrb[38].mxu0  ;;  %v896_v6 = vpop.f32.mrb[38].mxu1 }
 0x15f   :  { %1232 = vst [vmem:[%s2065_s3 + $0x90] sm:$0xff] %v1168_v1  ;;  %1264 = vst [vmem:[%s2065_s3 + $0x190] sm:$0xff] %v1200_v2  ;;  %v1169_v7 = vadd.f32 %v1804_v17, %v768_v5  ;;  %v1201_v8 = vadd.f32 %v1804_v17, %v896_v6  ;;  %v770_v9 = vpop.f32.mrb[39].mxu0  ;;  %v898_v10 = vpop.f32.mrb[39].mxu1 }
 0x161   :  { %1233 = vst [vmem:[%s2065_s3 + $0x98] sm:$0xff] %v1169_v7  ;;  %1265 = vst [vmem:[%s2065_s3 + $0x198] sm:$0xff] %v1201_v8 }
 0x164   :  { %v773_v11 = vpop.f32.mrb[40].mxu0  ;;  %v901_v12 = vpop.f32.mrb[40].mxu1 }
 0x165   :  { %v1170_v13 = vadd.f32 %v1804_v17, %v773_v11  ;;  %v1202_v14 = vadd.f32 %v1804_v17, %v901_v12  ;;  %v775_v15 = vpop.f32.mrb[41].mxu0  ;;  %v903_v16 = vpop.f32.mrb[41].mxu1 }
 0x166   :  { %v776_v18 = vpop.f32.mrb[42].mxu0  ;;  %v904_v19 = vpop.f32.mrb[42].mxu1 }
 0x167   :  { %1234 = vst [vmem:[%s2065_s3 + $0xa0] sm:$0xff] %v1170_v13  ;;  %1266 = vst [vmem:[%s2065_s3 + $0x1a0] sm:$0xff] %v1202_v14  ;;  %v1171_v20 = vadd.f32 %v1804_v17, %v776_v18  ;;  %v1203_v21 = vadd.f32 %v1804_v17, %v904_v19  ;;  %v778_v22 = vpop.f32.mrb[43].mxu0  ;;  %v906_v23 = vpop.f32.mrb[43].mxu1 }
 0x169   :  { %1235 = vst [vmem:[%s2065_s3 + $0xa8] sm:$0xff] %v1171_v20  ;;  %1267 = vst [vmem:[%s2065_s3 + $0x1a8] sm:$0xff] %v1203_v21 }
 0x16c   :  { %v781_v24 = vpop.f32.mrb[44].mxu0  ;;  %v909_v25 = vpop.f32.mrb[44].mxu1 }
 0x16d   :  { %v1172_v26 = vadd.f32 %v1804_v17, %v781_v24  ;;  %v1204_v27 = vadd.f32 %v1804_v17, %v909_v25  ;;  %v783_v28 = vpop.f32.mrb[45].mxu0  ;;  %v911_v29 = vpop.f32.mrb[45].mxu1 }
 0x16e   :  { %v784_v30 = vpop.f32.mrb[46].mxu0  ;;  %v912_v31 = vpop.f32.mrb[46].mxu1 }
 0x16f   :  { %1236 = vst [vmem:[%s2065_s3 + $0xb0] sm:$0xff] %v1172_v26  ;;  %1268 = vst [vmem:[%s2065_s3 + $0x1b0] sm:$0xff] %v1204_v27  ;;  %v1173_v32 = vadd.f32 %v1804_v17, %v784_v30  ;;  %v1205_v33 = vadd.f32 %v1804_v17, %v912_v31  ;;  %v786_v34 = vpop.f32.mrb[47].mxu0  ;;  %v914_v35 = vpop.f32.mrb[47].mxu1 }
 0x171   :  { %1237 = vst [vmem:[%s2065_s3 + $0xb8] sm:$0xff] %v1173_v32  ;;  %1269 = vst [vmem:[%s2065_s3 + $0x1b8] sm:$0xff] %v1205_v33 }
 0x174   :  { %v789_v36 = vpop.f32.mrb[48].mxu0  ;;  %v917_v37 = vpop.f32.mrb[48].mxu1 }
 0x175   :  { %v1174_v38 = vadd.f32 %v1804_v17, %v789_v36  ;;  %v1206_v39 = vadd.f32 %v1804_v17, %v917_v37  ;;  %v791_v40 = vpop.f32.mrb[49].mxu0  ;;  %v919_v41 = vpop.f32.mrb[49].mxu1 }
 0x176   :  { %v792_v42 = vpop.f32.mrb[50].mxu0  ;;  %v920_v43 = vpop.f32.mrb[50].mxu1 }
 0x177   :  { %1238 = vst [vmem:[%s2065_s3 + $0xc0] sm:$0xff] %v1174_v38  ;;  %1270 = vst [vmem:[%s2065_s3 + $0x1c0] sm:$0xff] %v1206_v39  ;;  %v1175_v44 = vadd.f32 %v1804_v17, %v792_v42  ;;  %v1207_v45 = vadd.f32 %v1804_v17, %v920_v43  ;;  %v794_v46 = vpop.f32.mrb[51].mxu0  ;;  %v922_v47 = vpop.f32.mrb[51].mxu1 }
 0x179   :  { %1239 = vst [vmem:[%s2065_s3 + $0xc8] sm:$0xff] %v1175_v44  ;;  %1271 = vst [vmem:[%s2065_s3 + $0x1c8] sm:$0xff] %v1207_v45 }
 0x17c   :  { %v797_v48 = vpop.f32.mrb[52].mxu0  ;;  %v925_v49 = vpop.f32.mrb[52].mxu1 }
 0x17d   :  { %v1176_v50 = vadd.f32 %v1804_v17, %v797_v48  ;;  %v1208_v51 = vadd.f32 %v1804_v17, %v925_v49  ;;  %v799_v52 = vpop.f32.mrb[53].mxu0  ;;  %v927_v53 = vpop.f32.mrb[53].mxu1 }
 0x17e   :  { %v800_v54 = vpop.f32.mrb[54].mxu0  ;;  %v928_v55 = vpop.f32.mrb[54].mxu1 }
 0x17f   :  { %1240 = vst [vmem:[%s2065_s3 + $0xd0] sm:$0xff] %v1176_v50  ;;  %1272 = vst [vmem:[%s2065_s3 + $0x1d0] sm:$0xff] %v1208_v51  ;;  %v1177_v56 = vadd.f32 %v1804_v17, %v800_v54  ;;  %v1209_v57 = vadd.f32 %v1804_v17, %v928_v55  ;;  %v802_v58 = vpop.f32.mrb[55].mxu0  ;;  %v930_v59 = vpop.f32.mrb[55].mxu1 }
 0x181   :  { %1241 = vst [vmem:[%s2065_s3 + $0xd8] sm:$0xff] %v1177_v56  ;;  %1273 = vst [vmem:[%s2065_s3 + $0x1d8] sm:$0xff] %v1209_v57 }
 0x184   :  { %v805_v60 = vpop.f32.mrb[56].mxu0  ;;  %v933_v61 = vpop.f32.mrb[56].mxu1 }
 0x185   :  { %v1178_v62 = vadd.f32 %v1804_v17, %v805_v60  ;;  %v1210_v63 = vadd.f32 %v1804_v17, %v933_v61  ;;  %v807_v0 = vpop.f32.mrb[57].mxu0  ;;  %v935_v1 = vpop.f32.mrb[57].mxu1 }
 0x186   :  { %v808_v2 = vpop.f32.mrb[58].mxu0  ;;  %v936_v3 = vpop.f32.mrb[58].mxu1 }
 0x187   :  { %1242 = vst [vmem:[%s2065_s3 + $0xe0] sm:$0xff] %v1178_v62  ;;  %1274 = vst [vmem:[%s2065_s3 + $0x1e0] sm:$0xff] %v1210_v63  ;;  %v1179_v4 = vadd.f32 %v1804_v17, %v808_v2  ;;  %v1211_v5 = vadd.f32 %v1804_v17, %v936_v3  ;;  %v810_v6 = vpop.f32.mrb[59].mxu0  ;;  %v938_v7 = vpop.f32.mrb[59].mxu1 }
 0x189   :  { %1243 = vst [vmem:[%s2065_s3 + $0xe8] sm:$0xff] %v1179_v4  ;;  %1275 = vst [vmem:[%s2065_s3 + $0x1e8] sm:$0xff] %v1211_v5 }
 0x18c   :  { %v813_v8 = vpop.f32.mrb[60].mxu0  ;;  %v941_v9 = vpop.f32.mrb[60].mxu1 }
 0x18d   :  { %v1180_v10 = vadd.f32 %v1804_v17, %v813_v8  ;;  %v1212_v11 = vadd.f32 %v1804_v17, %v941_v9  ;;  %v815_v12 = vpop.f32.mrb[61].mxu0  ;;  %v943_v13 = vpop.f32.mrb[61].mxu1 }
 0x18e   :  { %v816_v14 = vpop.f32.mrb[62].mxu0  ;;  %v944_v15 = vpop.f32.mrb[62].mxu1 }
 0x18f   :  { %1244 = vst [vmem:[%s2065_s3 + $0xf0] sm:$0xff] %v1180_v10  ;;  %1276 = vst [vmem:[%s2065_s3 + $0x1f0] sm:$0xff] %v1212_v11  ;;  %v1181_v16 = vadd.f32 %v1804_v17, %v816_v14  ;;  %v1213_v18 = vadd.f32 %v1804_v17, %v944_v15  ;;  %v818_v19 = vpop.f32.mrb[63].mxu0  ;;  %v946_v20 = vpop.f32.mrb[63].mxu1 }
 0x191   :  { %1245 = vst [vmem:[%s2065_s3 + $0xf8] sm:$0xff] %v1181_v16  ;;  %1277 = vst [vmem:[%s2065_s3 + $0x1f8] sm:$0xff] %v1213_v18 }

// kernel: generator_forward.73
= control target key start
LH: loop header
LB: loop body
LE: loop exit
PB: predicated region body
PF: predicated region fallthrough
CT: control target
= control target key end

     0   :  { %s1722_s1 = inlined_call_operand.vmem [shape: bf16[640,128], index: 1, kind: input, shape index: {}]   ;;  %s1723_s0 = inlined_call_operand.vmem [shape: bf16[128,640], index: 0, kind: input, shape index: {}]   ;;  %s1724_s2 = inlined_call_operand.vmem [shape: f32[1,128], index: 2, kind: input, shape index: {}]   ;;  %s1725_s3 = inlined_call_operand.vmem [shape: f32[128,128], index: 3, kind: output, shape index: {}]  }
   0x1   :  { %v1285_v0 = vld [vmem:[%s1722_s1 + $0x40] sm:$0xff]   ;;  %v1289_v4 = vld [vmem:[%s1722_s1 + $0x48] sm:$0xff]   ;;  %v1293_v8 = vld [vmem:[%s1722_s1 + $0x50] sm:$0xff]  }
   0x2   :  { %v1286_v1 = vld [vmem:[%s1722_s1 + $0xc0] sm:$0xff]   ;;  %1093 = vmatprep.subr.bf16.mxu0 %v1285_v0  ;;  %v1290_v5 = vld [vmem:[%s1722_s1 + $0xc8] sm:$0xff]   ;;  %v1294_v9 = vld [vmem:[%s1722_s1 + $0xd0] sm:$0xff]  }
   0x3   :  { %v1287_v2 = vld [vmem:[%s1722_s1] sm:$0xff]   ;;  %1157 = vmatprep.subr.bf16.mxu1 %v1286_v1  ;;  %v1291_v6 = vld [vmem:[%s1722_s1 + $0x8] sm:$0xff]   ;;  %v1295_v10 = vld [vmem:[%s1722_s1 + $0x10] sm:$0xff]  }
   0x4   :  { %v1288_v3 = vld [vmem:[%s1722_s1 + $0x80] sm:$0xff]   ;;  %1094 = vmatpush3.bf16.msra.mxu0 %v1287_v2  ;;  %v1292_v7 = vld [vmem:[%s1722_s1 + $0x88] sm:$0xff]   ;;  %v1296_v11 = vld [vmem:[%s1722_s1 + $0x90] sm:$0xff]  }
   0x5   :  { %1158 = vmatpush3.bf16.msra.mxu1 %v1288_v3  ;;  %1095 = vmatprep.subr.bf16.mxu0 %v1289_v4  ;;  %v1297_v12 = vld [vmem:[%s1722_s1 + $0x58] sm:$0xff]   ;;  %v1301_v16 = vld [vmem:[%s1722_s1 + $0x60] sm:$0xff]   ;;  %v1305_v20 = vld [vmem:[%s1722_s1 + $0x68] sm:$0xff]  }
   0x6   :  { %1159 = vmatprep.subr.bf16.mxu1 %v1290_v5  ;;  %v1298_v13 = vld [vmem:[%s1722_s1 + $0xd8] sm:$0xff]   ;;  %v1302_v17 = vld [vmem:[%s1722_s1 + $0xe0] sm:$0xff]   ;;  %v1306_v21 = vld [vmem:[%s1722_s1 + $0xe8] sm:$0xff]  }
   0x7   :  { %v1299_v14 = vld [vmem:[%s1722_s1 + $0x18] sm:$0xff]   ;;  %v1303_v18 = vld [vmem:[%s1722_s1 + $0x20] sm:$0xff]   ;;  %v1307_v22 = vld [vmem:[%s1722_s1 + $0x28] sm:$0xff]  }
   0x8   :  { %1096 = vmatpush3.bf16.msra.mxu0 %v1291_v6  ;;  %v1300_v15 = vld [vmem:[%s1722_s1 + $0x98] sm:$0xff]   ;;  %v1304_v19 = vld [vmem:[%s1722_s1 + $0xa0] sm:$0xff]   ;;  %v1308_v23 = vld [vmem:[%s1722_s1 + $0xa8] sm:$0xff]  }
   0x9   :  { %1160 = vmatpush3.bf16.msra.mxu1 %v1292_v7  ;;  %1097 = vmatprep.subr.bf16.mxu0 %v1293_v8  ;;  %v1309_v24 = vld [vmem:[%s1722_s1 + $0x70] sm:$0xff]   ;;  %v1313_v28 = vld [vmem:[%s1722_s1 + $0x78] sm:$0xff]   ;;  %v1322_v35 = vld [vmem:[%s1723_s0 + $0xc] ss:$20 sps:$4 sm:$0xff]  }
   0xa   :  { %1161 = vmatprep.subr.bf16.mxu1 %v1294_v9  ;;  %v1310_v25 = vld [vmem:[%s1722_s1 + $0xf0] sm:$0xff]   ;;  %v1314_v29 = vld [vmem:[%s1722_s1 + $0xf8] sm:$0xff]   ;;  %v1323_v36 = vld [vmem:[%s1722_s1 + $0x100] sm:$0xff]   ;;  %756 = vmatprep.mubr.bf16.mxu1 %v1322_v35 }
   0xb   :  { %v1311_v26 = vld [vmem:[%s1722_s1 + $0x30] sm:$0xff]   ;;  %v1315_v30 = vld [vmem:[%s1722_s1 + $0x38] sm:$0xff]   ;;  %v1324_v37 = vld [vmem:[%s1723_s0 + $0x2c] ss:$20 sps:$4 sm:$0xff]  }
   0xc   :  { %1098 = vmatpush3.bf16.msra.mxu0 %v1295_v10  ;;  %v1312_v27 = vld [vmem:[%s1722_s1 + $0xb0] sm:$0xff]   ;;  %v1316_v31 = vld [vmem:[%s1722_s1 + $0xb8] sm:$0xff]   ;;  %v1330_v39 = vld [vmem:[%s1722_s1 + $0x108] sm:$0xff]  }
   0xd   :  { %1162 = vmatpush3.bf16.msra.mxu1 %v1296_v11  ;;  %1099 = vmatprep.subr.bf16.mxu0 %v1297_v12  ;;  %v1317_v32 = vld [vmem:[%s1723_s0] ss:$20 sps:$4 sm:$0xff]   ;;  %v1319_v33 = vld [vmem:[%s1723_s0 + $0x4] ss:$20 sps:$4 sm:$0xff]   ;;  %v1320_v34 = vld [vmem:[%s1723_s0 + $0x8] ss:$20 sps:$4 sm:$0xff]  }
   0xe   :  { %1163 = vmatprep.subr.bf16.mxu1 %v1298_v13  ;;  %659 = vmatprep.mubr.bf16.mxu0 %v1319_v33  ;;  %v1326_v38 = vld [vmem:[%s1723_s0 + $0x34] ss:$20 sps:$4 sm:$0xff]   ;;  %v1329_v41 = vld [vmem:[%s1723_s0 + $0x30] ss:$20 sps:$4 sm:$0xff]   ;;  %v1344_v45 = vld [vmem:[%s1722_s1 + $0x118] sm:$0xff]  }
   0xf   :  { %v1328_v40 = vld [vmem:[%s1723_s0 + $0x28] ss:$20 sps:$4 sm:$0xff]   ;;  %v1337_v44 = vld [vmem:[%s1722_s1 + $0x110] sm:$0xff]   ;;  %v1336_v47 = vld [vmem:[%s1723_s0 + $0x58] ss:$20 sps:$4 sm:$0xff]  }
  0x10   :  { %1100 = vmatpush3.bf16.msra.mxu0 %v1299_v14  ;;  %v1331_v42 = vld [vmem:[%s1723_s0 + $0x54] ss:$20 sps:$4 sm:$0xff]   ;;  %v1333_v43 = vld [vmem:[%s1723_s0 + $0x5c] ss:$20 sps:$4 sm:$0xff]   ;;  %v1340_v49 = vld [vmem:[%s1723_s0 + $0x84] ss:$20 sps:$4 sm:$0xff]  }
  0x11   :  { %1164 = vmatpush3.bf16.msra.mxu1 %v1300_v15  ;;  %1101 = vmatprep.subr.bf16.mxu0 %v1301_v16  ;;  %v1335_v46 = vld [vmem:[%s1723_s0 + $0x50] ss:$20 sps:$4 sm:$0xff]   ;;  %v1358_v51 = vld [vmem:[%s1722_s1 + $0x128] sm:$0xff]   ;;  %v1343_v53 = vld [vmem:[%s1723_s0 + $0x80] ss:$20 sps:$4 sm:$0xff]  }
  0x12   :  { %1165 = vmatprep.subr.bf16.mxu1 %v1302_v17  ;;  %v1338_v48 = vld [vmem:[%s1723_s0 + $0x7c] ss:$20 sps:$4 sm:$0xff]   ;;  %v1351_v50 = vld [vmem:[%s1722_s1 + $0x120] sm:$0xff]   ;;  %v1342_v52 = vld [vmem:[%s1723_s0 + $0x78] ss:$20 sps:$4 sm:$0xff]  }
  0x13   :  { %v1345_v54 = vld [vmem:[%s1723_s0 + $0xa4] ss:$20 sps:$4 sm:$0xff]   ;;  %v1365_v55 = vld [vmem:[%s1722_s1 + $0x130] sm:$0xff]   ;;  %v1347_v56 = vld [vmem:[%s1723_s0 + $0xac] ss:$20 sps:$4 sm:$0xff]  }
  0x14   :  { %1102 = vmatpush3.bf16.msra.mxu0 %v1303_v18  ;;  %v1372_v57 = vld [vmem:[%s1722_s1 + $0x138] sm:$0xff]   ;;  %v1349_v58 = vld [vmem:[%s1723_s0 + $0xa0] ss:$20 sps:$4 sm:$0xff]   ;;  %v1357_v63 = vld [vmem:[%s1723_s0 + $0xd0] ss:$20 sps:$4 sm:$0xff]  }
  0x15   :  { %1166 = vmatpush3.bf16.msra.mxu1 %v1304_v19  ;;  %1103 = vmatprep.subr.bf16.mxu0 %v1305_v20  ;;  %v1350_v59 = vld [vmem:[%s1723_s0 + $0xa8] ss:$20 sps:$4 sm:$0xff]   ;;  %v1352_v60 = vld [vmem:[%s1723_s0 + $0xcc] ss:$20 sps:$4 sm:$0xff]   ;;  %v1363_v2 = vld [vmem:[%s1723_s0 + $0xf0] ss:$20 sps:$4 sm:$0xff]  }
  0x16   :  { %1167 = vmatprep.subr.bf16.mxu1 %v1306_v21  ;;  %v1354_v61 = vld [vmem:[%s1723_s0 + $0xd4] ss:$20 sps:$4 sm:$0xff]   ;;  %v1361_v1 = vld [vmem:[%s1723_s0 + $0xfc] ss:$20 sps:$4 sm:$0xff]   ;;  %v1364_v3 = vld [vmem:[%s1723_s0 + $0xf8] ss:$20 sps:$4 sm:$0xff]  }
  0x17   :  { %v1356_v62 = vld [vmem:[%s1723_s0 + $0xc8] ss:$20 sps:$4 sm:$0xff]   ;;  %v1368_v5 = vld [vmem:[%s1723_s0 + $0x124] ss:$20 sps:$4 sm:$0xff]   ;;  %v1371_v7 = vld [vmem:[%s1723_s0 + $0x120] ss:$20 sps:$4 sm:$0xff]  }
  0x18   :  { %1104 = vmatpush3.bf16.msra.mxu0 %v1307_v22  ;;  %v1359_v0 = vld [vmem:[%s1723_s0 + $0xf4] ss:$20 sps:$4 sm:$0xff]   ;;  %v1366_v4 = vld [vmem:[%s1723_s0 + $0x11c] ss:$20 sps:$4 sm:$0xff]   ;;  %v1370_v6 = vld [vmem:[%s1723_s0 + $0x118] ss:$20 sps:$4 sm:$0xff]  }
  0x19   :  { %1168 = vmatpush3.bf16.msra.mxu1 %v1308_v23  ;;  %1105 = vmatprep.subr.bf16.mxu0 %v1309_v24  ;;  %v1373_v8 = vld [vmem:[%s1723_s0 + $0x10] ss:$20 sps:$4 sm:$0xff]   ;;  %v1375_v10 = vld [vmem:[%s1723_s0 + $0x38] ss:$20 sps:$4 sm:$0xff]   ;;  %v1377_v12 = vld [vmem:[%s1723_s0 + $0x60] ss:$20 sps:$4 sm:$0xff]  }
  0x1a   :  { %1169 = vmatprep.subr.bf16.mxu1 %v1310_v25  ;;  %v1374_v9 = vld [vmem:[%s1723_s0 + $0xb0] ss:$20 sps:$4 sm:$0xff]   ;;  %v1376_v11 = vld [vmem:[%s1723_s0 + $0xd8] ss:$20 sps:$4 sm:$0xff]   ;;  %v1378_v13 = vld [vmem:[%s1723_s0 + $0x100] ss:$20 sps:$4 sm:$0xff]  }
  0x1b   :  { %v1379_v14 = vld [vmem:[%s1723_s0 + $0x88] ss:$20 sps:$4 sm:$0xff]  }
  0x1c   :  { %1106 = vmatpush3.bf16.msra.mxu0 %v1311_v26  ;;  %v1380_v15 = vld [vmem:[%s1723_s0 + $0x128] ss:$20 sps:$4 sm:$0xff]  }
  0x1d   :  { %1170 = vmatpush3.bf16.msra.mxu1 %v1312_v27  ;;  %1107 = vmatprep.subr.bf16.mxu0 %v1313_v28 }
  0x1e   :  { %1171 = vmatprep.subr.bf16.mxu1 %v1314_v29 }
  0x20   :  { %1108 = vmatpush3.bf16.msra.mxu0 %v1315_v30 }
  0x21   :  { %1172 = vmatpush3.bf16.msra.mxu1 %v1316_v31  ;;  %1237 = vmatprep.subr.bf16.mxu0 %v1323_v36 }
  0x22   :  { %1269 = vmatprep.subr.bf16.mxu1 %v1323_v36 }
  0x23   :  { %660 = vmatmul.mubr.bf16.vlgmr.msra.gmra.mrb[0].mxu0 %v1317_v32 }
  0x24   :  { %757 = vmatmul.mubr.bf16.vlgmr.msra.gmra.mrb[0].mxu1 %v1320_v34  ;;  %1238 = vmatpush3.bf16.msra.mxu0 %v1323_v36 }
  0x25   :  { %1277 = vmatpush3.bf16.msra.mxu1 %v1323_v36  ;;  %667 = vmatprep.mubr.bf16.mxu0 %v1324_v37 }
  0x26   :  { %764 = vmatprep.mubr.bf16.mxu1 %v1326_v38  ;;  %1239 = vmatprep.subr.bf16.mxu0 %v1330_v39 }
  0x27   :  { %1270 = vmatprep.subr.bf16.mxu1 %v1330_v39 }
  0x28   :  { %1240 = vmatpush3.bf16.msra.mxu0 %v1330_v39 }
  0x29   :  { %1278 = vmatpush3.bf16.msra.mxu1 %v1330_v39  ;;  %1241 = vmatprep.subr.bf16.mxu0 %v1337_v44 }
  0x2a   :  { %1271 = vmatprep.subr.bf16.mxu1 %v1337_v44 }
  0x2b   :  { %668 = vmatmul.mubr.bf16.gmra.mrb[4].mxu0 %v1328_v40 }
  0x2c   :  { %765 = vmatmul.mubr.bf16.gmra.mrb[4].mxu1 %v1329_v41  ;;  %675 = vmatprep.mubr.bf16.mxu0 %v1331_v42 }
  0x2d   :  { %772 = vmatprep.mubr.bf16.mxu1 %v1333_v43  ;;  %1242 = vmatpush3.bf16.msra.mxu0 %v1337_v44 }
  0x2e   :  { %1279 = vmatpush3.bf16.msra.mxu1 %v1337_v44  ;;  %1243 = vmatprep.subr.bf16.mxu0 %v1344_v45 }
  0x2f   :  { %1272 = vmatprep.subr.bf16.mxu1 %v1344_v45 }
  0x31   :  { %1244 = vmatpush3.bf16.msra.mxu0 %v1344_v45 }
  0x32   :  { %1280 = vmatpush3.bf16.msra.mxu1 %v1344_v45  ;;  %1245 = vmatprep.subr.bf16.mxu0 %v1351_v50 }
  0x33   :  { %676 = vmatmul.mubr.bf16.gmra.mrb[8].mxu0 %v1335_v46  ;;  %1273 = vmatprep.subr.bf16.mxu1 %v1351_v50 }
  0x34   :  { %773 = vmatmul.mubr.bf16.gmra.mrb[8].mxu1 %v1336_v47  ;;  %683 = vmatprep.mubr.bf16.mxu0 %v1338_v48 }
  0x35   :  { %780 = vmatprep.mubr.bf16.mxu1 %v1340_v49  ;;  %1246 = vmatpush3.bf16.msra.mxu0 %v1351_v50 }
  0x36   :  { %1281 = vmatpush3.bf16.msra.mxu1 %v1351_v50  ;;  %1247 = vmatprep.subr.bf16.mxu0 %v1358_v51 }
  0x37   :  { %1274 = vmatprep.subr.bf16.mxu1 %v1358_v51 }
  0x39   :  { %1248 = vmatpush3.bf16.msra.mxu0 %v1358_v51 }
  0x3a   :  { %1282 = vmatpush3.bf16.msra.mxu1 %v1358_v51  ;;  %1249 = vmatprep.subr.bf16.mxu0 %v1365_v55 }
  0x3b   :  { %684 = vmatmul.mubr.bf16.gmra.mrb[12].mxu0 %v1342_v52  ;;  %1275 = vmatprep.subr.bf16.mxu1 %v1365_v55 }
  0x3c   :  { %781 = vmatmul.mubr.bf16.gmra.mrb[12].mxu1 %v1343_v53  ;;  %691 = vmatprep.mubr.bf16.mxu0 %v1345_v54 }
  0x3d   :  { %788 = vmatprep.mubr.bf16.mxu1 %v1347_v56  ;;  %1250 = vmatpush3.bf16.msra.mxu0 %v1365_v55 }
  0x3e   :  { %1283 = vmatpush3.bf16.msra.mxu1 %v1365_v55  ;;  %1251 = vmatprep.subr.bf16.mxu0 %v1372_v57 }
  0x3f   :  { %1276 = vmatprep.subr.bf16.mxu1 %v1372_v57 }
  0x41   :  { %1252 = vmatpush3.bf16.msra.mxu0 %v1372_v57 }
  0x42   :  { %1284 = vmatpush3.bf16.msra.mxu1 %v1372_v57 }
  0x43   :  { %692 = vmatmul.mubr.bf16.gmra.mrb[16].mxu0 %v1349_v58 }
  0x44   :  { %789 = vmatmul.mubr.bf16.gmra.mrb[16].mxu1 %v1350_v59  ;;  %699 = vmatprep.mubr.bf16.mxu0 %v1352_v60 }
  0x45   :  { %796 = vmatprep.mubr.bf16.mxu1 %v1354_v61 }
  0x4b   :  { %700 = vmatmul.mubr.bf16.gmra.mrb[20].mxu0 %v1356_v62 }
  0x4c   :  { %797 = vmatmul.mubr.bf16.gmra.mrb[20].mxu1 %v1357_v63  ;;  %707 = vmatprep.mubr.bf16.mxu0 %v1359_v0 }
  0x4d   :  { %804 = vmatprep.mubr.bf16.mxu1 %v1361_v1 }
  0x53   :  { %708 = vmatmul.mubr.bf16.gmra.mrb[24].mxu0 %v1363_v2 }
  0x54   :  { %805 = vmatmul.mubr.bf16.gmra.mrb[24].mxu1 %v1364_v3  ;;  %715 = vmatprep.mubr.bf16.mxu0 %v1366_v4 }
  0x55   :  { %812 = vmatprep.mubr.bf16.mxu1 %v1368_v5 }
  0x5b   :  { %716 = vmatmul.mubr.bf16.gmra.mrb[28].mxu0 %v1370_v6 }
  0x5c   :  { %813 = vmatmul.mubr.bf16.gmra.mrb[28].mxu1 %v1371_v7  ;;  %1253 = vmatprep.mubr.bf16.mxu0 %v1373_v8 }
  0x5d   :  { %1261 = vmatprep.mubr.bf16.mxu1 %v1374_v9 }
  0x63   :  { %1254 = vmatmul.mubr.bf16.vlgmr.msra.gmra.mrb[32].mxu0 %v1375_v10 }
  0x64   :  { %1262 = vmatmul.mubr.bf16.vlgmr.msra.gmra.mrb[32].mxu1 %v1376_v11  ;;  %1257 = vmatprep.mubr.bf16.mxu0 %v1377_v12 }
  0x65   :  { %1265 = vmatprep.mubr.bf16.mxu1 %v1378_v13 }
  0x6b   :  { %1258 = vmatmul.mubr.bf16.gmra.mrb[36].mxu0 %v1379_v14 }
  0x6c   :  { %1266 = vmatmul.mubr.bf16.gmra.mrb[36].mxu1 %v1380_v15 }
  0xf6   :  { %v1109_v16 = vpop.f32.mrb[0].mxu0 }
  0xf7   :  { %v1173_v17 = vpop.f32.mrb[0].mxu1  ;;  %v1110_v18 = vpop.f32.mrb[1].mxu0 }
  0xf8   :  { %v1111_v19 = vadd.f32 %v1110_v18, %v1109_v16  ;;  %v1174_v20 = vpop.f32.mrb[1].mxu1  ;;  %v1112_v21 = vpop.f32.mrb[2].mxu0 }
  0xf9   :  { %v1175_v22 = vadd.f32 %v1174_v20, %v1173_v17  ;;  %v1176_v23 = vpop.f32.mrb[2].mxu1  ;;  %v1113_v24 = vpop.f32.mrb[3].mxu0 }
  0xfa   :  { %v1114_v25 = vadd.f32 %v1113_v24, %v1112_v21  ;;  %v1177_v26 = vpop.f32.mrb[3].mxu1 }
  0xfb   :  { %v1178_v27 = vadd.f32 %v1177_v26, %v1176_v23  ;;  %v1641_v28 = vadd.f32 %v1175_v22, %v1111_v19 }
  0xfd   :  { %v1643_v29 = vadd.f32 %v1178_v27, %v1114_v25 }
  0xfe   :  { %v1115_v30 = vpop.f32.mrb[4].mxu0 }
  0xff   :  { %v1179_v31 = vpop.f32.mrb[4].mxu1  ;;  %v1116_v32 = vpop.f32.mrb[5].mxu0 }
 0x100   :  { %v1117_v33 = vadd.f32 %v1116_v32, %v1115_v30  ;;  %v1180_v34 = vpop.f32.mrb[5].mxu1  ;;  %v1118_v35 = vpop.f32.mrb[6].mxu0 }
 0x101   :  { %v1181_v36 = vadd.f32 %v1180_v34, %v1179_v31  ;;  %v1182_v37 = vpop.f32.mrb[6].mxu1  ;;  %v1119_v38 = vpop.f32.mrb[7].mxu0 }
 0x102   :  { %v1120_v39 = vadd.f32 %v1119_v38, %v1118_v35  ;;  %v1183_v40 = vpop.f32.mrb[7].mxu1 }
 0x103   :  { %v1184_v41 = vadd.f32 %v1183_v40, %v1182_v37  ;;  %v1645_v42 = vadd.f32 %v1181_v36, %v1117_v33 }
 0x105   :  { %v1647_v43 = vadd.f32 %v1184_v41, %v1120_v39 }
 0x106   :  { %v1121_v44 = vpop.f32.mrb[8].mxu0 }
 0x107   :  { %v1185_v45 = vpop.f32.mrb[8].mxu1  ;;  %v1122_v46 = vpop.f32.mrb[9].mxu0 }
 0x108   :  { %v1123_v47 = vadd.f32 %v1122_v46, %v1121_v44  ;;  %v1186_v48 = vpop.f32.mrb[9].mxu1  ;;  %v1124_v49 = vpop.f32.mrb[10].mxu0 }
 0x109   :  { %v1187_v50 = vadd.f32 %v1186_v48, %v1185_v45  ;;  %v1188_v51 = vpop.f32.mrb[10].mxu1  ;;  %v1125_v52 = vpop.f32.mrb[11].mxu0 }
 0x10a   :  { %v1126_v53 = vadd.f32 %v1125_v52, %v1124_v49  ;;  %v1189_v54 = vpop.f32.mrb[11].mxu1 }
 0x10b   :  { %v1190_v55 = vadd.f32 %v1189_v54, %v1188_v51  ;;  %v1649_v56 = vadd.f32 %v1187_v50, %v1123_v47 }
 0x10d   :  { %v1651_v57 = vadd.f32 %v1190_v55, %v1126_v53 }
 0x10e   :  { %v1127_v58 = vpop.f32.mrb[12].mxu0 }
 0x10f   :  { %v1191_v59 = vpop.f32.mrb[12].mxu1  ;;  %v1128_v60 = vpop.f32.mrb[13].mxu0 }
 0x110   :  { %v1129_v61 = vadd.f32 %v1128_v60, %v1127_v58  ;;  %v1192_v62 = vpop.f32.mrb[13].mxu1  ;;  %v1130_v63 = vpop.f32.mrb[14].mxu0 }
 0x111   :  { %v1193_v0 = vadd.f32 %v1192_v62, %v1191_v59  ;;  %v1194_v1 = vpop.f32.mrb[14].mxu1  ;;  %v1131_v2 = vpop.f32.mrb[15].mxu0 }
 0x112   :  { %v1132_v3 = vadd.f32 %v1131_v2, %v1130_v63  ;;  %v1195_v4 = vpop.f32.mrb[15].mxu1 }
 0x113   :  { %v1196_v5 = vadd.f32 %v1195_v4, %v1194_v1  ;;  %v1653_v6 = vadd.f32 %v1193_v0, %v1129_v61 }
 0x115   :  { %v1655_v7 = vadd.f32 %v1196_v5, %v1132_v3 }
 0x116   :  { %v1133_v8 = vpop.f32.mrb[16].mxu0 }
 0x117   :  { %v1197_v9 = vpop.f32.mrb[16].mxu1  ;;  %v1134_v10 = vpop.f32.mrb[17].mxu0 }
 0x118   :  { %v1135_v11 = vadd.f32 %v1134_v10, %v1133_v8  ;;  %v1198_v12 = vpop.f32.mrb[17].mxu1  ;;  %v1136_v13 = vpop.f32.mrb[18].mxu0 }
 0x119   :  { %v1199_v14 = vadd.f32 %v1198_v12, %v1197_v9  ;;  %v1200_v15 = vpop.f32.mrb[18].mxu1  ;;  %v1137_v16 = vpop.f32.mrb[19].mxu0  ;;  %v1092_v9 = vld [vmem:[%s1724_s2] ss:$0 sm:$0xff] }
 0x11a   :  { %v1138_v17 = vadd.f32 %v1137_v16, %v1136_v13  ;;  %v1201_v18 = vpop.f32.mrb[19].mxu1 }
 0x11b   :  { %v1202_v19 = vadd.f32 %v1201_v18, %v1200_v15  ;;  %v791_v20 = vadd.f32 %v1199_v14, %v1135_v11 }
 0x11d   :  { %v1657_v21 = vadd.f32 %v1202_v19, %v1138_v17 }
 0x11e   :  { %v1139_v22 = vpop.f32.mrb[20].mxu0 }
 0x11f   :  { %v1203_v23 = vpop.f32.mrb[20].mxu1  ;;  %v1140_v24 = vpop.f32.mrb[21].mxu0 }
 0x120   :  { %v1141_v25 = vadd.f32 %v1140_v24, %v1139_v22  ;;  %v1204_v26 = vpop.f32.mrb[21].mxu1  ;;  %v1142_v27 = vpop.f32.mrb[22].mxu0 }
 0x121   :  { %v1205_v30 = vadd.f32 %v1204_v26, %v1203_v23  ;;  %v1206_v31 = vpop.f32.mrb[22].mxu1  ;;  %v1143_v32 = vpop.f32.mrb[23].mxu0 }
 0x122   :  { %v1144_v33 = vadd.f32 %v1143_v32, %v1142_v27  ;;  %v1207_v34 = vpop.f32.mrb[23].mxu1 }
 0x123   :  { %v1208_v35 = vadd.f32 %v1207_v34, %v1206_v31  ;;  %v799_v36 = vadd.f32 %v1205_v30, %v1141_v25 }
 0x125   :  { %v802_v37 = vadd.f32 %v1208_v35, %v1144_v33 }
 0x126   :  { %v1145_v38 = vpop.f32.mrb[24].mxu0 }
 0x127   :  { %v1209_v39 = vpop.f32.mrb[24].mxu1  ;;  %v1146_v40 = vpop.f32.mrb[25].mxu0 }
 0x128   :  { %v1147_v41 = vadd.f32 %v1146_v40, %v1145_v38  ;;  %v1210_v44 = vpop.f32.mrb[25].mxu1  ;;  %v1148_v45 = vpop.f32.mrb[26].mxu0 }
 0x129   :  { %v1211_v46 = vadd.f32 %v1210_v44, %v1209_v39  ;;  %v1212_v47 = vpop.f32.mrb[26].mxu1  ;;  %v1149_v48 = vpop.f32.mrb[27].mxu0 }
 0x12a   :  { %v1150_v49 = vadd.f32 %v1149_v48, %v1148_v45  ;;  %v1213_v50 = vpop.f32.mrb[27].mxu1 }
 0x12b   :  { %v1214_v51 = vadd.f32 %v1213_v50, %v1212_v47  ;;  %v807_v52 = vadd.f32 %v1211_v46, %v1147_v41 }
 0x12d   :  { %v1659_v53 = vadd.f32 %v1214_v51, %v1150_v49 }
 0x12e   :  { %v1151_v54 = vpop.f32.mrb[28].mxu0 }
 0x12f   :  { %v1215_v55 = vpop.f32.mrb[28].mxu1  ;;  %v1152_v58 = vpop.f32.mrb[29].mxu0 }
 0x130   :  { %v1153_v59 = vadd.f32 %v1152_v58, %v1151_v54  ;;  %v1216_v60 = vpop.f32.mrb[29].mxu1  ;;  %v1154_v61 = vpop.f32.mrb[30].mxu0 }
 0x131   :  { %v1217_v62 = vadd.f32 %v1216_v60, %v1215_v55  ;;  %v1218_v63 = vpop.f32.mrb[30].mxu1  ;;  %v1155_v0 = vpop.f32.mrb[31].mxu0 }
 0x132   :  { %v1156_v1 = vadd.f32 %v1155_v0, %v1154_v61  ;;  %v1219_v2 = vpop.f32.mrb[31].mxu1 }
 0x133   :  { %v1220_v3 = vadd.f32 %v1219_v2, %v1218_v63  ;;  %v815_v4 = vadd.f32 %v1217_v62, %v1153_v59 }
 0x135   :  { %v818_v5 = vadd.f32 %v1220_v3, %v1156_v1 }
 0x136   :  { %v1255_v8 = vpop.f32.mrb[32].mxu0 }
 0x137   :  { %v864_v10 = vadd.f32 %v1255_v8, %v1645_v42  ;;  %v1263_v11 = vpop.f32.mrb[32].mxu1  ;;  %v855_v12 = vpop.f32.mrb[33].mxu0 }
 0x138   :  { %v896_v13 = vadd.f32 %v1263_v11, %v799_v36  ;;  %v856_v14 = vadd.f32 %v855_v12, %v1641_v28  ;;  %v887_v15 = vpop.f32.mrb[33].mxu1  ;;  %v1256_v16 = vpop.f32.mrb[34].mxu0 }
 0x139   :  { %v978_v17 = vadd.f32 %v1092_v9, %v864_v10  ;;  %v888_v18 = vadd.f32 %v887_v15, %v791_v20  ;;  %v867_v19 = vadd.f32 %v1256_v16, %v1647_v43  ;;  %v1264_v22 = vpop.f32.mrb[34].mxu1  ;;  %v858_v23 = vpop.f32.mrb[35].mxu0 }
 0x13a   :  { %v986_v24 = vadd.f32 %v1092_v9, %v896_v13  ;;  %v976_v25 = vadd.f32 %v1092_v9, %v856_v14  ;;  %v899_v26 = vadd.f32 %v1264_v22, %v802_v37  ;;  %v859_v27 = vadd.f32 %v858_v23, %v1643_v29  ;;  %v890_v30 = vpop.f32.mrb[35].mxu1 }
 0x13b   :  { %994 = vst [vmem:[%s1725_s3 + $0x10] sm:$0xff] %v978_v17  ;;  %v984_v42 = vadd.f32 %v1092_v9, %v888_v18  ;;  %v979_v28 = vadd.f32 %v1092_v9, %v867_v19  ;;  %v891_v31 = vadd.f32 %v890_v30, %v1657_v21 }
 0x13c   :  { %1002 = vst [vmem:[%s1725_s3 + $0x50] sm:$0xff] %v986_v24  ;;  %992 = vst [vmem:[%s1725_s3] sm:$0xff] %v976_v25  ;;  %v987_v43 = vadd.f32 %v1092_v9, %v899_v26  ;;  %v977_v20 = vadd.f32 %v1092_v9, %v859_v27 }
 0x13d   :  { %1000 = vst [vmem:[%s1725_s3 + $0x40] sm:$0xff] %v984_v42  ;;  %995 = vst [vmem:[%s1725_s3 + $0x18] sm:$0xff] %v979_v28  ;;  %v985_v29 = vadd.f32 %v1092_v9, %v891_v31 }
 0x13e   :  { %1003 = vst [vmem:[%s1725_s3 + $0x58] sm:$0xff] %v987_v43  ;;  %993 = vst [vmem:[%s1725_s3 + $0x8] sm:$0xff] %v977_v20  ;;  %v1259_v21 = vpop.f32.mrb[36].mxu0 }
 0x13f   :  { %1001 = vst [vmem:[%s1725_s3 + $0x48] sm:$0xff] %v985_v29  ;;  %v880_v32 = vadd.f32 %v1259_v21, %v1653_v6  ;;  %v1267_v33 = vpop.f32.mrb[36].mxu1  ;;  %v871_v34 = vpop.f32.mrb[37].mxu0 }
 0x140   :  { %v912_v35 = vadd.f32 %v1267_v33, %v815_v4  ;;  %v872_v36 = vadd.f32 %v871_v34, %v1649_v56  ;;  %v903_v37 = vpop.f32.mrb[37].mxu1  ;;  %v1260_v38 = vpop.f32.mrb[38].mxu0 }
 0x141   :  { %v982_v39 = vadd.f32 %v1092_v9, %v880_v32  ;;  %v904_v40 = vadd.f32 %v903_v37, %v807_v52  ;;  %v883_v41 = vadd.f32 %v1260_v38, %v1655_v7  ;;  %v1268_v44 = vpop.f32.mrb[38].mxu1  ;;  %v874_v45 = vpop.f32.mrb[39].mxu0 }
 0x142   :  { %v990_v46 = vadd.f32 %v1092_v9, %v912_v35  ;;  %v980_v47 = vadd.f32 %v1092_v9, %v872_v36  ;;  %v915_v48 = vadd.f32 %v1268_v44, %v818_v5  ;;  %v875_v49 = vadd.f32 %v874_v45, %v1651_v57  ;;  %v906_v50 = vpop.f32.mrb[39].mxu1 }
 0x143   :  { %998 = vst [vmem:[%s1725_s3 + $0x30] sm:$0xff] %v982_v39  ;;  %v988_v6 = vadd.f32 %v1092_v9, %v904_v40  ;;  %v983_v56 = vadd.f32 %v1092_v9, %v883_v41  ;;  %v907_v51 = vadd.f32 %v906_v50, %v1659_v53 }
 0x144   :  { %1006 = vst [vmem:[%s1725_s3 + $0x70] sm:$0xff] %v990_v46  ;;  %996 = vst [vmem:[%s1725_s3 + $0x20] sm:$0xff] %v980_v47  ;;  %v991_v7 = vadd.f32 %v1092_v9, %v915_v48  ;;  %v981_v52 = vadd.f32 %v1092_v9, %v875_v49 }
 0x145   :  { %1004 = vst [vmem:[%s1725_s3 + $0x60] sm:$0xff] %v988_v6  ;;  %999 = vst [vmem:[%s1725_s3 + $0x38] sm:$0xff] %v983_v56  ;;  %v989_v57 = vadd.f32 %v1092_v9, %v907_v51 }
 0x146   :  { %1007 = vst [vmem:[%s1725_s3 + $0x78] sm:$0xff] %v991_v7  ;;  %997 = vst [vmem:[%s1725_s3 + $0x28] sm:$0xff] %v981_v52 }
 0x147   :  { %1005 = vst [vmem:[%s1725_s3 + $0x68] sm:$0xff] %v989_v57 }

// kernel: generator_forward.74
= control target key start
LH: loop header
LB: loop body
LE: loop exit
PB: predicated region body
PF: predicated region fallthrough
CT: control target
= control target key end

     0   :  { %s408_s9 = smov 0   ;;  %s410_s10 = smov 0   ;;  %s458_s0 = inlined_call_operand.vmem [shape: f32[2,64,128], index: 0, kind: input, shape index: {}]   ;;  %s459_s1 = inlined_call_operand.vmem [shape: f32[2,1,128], index: 1, kind: output, shape index: {0}]   ;;  %s460_s2 = inlined_call_operand.vmem [shape: f32[2,1,128], index: 2, kind: output, shape index: {1}]  }
   0x1   :  { %s412_s11 = smov 0  }
   0x2 LB: > { %s25_s12 = sadd.s32 1, %s386_s10  ;;  %p335_p0 = scmp.ge.s32.totalorder %s390_s11, 1  ;;  %s390_s11 = sphi %s412_s11, %s13_s11   ;;  %s386_s10 = sphi %s410_s10, %s462_s10   ;;  %s382_s9 = sphi %s408_s9, %s461_s9  }
   0x3   : > { %p27_p1 = scmp.ge.s32.totalorder %s25_s12, 2  ;;  %p134_p2 = scmp.lt.s32.totalorder %s390_s11, 3 }
   0x5   : > { %s464_s12 = smov (%p27_p1, %s25_s12), 0  ;;  %p135_p3 = pnand %p335_p0, %p134_p2 }
   0x6   : > { %p162_p4 = scmp.lt.s32.totalorder (!%p135_p3), %s382_s9, 1  ;;  %v392_v0 = vmov (!%p135_p3), 0.0  }
   0x7   : > { %138 = sbr.rel (%p135_p3) target bundleno = 76 (0x4c), region = 24 }
   0xe   : > { %s466_s9 = smov (!%p162_p4, %s382_s9), 1 }
   0xf   : > { %s340_s13 = sshll.u32 %s466_s9, 6  ;;  %s429_s16 = scalar_lea.vmem %s459_s1, %s466_s9 }
  0x10   : > { %s169_s19 = scalar_lea.vmem %s458_s0, %s340_s13  ;;  %181 = vst [vmem:[%s429_s16] sm:$0x1] %v392_v0  ;;  %s438_s22 = scalar_lea.vmem %s460_s2, %s466_s9 }
  0x11   : > { %182 = vst [vmem:[%s438_s22] sm:$0x1] %v392_v0  ;;  %v183_v1 = vld [vmem:[%s169_s19] sm:$0xff]  ;;  %v184_v2 = vld [vmem:[%s169_s19 + $0x8] sm:$0xff]  ;;  %v185_v3 = vld [vmem:[%s169_s19 + $0x10] sm:$0xff] }
  0x12   : > { %v186_v4 = vld [vmem:[%s169_s19 + $0x18] sm:$0xff]  ;;  %v192_v5 = vadd.f32 %v184_v2, %v183_v1  ;;  %v208_v6 = vmul.f32 %v183_v1, %v183_v1  ;;  %v209_v7 = vmul.f32 %v184_v2, %v184_v2  ;;  %v210_v8 = vmul.f32 %v185_v3, %v185_v3  ;;  %v187_v9 = vld [vmem:[%s169_s19 + $0x20] sm:$0xff]  ;;  %v188_v13 = vld [vmem:[%s169_s19 + $0x28] sm:$0xff] }
  0x13   : > { %v211_v11 = vmul.f32 %v186_v4, %v186_v4  ;;  %v212_v15 = vmul.f32 %v187_v9, %v187_v9  ;;  %v189_v17 = vld [vmem:[%s169_s19 + $0x30] sm:$0xff]  ;;  %v213_v19 = vmul.f32 %v188_v13, %v188_v13  ;;  %v190_v21 = vld [vmem:[%s169_s19 + $0x38] sm:$0xff] }
  0x14   : > { %v193_v10 = vadd.f32 %v192_v5, %v185_v3  ;;  %v216_v12 = vadd.f32 %v209_v7, %v208_v6  ;;  %v214_v23 = vmul.f32 %v189_v17, %v189_v17  ;;  %v215_v26 = vmul.f32 %v190_v21, %v190_v21 }
  0x16   : > { %v194_v14 = vadd.f32 %v193_v10, %v186_v4  ;;  %v217_v16 = vadd.f32 %v216_v12, %v210_v8 }
  0x17   : > { %v191_v40 = vld [vmem:[%s429_s16] sm:$0x1] }
  0x18   : > { %v195_v18 = vadd.f32 %v194_v14, %v187_v9  ;;  %v218_v20 = vadd.f32 %v217_v16, %v211_v11  ;;  %v207_v43 = vld [vmem:[%s438_s22] sm:$0x1] }
  0x1a   : > { %v196_v22 = vadd.f32 %v195_v18, %v188_v13  ;;  %v219_v24 = vadd.f32 %v218_v20, %v212_v15 }
  0x1c   : > { %v197_v25 = vadd.f32 %v196_v22, %v189_v17  ;;  %v220_v27 = vadd.f32 %v219_v24, %v213_v19 }
  0x1e   : > { %v198_v28 = vadd.f32 %v197_v25, %v190_v21  ;;  %v221_v29 = vadd.f32 %v220_v27, %v214_v23 }
  0x20   : > { %v199_v30 = vrot.slane %v198_v28, 4  ;;  %v222_v31 = vadd.f32 %v221_v29, %v215_v26 }
  0x22   : > { %v200_v32 = vadd.f32 %v199_v30, %v198_v28  ;;  %v223_v33 = vrot.slane %v222_v31, 4 }
  0x24   : > { %v201_v34 = vrot.slane %v200_v32, 2  ;;  %v224_v35 = vadd.f32 %v223_v33, %v222_v31 }
  0x26   : > { %v202_v36 = vadd.f32 %v201_v34, %v200_v32  ;;  %v225_v37 = vrot.slane %v224_v35, 2 }
  0x28   : > { %v203_v38 = vrot.slane %v202_v36, 1  ;;  %v226_v39 = vadd.f32 %v225_v37, %v224_v35 }
  0x2a   : > { %v204_v41 = vadd.f32 %v203_v38, %v202_v36  ;;  %v227_v42 = vrot.slane %v226_v39, 1 }
  0x2c   : > { %v205_v44 = vadd.f32 %v204_v41, %v191_v40  ;;  %v228_v45 = vadd.f32 %v227_v42, %v226_v39 }
  0x2e   : > { %206 = vst [vmem:[%s429_s16] sm:$0x1] %v205_v44  ;;  %v229_v46 = vadd.f32 %v228_v45, %v207_v43 }
  0x30   : > { %230 = vst [vmem:[%s438_s22] sm:$0x1] %v229_v46 }
  0x35   : > { %v234_v47 = vld [vmem:[%s429_s16] sm:$0x1] }
  0x36   : > { %v235_v48 = vmul.f32 0.015625, %v234_v47 }
  0x37   : > { %v236_v49 = vld [vmem:[%s438_s22] sm:$0x1] }
  0x38   : > { %v238_v50 = vmul.f32 %v235_v48, %v235_v48  ;;  %241 = vst [vmem:[%s429_s16] sm:$0x1] %v235_v48  ;;  %v237_v51 = vmul.f32 0.015625, %v236_v49 }
  0x3a   : > { %v239_v52 = vsub.f32 %v237_v51, %v238_v50 }
  0x3c   : > { %v240_v53 = vmax.f32 %v239_v52, 0.0 }
  0x3e   : > { %v242_v54 = vadd.f32 1e-05, %v240_v53 }
  0x40   : > { %366 = vrsqrt.f32 %v242_v54 }
  0x4a   : > { %v367_v55 = vpop.eup %366 }
  0x4b   : > { %244 = vst [vmem:[%s438_s22] sm:$0x1] %v367_v55 }
  0x4c PF: > { %s13_s11 = sadd.s32 1, %s390_s11   ;;  %s461_s9 = smov %s386_s10 }
  0x4d   : > { %p10_p5 = scmp.ge.s32.totalorder %s13_s11, 4   ;;  %s462_s10 = smov %s464_s12 }
  0x4f   :  { %12 = sbr.rel (!%p10_p5) target bundleno = 2 (0x2), region = 74 }

// kernel: generator_forward.75
= control target key start
LH: loop header
LB: loop body
LE: loop exit
PB: predicated region body
PF: predicated region fallthrough
CT: control target
= control target key end

     0   :  { %s480_s12 = smov 0   ;;  %s482_s13 = smov 0   ;;  %s519_s0 = inlined_call_operand.vmem [shape: f32[2,64,128], index: 0, kind: input, shape index: {}]   ;;  %s520_s1 = inlined_call_operand.vmem [shape: f32[2,1,128], index: 1, kind: input, shape index: {}]   ;;  %s521_s2 = inlined_call_operand.vmem [shape: f32[2,1,128], index: 2, kind: input, shape index: {}]   ;;  %s522_s3 = inlined_call_operand.vmem [shape: f32[2,64,128], index: 3, kind: output, shape index: {}]  }
   0x1   :  { %s484_s14 = smov 0  }
   0x2 LB: > { %s25_s15 = sadd.s32 1, %s454_s13  ;;  %p401_p0 = scmp.ge.s32.totalorder %s458_s14, 1  ;;  %s458_s14 = sphi %s484_s14, %s13_s14   ;;  %s454_s13 = sphi %s482_s13, %s524_s13   ;;  %s450_s12 = sphi %s480_s12, %s523_s12  }
   0x3   : > { %p27_p1 = scmp.ge.s32.totalorder %s25_s15, 2  ;;  %p174_p2 = scmp.lt.s32.totalorder %s458_s14, 3 }
   0x5   : > { %s526_s15 = smov (%p27_p1, %s25_s15), 0  ;;  %p175_p3 = pnand %p401_p0, %p174_p2 }
   0x6   : > { %p213_p4 = scmp.lt.s32.totalorder (!%p175_p3), %s450_s12, 1 }
   0x7   : > { %178 = sbr.rel (%p175_p3) target bundleno = 28 (0x1c), region = 32 }
   0xe   : > { %s528_s12 = smov (!%p213_p4, %s450_s12), 1 }
   0xf   : > { %s410_s16 = sshll.u32 %s528_s12, 6  ;;  %s224_s19 = scalar_lea.vmem %s520_s1, %s528_s12 }
  0x10   : > { %s220_s22 = scalar_lea.vmem %s519_s0, %s410_s16  ;;  %s227_s25 = scalar_lea.vmem %s521_s2, %s528_s12  ;;  %v406_v0 = vld [vmem:[%s224_s19] ss:$0 sm:$0xff] }
  0x11   : > { %v238_v1 = vld [vmem:[%s220_s22] sm:$0xff]  ;;  %v239_v3 = vld [vmem:[%s220_s22 + $0x8] sm:$0xff]  ;;  %v240_v6 = vld [vmem:[%s220_s22 + $0x10] sm:$0xff]  ;;  %s236_s28 = scalar_lea.vmem %s522_s3, %s410_s16 }
  0x12   : > { %v407_v2 = vld [vmem:[%s227_s25] ss:$0 sm:$0xff]  ;;  %v253_v4 = vsub.f32 %v238_v1, %v406_v0  ;;  %v254_v5 = vsub.f32 %v239_v3, %v406_v0  ;;  %v241_v7 = vld [vmem:[%s220_s22 + $0x18] sm:$0xff]  ;;  %v255_v9 = vsub.f32 %v240_v6, %v406_v0  ;;  %v243_v12 = vld [vmem:[%s220_s22 + $0x28] sm:$0xff] }
  0x13   : > { %v242_v8 = vld [vmem:[%s220_s22 + $0x20] sm:$0xff]  ;;  %v256_v10 = vsub.f32 %v241_v7, %v406_v0  ;;  %v244_v13 = vld [vmem:[%s220_s22 + $0x30] sm:$0xff]  ;;  %v245_v14 = vld [vmem:[%s220_s22 + $0x38] sm:$0xff]  ;;  %v258_v17 = vsub.f32 %v243_v12, %v406_v0 }
  0x14   : > { %v257_v11 = vsub.f32 %v242_v8, %v406_v0  ;;  %v268_v15 = vmul.f32 %v407_v2, %v253_v4  ;;  %v269_v16 = vmul.f32 %v407_v2, %v254_v5  ;;  %v259_v18 = vsub.f32 %v244_v13, %v406_v0 }
  0x15   : > { %v270_v19 = vmul.f32 %v407_v2, %v255_v9  ;;  %v271_v20 = vmul.f32 %v407_v2, %v256_v10  ;;  %v260_v22 = vsub.f32 %v245_v14, %v406_v0  ;;  %v273_v25 = vmul.f32 %v407_v2, %v258_v17 }
  0x16   : > { %v272_v21 = vmul.f32 %v407_v2, %v257_v11  ;;  %v276_v23 = vmax.f32 %v268_v15, 0.0  ;;  %v277_v24 = vmax.f32 %v269_v16, 0.0  ;;  %v274_v26 = vmul.f32 %v407_v2, %v259_v18 }
  0x17   : > { %v278_v27 = vmax.f32 %v270_v19, 0.0  ;;  %v279_v28 = vmax.f32 %v271_v20, 0.0  ;;  %v275_v30 = vmul.f32 %v407_v2, %v260_v22  ;;  %v281_v31 = vmax.f32 %v273_v25, 0.0 }
  0x18   : > { %v280_v29 = vmax.f32 %v272_v21, 0.0  ;;  %284 = vst [vmem:[%s236_s28] sm:$0xff] %v276_v23  ;;  %285 = vst [vmem:[%s236_s28 + $0x8] sm:$0xff] %v277_v24  ;;  %v282_v32 = vmax.f32 %v274_v26, 0.0 }
  0x19   : > { %286 = vst [vmem:[%s236_s28 + $0x10] sm:$0xff] %v278_v27  ;;  %287 = vst [vmem:[%s236_s28 + $0x18] sm:$0xff] %v279_v28  ;;  %v283_v33 = vmax.f32 %v275_v30, 0.0 }
  0x1a   : > { %288 = vst [vmem:[%s236_s28 + $0x20] sm:$0xff] %v280_v29  ;;  %289 = vst [vmem:[%s236_s28 + $0x28] sm:$0xff] %v281_v31 }
  0x1b   : > { %290 = vst [vmem:[%s236_s28 + $0x30] sm:$0xff] %v282_v32  ;;  %291 = vst [vmem:[%s236_s28 + $0x38] sm:$0xff] %v283_v33 }
  0x1c PF: > { %s13_s14 = sadd.s32 1, %s458_s14   ;;  %s523_s12 = smov %s454_s13 }
  0x1d   : > { %p10_p5 = scmp.ge.s32.totalorder %s13_s14, 4   ;;  %s524_s13 = smov %s526_s15 }
  0x1f   :  { %12 = sbr.rel (!%p10_p5) target bundleno = 2 (0x2), region = 68 }

// kernel: generator_forward.77
= control target key start
LH: loop header
LB: loop body
LE: loop exit
PB: predicated region body
PF: predicated region fallthrough
CT: control target
= control target key end

     0   :  { %s472_s9 = smov 0   ;;  %s474_s10 = smov 0   ;;  %s538_s0 = inlined_call_operand.vmem [shape: f32[2,16,256], index: 0, kind: input, shape index: {}]   ;;  %s539_s1 = inlined_call_operand.vmem [shape: f32[2,1,256], index: 1, kind: output, shape index: {0}]   ;;  %s540_s2 = inlined_call_operand.vmem [shape: f32[2,1,256], index: 2, kind: output, shape index: {1}]  }
   0x1   :  { %s476_s11 = smov 0  }
   0x2 LB: > { %s25_s12 = sadd.s32 1, %s449_s10  ;;  %p395_p0 = scmp.ge.s32.totalorder %s453_s11, 1  ;;  %s453_s11 = sphi %s476_s11, %s13_s11   ;;  %s449_s10 = sphi %s474_s10, %s544_s10   ;;  %s445_s9 = sphi %s472_s9, %s543_s9  }
   0x3   : > { %p27_p1 = scmp.ge.s32.totalorder %s25_s12, 2  ;;  %p135_p2 = scmp.lt.s32.totalorder %s453_s11, 3 }
   0x5   : > { %s546_s12 = smov (%p27_p1, %s25_s12), 0  ;;  %p136_p3 = pnand %p395_p0, %p135_p2 }
   0x6   : > { %p166_p4 = scmp.lt.s32.totalorder (!%p136_p3), %s445_s9, 1  ;;  %v188_v0 = vlaneseq (!%p136_p3)  ;;  %v455_v2 = vmov (!%p136_p3), 0.0   ;;  %v456_v20 = vmov (!%p136_p3), 1966171168  }
   0x7   : > { %139 = sbr.rel (%p136_p3) target bundleno = 71 (0x47), region = 24  ;;  %v217_v21 = vunpack.c.l.s4 (!%p136_p3), %v456_v20 }
   0x8   : > { %vm490_vm0 = vcmp.lt.s32.totalorder (!%p136_p3), %v188_v0, 256  ;;  %v220_v30 = vshrl.u32 (!%p136_p3), %v188_v0, 7 }
   0x9   : > { %v218_v29 = vunpack.c.0.s8 (!%p136_p3), %v217_v21 }
   0xb   : > { %v221_v39 = vsub.s32 (!%p136_p3), %v218_v29, %v220_v30 }
   0xe   : > { %s548_s9 = smov (!%p166_p4, %s445_s9), 1 }
   0xf   : > { %s402_s13 = sshll.u32 %s548_s9, 5  ;;  %s398_s14 = sshll.u32 %s548_s9, 1 }
  0x10   : > { %s174_s17 = scalar_lea.vmem %s538_s0, %s402_s13  ;;  %s500_s20 = scalar_lea.vmem %s539_s1, %s398_s14 }
  0x11   : > { %192 = vst.msk [vmem:[%s500_s20] sm:$0x3] %vm490_vm0, %v455_v2  ;;  %v194_v3 = vld [vmem:[%s174_s17] sm:$0xff]  ;;  %v195_v4 = vld [vmem:[%s174_s17 + $0x8] sm:$0xff]  ;;  %v196_v5 = vld [vmem:[%s174_s17 + $0x10] sm:$0xff]  ;;  %s508_s23 = scalar_lea.vmem %s540_s2, %s398_s14 }
  0x12   : > { %v197_v6 = vld [vmem:[%s174_s17 + $0x18] sm:$0xff]  ;;  %v199_v7 = vadd.f32 %v196_v5, %v194_v3  ;;  %v238_v8 = vmul.f32 %v194_v3, %v194_v3  ;;  %v239_v9 = vmul.f32 %v195_v4, %v195_v4  ;;  %v240_v10 = vmul.f32 %v196_v5, %v196_v5  ;;  %193 = vst.msk [vmem:[%s508_s23] sm:$0x3] %vm490_vm0, %v455_v2 }
  0x13   : > { %v206_v11 = vadd.f32 %v197_v6, %v195_v4  ;;  %v241_v12 = vmul.f32 %v197_v6, %v197_v6 }
  0x14   : > { %v200_v13 = vrot.slane %v199_v7, 4  ;;  %v242_v14 = vadd.f32 %v240_v10, %v238_v8 }
  0x15   : > { %v207_v15 = vrot.slane %v206_v11, 4  ;;  %v249_v16 = vadd.f32 %v241_v12, %v239_v9 }
  0x16   : > { %v201_v17 = vadd.f32 %v200_v13, %v199_v7  ;;  %v243_v18 = vrot.slane %v242_v14, 4 }
  0x17   : > { %v208_v19 = vadd.f32 %v207_v15, %v206_v11  ;;  %v250_v22 = vrot.slane %v249_v16, 4 }
  0x18   : > { %v202_v23 = vrot.slane %v201_v17, 2  ;;  %v244_v24 = vadd.f32 %v243_v18, %v242_v14  ;;  %v198_v47 = vld [vmem:[%s500_s20] sm:$0x3] }
  0x19   : > { %v209_v25 = vrot.slane %v208_v19, 2  ;;  %v251_v26 = vadd.f32 %v250_v22, %v249_v16  ;;  %v237_v50 = vld [vmem:[%s508_s23] sm:$0x3] }
  0x1a   : > { %v203_v27 = vadd.f32 %v202_v23, %v201_v17  ;;  %v245_v28 = vrot.slane %v244_v24, 2 }
  0x1b   : > { %v210_v31 = vadd.f32 %v209_v25, %v208_v19  ;;  %v252_v32 = vrot.slane %v251_v26, 2 }
  0x1c   : > { %v204_v33 = vrot.slane %v203_v27, 1  ;;  %v246_v34 = vadd.f32 %v245_v28, %v244_v24 }
  0x1d   : > { %v211_v35 = vrot.slane %v210_v31, 1  ;;  %v253_v36 = vadd.f32 %v252_v32, %v251_v26 }
  0x1e   : > { %v205_v37 = vadd.f32 %v204_v33, %v203_v27  ;;  %v247_v38 = vrot.slane %v246_v34, 1 }
  0x1f   : > { %v212_v40 = vadd.f32 %v211_v35, %v210_v31  ;;  %v254_v41 = vrot.slane %v253_v36, 1 }
  0x20   : > { %v248_v42 = vadd.f32 %v247_v38, %v246_v34 }
  0x21   : > { %v215_v43 = vcombine.low %v205_v37, %v212_v40  ;;  %v255_v44 = vadd.f32 %v254_v41, %v253_v36 }
  0x23   : > { %v222_v45 = vrot.slane %v215_v43, %v221_v39  ;;  %v258_v46 = vcombine.low %v248_v42, %v255_v44 }
  0x25   : > { %v229_v48 = vrot.slane %v222_v45, %v221_v39  ;;  %v265_v49 = vrot.slane %v258_v46, %v221_v39 }
  0x27   : > { %v231_v51 = vadd.f32 %v229_v48, %v198_v47  ;;  %v272_v52 = vrot.slane %v265_v49, %v221_v39 }
  0x29   : > { %236 = vst.msk [vmem:[%s500_s20] sm:$0x3] %vm490_vm0, %v231_v51  ;;  %v274_v53 = vadd.f32 %v272_v52, %v237_v50 }
  0x2b   : > { %275 = vst.msk [vmem:[%s508_s23] sm:$0x3] %vm490_vm0, %v274_v53 }
  0x30   : > { %v279_v54 = vld [vmem:[%s500_s20] sm:$0x3] }
  0x31   : > { %v280_v55 = vmul.f32 0.0625, %v279_v54 }
  0x32   : > { %v281_v56 = vld [vmem:[%s508_s23] sm:$0x3] }
  0x33   : > { %v283_v57 = vmul.f32 %v280_v55, %v280_v55  ;;  %286 = vst.msk [vmem:[%s500_s20] sm:$0x3] %vm490_vm0, %v280_v55  ;;  %v282_v58 = vmul.f32 0.0625, %v281_v56 }
  0x35   : > { %v284_v59 = vsub.f32 %v282_v58, %v283_v57 }
  0x37   : > { %v285_v60 = vmax.f32 %v284_v59, 0.0 }
  0x39   : > { %v287_v61 = vadd.f32 1e-05, %v285_v60 }
  0x3b   : > { %429 = vrsqrt.f32 %v287_v61 }
  0x45   : > { %v430_v62 = vpop.eup %429 }
  0x46   : > { %289 = vst.msk [vmem:[%s508_s23] sm:$0x3] %vm490_vm0, %v430_v62 }
  0x47 PF: > { %s13_s11 = sadd.s32 1, %s453_s11   ;;  %s543_s9 = smov %s449_s10 }
  0x48   : > { %p10_p5 = scmp.ge.s32.totalorder %s13_s11, 4   ;;  %s544_s10 = smov %s546_s12 }
  0x4a   :  { %12 = sbr.rel (!%p10_p5) target bundleno = 2 (0x2), region = 74 }

// kernel: generator_forward.76
= control target key start
LH: loop header
LB: loop body
LE: loop exit
PB: predicated region body
PF: predicated region fallthrough
CT: control target
= control target key end

     0   :  { %s2322_s1 = inlined_call_operand.vmem [shape: bf16[1152,256], index: 1, kind: input, shape index: {}]   ;;  %s2323_s0 = inlined_call_operand.vmem [shape: bf16[32,1152], index: 0, kind: input, shape index: {}]   ;;  %s2324_s2 = inlined_call_operand.vmem [shape: f32[1,256], index: 2, kind: input, shape index: {}]   ;;  %s2325_s3 = inlined_call_operand.vmem [shape: f32[32,256], index: 3, kind: output, shape index: {}]  }
   0x1   :  { %v1546_v0 = vld [vmem:[%s2322_s1 + $0x4] ss:$8 sps:$4 sm:$0xff]   ;;  %v1550_v2 = vld [vmem:[%s2322_s1] ss:$8 sps:$4 sm:$0xff]   ;;  %v1552_v4 = vld [vmem:[%s2322_s1 + $0x14] ss:$8 sps:$4 sm:$0xff]  }
   0x2   :  { %v1548_v1 = vld [vmem:[%s2322_s1 + $0x204] ss:$8 sps:$4 sm:$0xff]   ;;  %1011 = vmatprep.subr.bf16.mxu1 %v1546_v0  ;;  %v1551_v3 = vld [vmem:[%s2322_s1 + $0x200] ss:$8 sps:$4 sm:$0xff]   ;;  %v1554_v5 = vld [vmem:[%s2322_s1 + $0x214] ss:$8 sps:$4 sm:$0xff]  }
   0x3   :  { %1117 = vmatprep.subr.bf16.mxu0 %v1548_v1  ;;  %1012 = vmatpush1.bf16.msra.mxu1 %v1550_v2  ;;  %v1556_v6 = vld [vmem:[%s2322_s1 + $0x10] ss:$8 sps:$4 sm:$0xff]   ;;  %v1558_v8 = vld [vmem:[%s2322_s1 + $0x24] ss:$8 sps:$4 sm:$0xff]   ;;  %v1562_v10 = vld [vmem:[%s2322_s1 + $0x20] ss:$8 sps:$4 sm:$0xff]  }
   0x4   :  { %1118 = vmatpush1.bf16.msra.mxu0 %v1551_v3  ;;  %1013 = vmatprep.subr.bf16.mxu1 %v1552_v4  ;;  %v1557_v7 = vld [vmem:[%s2322_s1 + $0x210] ss:$8 sps:$4 sm:$0xff]   ;;  %v1560_v9 = vld [vmem:[%s2322_s1 + $0x224] ss:$8 sps:$4 sm:$0xff]   ;;  %v1563_v11 = vld [vmem:[%s2322_s1 + $0x220] ss:$8 sps:$4 sm:$0xff]  }
   0x5   :  { %1119 = vmatprep.subr.bf16.mxu0 %v1554_v5  ;;  %v1564_v12 = vld [vmem:[%s2322_s1 + $0x34] ss:$8 sps:$4 sm:$0xff]   ;;  %v1568_v14 = vld [vmem:[%s2322_s1 + $0x30] ss:$8 sps:$4 sm:$0xff]   ;;  %v1570_v16 = vld [vmem:[%s2322_s1 + $0x44] ss:$8 sps:$4 sm:$0xff]  }
   0x6   :  { %v1566_v13 = vld [vmem:[%s2322_s1 + $0x234] ss:$8 sps:$4 sm:$0xff]   ;;  %v1569_v15 = vld [vmem:[%s2322_s1 + $0x230] ss:$8 sps:$4 sm:$0xff]   ;;  %v1572_v17 = vld [vmem:[%s2322_s1 + $0x244] ss:$8 sps:$4 sm:$0xff]  }
   0x7   :  { %1014 = vmatpush1.bf16.msra.mxu1 %v1556_v6  ;;  %v1574_v18 = vld [vmem:[%s2322_s1 + $0x40] ss:$8 sps:$4 sm:$0xff]   ;;  %v1576_v20 = vld [vmem:[%s2322_s1 + $0x54] ss:$8 sps:$4 sm:$0xff]   ;;  %v1580_v22 = vld [vmem:[%s2322_s1 + $0x50] ss:$8 sps:$4 sm:$0xff]  }
   0x8   :  { %1120 = vmatpush1.bf16.msra.mxu0 %v1557_v7  ;;  %1015 = vmatprep.subr.bf16.mxu1 %v1558_v8  ;;  %v1575_v19 = vld [vmem:[%s2322_s1 + $0x240] ss:$8 sps:$4 sm:$0xff]   ;;  %v1578_v21 = vld [vmem:[%s2322_s1 + $0x254] ss:$8 sps:$4 sm:$0xff]   ;;  %v1581_v23 = vld [vmem:[%s2322_s1 + $0x250] ss:$8 sps:$4 sm:$0xff]  }
   0x9   :  { %1121 = vmatprep.subr.bf16.mxu0 %v1560_v9  ;;  %v1582_v24 = vld [vmem:[%s2322_s1 + $0x64] ss:$8 sps:$4 sm:$0xff]   ;;  %v1586_v26 = vld [vmem:[%s2322_s1 + $0x60] ss:$8 sps:$4 sm:$0xff]   ;;  %v1588_v28 = vld [vmem:[%s2322_s1 + $0x74] ss:$8 sps:$4 sm:$0xff]  }
   0xa   :  { %v1584_v25 = vld [vmem:[%s2322_s1 + $0x264] ss:$8 sps:$4 sm:$0xff]   ;;  %v1587_v27 = vld [vmem:[%s2322_s1 + $0x260] ss:$8 sps:$4 sm:$0xff]   ;;  %v1590_v29 = vld [vmem:[%s2322_s1 + $0x274] ss:$8 sps:$4 sm:$0xff]  }
   0xb   :  { %1016 = vmatpush1.bf16.msra.mxu1 %v1562_v10  ;;  %v1592_v30 = vld [vmem:[%s2322_s1 + $0x70] ss:$8 sps:$4 sm:$0xff]   ;;  %v1594_v32 = vld [vmem:[%s2322_s1 + $0x84] ss:$8 sps:$4 sm:$0xff]   ;;  %v1598_v34 = vld [vmem:[%s2322_s1 + $0x80] ss:$8 sps:$4 sm:$0xff]  }
   0xc   :  { %1122 = vmatpush1.bf16.msra.mxu0 %v1563_v11  ;;  %1017 = vmatprep.subr.bf16.mxu1 %v1564_v12  ;;  %v1593_v31 = vld [vmem:[%s2322_s1 + $0x270] ss:$8 sps:$4 sm:$0xff]   ;;  %v1596_v33 = vld [vmem:[%s2322_s1 + $0x284] ss:$8 sps:$4 sm:$0xff]   ;;  %v1599_v35 = vld [vmem:[%s2322_s1 + $0x280] ss:$8 sps:$4 sm:$0xff]  }
   0xd   :  { %1123 = vmatprep.subr.bf16.mxu0 %v1566_v13  ;;  %v1600_v36 = vld [vmem:[%s2322_s1 + $0x94] ss:$8 sps:$4 sm:$0xff]   ;;  %v1604_v38 = vld [vmem:[%s2322_s1 + $0x90] ss:$8 sps:$4 sm:$0xff]   ;;  %v1606_v40 = vld [vmem:[%s2322_s1 + $0xa4] ss:$8 sps:$4 sm:$0xff]  }
   0xe   :  { %v1602_v37 = vld [vmem:[%s2322_s1 + $0x294] ss:$8 sps:$4 sm:$0xff]   ;;  %v1605_v39 = vld [vmem:[%s2322_s1 + $0x290] ss:$8 sps:$4 sm:$0xff]   ;;  %v1608_v41 = vld [vmem:[%s2322_s1 + $0x2a4] ss:$8 sps:$4 sm:$0xff]  }
   0xf   :  { %1018 = vmatpush1.bf16.msra.mxu1 %v1568_v14  ;;  %v1610_v42 = vld [vmem:[%s2322_s1 + $0xa0] ss:$8 sps:$4 sm:$0xff]   ;;  %v1612_v44 = vld [vmem:[%s2322_s1 + $0xb4] ss:$8 sps:$4 sm:$0xff]   ;;  %v1616_v46 = vld [vmem:[%s2322_s1 + $0xb0] ss:$8 sps:$4 sm:$0xff]  }
  0x10   :  { %1124 = vmatpush1.bf16.msra.mxu0 %v1569_v15  ;;  %1019 = vmatprep.subr.bf16.mxu1 %v1570_v16  ;;  %v1611_v43 = vld [vmem:[%s2322_s1 + $0x2a0] ss:$8 sps:$4 sm:$0xff]   ;;  %v1614_v45 = vld [vmem:[%s2322_s1 + $0x2b4] ss:$8 sps:$4 sm:$0xff]   ;;  %v1617_v47 = vld [vmem:[%s2322_s1 + $0x2b0] ss:$8 sps:$4 sm:$0xff]  }
  0x11   :  { %1125 = vmatprep.subr.bf16.mxu0 %v1572_v17  ;;  %v1644_v48 = vld [vmem:[%s2323_s0 + $0x4] ss:$36 sps:$4 sm:$0xff]   ;;  %v1650_v51 = vld [vmem:[%s2323_s0 + $0x14] ss:$36 sps:$4 sm:$0xff]  }
  0x12   :  { %v1618_v49 = vld [vmem:[%s2322_s1 + $0xc4] ss:$8 sps:$4 sm:$0xff]   ;;  %1043 = vmatprep.mubr.bf16.mxu1 %v1644_v48  ;;  %v1622_v52 = vld [vmem:[%s2322_s1 + $0xc0] ss:$8 sps:$4 sm:$0xff]   ;;  %v1624_v54 = vld [vmem:[%s2322_s1 + $0xd4] ss:$8 sps:$4 sm:$0xff]   ;;  %1149 = vmatprep.mubr.bf16.mxu0 %v1650_v51 }
  0x13   :  { %1020 = vmatpush1.bf16.msra.mxu1 %v1574_v18  ;;  %v1620_v50 = vld [vmem:[%s2322_s1 + $0x2c4] ss:$8 sps:$4 sm:$0xff]   ;;  %v1623_v53 = vld [vmem:[%s2322_s1 + $0x2c0] ss:$8 sps:$4 sm:$0xff]   ;;  %v1626_v55 = vld [vmem:[%s2322_s1 + $0x2d4] ss:$8 sps:$4 sm:$0xff]  }
  0x14   :  { %1126 = vmatpush1.bf16.msra.mxu0 %v1575_v19  ;;  %1021 = vmatprep.subr.bf16.mxu1 %v1576_v20  ;;  %v1628_v56 = vld [vmem:[%s2322_s1 + $0xd0] ss:$8 sps:$4 sm:$0xff]   ;;  %v1630_v58 = vld [vmem:[%s2322_s1 + $0xe4] ss:$8 sps:$4 sm:$0xff]   ;;  %v1634_v60 = vld [vmem:[%s2322_s1 + $0xe0] ss:$8 sps:$4 sm:$0xff]  }
  0x15   :  { %1127 = vmatprep.subr.bf16.mxu0 %v1578_v21  ;;  %v1629_v57 = vld [vmem:[%s2322_s1 + $0x2d0] ss:$8 sps:$4 sm:$0xff]   ;;  %v1632_v59 = vld [vmem:[%s2322_s1 + $0x2e4] ss:$8 sps:$4 sm:$0xff]   ;;  %v1635_v61 = vld [vmem:[%s2322_s1 + $0x2e0] ss:$8 sps:$4 sm:$0xff]  }
  0x16   :  { %v1636_v62 = vld [vmem:[%s2322_s1 + $0xf4] ss:$8 sps:$4 sm:$0xff]   ;;  %v1640_v0 = vld [vmem:[%s2322_s1 + $0xf0] ss:$8 sps:$4 sm:$0xff]   ;;  %v1647_v2 = vld [vmem:[%s2322_s1 + $0x104] ss:$8 sps:$4 sm:$0xff]  }
  0x17   :  { %1022 = vmatpush1.bf16.msra.mxu1 %v1580_v22  ;;  %v1638_v63 = vld [vmem:[%s2322_s1 + $0x2f4] ss:$8 sps:$4 sm:$0xff]   ;;  %v1641_v1 = vld [vmem:[%s2322_s1 + $0x2f0] ss:$8 sps:$4 sm:$0xff]   ;;  %v1653_v3 = vld [vmem:[%s2322_s1 + $0x304] ss:$8 sps:$4 sm:$0xff]  }
  0x18   :  { %1128 = vmatpush1.bf16.msra.mxu0 %v1581_v23  ;;  %1023 = vmatprep.subr.bf16.mxu1 %v1582_v24  ;;  %v1642_v4 = vld [vmem:[%s2323_s0] ss:$36 sps:$4 sm:$0xff]   ;;  %v1648_v6 = vld [vmem:[%s2323_s0 + $0x10] ss:$36 sps:$4 sm:$0xff]  }
  0x19   :  { %1129 = vmatprep.subr.bf16.mxu0 %v1584_v25  ;;  %v1645_v5 = vld [vmem:[%s2322_s1 + $0x100] ss:$8 sps:$4 sm:$0xff]   ;;  %v1656_v8 = vld [vmem:[%s2322_s1 + $0x114] ss:$8 sps:$4 sm:$0xff]   ;;  %v1654_v10 = vld [vmem:[%s2322_s1 + $0x110] ss:$8 sps:$4 sm:$0xff]  }
  0x1a   :  { %v1651_v7 = vld [vmem:[%s2322_s1 + $0x300] ss:$8 sps:$4 sm:$0xff]   ;;  %v1659_v9 = vld [vmem:[%s2322_s1 + $0x314] ss:$8 sps:$4 sm:$0xff]   ;;  %v1657_v11 = vld [vmem:[%s2322_s1 + $0x310] ss:$8 sps:$4 sm:$0xff]  }
  0x1b   :  { %1024 = vmatpush1.bf16.msra.mxu1 %v1586_v26  ;;  %v1662_v12 = vld [vmem:[%s2322_s1 + $0x124] ss:$8 sps:$4 sm:$0xff]   ;;  %v1660_v14 = vld [vmem:[%s2322_s1 + $0x120] ss:$8 sps:$4 sm:$0xff]   ;;  %v1668_v16 = vld [vmem:[%s2322_s1 + $0x134] ss:$8 sps:$4 sm:$0xff]  }
  0x1c   :  { %1130 = vmatpush1.bf16.msra.mxu0 %v1587_v27  ;;  %1025 = vmatprep.subr.bf16.mxu1 %v1588_v28  ;;  %v1665_v13 = vld [vmem:[%s2322_s1 + $0x324] ss:$8 sps:$4 sm:$0xff]   ;;  %v1663_v15 = vld [vmem:[%s2322_s1 + $0x320] ss:$8 sps:$4 sm:$0xff]   ;;  %v1671_v17 = vld [vmem:[%s2322_s1 + $0x334] ss:$8 sps:$4 sm:$0xff]  }
  0x1d   :  { %1131 = vmatprep.subr.bf16.mxu0 %v1590_v29  ;;  %v1666_v18 = vld [vmem:[%s2322_s1 + $0x130] ss:$8 sps:$4 sm:$0xff]   ;;  %v1674_v20 = vld [vmem:[%s2322_s1 + $0x144] ss:$8 sps:$4 sm:$0xff]   ;;  %v1672_v22 = vld [vmem:[%s2322_s1 + $0x140] ss:$8 sps:$4 sm:$0xff]  }
  0x1e   :  { %v1669_v19 = vld [vmem:[%s2322_s1 + $0x330] ss:$8 sps:$4 sm:$0xff]   ;;  %v1677_v21 = vld [vmem:[%s2322_s1 + $0x344] ss:$8 sps:$4 sm:$0xff]   ;;  %v1675_v23 = vld [vmem:[%s2322_s1 + $0x340] ss:$8 sps:$4 sm:$0xff]  }
  0x1f   :  { %1026 = vmatpush1.bf16.msra.mxu1 %v1592_v30  ;;  %v1680_v24 = vld [vmem:[%s2322_s1 + $0x154] ss:$8 sps:$4 sm:$0xff]   ;;  %v1678_v26 = vld [vmem:[%s2322_s1 + $0x150] ss:$8 sps:$4 sm:$0xff]   ;;  %v1686_v28 = vld [vmem:[%s2322_s1 + $0x164] ss:$8 sps:$4 sm:$0xff]  }
  0x20   :  { %1132 = vmatpush1.bf16.msra.mxu0 %v1593_v31  ;;  %1027 = vmatprep.subr.bf16.mxu1 %v1594_v32  ;;  %v1683_v25 = vld [vmem:[%s2322_s1 + $0x354] ss:$8 sps:$4 sm:$0xff]   ;;  %v1681_v27 = vld [vmem:[%s2322_s1 + $0x350] ss:$8 sps:$4 sm:$0xff]   ;;  %v1736_v31 = vld [vmem:[%s2323_s0 + $0x48] ss:$36 sps:$4 sm:$0xff]  }
  0x21   :  { %1133 = vmatprep.subr.bf16.mxu0 %v1596_v33  ;;  %v1732_v29 = vld [vmem:[%s2323_s0 + $0x4c] ss:$36 sps:$4 sm:$0xff]   ;;  %v1734_v30 = vld [vmem:[%s2323_s0 + $0x5c] ss:$36 sps:$4 sm:$0xff]  }
  0x22   :  { %v1689_v32 = vld [vmem:[%s2322_s1 + $0x364] ss:$8 sps:$4 sm:$0xff]   ;;  %v1740_v33 = vld [vmem:[%s2323_s0 + $0x58] ss:$36 sps:$4 sm:$0xff]  }
  0x23   :  { %1028 = vmatpush1.bf16.msra.mxu1 %v1598_v34  ;;  %v1684_v34 = vld [vmem:[%s2322_s1 + $0x160] ss:$8 sps:$4 sm:$0xff]   ;;  %v1702_v48 = vld [vmem:[%s2322_s1 + $0x190] ss:$8 sps:$4 sm:$0xff]   ;;  %v1713_v51 = vld [vmem:[%s2322_s1 + $0x3a4] ss:$8 sps:$4 sm:$0xff]  }
  0x24   :  { %1134 = vmatpush1.bf16.msra.mxu0 %v1599_v35  ;;  %1029 = vmatprep.subr.bf16.mxu1 %v1600_v36  ;;  %v1687_v35 = vld [vmem:[%s2322_s1 + $0x360] ss:$8 sps:$4 sm:$0xff]   ;;  %v1692_v36 = vld [vmem:[%s2322_s1 + $0x174] ss:$8 sps:$4 sm:$0xff]  }
  0x25   :  { %1135 = vmatprep.subr.bf16.mxu0 %v1602_v37  ;;  %v1695_v37 = vld [vmem:[%s2322_s1 + $0x374] ss:$8 sps:$4 sm:$0xff]  }
  0x27   :  { %1030 = vmatpush1.bf16.msra.mxu1 %v1604_v38  ;;  %v1690_v38 = vld [vmem:[%s2322_s1 + $0x170] ss:$8 sps:$4 sm:$0xff]  }
  0x28   :  { %1136 = vmatpush1.bf16.msra.mxu0 %v1605_v39  ;;  %1031 = vmatprep.subr.bf16.mxu1 %v1606_v40  ;;  %v1693_v39 = vld [vmem:[%s2322_s1 + $0x370] ss:$8 sps:$4 sm:$0xff]   ;;  %v1698_v40 = vld [vmem:[%s2322_s1 + $0x184] ss:$8 sps:$4 sm:$0xff]  }
  0x29   :  { %1137 = vmatprep.subr.bf16.mxu0 %v1608_v41  ;;  %v1752_v41 = vld [vmem:[%s2323_s0 + $0xc] ss:$36 sps:$4 sm:$0xff]  }
  0x2b   :  { %1032 = vmatpush1.bf16.msra.mxu1 %v1610_v42  ;;  %v1701_v42 = vld [vmem:[%s2322_s1 + $0x384] ss:$8 sps:$4 sm:$0xff]  }
  0x2c   :  { %1138 = vmatpush1.bf16.msra.mxu0 %v1611_v43  ;;  %1033 = vmatprep.subr.bf16.mxu1 %v1612_v44  ;;  %v1755_v43 = vld [vmem:[%s2323_s0 + $0x1c] ss:$36 sps:$4 sm:$0xff]  }
  0x2d   :  { %1139 = vmatprep.subr.bf16.mxu0 %v1614_v45  ;;  %v1696_v44 = vld [vmem:[%s2322_s1 + $0x180] ss:$8 sps:$4 sm:$0xff]  }
  0x2e   :  { %v1699_v45 = vld [vmem:[%s2322_s1 + $0x380] ss:$8 sps:$4 sm:$0xff]  }
  0x2f   :  { %1034 = vmatpush1.bf16.msra.mxu1 %v1616_v46  ;;  %v1704_v46 = vld [vmem:[%s2322_s1 + $0x194] ss:$8 sps:$4 sm:$0xff]  }
  0x30   :  { %1140 = vmatpush1.bf16.msra.mxu0 %v1617_v47  ;;  %1035 = vmatprep.subr.bf16.mxu1 %v1618_v49  ;;  %v1707_v47 = vld [vmem:[%s2322_s1 + $0x394] ss:$8 sps:$4 sm:$0xff]   ;;  %v1705_v49 = vld [vmem:[%s2322_s1 + $0x390] ss:$8 sps:$4 sm:$0xff]  }
  0x31   :  { %1141 = vmatprep.subr.bf16.mxu0 %v1620_v50  ;;  %v1710_v50 = vld [vmem:[%s2322_s1 + $0x1a4] ss:$8 sps:$4 sm:$0xff]  }
  0x33   :  { %1036 = vmatpush1.bf16.msra.mxu1 %v1622_v52  ;;  %v1708_v52 = vld [vmem:[%s2322_s1 + $0x1a0] ss:$8 sps:$4 sm:$0xff]  }
  0x34   :  { %1142 = vmatpush1.bf16.msra.mxu0 %v1623_v53  ;;  %1037 = vmatprep.subr.bf16.mxu1 %v1624_v54  ;;  %v1711_v53 = vld [vmem:[%s2322_s1 + $0x3a0] ss:$8 sps:$4 sm:$0xff]   ;;  %v1716_v54 = vld [vmem:[%s2322_s1 + $0x1b4] ss:$8 sps:$4 sm:$0xff]  }
  0x35   :  { %1143 = vmatprep.subr.bf16.mxu0 %v1626_v55  ;;  %v1719_v55 = vld [vmem:[%s2322_s1 + $0x3b4] ss:$8 sps:$4 sm:$0xff]  }
  0x37   :  { %1038 = vmatpush1.bf16.msra.mxu1 %v1628_v56  ;;  %v1714_v56 = vld [vmem:[%s2322_s1 + $0x1b0] ss:$8 sps:$4 sm:$0xff]  }
  0x38   :  { %1144 = vmatpush1.bf16.msra.mxu0 %v1629_v57  ;;  %1039 = vmatprep.subr.bf16.mxu1 %v1630_v58  ;;  %v1717_v57 = vld [vmem:[%s2322_s1 + $0x3b0] ss:$8 sps:$4 sm:$0xff]   ;;  %v1722_v58 = vld [vmem:[%s2322_s1 + $0x1c4] ss:$8 sps:$4 sm:$0xff]  }
  0x39   :  { %1145 = vmatprep.subr.bf16.mxu0 %v1632_v59  ;;  %v1725_v59 = vld [vmem:[%s2322_s1 + $0x3c4] ss:$8 sps:$4 sm:$0xff]  }
  0x3b   :  { %1040 = vmatpush1.bf16.msra.mxu1 %v1634_v60  ;;  %v1720_v60 = vld [vmem:[%s2322_s1 + $0x1c0] ss:$8 sps:$4 sm:$0xff]  }
  0x3c   :  { %1146 = vmatpush1.bf16.msra.mxu0 %v1635_v61  ;;  %1041 = vmatprep.subr.bf16.mxu1 %v1636_v62  ;;  %v1723_v61 = vld [vmem:[%s2322_s1 + $0x3c0] ss:$8 sps:$4 sm:$0xff]   ;;  %v1728_v62 = vld [vmem:[%s2322_s1 + $0x1d4] ss:$8 sps:$4 sm:$0xff]  }
  0x3d   :  { %1147 = vmatprep.subr.bf16.mxu0 %v1638_v63  ;;  %v1731_v63 = vld [vmem:[%s2322_s1 + $0x3d4] ss:$8 sps:$4 sm:$0xff]  }
  0x3f   :  { %1042 = vmatpush1.bf16.msra.mxu1 %v1640_v0  ;;  %v1726_v0 = vld [vmem:[%s2322_s1 + $0x1d0] ss:$8 sps:$4 sm:$0xff]  }
  0x40   :  { %1148 = vmatpush1.bf16.msra.mxu0 %v1641_v1  ;;  %1064 = vmatprep.subr.bf16.mxu1 %v1647_v2  ;;  %v1729_v1 = vld [vmem:[%s2322_s1 + $0x3d0] ss:$8 sps:$4 sm:$0xff]   ;;  %v1739_v2 = vld [vmem:[%s2322_s1 + $0x1e4] ss:$8 sps:$4 sm:$0xff]  }
  0x41   :  { %1170 = vmatprep.subr.bf16.mxu0 %v1653_v3  ;;  %v1743_v3 = vld [vmem:[%s2322_s1 + $0x3e4] ss:$8 sps:$4 sm:$0xff]  }
  0x42   :  { %1044 = vmatmul.mubr.bf16.vlgmr.msra.gmra.mrb[0].mxu1 %v1642_v4  ;;  %v1737_v4 = vld [vmem:[%s2322_s1 + $0x1e0] ss:$8 sps:$4 sm:$0xff]  }
  0x43   :  { %1150 = vmatmul.mubr.bf16.vlgmr.msra.gmra.mrb[0].mxu0 %v1648_v6  ;;  %1065 = vmatpush1.bf16.msra.mxu1 %v1645_v5  ;;  %v1741_v5 = vld [vmem:[%s2322_s1 + $0x3e0] ss:$8 sps:$4 sm:$0xff]   ;;  %v1746_v6 = vld [vmem:[%s2322_s1 + $0x1f4] ss:$8 sps:$4 sm:$0xff]  }
  0x44   :  { %1171 = vmatpush1.bf16.msra.mxu0 %v1651_v7  ;;  %1066 = vmatprep.subr.bf16.mxu1 %v1656_v8  ;;  %v1749_v7 = vld [vmem:[%s2322_s1 + $0x3f4] ss:$8 sps:$4 sm:$0xff]   ;;  %v1744_v8 = vld [vmem:[%s2322_s1 + $0x1f0] ss:$8 sps:$4 sm:$0xff]  }
  0x45   :  { %1172 = vmatprep.subr.bf16.mxu0 %v1659_v9  ;;  %1053 = vmatprep.mubr.bf16.mxu1 %v1732_v29  ;;  %v1747_v9 = vld [vmem:[%s2322_s1 + $0x3f0] ss:$8 sps:$4 sm:$0xff]   ;;  %v1782_v29 = vld [vmem:[%s2322_s1 + $0x464] ss:$8 sps:$4 sm:$0xff]  }
  0x46   :  { %1159 = vmatprep.mubr.bf16.mxu0 %v1734_v30  ;;  %v1780_v30 = vld [vmem:[%s2322_s1 + $0x460] ss:$8 sps:$4 sm:$0xff]  }
  0x47   :  { %1067 = vmatpush1.bf16.msra.mxu1 %v1654_v10  ;;  %v1758_v10 = vld [vmem:[%s2322_s1 + $0x404] ss:$8 sps:$4 sm:$0xff]  }
  0x48   :  { %1173 = vmatpush1.bf16.msra.mxu0 %v1657_v11  ;;  %1068 = vmatprep.subr.bf16.mxu1 %v1662_v12  ;;  %v1750_v11 = vld [vmem:[%s2323_s0 + $0x8] ss:$36 sps:$4 sm:$0xff]   ;;  %v1753_v12 = vld [vmem:[%s2323_s0 + $0x18] ss:$36 sps:$4 sm:$0xff]  }
  0x49   :  { %1174 = vmatprep.subr.bf16.mxu0 %v1665_v13  ;;  %v1756_v13 = vld [vmem:[%s2322_s1 + $0x400] ss:$8 sps:$4 sm:$0xff]  }
  0x4a   :  { %1054 = vmatmul.mubr.bf16.gmra.mrb[4].mxu1 %v1736_v31  ;;  %v1785_v31 = vld [vmem:[%s2322_s1 + $0x474] ss:$8 sps:$4 sm:$0xff]  }
  0x4b   :  { %1069 = vmatpush1.bf16.msra.mxu1 %v1660_v14  ;;  %1160 = vmatmul.mubr.bf16.gmra.mrb[4].mxu0 %v1740_v33  ;;  %v1761_v14 = vld [vmem:[%s2322_s1 + $0x414] ss:$8 sps:$4 sm:$0xff]   ;;  %v1786_v33 = vld [vmem:[%s2323_s0 + $0x20] ss:$36 sps:$4 sm:$0xff]  }
  0x4c   :  { %1175 = vmatpush1.bf16.msra.mxu0 %v1663_v15  ;;  %1070 = vmatprep.subr.bf16.mxu1 %v1668_v16  ;;  %v1762_v15 = vld [vmem:[%s2323_s0 + $0x54] ss:$36 sps:$4 sm:$0xff]   ;;  %v1764_v16 = vld [vmem:[%s2323_s0 + $0x64] ss:$36 sps:$4 sm:$0xff]  }
  0x4d   :  { %1176 = vmatprep.subr.bf16.mxu0 %v1671_v17  ;;  %1096 = vmatprep.mubr.bf16.mxu1 %v1752_v41  ;;  %v1759_v17 = vld [vmem:[%s2322_s1 + $0x410] ss:$8 sps:$4 sm:$0xff]  }
  0x4e   :  { %1202 = vmatprep.mubr.bf16.mxu0 %v1755_v43 }
  0x4f   :  { %1071 = vmatpush1.bf16.msra.mxu1 %v1666_v18  ;;  %v1770_v18 = vld [vmem:[%s2322_s1 + $0x424] ss:$8 sps:$4 sm:$0xff]  }
  0x50   :  { %1177 = vmatpush1.bf16.msra.mxu0 %v1669_v19  ;;  %1072 = vmatprep.subr.bf16.mxu1 %v1674_v20  ;;  %v1766_v19 = vld [vmem:[%s2323_s0 + $0x50] ss:$36 sps:$4 sm:$0xff]   ;;  %v1767_v20 = vld [vmem:[%s2323_s0 + $0x60] ss:$36 sps:$4 sm:$0xff]  }
  0x51   :  { %1178 = vmatprep.subr.bf16.mxu0 %v1677_v21  ;;  %v1768_v21 = vld [vmem:[%s2322_s1 + $0x420] ss:$8 sps:$4 sm:$0xff]  }
  0x53   :  { %1073 = vmatpush1.bf16.msra.mxu1 %v1672_v22  ;;  %v1773_v22 = vld [vmem:[%s2322_s1 + $0x434] ss:$8 sps:$4 sm:$0xff]  }
  0x54   :  { %1179 = vmatpush1.bf16.msra.mxu0 %v1675_v23  ;;  %1074 = vmatprep.subr.bf16.mxu1 %v1680_v24  ;;  %v1771_v23 = vld [vmem:[%s2322_s1 + $0x430] ss:$8 sps:$4 sm:$0xff]   ;;  %v1776_v24 = vld [vmem:[%s2322_s1 + $0x444] ss:$8 sps:$4 sm:$0xff]  }
  0x55   :  { %1180 = vmatprep.subr.bf16.mxu0 %v1683_v25  ;;  %v1788_v25 = vmov 0  }
  0x57   :  { %1075 = vmatpush1.bf16.msra.mxu1 %v1678_v26  ;;  %v1774_v26 = vld [vmem:[%s2322_s1 + $0x440] ss:$8 sps:$4 sm:$0xff]  }
  0x58   :  { %1181 = vmatpush1.bf16.msra.mxu0 %v1681_v27  ;;  %1076 = vmatprep.subr.bf16.mxu1 %v1686_v28  ;;  %v1779_v27 = vld [vmem:[%s2322_s1 + $0x454] ss:$8 sps:$4 sm:$0xff]   ;;  %v1777_v28 = vld [vmem:[%s2322_s1 + $0x450] ss:$8 sps:$4 sm:$0xff]  }
  0x59   :  { %1182 = vmatprep.subr.bf16.mxu0 %v1689_v32  ;;  %v1783_v32 = vld [vmem:[%s2322_s1 + $0x470] ss:$8 sps:$4 sm:$0xff]  }
  0x5b   :  { %1077 = vmatpush1.bf16.msra.mxu1 %v1684_v34  ;;  %v1787_v34 = vld [vmem:[%s2323_s0 + $0x68] ss:$36 sps:$4 sm:$0xff]  }
  0x5c   :  { %1183 = vmatpush1.bf16.msra.mxu0 %v1687_v35  ;;  %1078 = vmatprep.subr.bf16.mxu1 %v1692_v36 }
  0x5d   :  { %1184 = vmatprep.subr.bf16.mxu0 %v1695_v37 }
  0x5f   :  { %1079 = vmatpush1.bf16.msra.mxu1 %v1690_v38 }
  0x60   :  { %1185 = vmatpush1.bf16.msra.mxu0 %v1693_v39  ;;  %1080 = vmatprep.subr.bf16.mxu1 %v1698_v40 }
  0x61   :  { %1186 = vmatprep.subr.bf16.mxu0 %v1701_v42 }
  0x63   :  { %1081 = vmatpush1.bf16.msra.mxu1 %v1696_v44 }
  0x64   :  { %1187 = vmatpush1.bf16.msra.mxu0 %v1699_v45  ;;  %1082 = vmatprep.subr.bf16.mxu1 %v1704_v46 }
  0x65   :  { %1188 = vmatprep.subr.bf16.mxu0 %v1707_v47 }
  0x67   :  { %1083 = vmatpush1.bf16.msra.mxu1 %v1702_v48 }
  0x68   :  { %1189 = vmatpush1.bf16.msra.mxu0 %v1705_v49  ;;  %1084 = vmatprep.subr.bf16.mxu1 %v1710_v50 }
  0x69   :  { %1190 = vmatprep.subr.bf16.mxu0 %v1713_v51  ;;  %v1305_v51 = vlaneseq }
  0x6b   :  { %1085 = vmatpush1.bf16.msra.mxu1 %v1708_v52  ;;  %v1306_v52 = vshrl.u32 %v1305_v51, 7 }
  0x6c   :  { %1191 = vmatpush1.bf16.msra.mxu0 %v1711_v53  ;;  %1086 = vmatprep.subr.bf16.mxu1 %v1716_v54  ;;  %v1303_v54 = vld [vmem:[%s2324_s2] sm:$0x3] }
  0x6d   :  { %1192 = vmatprep.subr.bf16.mxu0 %v1719_v55  ;;  %v1307_v53 = vsub.s32 0, %v1306_v52  ;;  %v1311_v55 = vsub.s32 1, %v1306_v52 }
  0x6f   :  { %1087 = vmatpush1.bf16.msra.mxu1 %v1714_v56  ;;  %v1308_v56 = vrot.slane %v1303_v54, %v1307_v53 }
  0x70   :  { %1193 = vmatpush1.bf16.msra.mxu0 %v1717_v57  ;;  %1088 = vmatprep.subr.bf16.mxu1 %v1722_v58 }
  0x71   :  { %1194 = vmatprep.subr.bf16.mxu0 %v1725_v59  ;;  %v1312_v59 = vrot.slane %v1303_v54, %v1311_v55 }
  0x73   :  { %1089 = vmatpush1.bf16.msra.mxu1 %v1720_v60 }
  0x74   :  { %1195 = vmatpush1.bf16.msra.mxu0 %v1723_v61  ;;  %1090 = vmatprep.subr.bf16.mxu1 %v1728_v62 }
  0x75   :  { %1196 = vmatprep.subr.bf16.mxu0 %v1731_v63 }
  0x77   :  { %1091 = vmatpush1.bf16.msra.mxu1 %v1726_v0 }
  0x78   :  { %1197 = vmatpush1.bf16.msra.mxu0 %v1729_v1  ;;  %1092 = vmatprep.subr.bf16.mxu1 %v1739_v2 }
  0x79   :  { %1198 = vmatprep.subr.bf16.mxu0 %v1743_v3 }
  0x7b   :  { %1093 = vmatpush1.bf16.msra.mxu1 %v1737_v4 }
  0x7c   :  { %1199 = vmatpush1.bf16.msra.mxu0 %v1741_v5  ;;  %1094 = vmatprep.subr.bf16.mxu1 %v1746_v6 }
  0x7d   :  { %1200 = vmatprep.subr.bf16.mxu0 %v1749_v7 }
  0x7f   :  { %1095 = vmatpush1.bf16.msra.mxu1 %v1744_v8 }
  0x80   :  { %1201 = vmatpush1.bf16.msra.mxu0 %v1747_v9  ;;  %1497 = vmatprep.subr.bf16.mxu1 %v1758_v10 }
  0x81   :  { %1223 = vmatprep.subr.bf16.mxu0 %v1758_v10 }
  0x82   :  { %1097 = vmatmul.mubr.bf16.vlgmr.msra.gmra.mrb[0].mxu1 %v1750_v11 }
  0x83   :  { %1203 = vmatmul.mubr.bf16.vlgmr.msra.gmra.mrb[0].mxu0 %v1753_v12  ;;  %1505 = vmatpush1.bf16.msra.mxu1 %v1756_v13 }
  0x84   :  { %1224 = vmatpush1.bf16.msra.mxu0 %v1756_v13  ;;  %1498 = vmatprep.subr.bf16.mxu1 %v1761_v14 }
  0x85   :  { %1225 = vmatprep.subr.bf16.mxu0 %v1761_v14  ;;  %1106 = vmatprep.mubr.bf16.mxu1 %v1762_v15 }
  0x86   :  { %1212 = vmatprep.mubr.bf16.mxu0 %v1764_v16 }
  0x87   :  { %1506 = vmatpush1.bf16.msra.mxu1 %v1759_v17 }
  0x88   :  { %1226 = vmatpush1.bf16.msra.mxu0 %v1759_v17  ;;  %1499 = vmatprep.subr.bf16.mxu1 %v1770_v18 }
  0x89   :  { %1227 = vmatprep.subr.bf16.mxu0 %v1770_v18 }
  0x8a   :  { %1107 = vmatmul.mubr.bf16.gmra.mrb[4].mxu1 %v1766_v19 }
  0x8b   :  { %1213 = vmatmul.mubr.bf16.gmra.mrb[4].mxu0 %v1767_v20  ;;  %1507 = vmatpush1.bf16.msra.mxu1 %v1768_v21 }
  0x8c   :  { %1228 = vmatpush1.bf16.msra.mxu0 %v1768_v21  ;;  %1500 = vmatprep.subr.bf16.mxu1 %v1773_v22 }
  0x8d   :  { %1229 = vmatprep.subr.bf16.mxu0 %v1773_v22  ;;  %1255 = vmatprep.mubr.bf16.mxu0 %v1788_v25 }
  0x8e   :  { %1265 = vmatprep.mubr.bf16.mxu1 %v1788_v25 }
  0x8f   :  { %1508 = vmatpush1.bf16.msra.mxu1 %v1771_v23 }
  0x90   :  { %1230 = vmatpush1.bf16.msra.mxu0 %v1771_v23  ;;  %1501 = vmatprep.subr.bf16.mxu1 %v1776_v24 }
  0x91   :  { %1231 = vmatprep.subr.bf16.mxu0 %v1776_v24 }
  0x93   :  { %1509 = vmatpush1.bf16.msra.mxu1 %v1774_v26 }
  0x94   :  { %1232 = vmatpush1.bf16.msra.mxu0 %v1774_v26  ;;  %1502 = vmatprep.subr.bf16.mxu1 %v1779_v27 }
  0x95   :  { %1233 = vmatprep.subr.bf16.mxu0 %v1779_v27 }
  0x97   :  { %1510 = vmatpush1.bf16.msra.mxu1 %v1777_v28 }
  0x98   :  { %1234 = vmatpush1.bf16.msra.mxu0 %v1777_v28  ;;  %1503 = vmatprep.subr.bf16.mxu1 %v1782_v29 }
  0x99   :  { %1235 = vmatprep.subr.bf16.mxu0 %v1782_v29 }
  0x9b   :  { %1511 = vmatpush1.bf16.msra.mxu1 %v1780_v30 }
  0x9c   :  { %1236 = vmatpush1.bf16.msra.mxu0 %v1780_v30  ;;  %1504 = vmatprep.subr.bf16.mxu1 %v1785_v31 }
  0x9d   :  { %1237 = vmatprep.subr.bf16.mxu0 %v1785_v31 }
  0x9f   :  { %1512 = vmatpush1.bf16.msra.mxu1 %v1783_v32 }
  0xa0   :  { %1238 = vmatpush1.bf16.msra.mxu0 %v1783_v32 }
  0xa2   :  { %1266 = vmatmul.mubr.bf16.vlgmr.msra.gmra.mrb[8].mxu1 %v1787_v34 }
  0xa3   :  { %1256 = vmatmul.mubr.bf16.vlgmr.msra.gmra.mrb[0].mxu0 %v1786_v33 }
 0x155   :  { %v1098_v35 = vpop.f32.mrb[0].mxu1 }
 0x156   :  { %v1100_v36 = vpop.f32.mrb[1].mxu1 }
 0x157   :  { %v1102_v37 = vpop.f32.mrb[2].mxu1 }
 0x158   :  { %v1104_v38 = vpop.f32.mrb[3].mxu1 }
 0x15d   :  { %v1108_v39 = vpop.f32.mrb[4].mxu1 }
 0x15e   :  { %v1214_v40 = vpop.f32.mrb[4].mxu0  ;;  %v1110_v42 = vpop.f32.mrb[5].mxu1 }
 0x15f   :  { %v1517_v41 = vadd.f32 %v1214_v40, %v1108_v39  ;;  %v1216_v43 = vpop.f32.mrb[5].mxu0  ;;  %v1112_v45 = vpop.f32.mrb[6].mxu1 }
 0x160   :  { %v1519_v44 = vadd.f32 %v1216_v43, %v1110_v42  ;;  %v1218_v46 = vpop.f32.mrb[6].mxu0  ;;  %v1114_v48 = vpop.f32.mrb[7].mxu1 }
 0x161   :  { %v1521_v47 = vadd.f32 %v1218_v46, %v1112_v45  ;;  %v1220_v49 = vpop.f32.mrb[7].mxu0 }
 0x162   :  { %v1523_v50 = vadd.f32 %v1220_v49, %v1114_v48 }
 0x175   :  { %v1267_v58 = vpop.f32.mrb[8].mxu1 }
 0x176   :  { %v1257_v57 = vpop.f32.mrb[0].mxu0  ;;  %v1518_v61 = vadd.f32 %v1517_v41, %v1267_v58  ;;  %v1269_v63 = vpop.f32.mrb[9].mxu1 }
 0x177   :  { %v1513_v60 = vadd.f32 %v1257_v57, %v1098_v35  ;;  %v1259_v62 = vpop.f32.mrb[1].mxu0  ;;  %v1520_v1 = vadd.f32 %v1519_v44, %v1269_v63  ;;  %v1271_v3 = vpop.f32.mrb[10].mxu1 }
 0x178   :  { %v1514_v0 = vadd.f32 %v1259_v62, %v1100_v36  ;;  %v1261_v2 = vpop.f32.mrb[2].mxu0  ;;  %v1319_v5 = vadd.f32 %v1518_v61, %v1308_v56  ;;  %v1522_v7 = vadd.f32 %v1521_v47, %v1271_v3  ;;  %v1273_v9 = vpop.f32.mrb[11].mxu1 }
 0x179   :  { %v1315_v4 = vadd.f32 %v1513_v60, %v1308_v56  ;;  %v1515_v6 = vadd.f32 %v1261_v2, %v1102_v37  ;;  %v1263_v8 = vpop.f32.mrb[3].mxu0  ;;  %v1320_v11 = vadd.f32 %v1520_v1, %v1312_v59  ;;  %v1524_v13 = vadd.f32 %v1523_v50, %v1273_v9 }
 0x17a   :  { %v1316_v10 = vadd.f32 %v1514_v0, %v1312_v59  ;;  %v1516_v12 = vadd.f32 %v1263_v8, %v1104_v38  ;;  %1327 = vst [vmem:[%s2325_s3 + $0x20] sm:$0xff] %v1319_v5  ;;  %v1321_v15 = vadd.f32 %v1522_v7, %v1308_v56 }
 0x17b   :  { %1323 = vst [vmem:[%s2325_s3] sm:$0xff] %v1315_v4  ;;  %v1317_v14 = vadd.f32 %v1515_v6, %v1308_v56  ;;  %1328 = vst [vmem:[%s2325_s3 + $0x28] sm:$0xff] %v1320_v11  ;;  %v1322_v17 = vadd.f32 %v1524_v13, %v1312_v59 }
 0x17c   :  { %1324 = vst [vmem:[%s2325_s3 + $0x8] sm:$0xff] %v1316_v10  ;;  %v1318_v16 = vadd.f32 %v1516_v12, %v1312_v59  ;;  %1329 = vst [vmem:[%s2325_s3 + $0x30] sm:$0xff] %v1321_v15 }
 0x17d   :  { %1325 = vst [vmem:[%s2325_s3 + $0x10] sm:$0xff] %v1317_v14  ;;  %1330 = vst [vmem:[%s2325_s3 + $0x38] sm:$0xff] %v1322_v17 }
 0x17e   :  { %1326 = vst [vmem:[%s2325_s3 + $0x18] sm:$0xff] %v1318_v16 }

// kernel: generator_forward.78
= control target key start
LH: loop header
LB: loop body
LE: loop exit
PB: predicated region body
PF: predicated region fallthrough
CT: control target
= control target key end

     0   :  { %s496_s12 = smov 0   ;;  %s498_s13 = smov 0   ;;  %s535_s0 = inlined_call_operand.vmem [shape: f32[2,16,256], index: 0, kind: input, shape index: {}]   ;;  %s536_s1 = inlined_call_operand.vmem [shape: f32[2,1,256], index: 1, kind: input, shape index: {}]   ;;  %s537_s2 = inlined_call_operand.vmem [shape: f32[2,1,256], index: 2, kind: input, shape index: {}]   ;;  %s538_s3 = inlined_call_operand.vmem [shape: f32[2,16,256], index: 3, kind: output, shape index: {}]  }
   0x1   :  { %s500_s14 = smov 0  }
   0x2 LB: > { %s25_s15 = sadd.s32 1, %s470_s13  ;;  %p417_p0 = scmp.ge.s32.totalorder %s474_s14, 1  ;;  %s474_s14 = sphi %s500_s14, %s13_s14   ;;  %s470_s13 = sphi %s498_s13, %s540_s13   ;;  %s466_s12 = sphi %s496_s12, %s539_s12  }
   0x3   : > { %p27_p1 = scmp.ge.s32.totalorder %s25_s15, 2  ;;  %p177_p2 = scmp.lt.s32.totalorder %s474_s14, 3 }
   0x5   : > { %s542_s15 = smov (%p27_p1, %s25_s15), 0  ;;  %p178_p3 = pnand %p417_p0, %p177_p2 }
   0x6   : > { %p220_p4 = scmp.lt.s32.totalorder (!%p178_p3), %s466_s12, 1  ;;  %v255_v0 = vlaneseq (!%p178_p3) }
   0x7   : > { %181 = sbr.rel (%p178_p3) target bundleno = 29 (0x1d), region = 32 }
   0x8   : > { %v256_v1 = vshrl.u32 (!%p178_p3), %v255_v0, 7 }
   0xa   : > { %v257_v2 = vsub.s32 (!%p178_p3), 0, %v256_v1  ;;  %v261_v3 = vsub.s32 (!%p178_p3), 1, %v256_v1 }
   0xe   : > { %s544_s12 = smov (!%p220_p4, %s466_s12), 1 }
   0xf   : > { %s426_s16 = sshll.u32 %s544_s12, 5  ;;  %s420_s17 = sshll.u32 %s544_s12, 1 }
  0x10   : > { %s228_s20 = scalar_lea.vmem %s535_s0, %s426_s16  ;;  %s233_s23 = scalar_lea.vmem %s536_s1, %s420_s17 }
  0x11   : > { %s237_s26 = scalar_lea.vmem %s537_s2, %s420_s17  ;;  %v249_v4 = vld [vmem:[%s228_s20] sm:$0xff]  ;;  %v250_v6 = vld [vmem:[%s228_s20 + $0x8] sm:$0xff]  ;;  %v251_v10 = vld [vmem:[%s228_s20 + $0x10] sm:$0xff]  ;;  %s247_s29 = scalar_lea.vmem %s538_s3, %s426_s16 }
  0x12   : > { %v253_v5 = vld [vmem:[%s233_s23] sm:$0x3]  ;;  %v252_v11 = vld [vmem:[%s228_s20 + $0x18] sm:$0xff] }
  0x13   : > { %v258_v7 = vrot.slane %v253_v5, %v257_v2  ;;  %v269_v8 = vld [vmem:[%s237_s26] sm:$0x3]  ;;  %v262_v9 = vrot.slane %v253_v5, %v261_v3 }
  0x14   : > { %v274_v12 = vrot.slane %v269_v8, %v257_v2  ;;  %v278_v13 = vrot.slane %v269_v8, %v261_v3 }
  0x15   : > { %v265_v14 = vsub.f32 %v249_v4, %v258_v7  ;;  %v266_v15 = vsub.f32 %v250_v6, %v262_v9  ;;  %v267_v16 = vsub.f32 %v251_v10, %v258_v7  ;;  %v268_v17 = vsub.f32 %v252_v11, %v262_v9 }
  0x17   : > { %v281_v18 = vmul.f32 %v274_v12, %v265_v14  ;;  %v282_v19 = vmul.f32 %v278_v13, %v266_v15  ;;  %v283_v20 = vmul.f32 %v274_v12, %v267_v16  ;;  %v284_v21 = vmul.f32 %v278_v13, %v268_v17 }
  0x19   : > { %v285_v22 = vmax.f32 %v281_v18, 0.0  ;;  %v286_v23 = vmax.f32 %v282_v19, 0.0  ;;  %v287_v24 = vmax.f32 %v283_v20, 0.0  ;;  %v288_v25 = vmax.f32 %v284_v21, 0.0 }
  0x1b   : > { %289 = vst [vmem:[%s247_s29] sm:$0xff] %v285_v22  ;;  %290 = vst [vmem:[%s247_s29 + $0x8] sm:$0xff] %v286_v23 }
  0x1c   : > { %291 = vst [vmem:[%s247_s29 + $0x10] sm:$0xff] %v287_v24  ;;  %292 = vst [vmem:[%s247_s29 + $0x18] sm:$0xff] %v288_v25 }
  0x1d PF: > { %s13_s14 = sadd.s32 1, %s474_s14   ;;  %s539_s12 = smov %s470_s13 }
  0x1e   : > { %p10_p5 = scmp.ge.s32.totalorder %s13_s14, 4   ;;  %s540_s13 = smov %s542_s15 }
  0x20   :  { %12 = sbr.rel (!%p10_p5) target bundleno = 2 (0x2), region = 68 }

// kernel: generator_forward.84
= control target key start
LH: loop header
LB: loop body
LE: loop exit
PB: predicated region body
PF: predicated region fallthrough
CT: control target
= control target key end

     0   :  { %s595_s15 = smov 0   ;;  %s597_s16 = smov 0   ;;  %s642_s0 = inlined_call_operand.vmem [shape: f32[2,16,256], index: 0, kind: input, shape index: {}]   ;;  %s643_s1 = inlined_call_operand.vmem [shape: f32[2,1,256], index: 1, kind: input, shape index: {}]   ;;  %s644_s2 = inlined_call_operand.vmem [shape: f32[2,1,256], index: 2, kind: input, shape index: {}]   ;;  %s645_s3 = inlined_call_operand.vmem [shape: f32[2,16,256], index: 3, kind: input, shape index: {}]   ;;  %s646_s4 = inlined_call_operand.vmem [shape: f32[2,16,256], index: 4, kind: output, shape index: {}]  }
   0x1   :  { %s599_s17 = smov 0  }
   0x2 LB: > { %s26_s18 = sadd.s32 1, %s564_s16  ;;  %p508_p0 = scmp.ge.s32.totalorder %s568_s17, 1  ;;  %s568_s17 = sphi %s599_s17, %s14_s17   ;;  %s564_s16 = sphi %s597_s16, %s648_s16   ;;  %s560_s15 = sphi %s595_s15, %s647_s15  }
   0x3   : > { %p28_p1 = scmp.ge.s32.totalorder %s26_s18, 2  ;;  %p220_p2 = scmp.lt.s32.totalorder %s568_s17, 3 }
   0x5   : > { %s650_s18 = smov (%p28_p1, %s26_s18), 0  ;;  %p221_p3 = pnand %p508_p0, %p220_p2 }
   0x6   : > { %p275_p4 = scmp.lt.s32.totalorder (!%p221_p3), %s560_s15, 1  ;;  %v321_v0 = vlaneseq (!%p221_p3) }
   0x7   : > { %224 = sbr.rel (%p221_p3) target bundleno = 29 (0x1d), region = 36 }
   0x8   : > { %v322_v1 = vshrl.u32 (!%p221_p3), %v321_v0, 7 }
   0xa   : > { %v323_v2 = vsub.s32 (!%p221_p3), 0, %v322_v1  ;;  %v327_v3 = vsub.s32 (!%p221_p3), 1, %v322_v1 }
   0xe   : > { %s652_s15 = smov (!%p275_p4, %s560_s15), 1 }
   0xf   : > { %s613_s19 = sshll.u32 %s652_s15, 5  ;;  %s511_s20 = sshll.u32 %s652_s15, 1 }
  0x10   : > { %s283_s23 = scalar_lea.vmem %s642_s0, %s613_s19  ;;  %s288_s26 = scalar_lea.vmem %s643_s1, %s511_s20 }
  0x11   : > { %s292_s29 = scalar_lea.vmem %s644_s2, %s511_s20  ;;  %s302_s6 = scalar_lea.vmem %s645_s3, %s613_s19  ;;  %v315_v4 = vld [vmem:[%s283_s23] sm:$0xff]  ;;  %v316_v6 = vld [vmem:[%s283_s23 + $0x8] sm:$0xff]  ;;  %v317_v12 = vld [vmem:[%s283_s23 + $0x10] sm:$0xff] }
  0x12   : > { %v319_v5 = vld [vmem:[%s288_s26] sm:$0x3]  ;;  %v318_v13 = vld [vmem:[%s283_s23 + $0x18] sm:$0xff]  ;;  %v352_v19 = vld [vmem:[%s302_s6 + $0x8] sm:$0xff]  ;;  %s313_s9 = scalar_lea.vmem %s646_s4, %s613_s19 }
  0x13   : > { %v324_v7 = vrot.slane %v319_v5, %v323_v2  ;;  %v335_v8 = vld [vmem:[%s292_s29] sm:$0x3]  ;;  %v328_v9 = vrot.slane %v319_v5, %v327_v3  ;;  %v353_v20 = vld [vmem:[%s302_s6 + $0x10] sm:$0xff]  ;;  %v354_v21 = vld [vmem:[%s302_s6 + $0x18] sm:$0xff] }
  0x14   : > { %v340_v10 = vrot.slane %v335_v8, %v323_v2  ;;  %v344_v11 = vrot.slane %v335_v8, %v327_v3  ;;  %v351_v15 = vld [vmem:[%s302_s6] sm:$0xff] }
  0x15   : > { %v331_v14 = vsub.f32 %v315_v4, %v324_v7  ;;  %v332_v16 = vsub.f32 %v316_v6, %v328_v9  ;;  %v333_v17 = vsub.f32 %v317_v12, %v324_v7  ;;  %v334_v18 = vsub.f32 %v318_v13, %v328_v9 }
  0x17   : > { %v347_v22 = vmul.f32 %v340_v10, %v331_v14  ;;  %v348_v23 = vmul.f32 %v344_v11, %v332_v16  ;;  %v349_v24 = vmul.f32 %v340_v10, %v333_v17  ;;  %v350_v25 = vmul.f32 %v344_v11, %v334_v18 }
  0x19   : > { %v355_v26 = vadd.f32 %v351_v15, %v347_v22  ;;  %v356_v27 = vadd.f32 %v352_v19, %v348_v23  ;;  %v357_v28 = vadd.f32 %v353_v20, %v349_v24  ;;  %v358_v29 = vadd.f32 %v354_v21, %v350_v25 }
  0x1b   : > { %359 = vst [vmem:[%s313_s9] sm:$0xff] %v355_v26  ;;  %360 = vst [vmem:[%s313_s9 + $0x8] sm:$0xff] %v356_v27 }
  0x1c   : > { %361 = vst [vmem:[%s313_s9 + $0x10] sm:$0xff] %v357_v28  ;;  %362 = vst [vmem:[%s313_s9 + $0x18] sm:$0xff] %v358_v29 }
  0x1d PF: > { %s14_s17 = sadd.s32 1, %s568_s17   ;;  %s647_s15 = smov %s564_s16 }
  0x1e   : > { %p11_p5 = scmp.ge.s32.totalorder %s14_s17, 4   ;;  %s648_s16 = smov %s650_s18 }
  0x20   :  { %13 = sbr.rel (!%p11_p5) target bundleno = 2 (0x2), region = 75 }

// kernel: generator_forward.79
= control target key start
LH: loop header
LB: loop body
LE: loop exit
PB: predicated region body
PF: predicated region fallthrough
CT: control target
= control target key end

     0   :  { %s2365_s12 = smov 0   ;;  %s2367_s13 = smov 0   ;;  %s2669_s0 = inlined_call_operand.vmem [shape: bf16[32,2304], index: 0, kind: input, shape index: {}]   ;;  %s2670_s1 = inlined_call_operand.vmem [shape: bf16[2304,256], index: 1, kind: input, shape index: {}]   ;;  %s2671_s2 = inlined_call_operand.vmem [shape: f32[1,256], index: 2, kind: input, shape index: {}]   ;;  %s2672_s3 = inlined_call_operand.vmem [shape: f32[32,256], index: 3, kind: output, shape index: {}]  }
   0x1   :  { %s2369_s14 = smov 0   ;;  %s2371_s15 = smov 0  }
   0x2   :  { %s2373_s16 = smov 0  }
   0x3 LB: > { %s25_s17 = sadd.s32 1, %s2337_s15  ;;  %p48_p1 = scmp.ne.s32.totalorder %s2329_s13, %s2325_s12  ;;  %s2341_s16 = sphi %s2373_s16, %s13_s16   ;;  %s2337_s15 = sphi %s2371_s15, %s2676_s15   ;;  %s2333_s14 = sphi %s2369_s14, %s2675_s14   ;;  %s2329_s13 = sphi %s2367_s13, %s2674_s13   ;;  %s2325_s12 = sphi %s2365_s12, %s2673_s12  }
   0x4   : > { %p26_p0 = scmp.ge.s32.totalorder %s25_s17, 2  ;;  %p49_p2 = scmp.eq.s32.totalorder %s2341_s16, 0 }
   0x5   : > { %s41_s19 = sadd.s32 1, %s2329_s13  ;;  %p1786_p5 = scmp.ge.s32.totalorder %s2341_s16, 2 }
   0x6   : > { %s2678_s17 = smov (%p26_p0, %s25_s17), 0  ;;  %p50_p3 = por %p49_p2, %p48_p1 }
   0x7   : > { %s37_s18 = ssub.s32 %s2337_s15, %s2678_s17  ;;  %164 = sbr.rel (%p1786_p5) target bundleno = 29 (0x1d), region = 20 }
   0x8   : > { %p39_p4 = scmp.eq.s32.totalorder %s37_s18, 0 }
   0xa   : > { %s2400_s20 = scalar_select %p39_p4, %s2329_s13, %s41_s19  }
   0xe   : > { %167 = sbr.rel (!%p50_p3) target bundleno = 29 (0x1d), region = 24  ;;  %s169_s21 = sand.u32 (%p50_p3), 1, %s2329_s13  }
   0xf   : > { %s1967_s22 = smul.u32 (%p50_p3), 36, %s2337_s15 }
  0x10   : > { %s2017_s23 = smul.u32 (%p50_p3), 144, %s169_s21 }
  0x11   : > { %s2408_s26 = scalar_lea.vmem (%p50_p3), %s2669_s0, %s1967_s22 }
  0x12   : > { %v192_v0 = vld [vmem:[%s2408_s26] sm:$0xff] (%p50_p3)  ;;  %v194_v1 = vld [vmem:[%s2408_s26 + $0x8] sm:$0xff] (%p50_p3)  ;;  %v196_v2 = vld [vmem:[%s2408_s26 + $0x10] sm:$0xff] (%p50_p3)  ;;  %s2413_s27 = scalar_lea.vmem (%p50_p3), [#allocation3], %s2017_s23 }
  0x13   : > { %193 = vst [vmem:[%s2413_s27] sm:$0xff] (%p50_p3), %v192_v0  ;;  %195 = vst [vmem:[%s2413_s27 + $0x8] sm:$0xff] (%p50_p3), %v194_v1  ;;  %v198_v3 = vld [vmem:[%s2408_s26 + $0x18] sm:$0xff] (%p50_p3)  ;;  %v200_v4 = vld [vmem:[%s2408_s26 + $0x48] sm:$0xff] (%p50_p3) }
  0x14   : > { %197 = vst [vmem:[%s2413_s27 + $0x10] sm:$0xff] (%p50_p3), %v196_v2  ;;  %v202_v5 = vld [vmem:[%s2408_s26 + $0x50] sm:$0xff] (%p50_p3)  ;;  %199 = vst [vmem:[%s2413_s27 + $0x18] sm:$0xff] (%p50_p3), %v198_v3  ;;  %v204_v6 = vld [vmem:[%s2408_s26 + $0x58] sm:$0xff] (%p50_p3) }
  0x15   : > { %201 = vst [vmem:[%s2413_s27 + $0x24] sm:$0xff] %v200_v4  ;;  %203 = vst [vmem:[%s2413_s27 + $0x2c] sm:$0xff] %v202_v5  ;;  %v206_v7 = vld [vmem:[%s2408_s26 + $0x60] sm:$0xff]  ;;  %v208_v8 = vld [vmem:[%s2408_s26 + $0x90] sm:$0xff] }
  0x16   : > { %205 = vst [vmem:[%s2413_s27 + $0x34] sm:$0xff] %v204_v6  ;;  %207 = vst [vmem:[%s2413_s27 + $0x3c] sm:$0xff] %v206_v7  ;;  %v210_v9 = vld [vmem:[%s2408_s26 + $0x98] sm:$0xff]  ;;  %v212_v10 = vld [vmem:[%s2408_s26 + $0xa0] sm:$0xff] }
  0x17   : > { %209 = vst [vmem:[%s2413_s27 + $0x48] sm:$0xff] %v208_v8  ;;  %v214_v11 = vld [vmem:[%s2408_s26 + $0xa8] sm:$0xff]  ;;  %211 = vst [vmem:[%s2413_s27 + $0x50] sm:$0xff] %v210_v9  ;;  %v216_v12 = vld [vmem:[%s2408_s26 + $0xd8] sm:$0xff] }
  0x18   : > { %213 = vst [vmem:[%s2413_s27 + $0x58] sm:$0xff] %v212_v10  ;;  %215 = vst [vmem:[%s2413_s27 + $0x60] sm:$0xff] %v214_v11  ;;  %v218_v13 = vld [vmem:[%s2408_s26 + $0xe0] sm:$0xff]  ;;  %v220_v14 = vld [vmem:[%s2408_s26 + $0xe8] sm:$0xff] }
  0x19   : > { %217 = vst [vmem:[%s2413_s27 + $0x6c] sm:$0xff] %v216_v12  ;;  %219 = vst [vmem:[%s2413_s27 + $0x74] sm:$0xff] %v218_v13  ;;  %v222_v15 = vld [vmem:[%s2408_s26 + $0xf0] sm:$0xff]  ;;  %v1788_v16 = vld [vmem:[%s2408_s26 + $0x20] sm:$0xf] }
  0x1a   : > { %221 = vst [vmem:[%s2413_s27 + $0x7c] sm:$0xff] %v220_v14  ;;  %v1790_v17 = vld [vmem:[%s2408_s26 + $0x68] sm:$0xf]  ;;  %223 = vst [vmem:[%s2413_s27 + $0x84] sm:$0xff] %v222_v15  ;;  %v1792_v18 = vld [vmem:[%s2408_s26 + $0xb0] sm:$0xf] }
  0x1b   : > { %1789 = vst [vmem:[%s2413_s27 + $0x20] sm:$0xf] %v1788_v16  ;;  %1791 = vst [vmem:[%s2413_s27 + $0x44] sm:$0xf] %v1790_v17  ;;  %v1794_v19 = vld [vmem:[%s2408_s26 + $0xf8] sm:$0xf] }
  0x1c   : > { %1793 = vst [vmem:[%s2413_s27 + $0x68] sm:$0xf] %v1792_v18  ;;  %1795 = vst [vmem:[%s2413_s27 + $0x8c] sm:$0xf] %v1794_v19 }
  0x1d PF: > { %p1796_p6 = scmp.ge.s32.totalorder %s2341_s16, 1  ;;  %p258_p7 = scmp.lt.s32.totalorder %s2341_s16, 3 }
  0x1f   : > { %p259_p8 = pnand %p1796_p6, %p258_p7 }
  0x20   : > { %s265_s28 = sand.u32 (!%p259_p8), 1, %s2325_s12   ;;  %s309_s29 = smul.u32 (!%p259_p8), 144, %s2333_s14 }
  0x21   : > { %262 = sbr.rel (%p259_p8) target bundleno = 439 (0x1b7), region = 54  ;;  %p1799_p10 = scmp.ne.s32.totalorder (!%p259_p8), %s2333_s14, 0 }
  0x22   : > { %s2018_s30 = smul.u32 (!%p259_p8), 144, %s265_s28  ;;  %p311_p9 = scmp.lt.s32.totalorder (!%p259_p8), %s309_s29, 287 }
  0x24   : > { %s2461_s8 = scalar_lea.vmem (!%p259_p8), [#allocation3], %s2018_s30 }
  0x28   : > { %s2680_s29 = smov (!%p311_p9, %s309_s29), 287  ;;  %342 = sbr.rel (%p1799_p10) target bundleno = 47 (0x2f), region = 62 }
  0x29   : > { %s1968_s4 = sshll.u32 %s2680_s29, 3  ;;  %v2343_v20 = vmov (!%p1799_p10), 0.0  }
  0x2a   : > { %s2459_s7 = scalar_lea.vmem %s2670_s1, %s1968_s4  ;;  %343 = vst [vmem:[#allocation2] sm:$0xff] (!%p1799_p10), %v2343_v20  ;;  %344 = vst [vmem:[#allocation2 + $0x8] sm:$0xff] (!%p1799_p10), %v2343_v20 }
  0x2b   : > { %345 = vst [vmem:[#allocation2 + $0x10] sm:$0xff] (!%p1799_p10), %v2343_v20  ;;  %346 = vst [vmem:[#allocation2 + $0x18] sm:$0xff] (!%p1799_p10), %v2343_v20 }
  0x2c   : > { %347 = vst [vmem:[#allocation2 + $0x20] sm:$0xff] (!%p1799_p10), %v2343_v20  ;;  %348 = vst [vmem:[#allocation2 + $0x28] sm:$0xff] (!%p1799_p10), %v2343_v20 }
  0x2d   : > { %349 = vst [vmem:[#allocation2 + $0x30] sm:$0xff] (!%p1799_p10), %v2343_v20  ;;  %350 = vst [vmem:[#allocation2 + $0x38] sm:$0xff] (!%p1799_p10), %v2343_v20 }
  0x2f PF: > { %v2061_v21 = vld [vmem:[%s2459_s7 + $0x4] ss:$8 sps:$4 sm:$0xff]   ;;  %v2065_v23 = vld [vmem:[%s2459_s7] ss:$8 sps:$4 sm:$0xff]   ;;  %v2067_v25 = vld [vmem:[%s2459_s7 + $0x14] ss:$8 sps:$4 sm:$0xff]  }
  0x30   : > { %v2063_v22 = vld [vmem:[%s2459_s7 + $0x204] ss:$8 sps:$4 sm:$0xff]   ;;  %1335 = vmatprep.subr.bf16.mxu1 %v2061_v21  ;;  %v2066_v24 = vld [vmem:[%s2459_s7 + $0x200] ss:$8 sps:$4 sm:$0xff]   ;;  %v2069_v26 = vld [vmem:[%s2459_s7 + $0x214] ss:$8 sps:$4 sm:$0xff]  }
  0x31   : > { %1441 = vmatprep.subr.bf16.mxu0 %v2063_v22  ;;  %1336 = vmatpush1.bf16.msra.mxu1 %v2065_v23  ;;  %v2071_v27 = vld [vmem:[%s2459_s7 + $0x10] ss:$8 sps:$4 sm:$0xff]   ;;  %v2073_v29 = vld [vmem:[%s2459_s7 + $0x24] ss:$8 sps:$4 sm:$0xff]   ;;  %v2077_v31 = vld [vmem:[%s2459_s7 + $0x20] ss:$8 sps:$4 sm:$0xff]  }
  0x32   : > { %1442 = vmatpush1.bf16.msra.mxu0 %v2066_v24  ;;  %1337 = vmatprep.subr.bf16.mxu1 %v2067_v25  ;;  %v2072_v28 = vld [vmem:[%s2459_s7 + $0x210] ss:$8 sps:$4 sm:$0xff]   ;;  %v2075_v30 = vld [vmem:[%s2459_s7 + $0x224] ss:$8 sps:$4 sm:$0xff]   ;;  %v2078_v32 = vld [vmem:[%s2459_s7 + $0x220] ss:$8 sps:$4 sm:$0xff]  }
  0x33   : > { %1443 = vmatprep.subr.bf16.mxu0 %v2069_v26  ;;  %v2079_v33 = vld [vmem:[%s2459_s7 + $0x34] ss:$8 sps:$4 sm:$0xff]   ;;  %v2083_v35 = vld [vmem:[%s2459_s7 + $0x30] ss:$8 sps:$4 sm:$0xff]   ;;  %v2085_v37 = vld [vmem:[%s2459_s7 + $0x44] ss:$8 sps:$4 sm:$0xff]  }
  0x34   : > { %v2081_v34 = vld [vmem:[%s2459_s7 + $0x234] ss:$8 sps:$4 sm:$0xff]   ;;  %v2084_v36 = vld [vmem:[%s2459_s7 + $0x230] ss:$8 sps:$4 sm:$0xff]   ;;  %v2087_v38 = vld [vmem:[%s2459_s7 + $0x244] ss:$8 sps:$4 sm:$0xff]  }
  0x35   : > { %1338 = vmatpush1.bf16.msra.mxu1 %v2071_v27  ;;  %v2089_v39 = vld [vmem:[%s2459_s7 + $0x40] ss:$8 sps:$4 sm:$0xff]   ;;  %v2091_v41 = vld [vmem:[%s2459_s7 + $0x54] ss:$8 sps:$4 sm:$0xff]   ;;  %v2095_v43 = vld [vmem:[%s2459_s7 + $0x50] ss:$8 sps:$4 sm:$0xff]  }
  0x36   : > { %1444 = vmatpush1.bf16.msra.mxu0 %v2072_v28  ;;  %1339 = vmatprep.subr.bf16.mxu1 %v2073_v29  ;;  %v2090_v40 = vld [vmem:[%s2459_s7 + $0x240] ss:$8 sps:$4 sm:$0xff]   ;;  %v2093_v42 = vld [vmem:[%s2459_s7 + $0x254] ss:$8 sps:$4 sm:$0xff]   ;;  %v2096_v44 = vld [vmem:[%s2459_s7 + $0x250] ss:$8 sps:$4 sm:$0xff]  }
  0x37   : > { %1445 = vmatprep.subr.bf16.mxu0 %v2075_v30  ;;  %v2097_v45 = vld [vmem:[%s2459_s7 + $0x64] ss:$8 sps:$4 sm:$0xff]   ;;  %v2101_v47 = vld [vmem:[%s2459_s7 + $0x60] ss:$8 sps:$4 sm:$0xff]   ;;  %v2103_v49 = vld [vmem:[%s2459_s7 + $0x74] ss:$8 sps:$4 sm:$0xff]  }
  0x38   : > { %v2099_v46 = vld [vmem:[%s2459_s7 + $0x264] ss:$8 sps:$4 sm:$0xff]   ;;  %v2102_v48 = vld [vmem:[%s2459_s7 + $0x260] ss:$8 sps:$4 sm:$0xff]   ;;  %v2105_v50 = vld [vmem:[%s2459_s7 + $0x274] ss:$8 sps:$4 sm:$0xff]  }
  0x39   : > { %1340 = vmatpush1.bf16.msra.mxu1 %v2077_v31  ;;  %v2107_v51 = vld [vmem:[%s2459_s7 + $0x70] ss:$8 sps:$4 sm:$0xff]   ;;  %v2109_v53 = vld [vmem:[%s2459_s7 + $0x84] ss:$8 sps:$4 sm:$0xff]   ;;  %v2113_v55 = vld [vmem:[%s2459_s7 + $0x80] ss:$8 sps:$4 sm:$0xff]  }
  0x3a   : > { %1446 = vmatpush1.bf16.msra.mxu0 %v2078_v32  ;;  %1341 = vmatprep.subr.bf16.mxu1 %v2079_v33  ;;  %v2108_v52 = vld [vmem:[%s2459_s7 + $0x270] ss:$8 sps:$4 sm:$0xff]   ;;  %v2111_v54 = vld [vmem:[%s2459_s7 + $0x284] ss:$8 sps:$4 sm:$0xff]   ;;  %v2114_v56 = vld [vmem:[%s2459_s7 + $0x280] ss:$8 sps:$4 sm:$0xff]  }
  0x3b   : > { %1447 = vmatprep.subr.bf16.mxu0 %v2081_v34  ;;  %v2115_v57 = vld [vmem:[%s2459_s7 + $0x94] ss:$8 sps:$4 sm:$0xff]   ;;  %v2119_v59 = vld [vmem:[%s2459_s7 + $0x90] ss:$8 sps:$4 sm:$0xff]   ;;  %v2121_v61 = vld [vmem:[%s2459_s7 + $0xa4] ss:$8 sps:$4 sm:$0xff]  }
  0x3c   : > { %v2117_v58 = vld [vmem:[%s2459_s7 + $0x294] ss:$8 sps:$4 sm:$0xff]   ;;  %v2120_v60 = vld [vmem:[%s2459_s7 + $0x290] ss:$8 sps:$4 sm:$0xff]   ;;  %v2123_v62 = vld [vmem:[%s2459_s7 + $0x2a4] ss:$8 sps:$4 sm:$0xff]  }
  0x3d   : > { %1342 = vmatpush1.bf16.msra.mxu1 %v2083_v35  ;;  %v2125_v63 = vld [vmem:[%s2459_s7 + $0xa0] ss:$8 sps:$4 sm:$0xff]   ;;  %v2127_v1 = vld [vmem:[%s2459_s7 + $0xb4] ss:$8 sps:$4 sm:$0xff]   ;;  %v2131_v3 = vld [vmem:[%s2459_s7 + $0xb0] ss:$8 sps:$4 sm:$0xff]  }
  0x3e   : > { %1448 = vmatpush1.bf16.msra.mxu0 %v2084_v36  ;;  %1343 = vmatprep.subr.bf16.mxu1 %v2085_v37  ;;  %v2126_v0 = vld [vmem:[%s2459_s7 + $0x2a0] ss:$8 sps:$4 sm:$0xff]   ;;  %v2129_v2 = vld [vmem:[%s2459_s7 + $0x2b4] ss:$8 sps:$4 sm:$0xff]   ;;  %v2132_v4 = vld [vmem:[%s2459_s7 + $0x2b0] ss:$8 sps:$4 sm:$0xff]  }
  0x3f   : > { %1449 = vmatprep.subr.bf16.mxu0 %v2087_v38  ;;  %v2159_v5 = vld [vmem:[%s2461_s8 + $0x4] ss:$36 sps:$4 sm:$0xff]   ;;  %v2165_v8 = vld [vmem:[%s2461_s8 + $0x14] ss:$36 sps:$4 sm:$0xff]   ;;  %p1962_p11 = scmp.ne.s32.totalorder %s2333_s14, 1 }
  0x40   : > { %v2133_v6 = vld [vmem:[%s2459_s7 + $0xc4] ss:$8 sps:$4 sm:$0xff]   ;;  %1367 = vmatprep.mubr.bf16.mxu1 %v2159_v5  ;;  %v2137_v9 = vld [vmem:[%s2459_s7 + $0xc0] ss:$8 sps:$4 sm:$0xff]   ;;  %v2139_v11 = vld [vmem:[%s2459_s7 + $0xd4] ss:$8 sps:$4 sm:$0xff]   ;;  %1473 = vmatprep.mubr.bf16.mxu0 %v2165_v8 }
  0x41   : > { %1344 = vmatpush1.bf16.msra.mxu1 %v2089_v39  ;;  %v2135_v7 = vld [vmem:[%s2459_s7 + $0x2c4] ss:$8 sps:$4 sm:$0xff]   ;;  %v2138_v10 = vld [vmem:[%s2459_s7 + $0x2c0] ss:$8 sps:$4 sm:$0xff]   ;;  %v2141_v12 = vld [vmem:[%s2459_s7 + $0x2d4] ss:$8 sps:$4 sm:$0xff]  }
  0x42   : > { %1450 = vmatpush1.bf16.msra.mxu0 %v2090_v40  ;;  %1345 = vmatprep.subr.bf16.mxu1 %v2091_v41  ;;  %v2143_v13 = vld [vmem:[%s2459_s7 + $0xd0] ss:$8 sps:$4 sm:$0xff]   ;;  %v2145_v15 = vld [vmem:[%s2459_s7 + $0xe4] ss:$8 sps:$4 sm:$0xff]   ;;  %v2149_v17 = vld [vmem:[%s2459_s7 + $0xe0] ss:$8 sps:$4 sm:$0xff]  }
  0x43   : > { %1451 = vmatprep.subr.bf16.mxu0 %v2093_v42  ;;  %v2144_v14 = vld [vmem:[%s2459_s7 + $0x2d0] ss:$8 sps:$4 sm:$0xff]   ;;  %v2147_v16 = vld [vmem:[%s2459_s7 + $0x2e4] ss:$8 sps:$4 sm:$0xff]   ;;  %v2150_v18 = vld [vmem:[%s2459_s7 + $0x2e0] ss:$8 sps:$4 sm:$0xff]  }
  0x44   : > { %v2151_v19 = vld [vmem:[%s2459_s7 + $0xf4] ss:$8 sps:$4 sm:$0xff]   ;;  %v2155_v21 = vld [vmem:[%s2459_s7 + $0xf0] ss:$8 sps:$4 sm:$0xff]   ;;  %v2162_v23 = vld [vmem:[%s2459_s7 + $0x104] ss:$8 sps:$4 sm:$0xff]  }
  0x45   : > { %1346 = vmatpush1.bf16.msra.mxu1 %v2095_v43  ;;  %v2153_v20 = vld [vmem:[%s2459_s7 + $0x2f4] ss:$8 sps:$4 sm:$0xff]   ;;  %v2156_v22 = vld [vmem:[%s2459_s7 + $0x2f0] ss:$8 sps:$4 sm:$0xff]   ;;  %v2168_v24 = vld [vmem:[%s2459_s7 + $0x304] ss:$8 sps:$4 sm:$0xff]  }
  0x46   : > { %1452 = vmatpush1.bf16.msra.mxu0 %v2096_v44  ;;  %1347 = vmatprep.subr.bf16.mxu1 %v2097_v45  ;;  %v2157_v25 = vld [vmem:[%s2461_s8] ss:$36 sps:$4 sm:$0xff]   ;;  %v2163_v27 = vld [vmem:[%s2461_s8 + $0x10] ss:$36 sps:$4 sm:$0xff]  }
  0x47   : > { %1453 = vmatprep.subr.bf16.mxu0 %v2099_v46  ;;  %v2160_v26 = vld [vmem:[%s2459_s7 + $0x100] ss:$8 sps:$4 sm:$0xff]   ;;  %v2171_v29 = vld [vmem:[%s2459_s7 + $0x114] ss:$8 sps:$4 sm:$0xff]   ;;  %v2169_v31 = vld [vmem:[%s2459_s7 + $0x110] ss:$8 sps:$4 sm:$0xff]  }
  0x48   : > { %v2166_v28 = vld [vmem:[%s2459_s7 + $0x300] ss:$8 sps:$4 sm:$0xff]   ;;  %v2174_v30 = vld [vmem:[%s2459_s7 + $0x314] ss:$8 sps:$4 sm:$0xff]   ;;  %v2172_v32 = vld [vmem:[%s2459_s7 + $0x310] ss:$8 sps:$4 sm:$0xff]  }
  0x49   : > { %1348 = vmatpush1.bf16.msra.mxu1 %v2101_v47  ;;  %v2177_v33 = vld [vmem:[%s2459_s7 + $0x124] ss:$8 sps:$4 sm:$0xff]   ;;  %v2175_v35 = vld [vmem:[%s2459_s7 + $0x120] ss:$8 sps:$4 sm:$0xff]   ;;  %v2183_v37 = vld [vmem:[%s2459_s7 + $0x134] ss:$8 sps:$4 sm:$0xff]  }
  0x4a   : > { %1454 = vmatpush1.bf16.msra.mxu0 %v2102_v48  ;;  %1349 = vmatprep.subr.bf16.mxu1 %v2103_v49  ;;  %v2180_v34 = vld [vmem:[%s2459_s7 + $0x324] ss:$8 sps:$4 sm:$0xff]   ;;  %v2178_v36 = vld [vmem:[%s2459_s7 + $0x320] ss:$8 sps:$4 sm:$0xff]   ;;  %v2186_v38 = vld [vmem:[%s2459_s7 + $0x334] ss:$8 sps:$4 sm:$0xff]  }
  0x4b   : > { %1455 = vmatprep.subr.bf16.mxu0 %v2105_v50  ;;  %v2181_v39 = vld [vmem:[%s2459_s7 + $0x130] ss:$8 sps:$4 sm:$0xff]   ;;  %v2189_v41 = vld [vmem:[%s2459_s7 + $0x144] ss:$8 sps:$4 sm:$0xff]   ;;  %v2187_v43 = vld [vmem:[%s2459_s7 + $0x140] ss:$8 sps:$4 sm:$0xff]  }
  0x4c   : > { %v2184_v40 = vld [vmem:[%s2459_s7 + $0x330] ss:$8 sps:$4 sm:$0xff]   ;;  %v2192_v42 = vld [vmem:[%s2459_s7 + $0x344] ss:$8 sps:$4 sm:$0xff]   ;;  %v2190_v44 = vld [vmem:[%s2459_s7 + $0x340] ss:$8 sps:$4 sm:$0xff]  }
  0x4d   : > { %1350 = vmatpush1.bf16.msra.mxu1 %v2107_v51  ;;  %v2195_v45 = vld [vmem:[%s2459_s7 + $0x154] ss:$8 sps:$4 sm:$0xff]   ;;  %v2193_v47 = vld [vmem:[%s2459_s7 + $0x150] ss:$8 sps:$4 sm:$0xff]   ;;  %v2201_v49 = vld [vmem:[%s2459_s7 + $0x164] ss:$8 sps:$4 sm:$0xff]  }
  0x4e   : > { %1456 = vmatpush1.bf16.msra.mxu0 %v2108_v52  ;;  %1351 = vmatprep.subr.bf16.mxu1 %v2109_v53  ;;  %v2198_v46 = vld [vmem:[%s2459_s7 + $0x354] ss:$8 sps:$4 sm:$0xff]   ;;  %v2196_v48 = vld [vmem:[%s2459_s7 + $0x350] ss:$8 sps:$4 sm:$0xff]   ;;  %v2204_v53 = vld [vmem:[%s2459_s7 + $0x364] ss:$8 sps:$4 sm:$0xff]  }
  0x4f   : > { %1457 = vmatprep.subr.bf16.mxu0 %v2111_v54  ;;  %v2247_v50 = vld [vmem:[%s2461_s8 + $0x4c] ss:$36 sps:$4 sm:$0xff]   ;;  %v2249_v51 = vld [vmem:[%s2461_s8 + $0x5c] ss:$36 sps:$4 sm:$0xff]  }
  0x50   : > { %v2251_v52 = vld [vmem:[%s2461_s8 + $0x48] ss:$36 sps:$4 sm:$0xff]   ;;  %v2255_v54 = vld [vmem:[%s2461_s8 + $0x58] ss:$36 sps:$4 sm:$0xff]  }
  0x51   : > { %1352 = vmatpush1.bf16.msra.mxu1 %v2113_v55  ;;  %v2199_v55 = vld [vmem:[%s2459_s7 + $0x160] ss:$8 sps:$4 sm:$0xff]   ;;  %v2217_v5 = vld [vmem:[%s2459_s7 + $0x190] ss:$8 sps:$4 sm:$0xff]   ;;  %v2228_v8 = vld [vmem:[%s2459_s7 + $0x3a4] ss:$8 sps:$4 sm:$0xff]  }
  0x52   : > { %1458 = vmatpush1.bf16.msra.mxu0 %v2114_v56  ;;  %1353 = vmatprep.subr.bf16.mxu1 %v2115_v57  ;;  %v2202_v56 = vld [vmem:[%s2459_s7 + $0x360] ss:$8 sps:$4 sm:$0xff]   ;;  %v2207_v57 = vld [vmem:[%s2459_s7 + $0x174] ss:$8 sps:$4 sm:$0xff]  }
  0x53   : > { %1459 = vmatprep.subr.bf16.mxu0 %v2117_v58  ;;  %v2210_v58 = vld [vmem:[%s2459_s7 + $0x374] ss:$8 sps:$4 sm:$0xff]  }
  0x55   : > { %1354 = vmatpush1.bf16.msra.mxu1 %v2119_v59  ;;  %v2205_v59 = vld [vmem:[%s2459_s7 + $0x170] ss:$8 sps:$4 sm:$0xff]  }
  0x56   : > { %1460 = vmatpush1.bf16.msra.mxu0 %v2120_v60  ;;  %1355 = vmatprep.subr.bf16.mxu1 %v2121_v61  ;;  %v2208_v60 = vld [vmem:[%s2459_s7 + $0x370] ss:$8 sps:$4 sm:$0xff]   ;;  %v2213_v61 = vld [vmem:[%s2459_s7 + $0x184] ss:$8 sps:$4 sm:$0xff]  }
  0x57   : > { %1461 = vmatprep.subr.bf16.mxu0 %v2123_v62  ;;  %v2267_v62 = vld [vmem:[%s2461_s8 + $0xc] ss:$36 sps:$4 sm:$0xff]  }
  0x59   : > { %1356 = vmatpush1.bf16.msra.mxu1 %v2125_v63  ;;  %v2216_v63 = vld [vmem:[%s2459_s7 + $0x384] ss:$8 sps:$4 sm:$0xff]  }
  0x5a   : > { %1462 = vmatpush1.bf16.msra.mxu0 %v2126_v0  ;;  %1357 = vmatprep.subr.bf16.mxu1 %v2127_v1  ;;  %v2270_v0 = vld [vmem:[%s2461_s8 + $0x1c] ss:$36 sps:$4 sm:$0xff]  }
  0x5b   : > { %1463 = vmatprep.subr.bf16.mxu0 %v2129_v2  ;;  %v2211_v1 = vld [vmem:[%s2459_s7 + $0x180] ss:$8 sps:$4 sm:$0xff]  }
  0x5c   : > { %v2214_v2 = vld [vmem:[%s2459_s7 + $0x380] ss:$8 sps:$4 sm:$0xff]  }
  0x5d   : > { %1358 = vmatpush1.bf16.msra.mxu1 %v2131_v3  ;;  %v2219_v3 = vld [vmem:[%s2459_s7 + $0x194] ss:$8 sps:$4 sm:$0xff]  }
  0x5e   : > { %1464 = vmatpush1.bf16.msra.mxu0 %v2132_v4  ;;  %1359 = vmatprep.subr.bf16.mxu1 %v2133_v6  ;;  %v2222_v4 = vld [vmem:[%s2459_s7 + $0x394] ss:$8 sps:$4 sm:$0xff]   ;;  %v2220_v6 = vld [vmem:[%s2459_s7 + $0x390] ss:$8 sps:$4 sm:$0xff]  }
  0x5f   : > { %1465 = vmatprep.subr.bf16.mxu0 %v2135_v7  ;;  %v2225_v7 = vld [vmem:[%s2459_s7 + $0x1a4] ss:$8 sps:$4 sm:$0xff]  }
  0x61   : > { %1360 = vmatpush1.bf16.msra.mxu1 %v2137_v9  ;;  %v2223_v9 = vld [vmem:[%s2459_s7 + $0x1a0] ss:$8 sps:$4 sm:$0xff]  }
  0x62   : > { %1466 = vmatpush1.bf16.msra.mxu0 %v2138_v10  ;;  %1361 = vmatprep.subr.bf16.mxu1 %v2139_v11  ;;  %v2226_v10 = vld [vmem:[%s2459_s7 + $0x3a0] ss:$8 sps:$4 sm:$0xff]   ;;  %v2231_v11 = vld [vmem:[%s2459_s7 + $0x1b4] ss:$8 sps:$4 sm:$0xff]  }
  0x63   : > { %1467 = vmatprep.subr.bf16.mxu0 %v2141_v12  ;;  %v2234_v12 = vld [vmem:[%s2459_s7 + $0x3b4] ss:$8 sps:$4 sm:$0xff]  }
  0x65   : > { %1362 = vmatpush1.bf16.msra.mxu1 %v2143_v13  ;;  %v2229_v13 = vld [vmem:[%s2459_s7 + $0x1b0] ss:$8 sps:$4 sm:$0xff]  }
  0x66   : > { %1468 = vmatpush1.bf16.msra.mxu0 %v2144_v14  ;;  %1363 = vmatprep.subr.bf16.mxu1 %v2145_v15  ;;  %v2232_v14 = vld [vmem:[%s2459_s7 + $0x3b0] ss:$8 sps:$4 sm:$0xff]   ;;  %v2237_v15 = vld [vmem:[%s2459_s7 + $0x1c4] ss:$8 sps:$4 sm:$0xff]  }
  0x67   : > { %1469 = vmatprep.subr.bf16.mxu0 %v2147_v16  ;;  %v2240_v16 = vld [vmem:[%s2459_s7 + $0x3c4] ss:$8 sps:$4 sm:$0xff]  }
  0x69   : > { %1364 = vmatpush1.bf16.msra.mxu1 %v2149_v17  ;;  %v2235_v17 = vld [vmem:[%s2459_s7 + $0x1c0] ss:$8 sps:$4 sm:$0xff]  }
  0x6a   : > { %1470 = vmatpush1.bf16.msra.mxu0 %v2150_v18  ;;  %1365 = vmatprep.subr.bf16.mxu1 %v2151_v19  ;;  %v2238_v18 = vld [vmem:[%s2459_s7 + $0x3c0] ss:$8 sps:$4 sm:$0xff]   ;;  %v2243_v19 = vld [vmem:[%s2459_s7 + $0x1d4] ss:$8 sps:$4 sm:$0xff]  }
  0x6b   : > { %1471 = vmatprep.subr.bf16.mxu0 %v2153_v20  ;;  %v2246_v20 = vld [vmem:[%s2459_s7 + $0x3d4] ss:$8 sps:$4 sm:$0xff]  }
  0x6d   : > { %1366 = vmatpush1.bf16.msra.mxu1 %v2155_v21  ;;  %v2241_v21 = vld [vmem:[%s2459_s7 + $0x1d0] ss:$8 sps:$4 sm:$0xff]  }
  0x6e   : > { %1472 = vmatpush1.bf16.msra.mxu0 %v2156_v22  ;;  %1388 = vmatprep.subr.bf16.mxu1 %v2162_v23  ;;  %v2244_v22 = vld [vmem:[%s2459_s7 + $0x3d0] ss:$8 sps:$4 sm:$0xff]   ;;  %v2254_v23 = vld [vmem:[%s2459_s7 + $0x1e4] ss:$8 sps:$4 sm:$0xff]  }
  0x6f   : > { %1494 = vmatprep.subr.bf16.mxu0 %v2168_v24  ;;  %v2258_v24 = vld [vmem:[%s2459_s7 + $0x3e4] ss:$8 sps:$4 sm:$0xff]  }
  0x70   : > { %1368 = vmatmul.mubr.bf16.vlgmr.msra.gmra.mrb[0].mxu1 %v2157_v25  ;;  %v2252_v25 = vld [vmem:[%s2459_s7 + $0x1e0] ss:$8 sps:$4 sm:$0xff]  }
  0x71   : > { %1474 = vmatmul.mubr.bf16.vlgmr.msra.gmra.mrb[0].mxu0 %v2163_v27  ;;  %1389 = vmatpush1.bf16.msra.mxu1 %v2160_v26  ;;  %v2256_v26 = vld [vmem:[%s2459_s7 + $0x3e0] ss:$8 sps:$4 sm:$0xff]   ;;  %v2261_v27 = vld [vmem:[%s2459_s7 + $0x1f4] ss:$8 sps:$4 sm:$0xff]  }
  0x72   : > { %1495 = vmatpush1.bf16.msra.mxu0 %v2166_v28  ;;  %1390 = vmatprep.subr.bf16.mxu1 %v2171_v29  ;;  %v2264_v28 = vld [vmem:[%s2459_s7 + $0x3f4] ss:$8 sps:$4 sm:$0xff]   ;;  %v2259_v29 = vld [vmem:[%s2459_s7 + $0x1f0] ss:$8 sps:$4 sm:$0xff]  }
  0x73   : > { %1496 = vmatprep.subr.bf16.mxu0 %v2174_v30  ;;  %1377 = vmatprep.mubr.bf16.mxu1 %v2247_v50  ;;  %v2262_v30 = vld [vmem:[%s2459_s7 + $0x3f0] ss:$8 sps:$4 sm:$0xff]   ;;  %v2297_v50 = vld [vmem:[%s2459_s7 + $0x464] ss:$8 sps:$4 sm:$0xff]  }
  0x74   : > { %1483 = vmatprep.mubr.bf16.mxu0 %v2249_v51  ;;  %v2295_v51 = vld [vmem:[%s2459_s7 + $0x460] ss:$8 sps:$4 sm:$0xff]  }
  0x75   : > { %1391 = vmatpush1.bf16.msra.mxu1 %v2169_v31  ;;  %v2273_v31 = vld [vmem:[%s2459_s7 + $0x404] ss:$8 sps:$4 sm:$0xff]  }
  0x76   : > { %1497 = vmatpush1.bf16.msra.mxu0 %v2172_v32  ;;  %1392 = vmatprep.subr.bf16.mxu1 %v2177_v33  ;;  %v2265_v32 = vld [vmem:[%s2461_s8 + $0x8] ss:$36 sps:$4 sm:$0xff]   ;;  %v2268_v33 = vld [vmem:[%s2461_s8 + $0x18] ss:$36 sps:$4 sm:$0xff]  }
  0x77   : > { %1498 = vmatprep.subr.bf16.mxu0 %v2180_v34  ;;  %v2271_v34 = vld [vmem:[%s2459_s7 + $0x400] ss:$8 sps:$4 sm:$0xff]  }
  0x78   : > { %1378 = vmatmul.mubr.bf16.gmra.mrb[4].mxu1 %v2251_v52  ;;  %v2300_v52 = vld [vmem:[%s2459_s7 + $0x474] ss:$8 sps:$4 sm:$0xff]  }
  0x79   : > { %1393 = vmatpush1.bf16.msra.mxu1 %v2175_v35  ;;  %1484 = vmatmul.mubr.bf16.gmra.mrb[4].mxu0 %v2255_v54  ;;  %v2276_v35 = vld [vmem:[%s2459_s7 + $0x414] ss:$8 sps:$4 sm:$0xff]  }
  0x7a   : > { %1499 = vmatpush1.bf16.msra.mxu0 %v2178_v36  ;;  %1394 = vmatprep.subr.bf16.mxu1 %v2183_v37  ;;  %v2277_v36 = vld [vmem:[%s2461_s8 + $0x54] ss:$36 sps:$4 sm:$0xff]   ;;  %v2279_v37 = vld [vmem:[%s2461_s8 + $0x64] ss:$36 sps:$4 sm:$0xff]  }
  0x7b   : > { %1500 = vmatprep.subr.bf16.mxu0 %v2186_v38  ;;  %1420 = vmatprep.mubr.bf16.mxu1 %v2267_v62  ;;  %v2274_v38 = vld [vmem:[%s2459_s7 + $0x410] ss:$8 sps:$4 sm:$0xff]  }
  0x7c   : > { %1526 = vmatprep.mubr.bf16.mxu0 %v2270_v0  ;;  %v2301_v54 = vld [vmem:[%s2461_s8 + $0x20] ss:$36 sps:$4 sm:$0xff]  }
  0x7d   : > { %1395 = vmatpush1.bf16.msra.mxu1 %v2181_v39  ;;  %v2285_v39 = vld [vmem:[%s2459_s7 + $0x424] ss:$8 sps:$4 sm:$0xff]  }
  0x7e   : > { %1501 = vmatpush1.bf16.msra.mxu0 %v2184_v40  ;;  %1396 = vmatprep.subr.bf16.mxu1 %v2189_v41  ;;  %v2281_v40 = vld [vmem:[%s2461_s8 + $0x50] ss:$36 sps:$4 sm:$0xff]   ;;  %v2282_v41 = vld [vmem:[%s2461_s8 + $0x60] ss:$36 sps:$4 sm:$0xff]  }
  0x7f   : > { %1502 = vmatprep.subr.bf16.mxu0 %v2192_v42  ;;  %v2283_v42 = vld [vmem:[%s2459_s7 + $0x420] ss:$8 sps:$4 sm:$0xff]  }
  0x81   : > { %1397 = vmatpush1.bf16.msra.mxu1 %v2187_v43  ;;  %v2288_v43 = vld [vmem:[%s2459_s7 + $0x434] ss:$8 sps:$4 sm:$0xff]  }
  0x82   : > { %1503 = vmatpush1.bf16.msra.mxu0 %v2190_v44  ;;  %1398 = vmatprep.subr.bf16.mxu1 %v2195_v45  ;;  %v2286_v44 = vld [vmem:[%s2459_s7 + $0x430] ss:$8 sps:$4 sm:$0xff]   ;;  %v2291_v45 = vld [vmem:[%s2459_s7 + $0x444] ss:$8 sps:$4 sm:$0xff]  }
  0x83   : > { %1504 = vmatprep.subr.bf16.mxu0 %v2198_v46  ;;  %v2344_v46 = vmov 0  }
  0x85   : > { %1399 = vmatpush1.bf16.msra.mxu1 %v2193_v47  ;;  %v2289_v47 = vld [vmem:[%s2459_s7 + $0x440] ss:$8 sps:$4 sm:$0xff]  }
  0x86   : > { %1505 = vmatpush1.bf16.msra.mxu0 %v2196_v48  ;;  %1400 = vmatprep.subr.bf16.mxu1 %v2201_v49  ;;  %v2294_v48 = vld [vmem:[%s2459_s7 + $0x454] ss:$8 sps:$4 sm:$0xff]   ;;  %v2292_v49 = vld [vmem:[%s2459_s7 + $0x450] ss:$8 sps:$4 sm:$0xff]  }
  0x87   : > { %1506 = vmatprep.subr.bf16.mxu0 %v2204_v53  ;;  %v2298_v53 = vld [vmem:[%s2459_s7 + $0x470] ss:$8 sps:$4 sm:$0xff]  }
  0x89   : > { %1401 = vmatpush1.bf16.msra.mxu1 %v2199_v55  ;;  %v2302_v55 = vld [vmem:[%s2461_s8 + $0x68] ss:$36 sps:$4 sm:$0xff]  }
  0x8a   : > { %1507 = vmatpush1.bf16.msra.mxu0 %v2202_v56  ;;  %1402 = vmatprep.subr.bf16.mxu1 %v2207_v57 }
  0x8b   : > { %1508 = vmatprep.subr.bf16.mxu0 %v2210_v58 }
  0x8d   : > { %1403 = vmatpush1.bf16.msra.mxu1 %v2205_v59 }
  0x8e   : > { %1509 = vmatpush1.bf16.msra.mxu0 %v2208_v60  ;;  %1404 = vmatprep.subr.bf16.mxu1 %v2213_v61 }
  0x8f   : > { %1510 = vmatprep.subr.bf16.mxu0 %v2216_v63 }
  0x91   : > { %1405 = vmatpush1.bf16.msra.mxu1 %v2211_v1 }
  0x92   : > { %1511 = vmatpush1.bf16.msra.mxu0 %v2214_v2  ;;  %1406 = vmatprep.subr.bf16.mxu1 %v2219_v3 }
  0x93   : > { %1512 = vmatprep.subr.bf16.mxu0 %v2222_v4 }
  0x95   : > { %1407 = vmatpush1.bf16.msra.mxu1 %v2217_v5 }
  0x96   : > { %1513 = vmatpush1.bf16.msra.mxu0 %v2220_v6  ;;  %1408 = vmatprep.subr.bf16.mxu1 %v2225_v7 }
  0x97   : > { %1514 = vmatprep.subr.bf16.mxu0 %v2228_v8  ;;  %v351_v8 = vld [vmem:[#allocation2] sm:$0xff] }
  0x99   : > { %1409 = vmatpush1.bf16.msra.mxu1 %v2223_v9 }
  0x9a   : > { %1515 = vmatpush1.bf16.msra.mxu0 %v2226_v10  ;;  %1410 = vmatprep.subr.bf16.mxu1 %v2231_v11  ;;  %v355_v10 = vld [vmem:[#allocation2 + $0x20] sm:$0xff] }
  0x9b   : > { %1516 = vmatprep.subr.bf16.mxu0 %v2234_v12 }
  0x9d   : > { %1411 = vmatpush1.bf16.msra.mxu1 %v2229_v13 }
  0x9e   : > { %1517 = vmatpush1.bf16.msra.mxu0 %v2232_v14  ;;  %1412 = vmatprep.subr.bf16.mxu1 %v2237_v15  ;;  %v352_v14 = vld [vmem:[#allocation2 + $0x8] sm:$0xff] }
  0x9f   : > { %1518 = vmatprep.subr.bf16.mxu0 %v2240_v16  ;;  %v356_v16 = vld [vmem:[#allocation2 + $0x28] sm:$0xff] }
  0xa1   : > { %1413 = vmatpush1.bf16.msra.mxu1 %v2235_v17 }
  0xa2   : > { %1519 = vmatpush1.bf16.msra.mxu0 %v2238_v18  ;;  %1414 = vmatprep.subr.bf16.mxu1 %v2243_v19 }
  0xa3   : > { %1520 = vmatprep.subr.bf16.mxu0 %v2246_v20  ;;  %v353_v20 = vld [vmem:[#allocation2 + $0x10] sm:$0xff] }
  0xa5   : > { %1415 = vmatpush1.bf16.msra.mxu1 %v2241_v21 }
  0xa6   : > { %1521 = vmatpush1.bf16.msra.mxu0 %v2244_v22  ;;  %1416 = vmatprep.subr.bf16.mxu1 %v2254_v23  ;;  %v357_v22 = vld [vmem:[#allocation2 + $0x30] sm:$0xff] }
  0xa7   : > { %1522 = vmatprep.subr.bf16.mxu0 %v2258_v24 }
  0xa9   : > { %1417 = vmatpush1.bf16.msra.mxu1 %v2252_v25 }
  0xaa   : > { %1523 = vmatpush1.bf16.msra.mxu0 %v2256_v26  ;;  %1418 = vmatprep.subr.bf16.mxu1 %v2261_v27 }
  0xab   : > { %1524 = vmatprep.subr.bf16.mxu0 %v2264_v28  ;;  %v354_v28 = vld [vmem:[#allocation2 + $0x18] sm:$0xff] }
  0xad   : > { %1419 = vmatpush1.bf16.msra.mxu1 %v2259_v29 }
  0xae   : > { %1525 = vmatpush1.bf16.msra.mxu0 %v2262_v30  ;;  %1969 = vmatprep.subr.bf16.mxu1 %v2273_v31  ;;  %v358_v30 = vld [vmem:[#allocation2 + $0x38] sm:$0xff] }
  0xaf   : > { %1547 = vmatprep.subr.bf16.mxu0 %v2273_v31 }
  0xb0   : > { %1421 = vmatmul.mubr.bf16.vlgmr.msra.gmra.mrb[0].mxu1 %v2265_v32 }
  0xb1   : > { %1527 = vmatmul.mubr.bf16.vlgmr.msra.gmra.mrb[0].mxu0 %v2268_v33  ;;  %1977 = vmatpush1.bf16.msra.mxu1 %v2271_v34 }
  0xb2   : > { %1548 = vmatpush1.bf16.msra.mxu0 %v2271_v34  ;;  %1970 = vmatprep.subr.bf16.mxu1 %v2276_v35 }
  0xb3   : > { %1549 = vmatprep.subr.bf16.mxu0 %v2276_v35  ;;  %1430 = vmatprep.mubr.bf16.mxu1 %v2277_v36 }
  0xb4   : > { %1536 = vmatprep.mubr.bf16.mxu0 %v2279_v37 }
  0xb5   : > { %1978 = vmatpush1.bf16.msra.mxu1 %v2274_v38 }
  0xb6   : > { %1550 = vmatpush1.bf16.msra.mxu0 %v2274_v38  ;;  %1971 = vmatprep.subr.bf16.mxu1 %v2285_v39 }
  0xb7   : > { %1551 = vmatprep.subr.bf16.mxu0 %v2285_v39 }
  0xb8   : > { %1431 = vmatmul.mubr.bf16.gmra.mrb[4].mxu1 %v2281_v40  ;;  %v1630_v40 = vlaneseq (!%p1962_p11) }
  0xb9   : > { %1537 = vmatmul.mubr.bf16.gmra.mrb[4].mxu0 %v2282_v41  ;;  %1979 = vmatpush1.bf16.msra.mxu1 %v2283_v42 }
  0xba   : > { %1552 = vmatpush1.bf16.msra.mxu0 %v2283_v42  ;;  %1972 = vmatprep.subr.bf16.mxu1 %v2288_v43  ;;  %v1631_v41 = vshrl.u32 (!%p1962_p11), %v1630_v40, 7  ;;  %v1628_v42 = vld [vmem:[%s2671_s2] sm:$0x3] (!%p1962_p11) }
  0xbb   : > { %1553 = vmatprep.subr.bf16.mxu0 %v2288_v43  ;;  %1579 = vmatprep.mubr.bf16.mxu0 %v2344_v46 }
  0xbc   : > { %1589 = vmatprep.mubr.bf16.mxu1 %v2344_v46  ;;  %v1636_v46 = vsub.s32 (!%p1962_p11), 1, %v1631_v41 }
  0xbd   : > { %1980 = vmatpush1.bf16.msra.mxu1 %v2286_v44 }
  0xbe   : > { %1554 = vmatpush1.bf16.msra.mxu0 %v2286_v44  ;;  %1973 = vmatprep.subr.bf16.mxu1 %v2291_v45  ;;  %v1632_v44 = vsub.s32 (!%p1962_p11), 0, %v1631_v41 }
  0xbf   : > { %1555 = vmatprep.subr.bf16.mxu0 %v2291_v45 }
  0xc1   : > { %1981 = vmatpush1.bf16.msra.mxu1 %v2289_v47 }
  0xc2   : > { %1556 = vmatpush1.bf16.msra.mxu0 %v2289_v47  ;;  %1974 = vmatprep.subr.bf16.mxu1 %v2294_v48 }
  0xc3   : > { %1557 = vmatprep.subr.bf16.mxu0 %v2294_v48 }
  0xc5   : > { %1982 = vmatpush1.bf16.msra.mxu1 %v2292_v49 }
  0xc6   : > { %1558 = vmatpush1.bf16.msra.mxu0 %v2292_v49  ;;  %1975 = vmatprep.subr.bf16.mxu1 %v2297_v50 }
  0xc7   : > { %1559 = vmatprep.subr.bf16.mxu0 %v2297_v50  ;;  %v1633_v50 = vrot.slane (!%p1962_p11), %v1628_v42, %v1632_v44 }
  0xc9   : > { %1983 = vmatpush1.bf16.msra.mxu1 %v2295_v51 }
  0xca   : > { %1560 = vmatpush1.bf16.msra.mxu0 %v2295_v51  ;;  %1976 = vmatprep.subr.bf16.mxu1 %v2300_v52  ;;  %v1637_v51 = vrot.slane (!%p1962_p11), %v1628_v42, %v1636_v46 }
  0xcb   : > { %1561 = vmatprep.subr.bf16.mxu0 %v2300_v52 }
  0xcd   : > { %1984 = vmatpush1.bf16.msra.mxu1 %v2298_v53 }
  0xce   : > { %1562 = vmatpush1.bf16.msra.mxu0 %v2298_v53 }
  0xd0   : > { %1590 = vmatmul.mubr.bf16.vlgmr.msra.gmra.mrb[8].mxu1 %v2302_v55 }
  0xd1   : > { %1580 = vmatmul.mubr.bf16.vlgmr.msra.gmra.mrb[0].mxu0 %v2301_v54 }
 0x183   : > { %v1422_v56 = vpop.f32.mrb[0].mxu1 }
 0x184   : > { %v1424_v57 = vpop.f32.mrb[1].mxu1 }
 0x185   : > { %v1426_v58 = vpop.f32.mrb[2].mxu1 }
 0x186   : > { %v1428_v59 = vpop.f32.mrb[3].mxu1 }
 0x18b   : > { %v1432_v60 = vpop.f32.mrb[4].mxu1 }
 0x18c   : > { %v1538_v61 = vpop.f32.mrb[4].mxu0  ;;  %v1434_v63 = vpop.f32.mrb[5].mxu1 }
 0x18d   : > { %v1989_v62 = vadd.f32 %v1538_v61, %v1432_v60  ;;  %v1540_v0 = vpop.f32.mrb[5].mxu0  ;;  %v1436_v2 = vpop.f32.mrb[6].mxu1 }
 0x18e   : > { %v1991_v1 = vadd.f32 %v1540_v0, %v1434_v63  ;;  %v1542_v3 = vpop.f32.mrb[6].mxu0  ;;  %v1438_v5 = vpop.f32.mrb[7].mxu1 }
 0x18f   : > { %v1993_v4 = vadd.f32 %v1542_v3, %v1436_v2  ;;  %v1544_v6 = vpop.f32.mrb[7].mxu0 }
 0x190   : > { %v1995_v7 = vadd.f32 %v1544_v6, %v1438_v5 }
 0x1a3   : > { %v1591_v11 = vpop.f32.mrb[8].mxu1 }
 0x1a4   : > { %v1581_v9 = vpop.f32.mrb[0].mxu0  ;;  %v1990_v13 = vadd.f32 %v1989_v62, %v1591_v11  ;;  %v1593_v17 = vpop.f32.mrb[9].mxu1 }
 0x1a5   : > { %v1985_v12 = vadd.f32 %v1581_v9, %v1422_v56  ;;  %v1583_v15 = vpop.f32.mrb[1].mxu0  ;;  %v1992_v19 = vadd.f32 %v1991_v1, %v1593_v17  ;;  %v1595_v23 = vpop.f32.mrb[10].mxu1 }
 0x1a6   : > { %v1986_v18 = vadd.f32 %v1583_v15, %v1424_v57  ;;  %v1585_v21 = vpop.f32.mrb[2].mxu0  ;;  %v1604_v25 = vadd.f32 %v1990_v13, %v355_v10  ;;  %v1994_v27 = vadd.f32 %v1993_v4, %v1595_v23  ;;  %v1597_v31 = vpop.f32.mrb[11].mxu1  ;;  %1619 = sbr.rel (%p1962_p11) target bundleno = 439 (0x1b7), region = 66 }
 0x1a7   : > { %v1600_v24 = vadd.f32 %v1985_v12, %v351_v8  ;;  %v1987_v26 = vadd.f32 %v1585_v21, %v1426_v58  ;;  %v1587_v29 = vpop.f32.mrb[3].mxu0  ;;  %v1605_v33 = vadd.f32 %v1992_v19, %v356_v16  ;;  %v1996_v35 = vadd.f32 %v1995_v7, %v1597_v31 }
 0x1a8   : > { %v1601_v32 = vadd.f32 %v1986_v18, %v352_v14  ;;  %v1988_v34 = vadd.f32 %v1587_v29, %v1428_v59  ;;  %1612 = vst [vmem:[#allocation2 + $0x20] sm:$0xff] %v1604_v25  ;;  %v1606_v37 = vadd.f32 %v1994_v27, %v357_v22 }
 0x1a9   : > { %1608 = vst [vmem:[#allocation2] sm:$0xff] %v1600_v24  ;;  %v1602_v36 = vadd.f32 %v1987_v26, %v353_v20  ;;  %1613 = vst [vmem:[#allocation2 + $0x28] sm:$0xff] %v1605_v33  ;;  %v1607_v39 = vadd.f32 %v1996_v35, %v358_v30 }
 0x1aa   : > { %1609 = vst [vmem:[#allocation2 + $0x8] sm:$0xff] %v1601_v32  ;;  %v1603_v38 = vadd.f32 %v1988_v34, %v354_v28  ;;  %1614 = vst [vmem:[#allocation2 + $0x30] sm:$0xff] %v1606_v37 }
 0x1ab   : > { %1610 = vst [vmem:[#allocation2 + $0x10] sm:$0xff] %v1602_v36  ;;  %1615 = vst [vmem:[#allocation2 + $0x38] sm:$0xff] %v1607_v39 }
 0x1ac   : > { %1611 = vst [vmem:[#allocation2 + $0x18] sm:$0xff] %v1603_v38 }
 0x1af   : > { %v1624_v49 = vld [vmem:[#allocation2 + $0x20] sm:$0xff] }
 0x1b0   : > { %v1620_v43 = vld [vmem:[#allocation2] sm:$0xff]  ;;  %v1625_v52 = vld [vmem:[#allocation2 + $0x28] sm:$0xff]  ;;  %v1644_v59 = vadd.f32 %v1633_v50, %v1624_v49 }
 0x1b1   : > { %v1621_v45 = vld [vmem:[#allocation2 + $0x8] sm:$0xff]  ;;  %v1626_v53 = vld [vmem:[#allocation2 + $0x30] sm:$0xff]  ;;  %v1640_v55 = vadd.f32 %v1633_v50, %v1620_v43  ;;  %v1645_v60 = vadd.f32 %v1637_v51, %v1625_v52 }
 0x1b2   : > { %v1622_v47 = vld [vmem:[#allocation2 + $0x10] sm:$0xff]  ;;  %v1627_v54 = vld [vmem:[#allocation2 + $0x38] sm:$0xff]  ;;  %v1641_v56 = vadd.f32 %v1637_v51, %v1621_v45  ;;  %v1646_v61 = vadd.f32 %v1633_v50, %v1626_v53  ;;  %1652 = vst [vmem:[%s2672_s3 + $0x20] sm:$0xff] %v1644_v59 }
 0x1b3   : > { %v1623_v48 = vld [vmem:[#allocation2 + $0x18] sm:$0xff]  ;;  %v1642_v57 = vadd.f32 %v1633_v50, %v1622_v47  ;;  %v1647_v62 = vadd.f32 %v1637_v51, %v1627_v54  ;;  %1648 = vst [vmem:[%s2672_s3] sm:$0xff] %v1640_v55  ;;  %1653 = vst [vmem:[%s2672_s3 + $0x28] sm:$0xff] %v1645_v60 }
 0x1b4   : > { %v1643_v58 = vadd.f32 %v1637_v51, %v1623_v48  ;;  %1649 = vst [vmem:[%s2672_s3 + $0x8] sm:$0xff] %v1641_v56  ;;  %1654 = vst [vmem:[%s2672_s3 + $0x30] sm:$0xff] %v1646_v61 }
 0x1b5   : > { %1650 = vst [vmem:[%s2672_s3 + $0x10] sm:$0xff] %v1642_v57  ;;  %1655 = vst [vmem:[%s2672_s3 + $0x38] sm:$0xff] %v1647_v62 }
 0x1b6   : > { %1651 = vst [vmem:[%s2672_s3 + $0x18] sm:$0xff] %v1643_v58 }
 0x1b7 PF: > { %s13_s16 = sadd.s32 1, %s2341_s16   ;;  %s2673_s12 = smov %s2329_s13 }
 0x1b8   : > { %p10_p12 = scmp.ge.s32.totalorder %s13_s16, 4   ;;  %s2674_s13 = smov %s2400_s20 }
 0x1b9   : > { %s2675_s14 = smov %s2337_s15  ;;  %s2676_s15 = smov %s2678_s17 }
 0x1ba   :  { %12 = sbr.rel (!%p10_p12) target bundleno = 3 (0x3), region = 113 }

// kernel: generator_forward.133
= control target key start
LH: loop header
LB: loop body
LE: loop exit
PB: predicated region body
PF: predicated region fallthrough
CT: control target
= control target key end

     0   :  { %s1869_s12 = smov 0   ;;  %s1871_s13 = smov 0   ;;  %s2089_s0 = inlined_call_operand.vmem [shape: bf16[32,2304], index: 0, kind: input, shape index: {}]   ;;  %s2090_s1 = inlined_call_operand.vmem [shape: bf16[2304,128], index: 1, kind: input, shape index: {}]   ;;  %s2091_s2 = inlined_call_operand.vmem [shape: f32[1,128], index: 2, kind: input, shape index: {}]   ;;  %s2092_s3 = inlined_call_operand.vmem [shape: f32[32,128], index: 3, kind: output, shape index: {}]  }
   0x1   :  { %s1873_s14 = smov 0   ;;  %s1875_s15 = smov 0  }
   0x2   :  { %s1877_s16 = smov 0  }
   0x3 LB: > { %s25_s17 = sadd.s32 1, %s1842_s15  ;;  %p48_p1 = scmp.ne.s32.totalorder %s1834_s13, %s1830_s12  ;;  %s1846_s16 = sphi %s1877_s16, %s13_s16   ;;  %s1842_s15 = sphi %s1875_s15, %s2096_s15   ;;  %s1838_s14 = sphi %s1873_s14, %s2095_s14   ;;  %s1834_s13 = sphi %s1871_s13, %s2094_s13   ;;  %s1830_s12 = sphi %s1869_s12, %s2093_s12  }
   0x4   : > { %p26_p0 = scmp.ge.s32.totalorder %s25_s17, 2  ;;  %p49_p2 = scmp.eq.s32.totalorder %s1846_s16, 0 }
   0x5   : > { %s41_s19 = sadd.s32 1, %s1834_s13  ;;  %p1415_p5 = scmp.ge.s32.totalorder %s1846_s16, 2 }
   0x6   : > { %s2098_s17 = smov (%p26_p0, %s25_s17), 0  ;;  %p50_p3 = por %p49_p2, %p48_p1 }
   0x7   : > { %s37_s18 = ssub.s32 %s1842_s15, %s2098_s17  ;;  %162 = sbr.rel (%p1415_p5) target bundleno = 29 (0x1d), region = 20 }
   0x8   : > { %p39_p4 = scmp.eq.s32.totalorder %s37_s18, 0 }
   0xa   : > { %s1904_s20 = scalar_select %p39_p4, %s1834_s13, %s41_s19  }
   0xe   : > { %165 = sbr.rel (!%p50_p3) target bundleno = 29 (0x1d), region = 24  ;;  %s167_s21 = sand.u32 (%p50_p3), 1, %s1834_s13  }
   0xf   : > { %s1524_s22 = smul.u32 (%p50_p3), 36, %s1842_s15 }
  0x10   : > { %s1667_s23 = smul.u32 (%p50_p3), 144, %s167_s21 }
  0x11   : > { %s1912_s26 = scalar_lea.vmem (%p50_p3), %s2089_s0, %s1524_s22 }
  0x12   : > { %v190_v0 = vld [vmem:[%s1912_s26] sm:$0xff] (%p50_p3)  ;;  %v192_v1 = vld [vmem:[%s1912_s26 + $0x8] sm:$0xff] (%p50_p3)  ;;  %v194_v2 = vld [vmem:[%s1912_s26 + $0x10] sm:$0xff] (%p50_p3)  ;;  %s1917_s27 = scalar_lea.vmem (%p50_p3), [#allocation3], %s1667_s23 }
  0x13   : > { %191 = vst [vmem:[%s1917_s27] sm:$0xff] (%p50_p3), %v190_v0  ;;  %193 = vst [vmem:[%s1917_s27 + $0x8] sm:$0xff] (%p50_p3), %v192_v1  ;;  %v196_v3 = vld [vmem:[%s1912_s26 + $0x18] sm:$0xff] (%p50_p3)  ;;  %v198_v4 = vld [vmem:[%s1912_s26 + $0x48] sm:$0xff] (%p50_p3) }
  0x14   : > { %195 = vst [vmem:[%s1917_s27 + $0x10] sm:$0xff] (%p50_p3), %v194_v2  ;;  %v200_v5 = vld [vmem:[%s1912_s26 + $0x50] sm:$0xff] (%p50_p3)  ;;  %197 = vst [vmem:[%s1917_s27 + $0x18] sm:$0xff] (%p50_p3), %v196_v3  ;;  %v202_v6 = vld [vmem:[%s1912_s26 + $0x58] sm:$0xff] (%p50_p3) }
  0x15   : > { %199 = vst [vmem:[%s1917_s27 + $0x24] sm:$0xff] %v198_v4  ;;  %201 = vst [vmem:[%s1917_s27 + $0x2c] sm:$0xff] %v200_v5  ;;  %v204_v7 = vld [vmem:[%s1912_s26 + $0x60] sm:$0xff]  ;;  %v206_v8 = vld [vmem:[%s1912_s26 + $0x90] sm:$0xff] }
  0x16   : > { %203 = vst [vmem:[%s1917_s27 + $0x34] sm:$0xff] %v202_v6  ;;  %205 = vst [vmem:[%s1917_s27 + $0x3c] sm:$0xff] %v204_v7  ;;  %v208_v9 = vld [vmem:[%s1912_s26 + $0x98] sm:$0xff]  ;;  %v210_v10 = vld [vmem:[%s1912_s26 + $0xa0] sm:$0xff] }
  0x17   : > { %207 = vst [vmem:[%s1917_s27 + $0x48] sm:$0xff] %v206_v8  ;;  %v212_v11 = vld [vmem:[%s1912_s26 + $0xa8] sm:$0xff]  ;;  %209 = vst [vmem:[%s1917_s27 + $0x50] sm:$0xff] %v208_v9  ;;  %v214_v12 = vld [vmem:[%s1912_s26 + $0xd8] sm:$0xff] }
  0x18   : > { %211 = vst [vmem:[%s1917_s27 + $0x58] sm:$0xff] %v210_v10  ;;  %213 = vst [vmem:[%s1917_s27 + $0x60] sm:$0xff] %v212_v11  ;;  %v216_v13 = vld [vmem:[%s1912_s26 + $0xe0] sm:$0xff]  ;;  %v218_v14 = vld [vmem:[%s1912_s26 + $0xe8] sm:$0xff] }
  0x19   : > { %215 = vst [vmem:[%s1917_s27 + $0x6c] sm:$0xff] %v214_v12  ;;  %217 = vst [vmem:[%s1917_s27 + $0x74] sm:$0xff] %v216_v13  ;;  %v220_v15 = vld [vmem:[%s1912_s26 + $0xf0] sm:$0xff]  ;;  %v1417_v16 = vld [vmem:[%s1912_s26 + $0x20] sm:$0xf] }
  0x1a   : > { %219 = vst [vmem:[%s1917_s27 + $0x7c] sm:$0xff] %v218_v14  ;;  %v1419_v17 = vld [vmem:[%s1912_s26 + $0x68] sm:$0xf]  ;;  %221 = vst [vmem:[%s1917_s27 + $0x84] sm:$0xff] %v220_v15  ;;  %v1421_v18 = vld [vmem:[%s1912_s26 + $0xb0] sm:$0xf] }
  0x1b   : > { %1418 = vst [vmem:[%s1917_s27 + $0x20] sm:$0xf] %v1417_v16  ;;  %1420 = vst [vmem:[%s1917_s27 + $0x44] sm:$0xf] %v1419_v17  ;;  %v1423_v19 = vld [vmem:[%s1912_s26 + $0xf8] sm:$0xf] }
  0x1c   : > { %1422 = vst [vmem:[%s1917_s27 + $0x68] sm:$0xf] %v1421_v18  ;;  %1424 = vst [vmem:[%s1917_s27 + $0x8c] sm:$0xf] %v1423_v19 }
  0x1d PF: > { %p1425_p6 = scmp.ge.s32.totalorder %s1846_s16, 1  ;;  %p253_p7 = scmp.lt.s32.totalorder %s1846_s16, 3 }
  0x1f   : > { %p254_p8 = pnand %p1425_p6, %p253_p7 }
  0x20   : > { %s260_s28 = sand.u32 (!%p254_p8), 1, %s1830_s12   ;;  %s299_s29 = smul.u32 (!%p254_p8), 144, %s1838_s14 }
  0x21   : > { %257 = sbr.rel (%p254_p8) target bundleno = 375 (0x177), region = 54  ;;  %p1427_p10 = scmp.ne.s32.totalorder (!%p254_p8), %s1838_s14, 0 }
  0x22   : > { %s1668_s30 = smul.u32 (!%p254_p8), 144, %s260_s28  ;;  %p300_p9 = scmp.lt.s32.totalorder (!%p254_p8), %s299_s29, 287 }
  0x24   : > { %s1965_s8 = scalar_lea.vmem (!%p254_p8), [#allocation3], %s1668_s30 }
  0x28   : > { %s2100_s29 = smov (!%p300_p9, %s299_s29), 287  ;;  %324 = sbr.rel (%p1427_p10) target bundleno = 47 (0x2f), region = 62 }
  0x29   : > { %s1426_s4 = sshll.u32 %s2100_s29, 2  ;;  %v1848_v20 = vmov (!%p1427_p10), 0.0  }
  0x2a   : > { %s1963_s7 = scalar_lea.vmem %s2090_s1, %s1426_s4  ;;  %325 = vst [vmem:[#allocation2] sm:$0xff] (!%p1427_p10), %v1848_v20  ;;  %326 = vst [vmem:[#allocation2 + $0x8] sm:$0xff] (!%p1427_p10), %v1848_v20 }
  0x2b   : > { %327 = vst [vmem:[#allocation2 + $0x10] sm:$0xff] (!%p1427_p10), %v1848_v20  ;;  %328 = vst [vmem:[#allocation2 + $0x18] sm:$0xff] (!%p1427_p10), %v1848_v20 }
  0x2f PF: > { %v1710_v21 = vld [vmem:[%s1963_s7 + $0x40] sm:$0xff]   ;;  %v1714_v25 = vld [vmem:[%s1963_s7 + $0x48] sm:$0xff]   ;;  %v1718_v29 = vld [vmem:[%s1963_s7 + $0x50] sm:$0xff]   ;;  %p1518_p11 = scmp.ne.s32.totalorder %s1838_s14, 1 }
  0x30   : > { %v1711_v22 = vld [vmem:[%s1963_s7 + $0xc0] sm:$0xff]   ;;  %1525 = vmatprep.subr.bf16.mxu0 %v1710_v21  ;;  %v1715_v26 = vld [vmem:[%s1963_s7 + $0xc8] sm:$0xff]   ;;  %v1719_v30 = vld [vmem:[%s1963_s7 + $0xd0] sm:$0xff]  }
  0x31   : > { %v1712_v23 = vld [vmem:[%s1963_s7] sm:$0xff]   ;;  %1553 = vmatprep.subr.bf16.mxu1 %v1711_v22  ;;  %v1716_v27 = vld [vmem:[%s1963_s7 + $0x8] sm:$0xff]   ;;  %v1720_v31 = vld [vmem:[%s1963_s7 + $0x10] sm:$0xff]  }
  0x32   : > { %v1713_v24 = vld [vmem:[%s1963_s7 + $0x80] sm:$0xff]   ;;  %1526 = vmatpush3.bf16.msra.mxu0 %v1712_v23  ;;  %v1717_v28 = vld [vmem:[%s1963_s7 + $0x88] sm:$0xff]   ;;  %v1721_v32 = vld [vmem:[%s1963_s7 + $0x90] sm:$0xff]  }
  0x33   : > { %1554 = vmatpush3.bf16.msra.mxu1 %v1713_v24  ;;  %1527 = vmatprep.subr.bf16.mxu0 %v1714_v25  ;;  %v1722_v33 = vld [vmem:[%s1963_s7 + $0x58] sm:$0xff]   ;;  %v1726_v37 = vld [vmem:[%s1963_s7 + $0x60] sm:$0xff]   ;;  %v1730_v41 = vld [vmem:[%s1963_s7 + $0x68] sm:$0xff]  }
  0x34   : > { %1555 = vmatprep.subr.bf16.mxu1 %v1715_v26  ;;  %v1723_v34 = vld [vmem:[%s1963_s7 + $0xd8] sm:$0xff]   ;;  %v1727_v38 = vld [vmem:[%s1963_s7 + $0xe0] sm:$0xff]   ;;  %v1731_v42 = vld [vmem:[%s1963_s7 + $0xe8] sm:$0xff]  }
  0x35   : > { %v1724_v35 = vld [vmem:[%s1963_s7 + $0x18] sm:$0xff]   ;;  %v1728_v39 = vld [vmem:[%s1963_s7 + $0x20] sm:$0xff]   ;;  %v1732_v43 = vld [vmem:[%s1963_s7 + $0x28] sm:$0xff]  }
  0x36   : > { %1528 = vmatpush3.bf16.msra.mxu0 %v1716_v27  ;;  %v1725_v36 = vld [vmem:[%s1963_s7 + $0x98] sm:$0xff]   ;;  %v1729_v40 = vld [vmem:[%s1963_s7 + $0xa0] sm:$0xff]   ;;  %v1733_v44 = vld [vmem:[%s1963_s7 + $0xa8] sm:$0xff]  }
  0x37   : > { %1556 = vmatpush3.bf16.msra.mxu1 %v1717_v28  ;;  %1529 = vmatprep.subr.bf16.mxu0 %v1718_v29  ;;  %v1734_v45 = vld [vmem:[%s1963_s7 + $0x70] sm:$0xff]   ;;  %v1738_v49 = vld [vmem:[%s1963_s7 + $0x78] sm:$0xff]   ;;  %v1748_v57 = vld [vmem:[%s1963_s7 + $0x140] sm:$0xff]  }
  0x38   : > { %1557 = vmatprep.subr.bf16.mxu1 %v1719_v30  ;;  %v1735_v46 = vld [vmem:[%s1963_s7 + $0xf0] sm:$0xff]   ;;  %v1739_v50 = vld [vmem:[%s1963_s7 + $0xf8] sm:$0xff]   ;;  %v1749_v58 = vld [vmem:[%s1963_s7 + $0x100] sm:$0xff]  }
  0x39   : > { %v1736_v47 = vld [vmem:[%s1963_s7 + $0x30] sm:$0xff]   ;;  %v1740_v51 = vld [vmem:[%s1963_s7 + $0x38] sm:$0xff]   ;;  %v1750_v59 = vld [vmem:[%s1963_s7 + $0x1c0] sm:$0xff]  }
  0x3a   : > { %1530 = vmatpush3.bf16.msra.mxu0 %v1720_v31  ;;  %v1737_v48 = vld [vmem:[%s1963_s7 + $0xb0] sm:$0xff]   ;;  %v1741_v52 = vld [vmem:[%s1963_s7 + $0xb8] sm:$0xff]   ;;  %v1751_v60 = vld [vmem:[%s1963_s7 + $0x180] sm:$0xff]  }
  0x3b   : > { %1558 = vmatpush3.bf16.msra.mxu1 %v1721_v32  ;;  %1531 = vmatprep.subr.bf16.mxu0 %v1722_v33  ;;  %v1742_v53 = vld [vmem:[%s1965_s8] ss:$36 sps:$4 sm:$0xff]   ;;  %v1745_v55 = vld [vmem:[%s1965_s8 + $0x8] ss:$36 sps:$4 sm:$0xff]   ;;  %v1771_v15 = vld [vmem:[%s1965_s8 + $0x54] ss:$36 sps:$4 sm:$0xff]  }
  0x3c   : > { %1559 = vmatprep.subr.bf16.mxu1 %v1723_v34  ;;  %v1744_v54 = vld [vmem:[%s1965_s8 + $0x4] ss:$36 sps:$4 sm:$0xff]   ;;  %v1747_v56 = vld [vmem:[%s1965_s8 + $0xc] ss:$36 sps:$4 sm:$0xff]   ;;  %v1787_v29 = vld [vmem:[%s1965_s8 + $0x14] ss:$36 sps:$4 sm:$0xff]  }
  0x3d   : > { %1053 = vmatprep.mubr.bf16.mxu0 %v1744_v54  ;;  %1102 = vmatprep.mubr.bf16.mxu1 %v1747_v56  ;;  %v1752_v61 = vld [vmem:[%s1963_s7 + $0x148] sm:$0xff]   ;;  %v1756_v1 = vld [vmem:[%s1963_s7 + $0x150] sm:$0xff]   ;;  %v1760_v5 = vld [vmem:[%s1963_s7 + $0x158] sm:$0xff]  }
  0x3e   : > { %1532 = vmatpush3.bf16.msra.mxu0 %v1724_v35  ;;  %v1753_v62 = vld [vmem:[%s1963_s7 + $0x108] sm:$0xff]   ;;  %v1757_v2 = vld [vmem:[%s1963_s7 + $0x110] sm:$0xff]   ;;  %v1761_v6 = vld [vmem:[%s1963_s7 + $0x118] sm:$0xff]  }
  0x3f   : > { %1560 = vmatpush3.bf16.msra.mxu1 %v1725_v36  ;;  %1533 = vmatprep.subr.bf16.mxu0 %v1726_v37  ;;  %v1754_v63 = vld [vmem:[%s1963_s7 + $0x1c8] sm:$0xff]   ;;  %v1758_v3 = vld [vmem:[%s1963_s7 + $0x1d0] sm:$0xff]   ;;  %v1762_v7 = vld [vmem:[%s1963_s7 + $0x1d8] sm:$0xff]  }
  0x40   : > { %1561 = vmatprep.subr.bf16.mxu1 %v1727_v38  ;;  %v1755_v0 = vld [vmem:[%s1963_s7 + $0x188] sm:$0xff]   ;;  %v1759_v4 = vld [vmem:[%s1963_s7 + $0x190] sm:$0xff]   ;;  %v1763_v8 = vld [vmem:[%s1963_s7 + $0x198] sm:$0xff]  }
  0x41   : > { %v1764_v9 = vld [vmem:[%s1963_s7 + $0x160] sm:$0xff]   ;;  %v1768_v13 = vld [vmem:[%s1963_s7 + $0x168] sm:$0xff]   ;;  %v1778_v21 = vld [vmem:[%s1963_s7 + $0x170] sm:$0xff]  }
  0x42   : > { %1534 = vmatpush3.bf16.msra.mxu0 %v1728_v39  ;;  %v1765_v10 = vld [vmem:[%s1963_s7 + $0x120] sm:$0xff]   ;;  %v1773_v16 = vld [vmem:[%s1963_s7 + $0x128] sm:$0xff]   ;;  %v1779_v22 = vld [vmem:[%s1963_s7 + $0x130] sm:$0xff]  }
  0x43   : > { %1562 = vmatpush3.bf16.msra.mxu1 %v1729_v40  ;;  %1535 = vmatprep.subr.bf16.mxu0 %v1730_v41  ;;  %v1766_v11 = vld [vmem:[%s1963_s7 + $0x1e0] sm:$0xff]   ;;  %v1774_v17 = vld [vmem:[%s1965_s8 + $0x48] ss:$36 sps:$4 sm:$0xff]   ;;  %v1780_v23 = vld [vmem:[%s1963_s7 + $0x1f0] sm:$0xff]  }
  0x44   : > { %1563 = vmatprep.subr.bf16.mxu1 %v1731_v42  ;;  %v1767_v12 = vld [vmem:[%s1963_s7 + $0x1a0] sm:$0xff]   ;;  %v1776_v19 = vld [vmem:[%s1963_s7 + $0x1e8] sm:$0xff]   ;;  %v1781_v24 = vld [vmem:[%s1963_s7 + $0x1b0] sm:$0xff]  }
  0x45   : > { %v1769_v14 = vld [vmem:[%s1965_s8 + $0x4c] ss:$36 sps:$4 sm:$0xff]   ;;  %v1790_v32 = vld [vmem:[%s1965_s8 + $0x18] ss:$36 sps:$4 sm:$0xff]   ;;  %v1798_v38 = vld [vmem:[%s1965_s8 + $0x64] ss:$36 sps:$4 sm:$0xff]  }
  0x46   : > { %1536 = vmatpush3.bf16.msra.mxu0 %v1732_v43  ;;  %v1775_v18 = vld [vmem:[%s1965_s8 + $0x50] ss:$36 sps:$4 sm:$0xff]   ;;  %v1777_v20 = vld [vmem:[%s1963_s7 + $0x1a8] sm:$0xff]   ;;  %v1782_v25 = vld [vmem:[%s1963_s7 + $0x178] sm:$0xff]  }
  0x47   : > { %1564 = vmatpush3.bf16.msra.mxu1 %v1733_v44  ;;  %1537 = vmatprep.subr.bf16.mxu0 %v1734_v45  ;;  %v1783_v26 = vld [vmem:[%s1963_s7 + $0x138] sm:$0xff]   ;;  %v1785_v28 = vld [vmem:[%s1965_s8 + $0x10] ss:$36 sps:$4 sm:$0xff]   ;;  %v1793_v34 = vld [vmem:[%s1963_s7 + $0x208] sm:$0xff]  }
  0x48   : > { %1565 = vmatprep.subr.bf16.mxu1 %v1735_v46  ;;  %v1784_v27 = vld [vmem:[%s1963_s7 + $0x1f8] sm:$0xff]   ;;  %v1789_v31 = vld [vmem:[%s1963_s7 + $0x200] sm:$0xff]   ;;  %v1797_v37 = vld [vmem:[%s1963_s7 + $0x210] sm:$0xff]  }
  0x49   : > { %v1788_v30 = vld [vmem:[%s1963_s7 + $0x1b8] sm:$0xff]   ;;  %v1800_v39 = vld [vmem:[%s1965_s8 + $0x60] ss:$36 sps:$4 sm:$0xff]   ;;  %v1803_v43 = vld [vmem:[%s1963_s7 + $0x228] sm:$0xff]  }
  0x4a   : > { %1538 = vmatpush3.bf16.msra.mxu0 %v1736_v47  ;;  %v1792_v33 = vld [vmem:[%s1965_s8 + $0x1c] ss:$36 sps:$4 sm:$0xff]   ;;  %v1807_v46 = vld [vmem:[%s1965_s8 + $0x68] ss:$36 sps:$4 sm:$0xff]  }
  0x4b   : > { %1566 = vmatpush3.bf16.msra.mxu1 %v1737_v48  ;;  %1539 = vmatprep.subr.bf16.mxu0 %v1738_v49  ;;  %v1794_v35 = vld [vmem:[%s1965_s8 + $0x5c] ss:$36 sps:$4 sm:$0xff]  }
  0x4c   : > { %1567 = vmatprep.subr.bf16.mxu1 %v1739_v50  ;;  %v1796_v36 = vld [vmem:[%s1965_s8 + $0x58] ss:$36 sps:$4 sm:$0xff]   ;;  %v1802_v41 = vld [vmem:[%s1963_s7 + $0x220] sm:$0xff]   ;;  %v1804_v44 = vld [vmem:[%s1963_s7 + $0x230] sm:$0xff]  }
  0x4d   : > { %v1801_v40 = vld [vmem:[%s1963_s7 + $0x218] sm:$0xff]   ;;  %v1806_v42 = vld [vmem:[%s1965_s8 + $0x20] ss:$36 sps:$4 sm:$0xff]  }
  0x4e   : > { %1540 = vmatpush3.bf16.msra.mxu0 %v1740_v51  ;;  %v1805_v45 = vld [vmem:[%s1963_s7 + $0x238] sm:$0xff]  }
  0x4f   : > { %1568 = vmatpush3.bf16.msra.mxu1 %v1741_v52  ;;  %1581 = vmatprep.subr.bf16.mxu0 %v1748_v57 }
  0x50   : > { %1609 = vmatprep.subr.bf16.mxu1 %v1750_v59 }
  0x51   : > { %1054 = vmatmul.mubr.bf16.vlgmr.msra.gmra.mrb[0].mxu0 %v1742_v53 }
  0x52   : > { %1103 = vmatmul.mubr.bf16.vlgmr.msra.gmra.mrb[0].mxu1 %v1745_v55  ;;  %1582 = vmatpush3.bf16.msra.mxu0 %v1749_v58 }
  0x53   : > { %1610 = vmatpush3.bf16.msra.mxu1 %v1751_v60  ;;  %1583 = vmatprep.subr.bf16.mxu0 %v1752_v61 }
  0x54   : > { %1611 = vmatprep.subr.bf16.mxu1 %v1754_v63  ;;  %1061 = vmatprep.mubr.bf16.mxu0 %v1769_v14 }
  0x55   : > { %1110 = vmatprep.mubr.bf16.mxu1 %v1771_v15 }
  0x56   : > { %1584 = vmatpush3.bf16.msra.mxu0 %v1753_v62 }
  0x57   : > { %1612 = vmatpush3.bf16.msra.mxu1 %v1755_v0  ;;  %1585 = vmatprep.subr.bf16.mxu0 %v1756_v1 }
  0x58   : > { %1613 = vmatprep.subr.bf16.mxu1 %v1758_v3 }
  0x59   : > { %1062 = vmatmul.mubr.bf16.gmra.mrb[4].mxu0 %v1774_v17 }
  0x5a   : > { %1586 = vmatpush3.bf16.msra.mxu0 %v1757_v2  ;;  %1111 = vmatmul.mubr.bf16.gmra.mrb[4].mxu1 %v1775_v18 }
  0x5b   : > { %1614 = vmatpush3.bf16.msra.mxu1 %v1759_v4  ;;  %1587 = vmatprep.subr.bf16.mxu0 %v1760_v5 }
  0x5c   : > { %1615 = vmatprep.subr.bf16.mxu1 %v1762_v7  ;;  %1151 = vmatprep.mubr.bf16.mxu0 %v1787_v29 }
  0x5d   : > { %1200 = vmatprep.mubr.bf16.mxu1 %v1792_v33 }
  0x5e   : > { %1588 = vmatpush3.bf16.msra.mxu0 %v1761_v6 }
  0x5f   : > { %1616 = vmatpush3.bf16.msra.mxu1 %v1763_v8  ;;  %1589 = vmatprep.subr.bf16.mxu0 %v1764_v9 }
  0x60   : > { %1617 = vmatprep.subr.bf16.mxu1 %v1766_v11 }
  0x62   : > { %1590 = vmatpush3.bf16.msra.mxu0 %v1765_v10 }
  0x63   : > { %1618 = vmatpush3.bf16.msra.mxu1 %v1767_v12  ;;  %1591 = vmatprep.subr.bf16.mxu0 %v1768_v13 }
  0x64   : > { %1619 = vmatprep.subr.bf16.mxu1 %v1776_v19 }
  0x66   : > { %1592 = vmatpush3.bf16.msra.mxu0 %v1773_v16 }
  0x67   : > { %1620 = vmatpush3.bf16.msra.mxu1 %v1777_v20  ;;  %1593 = vmatprep.subr.bf16.mxu0 %v1778_v21 }
  0x68   : > { %1621 = vmatprep.subr.bf16.mxu1 %v1780_v23 }
  0x6a   : > { %1594 = vmatpush3.bf16.msra.mxu0 %v1779_v22 }
  0x6b   : > { %1622 = vmatpush3.bf16.msra.mxu1 %v1781_v24  ;;  %1595 = vmatprep.subr.bf16.mxu0 %v1782_v25 }
  0x6c   : > { %1623 = vmatprep.subr.bf16.mxu1 %v1784_v27 }
  0x6e   : > { %1596 = vmatpush3.bf16.msra.mxu0 %v1783_v26 }
  0x6f   : > { %1624 = vmatpush3.bf16.msra.mxu1 %v1788_v30  ;;  %1647 = vmatprep.subr.bf16.mxu0 %v1789_v31 }
  0x71   : > { %1152 = vmatmul.mubr.bf16.vlgmr.msra.gmra.mrb[8].mxu0 %v1785_v28 }
  0x72   : > { %1648 = vmatpush3.bf16.msra.mxu0 %v1789_v31  ;;  %1201 = vmatmul.mubr.bf16.vlgmr.msra.gmra.mrb[8].mxu1 %v1790_v32 }
  0x73   : > { %1649 = vmatprep.subr.bf16.mxu0 %v1793_v34  ;;  %1159 = vmatprep.mubr.bf16.mxu0 %v1794_v35 }
  0x74   : > { %1208 = vmatprep.mubr.bf16.mxu1 %v1798_v38 }
  0x76   : > { %1650 = vmatpush3.bf16.msra.mxu0 %v1793_v34 }
  0x77   : > { %1651 = vmatprep.subr.bf16.mxu0 %v1797_v37 }
  0x79   : > { %1160 = vmatmul.mubr.bf16.gmra.mrb[12].mxu0 %v1796_v36 }
  0x7a   : > { %1652 = vmatpush3.bf16.msra.mxu0 %v1797_v37  ;;  %1209 = vmatmul.mubr.bf16.gmra.mrb[12].mxu1 %v1800_v39 }
  0x7b   : > { %1653 = vmatprep.subr.bf16.mxu0 %v1801_v40  ;;  %1663 = vmatprep.mubr.bf16.mxu0 %v1806_v42 }
  0x7e   : > { %1654 = vmatpush3.bf16.msra.mxu0 %v1801_v40 }
  0x7f   : > { %1655 = vmatprep.subr.bf16.mxu0 %v1802_v41 }
  0x82   : > { %1656 = vmatpush3.bf16.msra.mxu0 %v1802_v41 }
  0x83   : > { %1657 = vmatprep.subr.bf16.mxu0 %v1803_v43 }
  0x86   : > { %1658 = vmatpush3.bf16.msra.mxu0 %v1803_v43  ;;  %v331_v43 = vld [vmem:[#allocation2 + $0x10] sm:$0xff] }
  0x87   : > { %1659 = vmatprep.subr.bf16.mxu0 %v1804_v44 }
  0x8a   : > { %1660 = vmatpush3.bf16.msra.mxu0 %v1804_v44 }
  0x8b   : > { %1661 = vmatprep.subr.bf16.mxu0 %v1805_v45 }
  0x8e   : > { %1662 = vmatpush3.bf16.msra.mxu0 %v1805_v45 }
  0x91   : > { %1664 = vmatmul.mubr.bf16.vlgmr.msra.gmra.mrb[16].mxu0 %v1807_v46  ;;  %v329_v46 = vld [vmem:[#allocation2] sm:$0xff] }
 0x124   : > { %v1541_v47 = vpop.f32.mrb[0].mxu0 }
 0x125   : > { %v1569_v48 = vpop.f32.mrb[0].mxu1  ;;  %v1542_v49 = vpop.f32.mrb[1].mxu0 }
 0x126   : > { %v1543_v50 = vadd.f32 %v1542_v49, %v1541_v47  ;;  %v1570_v51 = vpop.f32.mrb[1].mxu1  ;;  %v1544_v52 = vpop.f32.mrb[2].mxu0  ;;  %v332_v49 = vld [vmem:[#allocation2 + $0x18] sm:$0xff] }
 0x127   : > { %v1571_v53 = vadd.f32 %v1570_v51, %v1569_v48  ;;  %v1572_v54 = vpop.f32.mrb[2].mxu1  ;;  %v1545_v55 = vpop.f32.mrb[3].mxu0 }
 0x128   : > { %v1546_v56 = vadd.f32 %v1545_v55, %v1544_v52  ;;  %v1573_v57 = vpop.f32.mrb[3].mxu1 }
 0x129   : > { %v1105_v58 = vadd.f32 %v1571_v53, %v1543_v50  ;;  %v1574_v59 = vadd.f32 %v1573_v57, %v1572_v54  ;;  %v330_v53 = vld [vmem:[#allocation2 + $0x8] sm:$0xff] }
 0x12b   : > { %v1108_v60 = vadd.f32 %v1574_v59, %v1546_v56 }
 0x12c   : > { %v1547_v61 = vpop.f32.mrb[4].mxu0 }
 0x12d   : > { %v1575_v62 = vpop.f32.mrb[4].mxu1  ;;  %v1548_v63 = vpop.f32.mrb[5].mxu0 }
 0x12e   : > { %v1576_v0 = vpop.f32.mrb[5].mxu1  ;;  %v1549_v1 = vadd.f32 %v1548_v63, %v1547_v61  ;;  %v1550_v3 = vpop.f32.mrb[6].mxu0 }
 0x12f   : > { %v1577_v2 = vadd.f32 %v1576_v0, %v1575_v62  ;;  %v1578_v4 = vpop.f32.mrb[6].mxu1  ;;  %v1551_v5 = vpop.f32.mrb[7].mxu0 }
 0x130   : > { %v1579_v6 = vpop.f32.mrb[7].mxu1  ;;  %v1552_v8 = vadd.f32 %v1551_v5, %v1550_v3 }
 0x131   : > { %v1113_v7 = vadd.f32 %v1577_v2, %v1549_v1  ;;  %v1580_v9 = vadd.f32 %v1579_v6, %v1578_v4 }
 0x133   : > { %v1116_v10 = vadd.f32 %v1580_v9, %v1552_v8 }
 0x144   : > { %v1597_v11 = vpop.f32.mrb[8].mxu0 }
 0x145   : > { %v1598_v12 = vpop.f32.mrb[9].mxu0  ;;  %v1625_v15 = vpop.f32.mrb[8].mxu1 }
 0x146   : > { %v1599_v13 = vadd.f32 %v1598_v12, %v1597_v11  ;;  %v1600_v14 = vpop.f32.mrb[10].mxu0  ;;  %v1626_v19 = vpop.f32.mrb[9].mxu1 }
 0x147   : > { %v1601_v16 = vpop.f32.mrb[11].mxu0  ;;  %v1627_v20 = vadd.f32 %v1626_v19, %v1625_v15  ;;  %v1628_v21 = vpop.f32.mrb[10].mxu1 }
 0x148   : > { %v1154_v17 = vadd.f32 %v1599_v13, %v1105_v58  ;;  %v1602_v18 = vadd.f32 %v1601_v16, %v1600_v14  ;;  %v1629_v23 = vpop.f32.mrb[11].mxu1 }
 0x149   : > { %v1630_v24 = vadd.f32 %v1629_v23, %v1628_v21 }
 0x14a   : > { %v1157_v22 = vadd.f32 %v1602_v18, %v1108_v60  ;;  %v1203_v25 = vadd.f32 %v1627_v20, %v1154_v17  ;;  %v1519_v60 = vld [vmem:[%s2091_s2] ss:$0 sm:$0xff] (!%p1518_p11) }
 0x14c   : > { %v1603_v26 = vpop.f32.mrb[12].mxu0  ;;  %v1206_v28 = vadd.f32 %v1630_v24, %v1157_v22 }
 0x14d   : > { %v1604_v27 = vpop.f32.mrb[13].mxu0  ;;  %v1631_v31 = vpop.f32.mrb[12].mxu1 }
 0x14e   : > { %v1605_v29 = vadd.f32 %v1604_v27, %v1603_v26  ;;  %v1606_v30 = vpop.f32.mrb[14].mxu0  ;;  %v1632_v35 = vpop.f32.mrb[13].mxu1 }
 0x14f   : > { %v1607_v32 = vpop.f32.mrb[15].mxu0  ;;  %v1633_v36 = vadd.f32 %v1632_v35, %v1631_v31  ;;  %v1634_v37 = vpop.f32.mrb[14].mxu1 }
 0x150   : > { %v1162_v33 = vadd.f32 %v1605_v29, %v1113_v7  ;;  %v1608_v34 = vadd.f32 %v1607_v32, %v1606_v30  ;;  %v1635_v39 = vpop.f32.mrb[15].mxu1 }
 0x151   : > { %v1636_v40 = vadd.f32 %v1635_v39, %v1634_v37 }
 0x152   : > { %v1165_v38 = vadd.f32 %v1608_v34, %v1116_v10  ;;  %v1211_v41 = vadd.f32 %v1633_v36, %v1162_v33 }
 0x154   : > { %v1214_v42 = vadd.f32 %v1636_v40, %v1165_v38 }
 0x164   : > { %v1665_v44 = vpop.f32.mrb[16].mxu0 }
 0x165   : > { %v1260_v45 = vadd.f32 %v1665_v44, %v1211_v41  ;;  %v1251_v47 = vpop.f32.mrb[17].mxu0 }
 0x166   : > { %v1252_v48 = vadd.f32 %v1251_v47, %v1203_v25  ;;  %v1666_v50 = vpop.f32.mrb[18].mxu0  ;;  %1277 = sbr.rel (%p1518_p11) target bundleno = 375 (0x177), region = 66 }
 0x167   : > { %v1268_v51 = vadd.f32 %v1260_v45, %v331_v43  ;;  %v1263_v52 = vadd.f32 %v1666_v50, %v1214_v42  ;;  %v1254_v54 = vpop.f32.mrb[19].mxu0 }
 0x168   : > { %v1266_v55 = vadd.f32 %v1252_v48, %v329_v46  ;;  %v1255_v56 = vadd.f32 %v1254_v54, %v1206_v28 }
 0x169   : > { %1272 = vst [vmem:[#allocation2 + $0x10] sm:$0xff] %v1268_v51  ;;  %v1269_v57 = vadd.f32 %v1263_v52, %v332_v49 }
 0x16a   : > { %1270 = vst [vmem:[#allocation2] sm:$0xff] %v1266_v55  ;;  %v1267_v58 = vadd.f32 %v1255_v56, %v330_v53 }
 0x16b   : > { %1273 = vst [vmem:[#allocation2 + $0x18] sm:$0xff] %v1269_v57 }
 0x16c   : > { %1271 = vst [vmem:[#allocation2 + $0x8] sm:$0xff] %v1267_v58 }
 0x170   : > { %v1280_v0 = vld [vmem:[#allocation2 + $0x10] sm:$0xff] }
 0x171   : > { %v1278_v59 = vld [vmem:[#allocation2] sm:$0xff]  ;;  %v1291_v2 = vadd.f32 %v1519_v60, %v1280_v0 }
 0x172   : > { %v1289_v62 = vadd.f32 %v1519_v60, %v1278_v59  ;;  %v1281_v1 = vld [vmem:[#allocation2 + $0x18] sm:$0xff] }
 0x173   : > { %v1279_v61 = vld [vmem:[#allocation2 + $0x8] sm:$0xff]  ;;  %v1292_v3 = vadd.f32 %v1519_v60, %v1281_v1  ;;  %1295 = vst [vmem:[%s2092_s3 + $0x10] sm:$0xff] %v1291_v2 }
 0x174   : > { %v1290_v63 = vadd.f32 %v1519_v60, %v1279_v61  ;;  %1293 = vst [vmem:[%s2092_s3] sm:$0xff] %v1289_v62 }
 0x175   : > { %1296 = vst [vmem:[%s2092_s3 + $0x18] sm:$0xff] %v1292_v3 }
 0x176   : > { %1294 = vst [vmem:[%s2092_s3 + $0x8] sm:$0xff] %v1290_v63 }
 0x177 PF: > { %s13_s16 = sadd.s32 1, %s1846_s16   ;;  %s2093_s12 = smov %s1834_s13 }
 0x178   : > { %p10_p12 = scmp.ge.s32.totalorder %s13_s16, 4   ;;  %s2094_s13 = smov %s1904_s20 }
 0x179   : > { %s2095_s14 = smov %s1842_s15  ;;  %s2096_s15 = smov %s2098_s17 }
 0x17a   :  { %12 = sbr.rel (!%p10_p12) target bundleno = 3 (0x3), region = 113 }

// kernel: generator_forward.136
= control target key start
LH: loop header
LB: loop body
LE: loop exit
PB: predicated region body
PF: predicated region fallthrough
CT: control target
= control target key end

     0   :  { %s2876_s1 = inlined_call_operand.vmem [shape: bf16[1152,128], index: 1, kind: input, shape index: {}]   ;;  %s2877_s0 = inlined_call_operand.vmem [shape: bf16[128,1152], index: 0, kind: input, shape index: {}]   ;;  %s2878_s2 = inlined_call_operand.vmem [shape: f32[1,128], index: 2, kind: input, shape index: {}]   ;;  %s2879_s3 = inlined_call_operand.vmem [shape: f32[128,128], index: 3, kind: output, shape index: {}]  }
   0x1   :  { %v2119_v0 = vld [vmem:[%s2876_s1 + $0x40] sm:$0xff]   ;;  %v2123_v4 = vld [vmem:[%s2876_s1 + $0x48] sm:$0xff]   ;;  %v2127_v8 = vld [vmem:[%s2876_s1 + $0x50] sm:$0xff]  }
   0x2   :  { %v2120_v1 = vld [vmem:[%s2876_s1 + $0xc0] sm:$0xff]   ;;  %1799 = vmatprep.subr.bf16.mxu0 %v2119_v0  ;;  %v2124_v5 = vld [vmem:[%s2876_s1 + $0xc8] sm:$0xff]   ;;  %v2128_v9 = vld [vmem:[%s2876_s1 + $0xd0] sm:$0xff]  }
   0x3   :  { %v2121_v2 = vld [vmem:[%s2876_s1] sm:$0xff]   ;;  %1863 = vmatprep.subr.bf16.mxu1 %v2120_v1  ;;  %v2125_v6 = vld [vmem:[%s2876_s1 + $0x8] sm:$0xff]   ;;  %v2129_v10 = vld [vmem:[%s2876_s1 + $0x10] sm:$0xff]  }
   0x4   :  { %v2122_v3 = vld [vmem:[%s2876_s1 + $0x80] sm:$0xff]   ;;  %1800 = vmatpush3.bf16.msra.mxu0 %v2121_v2  ;;  %v2126_v7 = vld [vmem:[%s2876_s1 + $0x88] sm:$0xff]   ;;  %v2130_v11 = vld [vmem:[%s2876_s1 + $0x90] sm:$0xff]  }
   0x5   :  { %1864 = vmatpush3.bf16.msra.mxu1 %v2122_v3  ;;  %1801 = vmatprep.subr.bf16.mxu0 %v2123_v4  ;;  %v2131_v12 = vld [vmem:[%s2876_s1 + $0x58] sm:$0xff]   ;;  %v2135_v16 = vld [vmem:[%s2876_s1 + $0x60] sm:$0xff]   ;;  %v2139_v20 = vld [vmem:[%s2876_s1 + $0x68] sm:$0xff]  }
   0x6   :  { %1865 = vmatprep.subr.bf16.mxu1 %v2124_v5  ;;  %v2132_v13 = vld [vmem:[%s2876_s1 + $0xd8] sm:$0xff]   ;;  %v2136_v17 = vld [vmem:[%s2876_s1 + $0xe0] sm:$0xff]   ;;  %v2140_v21 = vld [vmem:[%s2876_s1 + $0xe8] sm:$0xff]  }
   0x7   :  { %v2133_v14 = vld [vmem:[%s2876_s1 + $0x18] sm:$0xff]   ;;  %v2137_v18 = vld [vmem:[%s2876_s1 + $0x20] sm:$0xff]   ;;  %v2141_v22 = vld [vmem:[%s2876_s1 + $0x28] sm:$0xff]  }
   0x8   :  { %1802 = vmatpush3.bf16.msra.mxu0 %v2125_v6  ;;  %v2134_v15 = vld [vmem:[%s2876_s1 + $0x98] sm:$0xff]   ;;  %v2138_v19 = vld [vmem:[%s2876_s1 + $0xa0] sm:$0xff]   ;;  %v2142_v23 = vld [vmem:[%s2876_s1 + $0xa8] sm:$0xff]  }
   0x9   :  { %1866 = vmatpush3.bf16.msra.mxu1 %v2126_v7  ;;  %1803 = vmatprep.subr.bf16.mxu0 %v2127_v8  ;;  %v2143_v24 = vld [vmem:[%s2876_s1 + $0x70] sm:$0xff]   ;;  %v2147_v28 = vld [vmem:[%s2876_s1 + $0x78] sm:$0xff]   ;;  %v2151_v32 = vld [vmem:[%s2877_s0] ss:$36 sps:$4 sm:$0xff]  }
   0xa   :  { %1867 = vmatprep.subr.bf16.mxu1 %v2128_v9  ;;  %v2144_v25 = vld [vmem:[%s2876_s1 + $0xf0] sm:$0xff]   ;;  %v2148_v29 = vld [vmem:[%s2876_s1 + $0xf8] sm:$0xff]   ;;  %v2153_v33 = vld [vmem:[%s2877_s0 + $0x4] ss:$36 sps:$4 sm:$0xff]  }
   0xb   :  { %v2145_v26 = vld [vmem:[%s2876_s1 + $0x30] sm:$0xff]   ;;  %v2149_v30 = vld [vmem:[%s2876_s1 + $0x38] sm:$0xff]   ;;  %v2154_v34 = vld [vmem:[%s2877_s0 + $0x8] ss:$36 sps:$4 sm:$0xff]   ;;  %1107 = vmatprep.mubr.bf16.mxu0 %v2153_v33 }
   0xc   :  { %1804 = vmatpush3.bf16.msra.mxu0 %v2129_v10  ;;  %v2146_v27 = vld [vmem:[%s2876_s1 + $0xb0] sm:$0xff]   ;;  %v2150_v31 = vld [vmem:[%s2876_s1 + $0xb8] sm:$0xff]   ;;  %v2157_v36 = vld [vmem:[%s2876_s1 + $0x140] sm:$0xff]  }
   0xd   :  { %1868 = vmatpush3.bf16.msra.mxu1 %v2130_v11  ;;  %1805 = vmatprep.subr.bf16.mxu0 %v2131_v12  ;;  %v2156_v35 = vld [vmem:[%s2877_s0 + $0xc] ss:$36 sps:$4 sm:$0xff]   ;;  %v2158_v37 = vld [vmem:[%s2876_s1 + $0x1c0] sm:$0xff]   ;;  %v2163_v41 = vld [vmem:[%s2877_s0 + $0x54] ss:$36 sps:$4 sm:$0xff]  }
   0xe   :  { %1869 = vmatprep.subr.bf16.mxu1 %v2132_v13  ;;  %1204 = vmatprep.mubr.bf16.mxu1 %v2156_v35  ;;  %v2159_v38 = vld [vmem:[%s2876_s1 + $0x100] sm:$0xff]   ;;  %v2161_v40 = vld [vmem:[%s2877_s0 + $0x4c] ss:$36 sps:$4 sm:$0xff]   ;;  %v2171_v48 = vld [vmem:[%s2877_s0 + $0x94] ss:$36 sps:$4 sm:$0xff]  }
   0xf   :  { %v2160_v39 = vld [vmem:[%s2876_s1 + $0x180] sm:$0xff]   ;;  %v2165_v42 = vld [vmem:[%s2877_s0 + $0x48] ss:$36 sps:$4 sm:$0xff]   ;;  %v2166_v43 = vld [vmem:[%s2877_s0 + $0x50] ss:$36 sps:$4 sm:$0xff]  }
  0x10   :  { %1806 = vmatpush3.bf16.msra.mxu0 %v2133_v14  ;;  %v2167_v44 = vld [vmem:[%s2876_s1 + $0x148] sm:$0xff]   ;;  %v2173_v49 = vld [vmem:[%s2877_s0 + $0x9c] ss:$36 sps:$4 sm:$0xff]   ;;  %v2175_v50 = vld [vmem:[%s2877_s0 + $0x90] ss:$36 sps:$4 sm:$0xff]  }
  0x11   :  { %1870 = vmatpush3.bf16.msra.mxu1 %v2134_v15  ;;  %1807 = vmatprep.subr.bf16.mxu0 %v2135_v16  ;;  %v2168_v45 = vld [vmem:[%s2876_s1 + $0x1c8] sm:$0xff]   ;;  %v2176_v51 = vld [vmem:[%s2877_s0 + $0x98] ss:$36 sps:$4 sm:$0xff]   ;;  %v2177_v52 = vld [vmem:[%s2876_s1 + $0x150] sm:$0xff]  }
  0x12   :  { %1871 = vmatprep.subr.bf16.mxu1 %v2136_v17  ;;  %v2169_v46 = vld [vmem:[%s2876_s1 + $0x108] sm:$0xff]   ;;  %v2178_v53 = vld [vmem:[%s2876_s1 + $0x1d0] sm:$0xff]   ;;  %v2181_v56 = vld [vmem:[%s2877_s0 + $0xdc] ss:$36 sps:$4 sm:$0xff]  }
  0x13   :  { %v2170_v47 = vld [vmem:[%s2876_s1 + $0x188] sm:$0xff]   ;;  %v2179_v54 = vld [vmem:[%s2876_s1 + $0x110] sm:$0xff]   ;;  %v2185_v58 = vld [vmem:[%s2877_s0 + $0xd8] ss:$36 sps:$4 sm:$0xff]  }
  0x14   :  { %1808 = vmatpush3.bf16.msra.mxu0 %v2137_v18  ;;  %v2180_v55 = vld [vmem:[%s2876_s1 + $0x190] sm:$0xff]   ;;  %v2183_v57 = vld [vmem:[%s2877_s0 + $0xe4] ss:$36 sps:$4 sm:$0xff]   ;;  %v2187_v60 = vld [vmem:[%s2876_s1 + $0x158] sm:$0xff]  }
  0x15   :  { %1872 = vmatpush3.bf16.msra.mxu1 %v2138_v19  ;;  %1809 = vmatprep.subr.bf16.mxu0 %v2139_v20  ;;  %v2186_v59 = vld [vmem:[%s2877_s0 + $0xe0] ss:$36 sps:$4 sm:$0xff]   ;;  %v2188_v61 = vld [vmem:[%s2876_s1 + $0x1d8] sm:$0xff]   ;;  %v2193_v1 = vld [vmem:[%s2877_s0 + $0x12c] ss:$36 sps:$4 sm:$0xff]  }
  0x16   :  { %1873 = vmatprep.subr.bf16.mxu1 %v2140_v21  ;;  %v2189_v62 = vld [vmem:[%s2876_s1 + $0x118] sm:$0xff]   ;;  %v2191_v0 = vld [vmem:[%s2877_s0 + $0x124] ss:$36 sps:$4 sm:$0xff]   ;;  %v2201_v8 = vld [vmem:[%s2877_s0 + $0x16c] ss:$36 sps:$4 sm:$0xff]  }
  0x17   :  { %v2190_v63 = vld [vmem:[%s2876_s1 + $0x198] sm:$0xff]   ;;  %v2195_v2 = vld [vmem:[%s2877_s0 + $0x120] ss:$36 sps:$4 sm:$0xff]   ;;  %v2196_v4 = vld [vmem:[%s2877_s0 + $0x128] ss:$36 sps:$4 sm:$0xff]  }
  0x18   :  { %1810 = vmatpush3.bf16.msra.mxu0 %v2141_v22  ;;  %v2197_v3 = vld [vmem:[%s2876_s1 + $0x160] sm:$0xff]   ;;  %v2203_v9 = vld [vmem:[%s2877_s0 + $0x174] ss:$36 sps:$4 sm:$0xff]   ;;  %v2207_v10 = vld [vmem:[%s2876_s1 + $0x168] sm:$0xff]  }
  0x19   :  { %1874 = vmatpush3.bf16.msra.mxu1 %v2142_v23  ;;  %1811 = vmatprep.subr.bf16.mxu0 %v2143_v24  ;;  %v2198_v5 = vld [vmem:[%s2876_s1 + $0x1e0] sm:$0xff]   ;;  %v2208_v11 = vld [vmem:[%s2876_s1 + $0x1e8] sm:$0xff]   ;;  %v2206_v15 = vld [vmem:[%s2877_s0 + $0x170] ss:$36 sps:$4 sm:$0xff]  }
  0x1a   :  { %1875 = vmatprep.subr.bf16.mxu1 %v2144_v25  ;;  %v2199_v6 = vld [vmem:[%s2876_s1 + $0x120] sm:$0xff]   ;;  %v2205_v12 = vld [vmem:[%s2877_s0 + $0x168] ss:$36 sps:$4 sm:$0xff]   ;;  %v2211_v16 = vld [vmem:[%s2877_s0 + $0x1b4] ss:$36 sps:$4 sm:$0xff]  }
  0x1b   :  { %v2200_v7 = vld [vmem:[%s2876_s1 + $0x1a0] sm:$0xff]   ;;  %v2209_v13 = vld [vmem:[%s2876_s1 + $0x128] sm:$0xff]   ;;  %v2217_v18 = vld [vmem:[%s2876_s1 + $0x170] sm:$0xff]  }
  0x1c   :  { %1812 = vmatpush3.bf16.msra.mxu0 %v2145_v26  ;;  %v2210_v14 = vld [vmem:[%s2876_s1 + $0x1a8] sm:$0xff]   ;;  %v2213_v17 = vld [vmem:[%s2877_s0 + $0x1bc] ss:$36 sps:$4 sm:$0xff]   ;;  %v2218_v19 = vld [vmem:[%s2876_s1 + $0x1f0] sm:$0xff]  }
  0x1d   :  { %1876 = vmatpush3.bf16.msra.mxu1 %v2146_v27  ;;  %1813 = vmatprep.subr.bf16.mxu0 %v2147_v28  ;;  %v2219_v20 = vld [vmem:[%s2876_s1 + $0x130] sm:$0xff]   ;;  %v2216_v23 = vld [vmem:[%s2877_s0 + $0x1b8] ss:$36 sps:$4 sm:$0xff]   ;;  %v2223_v25 = vld [vmem:[%s2877_s0 + $0x204] ss:$36 sps:$4 sm:$0xff]  }
  0x1e   :  { %1877 = vmatprep.subr.bf16.mxu1 %v2148_v29  ;;  %v2220_v21 = vld [vmem:[%s2876_s1 + $0x1b0] sm:$0xff]   ;;  %v2221_v24 = vld [vmem:[%s2877_s0 + $0x1fc] ss:$36 sps:$4 sm:$0xff]  }
  0x1f   :  { %v2215_v22 = vld [vmem:[%s2877_s0 + $0x1b0] ss:$36 sps:$4 sm:$0xff]   ;;  %v2227_v26 = vld [vmem:[%s2876_s1 + $0x178] sm:$0xff]  }
  0x20   :  { %1814 = vmatpush3.bf16.msra.mxu0 %v2149_v30  ;;  %v2228_v27 = vld [vmem:[%s2876_s1 + $0x1f8] sm:$0xff]   ;;  %v2231_v35 = vld [vmem:[%s2877_s0 + $0x10] ss:$36 sps:$4 sm:$0xff]  }
  0x21   :  { %1878 = vmatpush3.bf16.msra.mxu1 %v2150_v31  ;;  %1927 = vmatprep.subr.bf16.mxu0 %v2157_v36  ;;  %v2229_v28 = vld [vmem:[%s2876_s1 + $0x138] sm:$0xff]   ;;  %v2226_v31 = vld [vmem:[%s2877_s0 + $0x200] ss:$36 sps:$4 sm:$0xff]  }
  0x22   :  { %1991 = vmatprep.subr.bf16.mxu1 %v2158_v37  ;;  %v2230_v29 = vld [vmem:[%s2876_s1 + $0x1b8] sm:$0xff]  }
  0x23   :  { %1108 = vmatmul.mubr.bf16.vlgmr.msra.gmra.mrb[0].mxu0 %v2151_v32  ;;  %v2225_v30 = vld [vmem:[%s2877_s0 + $0x1f8] ss:$36 sps:$4 sm:$0xff]   ;;  %v2237_v32 = vld [vmem:[%s2876_s1 + $0x200] sm:$0xff]  }
  0x24   :  { %1205 = vmatmul.mubr.bf16.vlgmr.msra.gmra.mrb[0].mxu1 %v2154_v34  ;;  %1928 = vmatpush3.bf16.msra.mxu0 %v2159_v38  ;;  %v2233_v33 = vld [vmem:[%s2877_s0 + $0x14] ss:$36 sps:$4 sm:$0xff]   ;;  %v2236_v34 = vld [vmem:[%s2877_s0 + $0x1c] ss:$36 sps:$4 sm:$0xff]   ;;  %v2240_v38 = vld [vmem:[%s2877_s0 + $0x64] ss:$36 sps:$4 sm:$0xff]  }
  0x25   :  { %1992 = vmatpush3.bf16.msra.mxu1 %v2160_v39  ;;  %1115 = vmatprep.mubr.bf16.mxu0 %v2161_v40  ;;  %v2234_v36 = vld [vmem:[%s2877_s0 + $0x18] ss:$36 sps:$4 sm:$0xff]   ;;  %v2244_v39 = vld [vmem:[%s2876_s1 + $0x208] sm:$0xff]   ;;  %v2251_v40 = vld [vmem:[%s2876_s1 + $0x210] sm:$0xff]  }
  0x26   :  { %1212 = vmatprep.mubr.bf16.mxu1 %v2163_v41  ;;  %1929 = vmatprep.subr.bf16.mxu0 %v2167_v44  ;;  %v2238_v37 = vld [vmem:[%s2877_s0 + $0x5c] ss:$36 sps:$4 sm:$0xff]   ;;  %v2247_v44 = vld [vmem:[%s2877_s0 + $0xac] ss:$36 sps:$4 sm:$0xff]  }
  0x27   :  { %1993 = vmatprep.subr.bf16.mxu1 %v2168_v45  ;;  %v2242_v41 = vld [vmem:[%s2877_s0 + $0x58] ss:$36 sps:$4 sm:$0xff]  }
  0x28   :  { %1930 = vmatpush3.bf16.msra.mxu0 %v2169_v46  ;;  %v2258_v45 = vld [vmem:[%s2876_s1 + $0x218] sm:$0xff]   ;;  %v2265_v46 = vld [vmem:[%s2876_s1 + $0x220] sm:$0xff]  }
  0x29   :  { %1994 = vmatpush3.bf16.msra.mxu1 %v2170_v47  ;;  %1931 = vmatprep.subr.bf16.mxu0 %v2177_v52  ;;  %v2249_v47 = vld [vmem:[%s2877_s0 + $0xa0] ss:$36 sps:$4 sm:$0xff]   ;;  %v2256_v52 = vld [vmem:[%s2877_s0 + $0xe8] ss:$36 sps:$4 sm:$0xff]  }
  0x2a   :  { %1995 = vmatprep.subr.bf16.mxu1 %v2178_v53  ;;  %v2279_v53 = vld [vmem:[%s2876_s1 + $0x230] sm:$0xff]  }
  0x2b   :  { %1116 = vmatmul.mubr.bf16.gmra.mrb[4].mxu0 %v2165_v42  ;;  %v2243_v42 = vld [vmem:[%s2877_s0 + $0x60] ss:$36 sps:$4 sm:$0xff]  }
  0x2c   :  { %1213 = vmatmul.mubr.bf16.gmra.mrb[4].mxu1 %v2166_v43  ;;  %1123 = vmatprep.mubr.bf16.mxu0 %v2171_v48  ;;  %v2245_v43 = vld [vmem:[%s2877_s0 + $0xa4] ss:$36 sps:$4 sm:$0xff]  }
  0x2d   :  { %1220 = vmatprep.mubr.bf16.mxu1 %v2173_v49  ;;  %1932 = vmatpush3.bf16.msra.mxu0 %v2179_v54  ;;  %v2250_v48 = vld [vmem:[%s2877_s0 + $0xa8] ss:$36 sps:$4 sm:$0xff]   ;;  %v2257_v54 = vld [vmem:[%s2877_s0 + $0xf0] ss:$36 sps:$4 sm:$0xff]  }
  0x2e   :  { %1996 = vmatpush3.bf16.msra.mxu1 %v2180_v55  ;;  %1933 = vmatprep.subr.bf16.mxu0 %v2187_v60  ;;  %v2252_v49 = vld [vmem:[%s2877_s0 + $0xec] ss:$36 sps:$4 sm:$0xff]   ;;  %v2259_v55 = vld [vmem:[%s2877_s0 + $0x134] ss:$36 sps:$4 sm:$0xff]   ;;  %v2266_v60 = vld [vmem:[%s2877_s0 + $0x17c] ss:$36 sps:$4 sm:$0xff]  }
  0x2f   :  { %1997 = vmatprep.subr.bf16.mxu1 %v2188_v61  ;;  %v2268_v61 = vld [vmem:[%s2877_s0 + $0x184] ss:$36 sps:$4 sm:$0xff]  }
  0x31   :  { %1934 = vmatpush3.bf16.msra.mxu0 %v2189_v62  ;;  %v2270_v62 = vld [vmem:[%s2877_s0 + $0x178] ss:$36 sps:$4 sm:$0xff]  }
  0x32   :  { %1998 = vmatpush3.bf16.msra.mxu1 %v2190_v63  ;;  %1935 = vmatprep.subr.bf16.mxu0 %v2197_v3  ;;  %v2271_v63 = vld [vmem:[%s2877_s0 + $0x180] ss:$36 sps:$4 sm:$0xff]   ;;  %v2278_v3 = vld [vmem:[%s2877_s0 + $0x1c8] ss:$36 sps:$4 sm:$0xff]  }
  0x33   :  { %1124 = vmatmul.mubr.bf16.gmra.mrb[8].mxu0 %v2175_v50  ;;  %1999 = vmatprep.subr.bf16.mxu1 %v2198_v5  ;;  %v2254_v50 = vld [vmem:[%s2877_s0 + $0xf4] ss:$36 sps:$4 sm:$0xff]  }
  0x34   :  { %1221 = vmatmul.mubr.bf16.gmra.mrb[8].mxu1 %v2176_v51  ;;  %1131 = vmatprep.mubr.bf16.mxu0 %v2181_v56  ;;  %v2272_v51 = vld [vmem:[%s2876_s1 + $0x228] sm:$0xff]   ;;  %v2261_v56 = vld [vmem:[%s2877_s0 + $0x13c] ss:$36 sps:$4 sm:$0xff]   ;;  %v2282_v5 = vld [vmem:[%s2877_s0 + $0x214] ss:$36 sps:$4 sm:$0xff]  }
  0x35   :  { %1228 = vmatprep.mubr.bf16.mxu1 %v2183_v57  ;;  %1936 = vmatpush3.bf16.msra.mxu0 %v2199_v6  ;;  %v2286_v57 = vld [vmem:[%s2876_s1 + $0x238] sm:$0xff]   ;;  %v2284_v6 = vld [vmem:[%s2877_s0 + $0x208] ss:$36 sps:$4 sm:$0xff]  }
  0x36   :  { %2000 = vmatpush3.bf16.msra.mxu1 %v2200_v7  ;;  %1937 = vmatprep.subr.bf16.mxu0 %v2207_v10  ;;  %v2285_v7 = vld [vmem:[%s2877_s0 + $0x210] ss:$36 sps:$4 sm:$0xff]   ;;  %v2289_v10 = vld [vmem:[%s2877_s0 + $0x68] ss:$36 sps:$4 sm:$0xff]  }
  0x37   :  { %2001 = vmatprep.subr.bf16.mxu1 %v2208_v11  ;;  %v2290_v11 = vld [vmem:[%s2877_s0 + $0x188] ss:$36 sps:$4 sm:$0xff]  }
  0x39   :  { %1938 = vmatpush3.bf16.msra.mxu0 %v2209_v13  ;;  %v2292_v13 = vld [vmem:[%s2877_s0 + $0x1d0] ss:$36 sps:$4 sm:$0xff]  }
  0x3a   :  { %2002 = vmatpush3.bf16.msra.mxu1 %v2210_v14  ;;  %1939 = vmatprep.subr.bf16.mxu0 %v2217_v18  ;;  %v2293_v14 = vld [vmem:[%s2877_s0 + $0xf8] ss:$36 sps:$4 sm:$0xff]  }
  0x3b   :  { %1132 = vmatmul.mubr.bf16.gmra.mrb[12].mxu0 %v2185_v58  ;;  %2003 = vmatprep.subr.bf16.mxu1 %v2218_v19  ;;  %v2263_v58 = vld [vmem:[%s2877_s0 + $0x130] ss:$36 sps:$4 sm:$0xff]  }
  0x3c   :  { %1229 = vmatmul.mubr.bf16.gmra.mrb[12].mxu1 %v2186_v59  ;;  %1139 = vmatprep.mubr.bf16.mxu0 %v2191_v0  ;;  %v2264_v59 = vld [vmem:[%s2877_s0 + $0x138] ss:$36 sps:$4 sm:$0xff]   ;;  %v2273_v0 = vld [vmem:[%s2877_s0 + $0x1c4] ss:$36 sps:$4 sm:$0xff]  }
  0x3d   :  { %1236 = vmatprep.mubr.bf16.mxu1 %v2193_v1  ;;  %1940 = vmatpush3.bf16.msra.mxu0 %v2219_v20  ;;  %v2275_v1 = vld [vmem:[%s2877_s0 + $0x1cc] ss:$36 sps:$4 sm:$0xff]  }
  0x3e   :  { %2004 = vmatpush3.bf16.msra.mxu1 %v2220_v21  ;;  %1941 = vmatprep.subr.bf16.mxu0 %v2227_v26 }
  0x3f   :  { %2005 = vmatprep.subr.bf16.mxu1 %v2228_v27 }
  0x41   :  { %1942 = vmatpush3.bf16.msra.mxu0 %v2229_v28 }
  0x42   :  { %2006 = vmatpush3.bf16.msra.mxu1 %v2230_v29  ;;  %2071 = vmatprep.subr.bf16.mxu0 %v2237_v32 }
  0x43   :  { %1140 = vmatmul.mubr.bf16.gmra.mrb[16].mxu0 %v2195_v2  ;;  %2103 = vmatprep.subr.bf16.mxu1 %v2237_v32  ;;  %v2277_v2 = vld [vmem:[%s2877_s0 + $0x1c0] ss:$36 sps:$4 sm:$0xff]  }
  0x44   :  { %1237 = vmatmul.mubr.bf16.gmra.mrb[16].mxu1 %v2196_v4  ;;  %1147 = vmatprep.mubr.bf16.mxu0 %v2201_v8  ;;  %v2280_v4 = vld [vmem:[%s2877_s0 + $0x20c] ss:$36 sps:$4 sm:$0xff]   ;;  %v2287_v8 = vld [vmem:[%s2877_s0 + $0x20] ss:$36 sps:$4 sm:$0xff]  }
  0x45   :  { %1244 = vmatprep.mubr.bf16.mxu1 %v2203_v9  ;;  %v2288_v9 = vld [vmem:[%s2877_s0 + $0x140] ss:$36 sps:$4 sm:$0xff]  }
  0x4b   :  { %1148 = vmatmul.mubr.bf16.gmra.mrb[20].mxu0 %v2205_v12  ;;  %v2291_v12 = vld [vmem:[%s2877_s0 + $0xb0] ss:$36 sps:$4 sm:$0xff]  }
  0x4c   :  { %1245 = vmatmul.mubr.bf16.gmra.mrb[20].mxu1 %v2206_v15  ;;  %1155 = vmatprep.mubr.bf16.mxu0 %v2211_v16  ;;  %v2294_v15 = vld [vmem:[%s2877_s0 + $0x218] ss:$36 sps:$4 sm:$0xff]  }
  0x4d   :  { %1252 = vmatprep.mubr.bf16.mxu1 %v2213_v17 }
  0x53   :  { %1156 = vmatmul.mubr.bf16.gmra.mrb[24].mxu0 %v2215_v22 }
  0x54   :  { %1253 = vmatmul.mubr.bf16.gmra.mrb[24].mxu1 %v2216_v23  ;;  %1163 = vmatprep.mubr.bf16.mxu0 %v2221_v24 }
  0x55   :  { %1260 = vmatprep.mubr.bf16.mxu1 %v2223_v25 }
  0x5b   :  { %1164 = vmatmul.mubr.bf16.gmra.mrb[28].mxu0 %v2225_v30 }
  0x5c   :  { %1261 = vmatmul.mubr.bf16.gmra.mrb[28].mxu1 %v2226_v31  ;;  %1301 = vmatprep.mubr.bf16.mxu0 %v2233_v33 }
  0x5d   :  { %1398 = vmatprep.mubr.bf16.mxu1 %v2236_v34 }
  0x63   :  { %1302 = vmatmul.mubr.bf16.vlgmr.msra.gmra.mrb[32].mxu0 %v2231_v35 }
  0x64   :  { %1399 = vmatmul.mubr.bf16.vlgmr.msra.gmra.mrb[32].mxu1 %v2234_v36  ;;  %2072 = vmatpush3.bf16.msra.mxu0 %v2237_v32 }
  0x65   :  { %2111 = vmatpush3.bf16.msra.mxu1 %v2237_v32  ;;  %1309 = vmatprep.mubr.bf16.mxu0 %v2238_v37 }
  0x66   :  { %1406 = vmatprep.mubr.bf16.mxu1 %v2240_v38  ;;  %2073 = vmatprep.subr.bf16.mxu0 %v2244_v39 }
  0x67   :  { %2104 = vmatprep.subr.bf16.mxu1 %v2244_v39 }
  0x68   :  { %2074 = vmatpush3.bf16.msra.mxu0 %v2244_v39 }
  0x69   :  { %2112 = vmatpush3.bf16.msra.mxu1 %v2244_v39  ;;  %2075 = vmatprep.subr.bf16.mxu0 %v2251_v40 }
  0x6a   :  { %2105 = vmatprep.subr.bf16.mxu1 %v2251_v40 }
  0x6b   :  { %1310 = vmatmul.mubr.bf16.gmra.mrb[36].mxu0 %v2242_v41 }
  0x6c   :  { %1407 = vmatmul.mubr.bf16.gmra.mrb[36].mxu1 %v2243_v42  ;;  %1317 = vmatprep.mubr.bf16.mxu0 %v2245_v43 }
  0x6d   :  { %1414 = vmatprep.mubr.bf16.mxu1 %v2247_v44  ;;  %2076 = vmatpush3.bf16.msra.mxu0 %v2251_v40 }
  0x6e   :  { %2113 = vmatpush3.bf16.msra.mxu1 %v2251_v40  ;;  %2077 = vmatprep.subr.bf16.mxu0 %v2258_v45 }
  0x6f   :  { %2106 = vmatprep.subr.bf16.mxu1 %v2258_v45 }
  0x71   :  { %2078 = vmatpush3.bf16.msra.mxu0 %v2258_v45 }
  0x72   :  { %2114 = vmatpush3.bf16.msra.mxu1 %v2258_v45  ;;  %2079 = vmatprep.subr.bf16.mxu0 %v2265_v46 }
  0x73   :  { %1318 = vmatmul.mubr.bf16.gmra.mrb[40].mxu0 %v2249_v47  ;;  %2107 = vmatprep.subr.bf16.mxu1 %v2265_v46 }
  0x74   :  { %1415 = vmatmul.mubr.bf16.gmra.mrb[40].mxu1 %v2250_v48  ;;  %1325 = vmatprep.mubr.bf16.mxu0 %v2252_v49 }
  0x75   :  { %1422 = vmatprep.mubr.bf16.mxu1 %v2254_v50  ;;  %2080 = vmatpush3.bf16.msra.mxu0 %v2265_v46 }
  0x76   :  { %2115 = vmatpush3.bf16.msra.mxu1 %v2265_v46  ;;  %2081 = vmatprep.subr.bf16.mxu0 %v2272_v51 }
  0x77   :  { %2108 = vmatprep.subr.bf16.mxu1 %v2272_v51 }
  0x79   :  { %2082 = vmatpush3.bf16.msra.mxu0 %v2272_v51 }
  0x7a   :  { %2116 = vmatpush3.bf16.msra.mxu1 %v2272_v51  ;;  %2083 = vmatprep.subr.bf16.mxu0 %v2279_v53 }
  0x7b   :  { %1326 = vmatmul.mubr.bf16.gmra.mrb[44].mxu0 %v2256_v52  ;;  %2109 = vmatprep.subr.bf16.mxu1 %v2279_v53 }
  0x7c   :  { %1423 = vmatmul.mubr.bf16.gmra.mrb[44].mxu1 %v2257_v54  ;;  %1333 = vmatprep.mubr.bf16.mxu0 %v2259_v55 }
  0x7d   :  { %1430 = vmatprep.mubr.bf16.mxu1 %v2261_v56  ;;  %2084 = vmatpush3.bf16.msra.mxu0 %v2279_v53 }
  0x7e   :  { %2117 = vmatpush3.bf16.msra.mxu1 %v2279_v53  ;;  %2085 = vmatprep.subr.bf16.mxu0 %v2286_v57 }
  0x7f   :  { %2110 = vmatprep.subr.bf16.mxu1 %v2286_v57 }
  0x81   :  { %2086 = vmatpush3.bf16.msra.mxu0 %v2286_v57 }
  0x82   :  { %2118 = vmatpush3.bf16.msra.mxu1 %v2286_v57 }
  0x83   :  { %1334 = vmatmul.mubr.bf16.gmra.mrb[48].mxu0 %v2263_v58 }
  0x84   :  { %1431 = vmatmul.mubr.bf16.gmra.mrb[48].mxu1 %v2264_v59  ;;  %1341 = vmatprep.mubr.bf16.mxu0 %v2266_v60 }
  0x85   :  { %1438 = vmatprep.mubr.bf16.mxu1 %v2268_v61 }
  0x8b   :  { %1342 = vmatmul.mubr.bf16.gmra.mrb[52].mxu0 %v2270_v62 }
  0x8c   :  { %1439 = vmatmul.mubr.bf16.gmra.mrb[52].mxu1 %v2271_v63  ;;  %1349 = vmatprep.mubr.bf16.mxu0 %v2273_v0 }
  0x8d   :  { %1446 = vmatprep.mubr.bf16.mxu1 %v2275_v1 }
  0x93   :  { %1350 = vmatmul.mubr.bf16.gmra.mrb[56].mxu0 %v2277_v2 }
  0x94   :  { %1447 = vmatmul.mubr.bf16.gmra.mrb[56].mxu1 %v2278_v3  ;;  %1357 = vmatprep.mubr.bf16.mxu0 %v2280_v4 }
  0x95   :  { %1454 = vmatprep.mubr.bf16.mxu1 %v2282_v5 }
  0x9b   :  { %1358 = vmatmul.mubr.bf16.gmra.mrb[60].mxu0 %v2284_v6 }
  0x9c   :  { %1455 = vmatmul.mubr.bf16.gmra.mrb[60].mxu1 %v2285_v7  ;;  %2087 = vmatprep.mubr.bf16.mxu0 %v2287_v8 }
  0x9d   :  { %2095 = vmatprep.mubr.bf16.mxu1 %v2288_v9 }
  0xa3   :  { %2088 = vmatmul.mubr.bf16.vlgmr.msra.gmra.mrb[64].mxu0 %v2289_v10 }
  0xa4   :  { %2096 = vmatmul.mubr.bf16.vlgmr.msra.gmra.mrb[64].mxu1 %v2290_v11  ;;  %2091 = vmatprep.mubr.bf16.mxu0 %v2291_v12 }
  0xa5   :  { %2099 = vmatprep.mubr.bf16.mxu1 %v2292_v13 }
  0xab   :  { %2092 = vmatmul.mubr.bf16.gmra.mrb[68].mxu0 %v2293_v14 }
  0xac   :  { %2100 = vmatmul.mubr.bf16.gmra.mrb[68].mxu1 %v2294_v15 }
  0xf6   :  { %v1815_v16 = vpop.f32.mrb[0].mxu0 }
  0xf7   :  { %v1879_v17 = vpop.f32.mrb[0].mxu1  ;;  %v1816_v18 = vpop.f32.mrb[1].mxu0 }
  0xf8   :  { %v1817_v19 = vadd.f32 %v1816_v18, %v1815_v16  ;;  %v1880_v20 = vpop.f32.mrb[1].mxu1  ;;  %v1818_v21 = vpop.f32.mrb[2].mxu0 }
  0xf9   :  { %v1881_v22 = vadd.f32 %v1880_v20, %v1879_v17  ;;  %v1882_v23 = vpop.f32.mrb[2].mxu1  ;;  %v1819_v24 = vpop.f32.mrb[3].mxu0 }
  0xfa   :  { %v1820_v25 = vadd.f32 %v1819_v24, %v1818_v21  ;;  %v1883_v26 = vpop.f32.mrb[3].mxu1 }
  0xfb   :  { %v2747_v27 = vadd.f32 %v1881_v22, %v1817_v19  ;;  %v1884_v28 = vadd.f32 %v1883_v26, %v1882_v23 }
  0xfd   :  { %v2749_v29 = vadd.f32 %v1884_v28, %v1820_v25 }
  0xfe   :  { %v1821_v30 = vpop.f32.mrb[4].mxu0 }
  0xff   :  { %v1885_v31 = vpop.f32.mrb[4].mxu1  ;;  %v1822_v32 = vpop.f32.mrb[5].mxu0 }
 0x100   :  { %v1823_v33 = vadd.f32 %v1822_v32, %v1821_v30  ;;  %v1886_v34 = vpop.f32.mrb[5].mxu1  ;;  %v1824_v35 = vpop.f32.mrb[6].mxu0 }
 0x101   :  { %v1887_v36 = vadd.f32 %v1886_v34, %v1885_v31  ;;  %v1888_v37 = vpop.f32.mrb[6].mxu1  ;;  %v1825_v38 = vpop.f32.mrb[7].mxu0 }
 0x102   :  { %v1826_v39 = vadd.f32 %v1825_v38, %v1824_v35  ;;  %v1889_v40 = vpop.f32.mrb[7].mxu1 }
 0x103   :  { %v2751_v41 = vadd.f32 %v1887_v36, %v1823_v33  ;;  %v1890_v42 = vadd.f32 %v1889_v40, %v1888_v37 }
 0x105   :  { %v2753_v43 = vadd.f32 %v1890_v42, %v1826_v39 }
 0x106   :  { %v1827_v44 = vpop.f32.mrb[8].mxu0 }
 0x107   :  { %v1891_v45 = vpop.f32.mrb[8].mxu1  ;;  %v1828_v46 = vpop.f32.mrb[9].mxu0 }
 0x108   :  { %v1829_v47 = vadd.f32 %v1828_v46, %v1827_v44  ;;  %v1892_v48 = vpop.f32.mrb[9].mxu1  ;;  %v1830_v49 = vpop.f32.mrb[10].mxu0 }
 0x109   :  { %v1893_v50 = vadd.f32 %v1892_v48, %v1891_v45  ;;  %v1894_v51 = vpop.f32.mrb[10].mxu1  ;;  %v1831_v52 = vpop.f32.mrb[11].mxu0 }
 0x10a   :  { %v1832_v53 = vadd.f32 %v1831_v52, %v1830_v49  ;;  %v1895_v54 = vpop.f32.mrb[11].mxu1 }
 0x10b   :  { %v2755_v55 = vadd.f32 %v1893_v50, %v1829_v47  ;;  %v1896_v56 = vadd.f32 %v1895_v54, %v1894_v51 }
 0x10d   :  { %v2757_v57 = vadd.f32 %v1896_v56, %v1832_v53 }
 0x10e   :  { %v1833_v58 = vpop.f32.mrb[12].mxu0 }
 0x10f   :  { %v1897_v59 = vpop.f32.mrb[12].mxu1  ;;  %v1834_v60 = vpop.f32.mrb[13].mxu0 }
 0x110   :  { %v1835_v61 = vadd.f32 %v1834_v60, %v1833_v58  ;;  %v1898_v62 = vpop.f32.mrb[13].mxu1  ;;  %v1836_v63 = vpop.f32.mrb[14].mxu0 }
 0x111   :  { %v1899_v0 = vadd.f32 %v1898_v62, %v1897_v59  ;;  %v1900_v1 = vpop.f32.mrb[14].mxu1  ;;  %v1837_v2 = vpop.f32.mrb[15].mxu0 }
 0x112   :  { %v1838_v3 = vadd.f32 %v1837_v2, %v1836_v63  ;;  %v1901_v4 = vpop.f32.mrb[15].mxu1 }
 0x113   :  { %v2759_v5 = vadd.f32 %v1899_v0, %v1835_v61  ;;  %v1902_v6 = vadd.f32 %v1901_v4, %v1900_v1 }
 0x115   :  { %v2761_v7 = vadd.f32 %v1902_v6, %v1838_v3 }
 0x116   :  { %v1839_v8 = vpop.f32.mrb[16].mxu0 }
 0x117   :  { %v1903_v9 = vpop.f32.mrb[16].mxu1  ;;  %v1840_v10 = vpop.f32.mrb[17].mxu0 }
 0x118   :  { %v1841_v11 = vadd.f32 %v1840_v10, %v1839_v8  ;;  %v1904_v12 = vpop.f32.mrb[17].mxu1  ;;  %v1842_v13 = vpop.f32.mrb[18].mxu0 }
 0x119   :  { %v1905_v14 = vadd.f32 %v1904_v12, %v1903_v9  ;;  %v1906_v15 = vpop.f32.mrb[18].mxu1  ;;  %v1843_v16 = vpop.f32.mrb[19].mxu0 }
 0x11a   :  { %v1844_v17 = vadd.f32 %v1843_v16, %v1842_v13  ;;  %v1907_v18 = vpop.f32.mrb[19].mxu1 }
 0x11b   :  { %v2763_v19 = vadd.f32 %v1905_v14, %v1841_v11  ;;  %v1908_v20 = vadd.f32 %v1907_v18, %v1906_v15 }
 0x11d   :  { %v2765_v21 = vadd.f32 %v1908_v20, %v1844_v17 }
 0x11e   :  { %v1845_v22 = vpop.f32.mrb[20].mxu0 }
 0x11f   :  { %v1909_v23 = vpop.f32.mrb[20].mxu1  ;;  %v1846_v24 = vpop.f32.mrb[21].mxu0 }
 0x120   :  { %v1847_v25 = vadd.f32 %v1846_v24, %v1845_v22  ;;  %v1910_v26 = vpop.f32.mrb[21].mxu1  ;;  %v1848_v28 = vpop.f32.mrb[22].mxu0 }
 0x121   :  { %v1911_v30 = vadd.f32 %v1910_v26, %v1909_v23  ;;  %v1912_v31 = vpop.f32.mrb[22].mxu1  ;;  %v1849_v32 = vpop.f32.mrb[23].mxu0 }
 0x122   :  { %v1850_v33 = vadd.f32 %v1849_v32, %v1848_v28  ;;  %v1913_v34 = vpop.f32.mrb[23].mxu1 }
 0x123   :  { %v2767_v35 = vadd.f32 %v1911_v30, %v1847_v25  ;;  %v1914_v36 = vadd.f32 %v1913_v34, %v1912_v31 }
 0x125   :  { %v2769_v37 = vadd.f32 %v1914_v36, %v1850_v33 }
 0x126   :  { %v1851_v38 = vpop.f32.mrb[24].mxu0 }
 0x127   :  { %v1915_v39 = vpop.f32.mrb[24].mxu1  ;;  %v1852_v40 = vpop.f32.mrb[25].mxu0 }
 0x128   :  { %v1853_v42 = vadd.f32 %v1852_v40, %v1851_v38  ;;  %v1916_v44 = vpop.f32.mrb[25].mxu1  ;;  %v1854_v45 = vpop.f32.mrb[26].mxu0 }
 0x129   :  { %v1917_v46 = vadd.f32 %v1916_v44, %v1915_v39  ;;  %v1918_v47 = vpop.f32.mrb[26].mxu1  ;;  %v1855_v48 = vpop.f32.mrb[27].mxu0 }
 0x12a   :  { %v1856_v49 = vadd.f32 %v1855_v48, %v1854_v45  ;;  %v1919_v50 = vpop.f32.mrb[27].mxu1 }
 0x12b   :  { %v2771_v51 = vadd.f32 %v1917_v46, %v1853_v42  ;;  %v1920_v52 = vadd.f32 %v1919_v50, %v1918_v47 }
 0x12d   :  { %v2773_v53 = vadd.f32 %v1920_v52, %v1856_v49 }
 0x12e   :  { %v1857_v54 = vpop.f32.mrb[28].mxu0 }
 0x12f   :  { %v1921_v56 = vpop.f32.mrb[28].mxu1  ;;  %v1858_v58 = vpop.f32.mrb[29].mxu0 }
 0x130   :  { %v1859_v59 = vadd.f32 %v1858_v58, %v1857_v54  ;;  %v1922_v60 = vpop.f32.mrb[29].mxu1  ;;  %v1860_v61 = vpop.f32.mrb[30].mxu0 }
 0x131   :  { %v1923_v62 = vadd.f32 %v1922_v60, %v1921_v56  ;;  %v1924_v63 = vpop.f32.mrb[30].mxu1  ;;  %v1861_v0 = vpop.f32.mrb[31].mxu0 }
 0x132   :  { %v1862_v1 = vadd.f32 %v1861_v0, %v1860_v61  ;;  %v1925_v2 = vpop.f32.mrb[31].mxu1 }
 0x133   :  { %v2775_v3 = vadd.f32 %v1923_v62, %v1859_v59  ;;  %v1926_v4 = vadd.f32 %v1925_v2, %v1924_v63 }
 0x135   :  { %v2777_v6 = vadd.f32 %v1926_v4, %v1862_v1 }
 0x136   :  { %v1943_v8 = vpop.f32.mrb[32].mxu0 }
 0x137   :  { %v2007_v9 = vpop.f32.mrb[32].mxu1  ;;  %v1944_v10 = vpop.f32.mrb[33].mxu0 }
 0x138   :  { %v1945_v11 = vadd.f32 %v1944_v10, %v1943_v8  ;;  %v2008_v12 = vpop.f32.mrb[33].mxu1  ;;  %v1946_v13 = vpop.f32.mrb[34].mxu0 }
 0x139   :  { %v2009_v14 = vadd.f32 %v2008_v12, %v2007_v9  ;;  %v2010_v15 = vpop.f32.mrb[34].mxu1  ;;  %v1947_v16 = vpop.f32.mrb[35].mxu0 }
 0x13a   :  { %v1304_v17 = vadd.f32 %v1945_v11, %v2747_v27  ;;  %v1948_v18 = vadd.f32 %v1947_v16, %v1946_v13  ;;  %v2011_v20 = vpop.f32.mrb[35].mxu1 }
 0x13b   :  { %v2012_v22 = vadd.f32 %v2011_v20, %v2010_v15 }
 0x13c   :  { %v1307_v23 = vadd.f32 %v1948_v18, %v2749_v29  ;;  %v2781_v24 = vadd.f32 %v2009_v14, %v1304_v17 }
 0x13e   :  { %v1949_v25 = vpop.f32.mrb[36].mxu0  ;;  %v2783_v26 = vadd.f32 %v2012_v22, %v1307_v23 }
 0x13f   :  { %v2013_v28 = vpop.f32.mrb[36].mxu1  ;;  %v1950_v30 = vpop.f32.mrb[37].mxu0 }
 0x140   :  { %v1951_v31 = vadd.f32 %v1950_v30, %v1949_v25  ;;  %v2014_v32 = vpop.f32.mrb[37].mxu1  ;;  %v1952_v33 = vpop.f32.mrb[38].mxu0 }
 0x141   :  { %v2015_v34 = vadd.f32 %v2014_v32, %v2013_v28  ;;  %v2016_v36 = vpop.f32.mrb[38].mxu1  ;;  %v1953_v38 = vpop.f32.mrb[39].mxu0 }
 0x142   :  { %v1312_v27 = vadd.f32 %v1951_v31, %v2751_v41  ;;  %v1954_v39 = vadd.f32 %v1953_v38, %v1952_v33  ;;  %v2017_v40 = vpop.f32.mrb[39].mxu1 }
 0x143   :  { %v2018_v42 = vadd.f32 %v2017_v40, %v2016_v36 }
 0x144   :  { %v1315_v29 = vadd.f32 %v1954_v39, %v2753_v43  ;;  %v2787_v44 = vadd.f32 %v2015_v34, %v1312_v27 }
 0x146   :  { %v1955_v45 = vpop.f32.mrb[40].mxu0  ;;  %v2789_v46 = vadd.f32 %v2018_v42, %v1315_v29 }
 0x147   :  { %v2019_v47 = vpop.f32.mrb[40].mxu1  ;;  %v1956_v48 = vpop.f32.mrb[41].mxu0 }
 0x148   :  { %v1957_v49 = vadd.f32 %v1956_v48, %v1955_v45  ;;  %v2020_v50 = vpop.f32.mrb[41].mxu1  ;;  %v1958_v52 = vpop.f32.mrb[42].mxu0 }
 0x149   :  { %v2021_v54 = vadd.f32 %v2020_v50, %v2019_v47  ;;  %v2022_v56 = vpop.f32.mrb[42].mxu1  ;;  %v1959_v58 = vpop.f32.mrb[43].mxu0 }
 0x14a   :  { %v1320_v41 = vadd.f32 %v1957_v49, %v2755_v55  ;;  %v1960_v59 = vadd.f32 %v1959_v58, %v1958_v52  ;;  %v2023_v60 = vpop.f32.mrb[43].mxu1 }
 0x14b   :  { %v2024_v61 = vadd.f32 %v2023_v60, %v2022_v56 }
 0x14c   :  { %v1323_v43 = vadd.f32 %v1960_v59, %v2757_v57  ;;  %v2793_v62 = vadd.f32 %v2021_v54, %v1320_v41 }
 0x14e   :  { %v1961_v63 = vpop.f32.mrb[44].mxu0  ;;  %v2795_v0 = vadd.f32 %v2024_v61, %v1323_v43 }
 0x14f   :  { %v2025_v1 = vpop.f32.mrb[44].mxu1  ;;  %v1962_v2 = vpop.f32.mrb[45].mxu0 }
 0x150   :  { %v1963_v4 = vadd.f32 %v1962_v2, %v1961_v63  ;;  %v2026_v8 = vpop.f32.mrb[45].mxu1  ;;  %v1964_v9 = vpop.f32.mrb[46].mxu0 }
 0x151   :  { %v2027_v10 = vadd.f32 %v2026_v8, %v2025_v1  ;;  %v2028_v11 = vpop.f32.mrb[46].mxu1  ;;  %v1965_v12 = vpop.f32.mrb[47].mxu0 }
 0x152   :  { %v1328_v55 = vadd.f32 %v1963_v4, %v2759_v5  ;;  %v1966_v13 = vadd.f32 %v1965_v12, %v1964_v9  ;;  %v2029_v14 = vpop.f32.mrb[47].mxu1 }
 0x153   :  { %v2030_v15 = vadd.f32 %v2029_v14, %v2028_v11 }
 0x154   :  { %v1331_v57 = vadd.f32 %v1966_v13, %v2761_v7  ;;  %v2799_v16 = vadd.f32 %v2027_v10, %v1328_v55 }
 0x156   :  { %v1967_v17 = vpop.f32.mrb[48].mxu0  ;;  %v2801_v18 = vadd.f32 %v2030_v15, %v1331_v57 }
 0x157   :  { %v2031_v20 = vpop.f32.mrb[48].mxu1  ;;  %v1968_v22 = vpop.f32.mrb[49].mxu0 }
 0x158   :  { %v1969_v23 = vadd.f32 %v1968_v22, %v1967_v17  ;;  %v2032_v25 = vpop.f32.mrb[49].mxu1  ;;  %v1970_v28 = vpop.f32.mrb[50].mxu0 }
 0x159   :  { %v2033_v30 = vadd.f32 %v2032_v25, %v2031_v20  ;;  %v2034_v31 = vpop.f32.mrb[50].mxu1  ;;  %v1971_v32 = vpop.f32.mrb[51].mxu0 }
 0x15a   :  { %v1336_v5 = vadd.f32 %v1969_v23, %v2763_v19  ;;  %v1972_v33 = vadd.f32 %v1971_v32, %v1970_v28  ;;  %v2035_v34 = vpop.f32.mrb[51].mxu1 }
 0x15b   :  { %v2036_v36 = vadd.f32 %v2035_v34, %v2034_v31 }
 0x15c   :  { %v1339_v7 = vadd.f32 %v1972_v33, %v2765_v21  ;;  %v1433_v38 = vadd.f32 %v2033_v30, %v1336_v5  ;;  %v1798_v33 = vld [vmem:[%s2878_s2] ss:$0 sm:$0xff] }
 0x15e   :  { %v1973_v27 = vpop.f32.mrb[52].mxu0  ;;  %v2805_v39 = vadd.f32 %v2036_v36, %v1339_v7 }
 0x15f   :  { %v2037_v40 = vpop.f32.mrb[52].mxu1  ;;  %v1974_v42 = vpop.f32.mrb[53].mxu0 }
 0x160   :  { %v1975_v29 = vadd.f32 %v1974_v42, %v1973_v27  ;;  %v2038_v45 = vpop.f32.mrb[53].mxu1  ;;  %v1976_v47 = vpop.f32.mrb[54].mxu0 }
 0x161   :  { %v2039_v48 = vadd.f32 %v2038_v45, %v2037_v40  ;;  %v2040_v49 = vpop.f32.mrb[54].mxu1  ;;  %v1977_v50 = vpop.f32.mrb[55].mxu0 }
 0x162   :  { %v1344_v52 = vadd.f32 %v1975_v29, %v2767_v35  ;;  %v1978_v19 = vadd.f32 %v1977_v50, %v1976_v47  ;;  %v2041_v54 = vpop.f32.mrb[55].mxu1 }
 0x163   :  { %v2042_v56 = vadd.f32 %v2041_v54, %v2040_v49 }
 0x164   :  { %v1347_v58 = vadd.f32 %v1978_v19, %v2769_v37  ;;  %v1441_v21 = vadd.f32 %v2039_v48, %v1344_v52 }
 0x166   :  { %v1979_v41 = vpop.f32.mrb[56].mxu0  ;;  %v1444_v59 = vadd.f32 %v2042_v56, %v1347_v58 }
 0x167   :  { %v2043_v60 = vpop.f32.mrb[56].mxu1  ;;  %v1980_v61 = vpop.f32.mrb[57].mxu0 }
 0x168   :  { %v1981_v43 = vadd.f32 %v1980_v61, %v1979_v41  ;;  %v2044_v63 = vpop.f32.mrb[57].mxu1  ;;  %v1982_v1 = vpop.f32.mrb[58].mxu0 }
 0x169   :  { %v2045_v2 = vadd.f32 %v2044_v63, %v2043_v60  ;;  %v2046_v4 = vpop.f32.mrb[58].mxu1  ;;  %v1983_v8 = vpop.f32.mrb[59].mxu0 }
 0x16a   :  { %v1352_v9 = vadd.f32 %v1981_v43, %v2771_v51  ;;  %v1984_v10 = vadd.f32 %v1983_v8, %v1982_v1  ;;  %v2047_v35 = vpop.f32.mrb[59].mxu1 }
 0x16b   :  { %v2048_v11 = vadd.f32 %v2047_v35, %v2046_v4 }
 0x16c   :  { %v1355_v12 = vadd.f32 %v1984_v10, %v2773_v53  ;;  %v1449_v55 = vadd.f32 %v2045_v2, %v1352_v9 }
 0x16e   :  { %v1985_v37 = vpop.f32.mrb[60].mxu0  ;;  %v2811_v13 = vadd.f32 %v2048_v11, %v1355_v12 }
 0x16f   :  { %v2049_v14 = vpop.f32.mrb[60].mxu1  ;;  %v1986_v15 = vpop.f32.mrb[61].mxu0 }
 0x170   :  { %v1987_v57 = vadd.f32 %v1986_v15, %v1985_v37  ;;  %v2050_v17 = vpop.f32.mrb[61].mxu1  ;;  %v1988_v20 = vpop.f32.mrb[62].mxu0 }
 0x171   :  { %v2051_v22 = vadd.f32 %v2050_v17, %v2049_v14  ;;  %v2052_v23 = vpop.f32.mrb[62].mxu1  ;;  %v1989_v25 = vpop.f32.mrb[63].mxu0 }
 0x172   :  { %v1360_v28 = vadd.f32 %v1987_v57, %v2775_v3  ;;  %v1990_v51 = vadd.f32 %v1989_v25, %v1988_v20  ;;  %v2053_v30 = vpop.f32.mrb[63].mxu1 }
 0x173   :  { %v2054_v31 = vadd.f32 %v2053_v30, %v2052_v23 }
 0x174   :  { %v1363_v32 = vadd.f32 %v1990_v51, %v2777_v6  ;;  %v1457_v53 = vadd.f32 %v2051_v22, %v1360_v28 }
 0x176   :  { %v2089_v5 = vpop.f32.mrb[64].mxu0  ;;  %v1460_v34 = vadd.f32 %v2054_v31, %v1363_v32 }
 0x177   :  { %v1506_v36 = vadd.f32 %v2089_v5, %v2787_v44  ;;  %v2097_v7 = vpop.f32.mrb[64].mxu1  ;;  %v1497_v27 = vpop.f32.mrb[65].mxu0 }
 0x178   :  { %v1538_v40 = vadd.f32 %v2097_v7, %v1441_v21  ;;  %v1498_v42 = vadd.f32 %v1497_v27, %v2781_v24  ;;  %v1529_v3 = vpop.f32.mrb[65].mxu1  ;;  %v2090_v29 = vpop.f32.mrb[66].mxu0 }
 0x179   :  { %v1620_v45 = vadd.f32 %v1798_v33, %v1506_v36  ;;  %v1530_v47 = vadd.f32 %v1529_v3, %v1433_v38  ;;  %v1509_v6 = vadd.f32 %v2090_v29, %v2789_v46  ;;  %v2098_v48 = vpop.f32.mrb[66].mxu1  ;;  %v1500_v49 = vpop.f32.mrb[67].mxu0 }
 0x17a   :  { %v1628_v50 = vadd.f32 %v1798_v33, %v1538_v40  ;;  %v1618_v52 = vadd.f32 %v1798_v33, %v1498_v42  ;;  %v1541_v19 = vadd.f32 %v2098_v48, %v1444_v59  ;;  %v1501_v54 = vadd.f32 %v1500_v49, %v2783_v26  ;;  %v1532_v56 = vpop.f32.mrb[67].mxu1 }
 0x17b   :  { %1636 = vst [vmem:[%s2879_s3 + $0x10] sm:$0xff] %v1620_v45  ;;  %v1626_v44 = vadd.f32 %v1798_v33, %v1530_v47  ;;  %v1621_v24 = vadd.f32 %v1798_v33, %v1509_v6  ;;  %v1533_v58 = vadd.f32 %v1532_v56, %v2805_v39 }
 0x17c   :  { %1644 = vst [vmem:[%s2879_s3 + $0x50] sm:$0xff] %v1628_v50  ;;  %1634 = vst [vmem:[%s2879_s3] sm:$0xff] %v1618_v52  ;;  %v1629_v46 = vadd.f32 %v1798_v33, %v1541_v19  ;;  %v1619_v38 = vadd.f32 %v1798_v33, %v1501_v54 }
 0x17d   :  { %1642 = vst [vmem:[%s2879_s3 + $0x40] sm:$0xff] %v1626_v44  ;;  %1637 = vst [vmem:[%s2879_s3 + $0x18] sm:$0xff] %v1621_v24  ;;  %v1627_v26 = vadd.f32 %v1798_v33, %v1533_v58 }
 0x17e   :  { %1645 = vst [vmem:[%s2879_s3 + $0x58] sm:$0xff] %v1629_v46  ;;  %1635 = vst [vmem:[%s2879_s3 + $0x8] sm:$0xff] %v1619_v38  ;;  %v2093_v39 = vpop.f32.mrb[68].mxu0 }
 0x17f   :  { %1643 = vst [vmem:[%s2879_s3 + $0x48] sm:$0xff] %v1627_v26  ;;  %v1522_v21 = vadd.f32 %v2093_v39, %v2799_v16  ;;  %v2101_v41 = vpop.f32.mrb[68].mxu1  ;;  %v1513_v59 = vpop.f32.mrb[69].mxu0 }
 0x180   :  { %v1554_v60 = vadd.f32 %v2101_v41, %v1457_v53  ;;  %v1514_v61 = vadd.f32 %v1513_v59, %v2793_v62  ;;  %v1545_v43 = vpop.f32.mrb[69].mxu1  ;;  %v2094_v63 = vpop.f32.mrb[70].mxu0 }
 0x181   :  { %v1624_v1 = vadd.f32 %v1798_v33, %v1522_v21  ;;  %v1546_v2 = vadd.f32 %v1545_v43, %v1449_v55  ;;  %v1525_v4 = vadd.f32 %v2094_v63, %v2801_v18  ;;  %v2102_v8 = vpop.f32.mrb[70].mxu1  ;;  %v1516_v9 = vpop.f32.mrb[71].mxu0 }
 0x182   :  { %v1632_v10 = vadd.f32 %v1798_v33, %v1554_v60  ;;  %v1622_v35 = vadd.f32 %v1798_v33, %v1514_v61  ;;  %v1557_v11 = vadd.f32 %v2102_v8, %v1460_v34  ;;  %v1517_v12 = vadd.f32 %v1516_v9, %v2795_v0  ;;  %v1548_v37 = vpop.f32.mrb[71].mxu1 }
 0x183   :  { %1640 = vst [vmem:[%s2879_s3 + $0x30] sm:$0xff] %v1624_v1  ;;  %v1630_v16 = vadd.f32 %v1798_v33, %v1546_v2  ;;  %v1625_v62 = vadd.f32 %v1798_v33, %v1525_v4  ;;  %v1549_v14 = vadd.f32 %v1548_v37, %v2811_v13 }
 0x184   :  { %1648 = vst [vmem:[%s2879_s3 + $0x70] sm:$0xff] %v1632_v10  ;;  %1638 = vst [vmem:[%s2879_s3 + $0x20] sm:$0xff] %v1622_v35  ;;  %v1633_v18 = vadd.f32 %v1798_v33, %v1557_v11  ;;  %v1623_v55 = vadd.f32 %v1798_v33, %v1517_v12 }
 0x185   :  { %1646 = vst [vmem:[%s2879_s3 + $0x60] sm:$0xff] %v1630_v16  ;;  %1641 = vst [vmem:[%s2879_s3 + $0x38] sm:$0xff] %v1625_v62  ;;  %v1631_v0 = vadd.f32 %v1798_v33, %v1549_v14 }
 0x186   :  { %1649 = vst [vmem:[%s2879_s3 + $0x78] sm:$0xff] %v1633_v18  ;;  %1639 = vst [vmem:[%s2879_s3 + $0x28] sm:$0xff] %v1623_v55 }
 0x187   :  { %1647 = vst [vmem:[%s2879_s3 + $0x68] sm:$0xff] %v1631_v0 }

// kernel: generator_forward.139
= control target key start
LH: loop header
LB: loop body
LE: loop exit
PB: predicated region body
PF: predicated region fallthrough
CT: control target
= control target key end

     0   :  { %s7073_s12 = smov 0   ;;  %s7075_s13 = smov 0   ;;  %s8975_s0 = inlined_call_operand.vmem [shape: bf16[512,3456], index: 0, kind: input, shape index: {}]   ;;  %s8976_s1 = inlined_call_operand.vmem [shape: bf16[3456,128], index: 1, kind: input, shape index: {}]   ;;  %s8977_s2 = inlined_call_operand.vmem [shape: f32[1,128], index: 2, kind: input, shape index: {}]   ;;  %s8978_s3 = inlined_call_operand.vmem [shape: f32[512,128], index: 3, kind: output, shape index: {}]  }
   0x1   :  { %s7077_s14 = smov 0   ;;  %s7079_s15 = smov 0  }
   0x2   :  { %s7081_s16 = smov 0  }
   0x3 LB: > { %s25_s17 = sadd.s32 1, %s7045_s15  ;;  %p48_p1 = scmp.ne.s32.totalorder %s7037_s13, %s7033_s12  ;;  %s7049_s16 = sphi %s7081_s16, %s13_s16   ;;  %s7045_s15 = sphi %s7079_s15, %s9018_s15   ;;  %s7041_s14 = sphi %s7077_s14, %s9017_s14   ;;  %s7037_s13 = sphi %s7075_s13, %s9016_s13   ;;  %s7033_s12 = sphi %s7073_s12, %s9015_s12  }
   0x4   : > { %p26_p0 = scmp.ge.s32.totalorder %s25_s17, 3  ;;  %p49_p2 = scmp.eq.s32.totalorder %s7049_s16, 0 }
   0x5   : > { %s41_s19 = sadd.s32 1, %s7037_s13  ;;  %p5379_p5 = scmp.ge.s32.totalorder %s7049_s16, 3 }
   0x6   : > { %s9020_s17 = smov (%p26_p0, %s25_s17), 0  ;;  %p50_p3 = por %p49_p2, %p48_p1 }
   0x7   : > { %s37_s18 = ssub.s32 %s7045_s15, %s9020_s17  ;;  %162 = sbr.rel (%p5379_p5) target bundleno = 189 (0xbd), region = 20 }
   0x8   : > { %p39_p4 = scmp.eq.s32.totalorder %s37_s18, 0 }
   0xa   : > { %s7108_s20 = scalar_select %p39_p4, %s7037_s13, %s41_s19  }
   0xe   : > { %165 = sbr.rel (!%p50_p3) target bundleno = 189 (0xbd), region = 24  ;;  %s167_s21 = sand.u32 (%p50_p3), 1, %s7037_s13  }
   0xf   : > { %s5878_s22 = smul.u32 (%p50_p3), 36, %s7045_s15 }
  0x10   : > { %s6351_s23 = smul.u32 (%p50_p3), 2304, %s167_s21 }
  0x11   : > { %s7116_s26 = scalar_lea.vmem (%p50_p3), %s8975_s0, %s5878_s22 }
  0x12   : > { %v190_v0 = vld [vmem:[%s7116_s26] sm:$0xff] (%p50_p3)  ;;  %v192_v1 = vld [vmem:[%s7116_s26 + $0x8] sm:$0xff] (%p50_p3)  ;;  %v194_v2 = vld [vmem:[%s7116_s26 + $0x10] sm:$0xff] (%p50_p3)  ;;  %s7121_s27 = scalar_lea.vmem (%p50_p3), [#allocation3], %s6351_s23 }
  0x13   : > { %191 = vst [vmem:[%s7121_s27] sm:$0xff] (%p50_p3), %v190_v0  ;;  %193 = vst [vmem:[%s7121_s27 + $0x8] sm:$0xff] (%p50_p3), %v192_v1  ;;  %v196_v3 = vld [vmem:[%s7116_s26 + $0x18] sm:$0xff] (%p50_p3)  ;;  %v198_v4 = vld [vmem:[%s7116_s26 + $0x6c] sm:$0xff] (%p50_p3) }
  0x14   : > { %195 = vst [vmem:[%s7121_s27 + $0x10] sm:$0xff] (%p50_p3), %v194_v2  ;;  %v200_v5 = vld [vmem:[%s7116_s26 + $0x74] sm:$0xff] (%p50_p3)  ;;  %197 = vst [vmem:[%s7121_s27 + $0x18] sm:$0xff] (%p50_p3), %v196_v3  ;;  %v202_v6 = vld [vmem:[%s7116_s26 + $0x7c] sm:$0xff] (%p50_p3) }
  0x15   : > { %199 = vst [vmem:[%s7121_s27 + $0x24] sm:$0xff] %v198_v4  ;;  %201 = vst [vmem:[%s7121_s27 + $0x2c] sm:$0xff] %v200_v5  ;;  %v204_v7 = vld [vmem:[%s7116_s26 + $0x84] sm:$0xff]  ;;  %v206_v8 = vld [vmem:[%s7116_s26 + $0xd8] sm:$0xff] }
  0x16   : > { %203 = vst [vmem:[%s7121_s27 + $0x34] sm:$0xff] %v202_v6  ;;  %205 = vst [vmem:[%s7121_s27 + $0x3c] sm:$0xff] %v204_v7  ;;  %v208_v9 = vld [vmem:[%s7116_s26 + $0xe0] sm:$0xff]  ;;  %v210_v10 = vld [vmem:[%s7116_s26 + $0xe8] sm:$0xff] }
  0x17   : > { %207 = vst [vmem:[%s7121_s27 + $0x48] sm:$0xff] %v206_v8  ;;  %v212_v11 = vld [vmem:[%s7116_s26 + $0xf0] sm:$0xff]  ;;  %209 = vst [vmem:[%s7121_s27 + $0x50] sm:$0xff] %v208_v9  ;;  %v214_v12 = vld [vmem:[%s7116_s26 + $0x144] sm:$0xff] }
  0x18   : > { %211 = vst [vmem:[%s7121_s27 + $0x58] sm:$0xff] %v210_v10  ;;  %213 = vst [vmem:[%s7121_s27 + $0x60] sm:$0xff] %v212_v11  ;;  %v216_v13 = vld [vmem:[%s7116_s26 + $0x14c] sm:$0xff]  ;;  %v218_v14 = vld [vmem:[%s7116_s26 + $0x154] sm:$0xff] }
  0x19   : > { %215 = vst [vmem:[%s7121_s27 + $0x6c] sm:$0xff] %v214_v12  ;;  %217 = vst [vmem:[%s7121_s27 + $0x74] sm:$0xff] %v216_v13  ;;  %v220_v15 = vld [vmem:[%s7116_s26 + $0x15c] sm:$0xff]  ;;  %v222_v16 = vld [vmem:[%s7116_s26 + $0x1b0] sm:$0xff] }
  0x1a   : > { %219 = vst [vmem:[%s7121_s27 + $0x7c] sm:$0xff] %v218_v14  ;;  %v224_v17 = vld [vmem:[%s7116_s26 + $0x1b8] sm:$0xff]  ;;  %221 = vst [vmem:[%s7121_s27 + $0x84] sm:$0xff] %v220_v15  ;;  %v226_v18 = vld [vmem:[%s7116_s26 + $0x1c0] sm:$0xff] }
  0x1b   : > { %223 = vst [vmem:[%s7121_s27 + $0x90] sm:$0xff] %v222_v16  ;;  %225 = vst [vmem:[%s7121_s27 + $0x98] sm:$0xff] %v224_v17  ;;  %v228_v19 = vld [vmem:[%s7116_s26 + $0x1c8] sm:$0xff]  ;;  %v230_v20 = vld [vmem:[%s7116_s26 + $0x21c] sm:$0xff] }
  0x1c   : > { %227 = vst [vmem:[%s7121_s27 + $0xa0] sm:$0xff] %v226_v18  ;;  %229 = vst [vmem:[%s7121_s27 + $0xa8] sm:$0xff] %v228_v19  ;;  %v232_v21 = vld [vmem:[%s7116_s26 + $0x224] sm:$0xff]  ;;  %v234_v22 = vld [vmem:[%s7116_s26 + $0x22c] sm:$0xff] }
  0x1d   : > { %231 = vst [vmem:[%s7121_s27 + $0xb4] sm:$0xff] %v230_v20  ;;  %v236_v23 = vld [vmem:[%s7116_s26 + $0x234] sm:$0xff]  ;;  %233 = vst [vmem:[%s7121_s27 + $0xbc] sm:$0xff] %v232_v21  ;;  %v238_v24 = vld [vmem:[%s7116_s26 + $0x288] sm:$0xff] }
  0x1e   : > { %235 = vst [vmem:[%s7121_s27 + $0xc4] sm:$0xff] %v234_v22  ;;  %237 = vst [vmem:[%s7121_s27 + $0xcc] sm:$0xff] %v236_v23  ;;  %v240_v25 = vld [vmem:[%s7116_s26 + $0x290] sm:$0xff]  ;;  %v242_v26 = vld [vmem:[%s7116_s26 + $0x298] sm:$0xff] }
  0x1f   : > { %239 = vst [vmem:[%s7121_s27 + $0xd8] sm:$0xff] %v238_v24  ;;  %241 = vst [vmem:[%s7121_s27 + $0xe0] sm:$0xff] %v240_v25  ;;  %v244_v27 = vld [vmem:[%s7116_s26 + $0x2a0] sm:$0xff]  ;;  %v246_v28 = vld [vmem:[%s7116_s26 + $0x2f4] sm:$0xff] }
  0x20   : > { %243 = vst [vmem:[%s7121_s27 + $0xe8] sm:$0xff] %v242_v26  ;;  %v248_v29 = vld [vmem:[%s7116_s26 + $0x2fc] sm:$0xff]  ;;  %245 = vst [vmem:[%s7121_s27 + $0xf0] sm:$0xff] %v244_v27  ;;  %v250_v30 = vld [vmem:[%s7116_s26 + $0x304] sm:$0xff] }
  0x21   : > { %247 = vst [vmem:[%s7121_s27 + $0xfc] sm:$0xff] %v246_v28  ;;  %249 = vst [vmem:[%s7121_s27 + $0x104] sm:$0xff] %v248_v29  ;;  %v252_v31 = vld [vmem:[%s7116_s26 + $0x30c] sm:$0xff]  ;;  %v254_v32 = vld [vmem:[%s7116_s26 + $0x360] sm:$0xff] }
  0x22   : > { %251 = vst [vmem:[%s7121_s27 + $0x10c] sm:$0xff] %v250_v30  ;;  %253 = vst [vmem:[%s7121_s27 + $0x114] sm:$0xff] %v252_v31  ;;  %v256_v33 = vld [vmem:[%s7116_s26 + $0x368] sm:$0xff]  ;;  %v258_v34 = vld [vmem:[%s7116_s26 + $0x370] sm:$0xff] }
  0x23   : > { %255 = vst [vmem:[%s7121_s27 + $0x120] sm:$0xff] %v254_v32  ;;  %v260_v35 = vld [vmem:[%s7116_s26 + $0x378] sm:$0xff]  ;;  %257 = vst [vmem:[%s7121_s27 + $0x128] sm:$0xff] %v256_v33  ;;  %v262_v36 = vld [vmem:[%s7116_s26 + $0x3cc] sm:$0xff] }
  0x24   : > { %259 = vst [vmem:[%s7121_s27 + $0x130] sm:$0xff] %v258_v34  ;;  %261 = vst [vmem:[%s7121_s27 + $0x138] sm:$0xff] %v260_v35  ;;  %v264_v37 = vld [vmem:[%s7116_s26 + $0x3d4] sm:$0xff]  ;;  %v266_v38 = vld [vmem:[%s7116_s26 + $0x3dc] sm:$0xff] }
  0x25   : > { %263 = vst [vmem:[%s7121_s27 + $0x144] sm:$0xff] %v262_v36  ;;  %265 = vst [vmem:[%s7121_s27 + $0x14c] sm:$0xff] %v264_v37  ;;  %v268_v39 = vld [vmem:[%s7116_s26 + $0x3e4] sm:$0xff]  ;;  %v270_v40 = vld [vmem:[%s7116_s26 + $0x438] sm:$0xff] }
  0x26   : > { %267 = vst [vmem:[%s7121_s27 + $0x154] sm:$0xff] %v266_v38  ;;  %v272_v41 = vld [vmem:[%s7116_s26 + $0x440] sm:$0xff]  ;;  %269 = vst [vmem:[%s7121_s27 + $0x15c] sm:$0xff] %v268_v39  ;;  %v274_v42 = vld [vmem:[%s7116_s26 + $0x448] sm:$0xff] }
  0x27   : > { %271 = vst [vmem:[%s7121_s27 + $0x168] sm:$0xff] %v270_v40  ;;  %273 = vst [vmem:[%s7121_s27 + $0x170] sm:$0xff] %v272_v41  ;;  %v276_v43 = vld [vmem:[%s7116_s26 + $0x450] sm:$0xff]  ;;  %v278_v44 = vld [vmem:[%s7116_s26 + $0x4a4] sm:$0xff] }
  0x28   : > { %275 = vst [vmem:[%s7121_s27 + $0x178] sm:$0xff] %v274_v42  ;;  %277 = vst [vmem:[%s7121_s27 + $0x180] sm:$0xff] %v276_v43  ;;  %v280_v45 = vld [vmem:[%s7116_s26 + $0x4ac] sm:$0xff]  ;;  %v282_v46 = vld [vmem:[%s7116_s26 + $0x4b4] sm:$0xff] }
  0x29   : > { %279 = vst [vmem:[%s7121_s27 + $0x18c] sm:$0xff] %v278_v44  ;;  %v284_v47 = vld [vmem:[%s7116_s26 + $0x4bc] sm:$0xff]  ;;  %281 = vst [vmem:[%s7121_s27 + $0x194] sm:$0xff] %v280_v45  ;;  %v286_v48 = vld [vmem:[%s7116_s26 + $0x510] sm:$0xff] }
  0x2a   : > { %283 = vst [vmem:[%s7121_s27 + $0x19c] sm:$0xff] %v282_v46  ;;  %285 = vst [vmem:[%s7121_s27 + $0x1a4] sm:$0xff] %v284_v47  ;;  %v288_v49 = vld [vmem:[%s7116_s26 + $0x518] sm:$0xff]  ;;  %v290_v50 = vld [vmem:[%s7116_s26 + $0x520] sm:$0xff] }
  0x2b   : > { %287 = vst [vmem:[%s7121_s27 + $0x1b0] sm:$0xff] %v286_v48  ;;  %289 = vst [vmem:[%s7121_s27 + $0x1b8] sm:$0xff] %v288_v49  ;;  %v292_v51 = vld [vmem:[%s7116_s26 + $0x528] sm:$0xff]  ;;  %v294_v52 = vld [vmem:[%s7116_s26 + $0x57c] sm:$0xff] }
  0x2c   : > { %291 = vst [vmem:[%s7121_s27 + $0x1c0] sm:$0xff] %v290_v50  ;;  %v296_v53 = vld [vmem:[%s7116_s26 + $0x584] sm:$0xff]  ;;  %293 = vst [vmem:[%s7121_s27 + $0x1c8] sm:$0xff] %v292_v51  ;;  %v298_v54 = vld [vmem:[%s7116_s26 + $0x58c] sm:$0xff] }
  0x2d   : > { %295 = vst [vmem:[%s7121_s27 + $0x1d4] sm:$0xff] %v294_v52  ;;  %297 = vst [vmem:[%s7121_s27 + $0x1dc] sm:$0xff] %v296_v53  ;;  %v300_v55 = vld [vmem:[%s7116_s26 + $0x594] sm:$0xff]  ;;  %v302_v56 = vld [vmem:[%s7116_s26 + $0x5e8] sm:$0xff] }
  0x2e   : > { %299 = vst [vmem:[%s7121_s27 + $0x1e4] sm:$0xff] %v298_v54  ;;  %301 = vst [vmem:[%s7121_s27 + $0x1ec] sm:$0xff] %v300_v55  ;;  %v304_v57 = vld [vmem:[%s7116_s26 + $0x5f0] sm:$0xff]  ;;  %v306_v58 = vld [vmem:[%s7116_s26 + $0x5f8] sm:$0xff] }
  0x2f   : > { %303 = vst [vmem:[%s7121_s27 + $0x1f8] sm:$0xff] %v302_v56  ;;  %v308_v59 = vld [vmem:[%s7116_s26 + $0x600] sm:$0xff]  ;;  %305 = vst [vmem:[%s7121_s27 + $0x200] sm:$0xff] %v304_v57  ;;  %v310_v60 = vld [vmem:[%s7116_s26 + $0x654] sm:$0xff] }
  0x30   : > { %307 = vst [vmem:[%s7121_s27 + $0x208] sm:$0xff] %v306_v58  ;;  %309 = vst [vmem:[%s7121_s27 + $0x210] sm:$0xff] %v308_v59  ;;  %v312_v61 = vld [vmem:[%s7116_s26 + $0x65c] sm:$0xff]  ;;  %v314_v62 = vld [vmem:[%s7116_s26 + $0x664] sm:$0xff] }
  0x31   : > { %311 = vst [vmem:[%s7121_s27 + $0x21c] sm:$0xff] %v310_v60  ;;  %313 = vst [vmem:[%s7121_s27 + $0x224] sm:$0xff] %v312_v61  ;;  %v316_v63 = vld [vmem:[%s7116_s26 + $0x66c] sm:$0xff]  ;;  %v318_v0 = vld [vmem:[%s7116_s26 + $0x6c0] sm:$0xff] }
  0x32   : > { %315 = vst [vmem:[%s7121_s27 + $0x22c] sm:$0xff] %v314_v62  ;;  %v320_v1 = vld [vmem:[%s7116_s26 + $0x6c8] sm:$0xff]  ;;  %317 = vst [vmem:[%s7121_s27 + $0x234] sm:$0xff] %v316_v63  ;;  %v322_v2 = vld [vmem:[%s7116_s26 + $0x6d0] sm:$0xff] }
  0x33   : > { %319 = vst [vmem:[%s7121_s27 + $0x240] sm:$0xff] %v318_v0  ;;  %321 = vst [vmem:[%s7121_s27 + $0x248] sm:$0xff] %v320_v1  ;;  %v324_v3 = vld [vmem:[%s7116_s26 + $0x6d8] sm:$0xff]  ;;  %v326_v4 = vld [vmem:[%s7116_s26 + $0x72c] sm:$0xff] }
  0x34   : > { %323 = vst [vmem:[%s7121_s27 + $0x250] sm:$0xff] %v322_v2  ;;  %325 = vst [vmem:[%s7121_s27 + $0x258] sm:$0xff] %v324_v3  ;;  %v328_v5 = vld [vmem:[%s7116_s26 + $0x734] sm:$0xff]  ;;  %v330_v6 = vld [vmem:[%s7116_s26 + $0x73c] sm:$0xff] }
  0x35   : > { %327 = vst [vmem:[%s7121_s27 + $0x264] sm:$0xff] %v326_v4  ;;  %v332_v7 = vld [vmem:[%s7116_s26 + $0x744] sm:$0xff]  ;;  %329 = vst [vmem:[%s7121_s27 + $0x26c] sm:$0xff] %v328_v5  ;;  %v334_v8 = vld [vmem:[%s7116_s26 + $0x798] sm:$0xff] }
  0x36   : > { %331 = vst [vmem:[%s7121_s27 + $0x274] sm:$0xff] %v330_v6  ;;  %333 = vst [vmem:[%s7121_s27 + $0x27c] sm:$0xff] %v332_v7  ;;  %v336_v9 = vld [vmem:[%s7116_s26 + $0x7a0] sm:$0xff]  ;;  %v338_v10 = vld [vmem:[%s7116_s26 + $0x7a8] sm:$0xff] }
  0x37   : > { %335 = vst [vmem:[%s7121_s27 + $0x288] sm:$0xff] %v334_v8  ;;  %337 = vst [vmem:[%s7121_s27 + $0x290] sm:$0xff] %v336_v9  ;;  %v340_v11 = vld [vmem:[%s7116_s26 + $0x7b0] sm:$0xff]  ;;  %v342_v12 = vld [vmem:[%s7116_s26 + $0x804] sm:$0xff] }
  0x38   : > { %339 = vst [vmem:[%s7121_s27 + $0x298] sm:$0xff] %v338_v10  ;;  %v344_v13 = vld [vmem:[%s7116_s26 + $0x80c] sm:$0xff]  ;;  %341 = vst [vmem:[%s7121_s27 + $0x2a0] sm:$0xff] %v340_v11  ;;  %v346_v14 = vld [vmem:[%s7116_s26 + $0x814] sm:$0xff] }
  0x39   : > { %343 = vst [vmem:[%s7121_s27 + $0x2ac] sm:$0xff] %v342_v12  ;;  %345 = vst [vmem:[%s7121_s27 + $0x2b4] sm:$0xff] %v344_v13  ;;  %v348_v15 = vld [vmem:[%s7116_s26 + $0x81c] sm:$0xff]  ;;  %v350_v16 = vld [vmem:[%s7116_s26 + $0x870] sm:$0xff] }
  0x3a   : > { %347 = vst [vmem:[%s7121_s27 + $0x2bc] sm:$0xff] %v346_v14  ;;  %349 = vst [vmem:[%s7121_s27 + $0x2c4] sm:$0xff] %v348_v15  ;;  %v352_v17 = vld [vmem:[%s7116_s26 + $0x878] sm:$0xff]  ;;  %v354_v18 = vld [vmem:[%s7116_s26 + $0x880] sm:$0xff] }
  0x3b   : > { %351 = vst [vmem:[%s7121_s27 + $0x2d0] sm:$0xff] %v350_v16  ;;  %v356_v19 = vld [vmem:[%s7116_s26 + $0x888] sm:$0xff]  ;;  %353 = vst [vmem:[%s7121_s27 + $0x2d8] sm:$0xff] %v352_v17  ;;  %v358_v20 = vld [vmem:[%s7116_s26 + $0x8dc] sm:$0xff] }
  0x3c   : > { %355 = vst [vmem:[%s7121_s27 + $0x2e0] sm:$0xff] %v354_v18  ;;  %357 = vst [vmem:[%s7121_s27 + $0x2e8] sm:$0xff] %v356_v19  ;;  %v360_v21 = vld [vmem:[%s7116_s26 + $0x8e4] sm:$0xff]  ;;  %v362_v22 = vld [vmem:[%s7116_s26 + $0x8ec] sm:$0xff] }
  0x3d   : > { %359 = vst [vmem:[%s7121_s27 + $0x2f4] sm:$0xff] %v358_v20  ;;  %361 = vst [vmem:[%s7121_s27 + $0x2fc] sm:$0xff] %v360_v21  ;;  %v364_v23 = vld [vmem:[%s7116_s26 + $0x8f4] sm:$0xff]  ;;  %v366_v24 = vld [vmem:[%s7116_s26 + $0x948] sm:$0xff] }
  0x3e   : > { %363 = vst [vmem:[%s7121_s27 + $0x304] sm:$0xff] %v362_v22  ;;  %v368_v25 = vld [vmem:[%s7116_s26 + $0x950] sm:$0xff]  ;;  %365 = vst [vmem:[%s7121_s27 + $0x30c] sm:$0xff] %v364_v23  ;;  %v370_v26 = vld [vmem:[%s7116_s26 + $0x958] sm:$0xff] }
  0x3f   : > { %367 = vst [vmem:[%s7121_s27 + $0x318] sm:$0xff] %v366_v24  ;;  %369 = vst [vmem:[%s7121_s27 + $0x320] sm:$0xff] %v368_v25  ;;  %v372_v27 = vld [vmem:[%s7116_s26 + $0x960] sm:$0xff]  ;;  %v374_v28 = vld [vmem:[%s7116_s26 + $0x9b4] sm:$0xff] }
  0x40   : > { %371 = vst [vmem:[%s7121_s27 + $0x328] sm:$0xff] %v370_v26  ;;  %373 = vst [vmem:[%s7121_s27 + $0x330] sm:$0xff] %v372_v27  ;;  %v376_v29 = vld [vmem:[%s7116_s26 + $0x9bc] sm:$0xff]  ;;  %v378_v30 = vld [vmem:[%s7116_s26 + $0x9c4] sm:$0xff] }
  0x41   : > { %375 = vst [vmem:[%s7121_s27 + $0x33c] sm:$0xff] %v374_v28  ;;  %v380_v31 = vld [vmem:[%s7116_s26 + $0x9cc] sm:$0xff]  ;;  %377 = vst [vmem:[%s7121_s27 + $0x344] sm:$0xff] %v376_v29  ;;  %v382_v32 = vld [vmem:[%s7116_s26 + $0xa20] sm:$0xff] }
  0x42   : > { %379 = vst [vmem:[%s7121_s27 + $0x34c] sm:$0xff] %v378_v30  ;;  %381 = vst [vmem:[%s7121_s27 + $0x354] sm:$0xff] %v380_v31  ;;  %v384_v33 = vld [vmem:[%s7116_s26 + $0xa28] sm:$0xff]  ;;  %v386_v34 = vld [vmem:[%s7116_s26 + $0xa30] sm:$0xff] }
  0x43   : > { %383 = vst [vmem:[%s7121_s27 + $0x360] sm:$0xff] %v382_v32  ;;  %385 = vst [vmem:[%s7121_s27 + $0x368] sm:$0xff] %v384_v33  ;;  %v388_v35 = vld [vmem:[%s7116_s26 + $0xa38] sm:$0xff]  ;;  %v390_v36 = vld [vmem:[%s7116_s26 + $0xa8c] sm:$0xff] }
  0x44   : > { %387 = vst [vmem:[%s7121_s27 + $0x370] sm:$0xff] %v386_v34  ;;  %v392_v37 = vld [vmem:[%s7116_s26 + $0xa94] sm:$0xff]  ;;  %389 = vst [vmem:[%s7121_s27 + $0x378] sm:$0xff] %v388_v35  ;;  %v394_v38 = vld [vmem:[%s7116_s26 + $0xa9c] sm:$0xff] }
  0x45   : > { %391 = vst [vmem:[%s7121_s27 + $0x384] sm:$0xff] %v390_v36  ;;  %393 = vst [vmem:[%s7121_s27 + $0x38c] sm:$0xff] %v392_v37  ;;  %v396_v39 = vld [vmem:[%s7116_s26 + $0xaa4] sm:$0xff]  ;;  %v398_v40 = vld [vmem:[%s7116_s26 + $0xaf8] sm:$0xff] }
  0x46   : > { %395 = vst [vmem:[%s7121_s27 + $0x394] sm:$0xff] %v394_v38  ;;  %397 = vst [vmem:[%s7121_s27 + $0x39c] sm:$0xff] %v396_v39  ;;  %v400_v41 = vld [vmem:[%s7116_s26 + $0xb00] sm:$0xff]  ;;  %v402_v42 = vld [vmem:[%s7116_s26 + $0xb08] sm:$0xff] }
  0x47   : > { %399 = vst [vmem:[%s7121_s27 + $0x3a8] sm:$0xff] %v398_v40  ;;  %v404_v43 = vld [vmem:[%s7116_s26 + $0xb10] sm:$0xff]  ;;  %401 = vst [vmem:[%s7121_s27 + $0x3b0] sm:$0xff] %v400_v41  ;;  %v406_v44 = vld [vmem:[%s7116_s26 + $0xb64] sm:$0xff] }
  0x48   : > { %403 = vst [vmem:[%s7121_s27 + $0x3b8] sm:$0xff] %v402_v42  ;;  %405 = vst [vmem:[%s7121_s27 + $0x3c0] sm:$0xff] %v404_v43  ;;  %v408_v45 = vld [vmem:[%s7116_s26 + $0xb6c] sm:$0xff]  ;;  %v410_v46 = vld [vmem:[%s7116_s26 + $0xb74] sm:$0xff] }
  0x49   : > { %407 = vst [vmem:[%s7121_s27 + $0x3cc] sm:$0xff] %v406_v44  ;;  %409 = vst [vmem:[%s7121_s27 + $0x3d4] sm:$0xff] %v408_v45  ;;  %v412_v47 = vld [vmem:[%s7116_s26 + $0xb7c] sm:$0xff]  ;;  %v414_v48 = vld [vmem:[%s7116_s26 + $0xbd0] sm:$0xff] }
  0x4a   : > { %411 = vst [vmem:[%s7121_s27 + $0x3dc] sm:$0xff] %v410_v46  ;;  %v416_v49 = vld [vmem:[%s7116_s26 + $0xbd8] sm:$0xff]  ;;  %413 = vst [vmem:[%s7121_s27 + $0x3e4] sm:$0xff] %v412_v47  ;;  %v418_v50 = vld [vmem:[%s7116_s26 + $0xbe0] sm:$0xff] }
  0x4b   : > { %415 = vst [vmem:[%s7121_s27 + $0x3f0] sm:$0xff] %v414_v48  ;;  %417 = vst [vmem:[%s7121_s27 + $0x3f8] sm:$0xff] %v416_v49  ;;  %v420_v51 = vld [vmem:[%s7116_s26 + $0xbe8] sm:$0xff]  ;;  %v422_v52 = vld [vmem:[%s7116_s26 + $0xc3c] sm:$0xff] }
  0x4c   : > { %419 = vst [vmem:[%s7121_s27 + $0x400] sm:$0xff] %v418_v50  ;;  %421 = vst [vmem:[%s7121_s27 + $0x408] sm:$0xff] %v420_v51  ;;  %v424_v53 = vld [vmem:[%s7116_s26 + $0xc44] sm:$0xff]  ;;  %v426_v54 = vld [vmem:[%s7116_s26 + $0xc4c] sm:$0xff] }
  0x4d   : > { %423 = vst [vmem:[%s7121_s27 + $0x414] sm:$0xff] %v422_v52  ;;  %v428_v55 = vld [vmem:[%s7116_s26 + $0xc54] sm:$0xff]  ;;  %425 = vst [vmem:[%s7121_s27 + $0x41c] sm:$0xff] %v424_v53  ;;  %v430_v56 = vld [vmem:[%s7116_s26 + $0xca8] sm:$0xff] }
  0x4e   : > { %427 = vst [vmem:[%s7121_s27 + $0x424] sm:$0xff] %v426_v54  ;;  %429 = vst [vmem:[%s7121_s27 + $0x42c] sm:$0xff] %v428_v55  ;;  %v432_v57 = vld [vmem:[%s7116_s26 + $0xcb0] sm:$0xff]  ;;  %v434_v58 = vld [vmem:[%s7116_s26 + $0xcb8] sm:$0xff] }
  0x4f   : > { %431 = vst [vmem:[%s7121_s27 + $0x438] sm:$0xff] %v430_v56  ;;  %433 = vst [vmem:[%s7121_s27 + $0x440] sm:$0xff] %v432_v57  ;;  %v436_v59 = vld [vmem:[%s7116_s26 + $0xcc0] sm:$0xff]  ;;  %v438_v60 = vld [vmem:[%s7116_s26 + $0xd14] sm:$0xff] }
  0x50   : > { %435 = vst [vmem:[%s7121_s27 + $0x448] sm:$0xff] %v434_v58  ;;  %v440_v61 = vld [vmem:[%s7116_s26 + $0xd1c] sm:$0xff]  ;;  %437 = vst [vmem:[%s7121_s27 + $0x450] sm:$0xff] %v436_v59  ;;  %v442_v62 = vld [vmem:[%s7116_s26 + $0xd24] sm:$0xff] }
  0x51   : > { %439 = vst [vmem:[%s7121_s27 + $0x45c] sm:$0xff] %v438_v60  ;;  %441 = vst [vmem:[%s7121_s27 + $0x464] sm:$0xff] %v440_v61  ;;  %v444_v63 = vld [vmem:[%s7116_s26 + $0xd2c] sm:$0xff]  ;;  %v446_v0 = vld [vmem:[%s7116_s26 + $0xd80] sm:$0xff] }
  0x52   : > { %443 = vst [vmem:[%s7121_s27 + $0x46c] sm:$0xff] %v442_v62  ;;  %445 = vst [vmem:[%s7121_s27 + $0x474] sm:$0xff] %v444_v63  ;;  %v448_v1 = vld [vmem:[%s7116_s26 + $0xd88] sm:$0xff]  ;;  %v450_v2 = vld [vmem:[%s7116_s26 + $0xd90] sm:$0xff] }
  0x53   : > { %447 = vst [vmem:[%s7121_s27 + $0x480] sm:$0xff] %v446_v0  ;;  %v452_v3 = vld [vmem:[%s7116_s26 + $0xd98] sm:$0xff]  ;;  %449 = vst [vmem:[%s7121_s27 + $0x488] sm:$0xff] %v448_v1  ;;  %v454_v4 = vld [vmem:[%s7116_s26 + $0xdec] sm:$0xff] }
  0x54   : > { %451 = vst [vmem:[%s7121_s27 + $0x490] sm:$0xff] %v450_v2  ;;  %453 = vst [vmem:[%s7121_s27 + $0x498] sm:$0xff] %v452_v3  ;;  %v456_v5 = vld [vmem:[%s7116_s26 + $0xdf4] sm:$0xff]  ;;  %v458_v6 = vld [vmem:[%s7116_s26 + $0xdfc] sm:$0xff] }
  0x55   : > { %455 = vst [vmem:[%s7121_s27 + $0x4a4] sm:$0xff] %v454_v4  ;;  %457 = vst [vmem:[%s7121_s27 + $0x4ac] sm:$0xff] %v456_v5  ;;  %v460_v7 = vld [vmem:[%s7116_s26 + $0xe04] sm:$0xff]  ;;  %v462_v8 = vld [vmem:[%s7116_s26 + $0xe58] sm:$0xff] }
  0x56   : > { %459 = vst [vmem:[%s7121_s27 + $0x4b4] sm:$0xff] %v458_v6  ;;  %v464_v9 = vld [vmem:[%s7116_s26 + $0xe60] sm:$0xff]  ;;  %461 = vst [vmem:[%s7121_s27 + $0x4bc] sm:$0xff] %v460_v7  ;;  %v466_v10 = vld [vmem:[%s7116_s26 + $0xe68] sm:$0xff] }
  0x57   : > { %463 = vst [vmem:[%s7121_s27 + $0x4c8] sm:$0xff] %v462_v8  ;;  %465 = vst [vmem:[%s7121_s27 + $0x4d0] sm:$0xff] %v464_v9  ;;  %v468_v11 = vld [vmem:[%s7116_s26 + $0xe70] sm:$0xff]  ;;  %v470_v12 = vld [vmem:[%s7116_s26 + $0xec4] sm:$0xff] }
  0x58   : > { %467 = vst [vmem:[%s7121_s27 + $0x4d8] sm:$0xff] %v466_v10  ;;  %469 = vst [vmem:[%s7121_s27 + $0x4e0] sm:$0xff] %v468_v11  ;;  %v472_v13 = vld [vmem:[%s7116_s26 + $0xecc] sm:$0xff]  ;;  %v474_v14 = vld [vmem:[%s7116_s26 + $0xed4] sm:$0xff] }
  0x59   : > { %471 = vst [vmem:[%s7121_s27 + $0x4ec] sm:$0xff] %v470_v12  ;;  %v476_v15 = vld [vmem:[%s7116_s26 + $0xedc] sm:$0xff]  ;;  %473 = vst [vmem:[%s7121_s27 + $0x4f4] sm:$0xff] %v472_v13  ;;  %v478_v16 = vld [vmem:[%s7116_s26 + $0xf30] sm:$0xff] }
  0x5a   : > { %475 = vst [vmem:[%s7121_s27 + $0x4fc] sm:$0xff] %v474_v14  ;;  %477 = vst [vmem:[%s7121_s27 + $0x504] sm:$0xff] %v476_v15  ;;  %v480_v17 = vld [vmem:[%s7116_s26 + $0xf38] sm:$0xff]  ;;  %v482_v18 = vld [vmem:[%s7116_s26 + $0xf40] sm:$0xff] }
  0x5b   : > { %479 = vst [vmem:[%s7121_s27 + $0x510] sm:$0xff] %v478_v16  ;;  %481 = vst [vmem:[%s7121_s27 + $0x518] sm:$0xff] %v480_v17  ;;  %v484_v19 = vld [vmem:[%s7116_s26 + $0xf48] sm:$0xff]  ;;  %v486_v20 = vld [vmem:[%s7116_s26 + $0xf9c] sm:$0xff] }
  0x5c   : > { %483 = vst [vmem:[%s7121_s27 + $0x520] sm:$0xff] %v482_v18  ;;  %v488_v21 = vld [vmem:[%s7116_s26 + $0xfa4] sm:$0xff]  ;;  %485 = vst [vmem:[%s7121_s27 + $0x528] sm:$0xff] %v484_v19  ;;  %v490_v22 = vld [vmem:[%s7116_s26 + $0xfac] sm:$0xff] }
  0x5d   : > { %487 = vst [vmem:[%s7121_s27 + $0x534] sm:$0xff] %v486_v20  ;;  %489 = vst [vmem:[%s7121_s27 + $0x53c] sm:$0xff] %v488_v21  ;;  %v492_v23 = vld [vmem:[%s7116_s26 + $0xfb4] sm:$0xff]  ;;  %v494_v24 = vld [vmem:[%s7116_s26 + $0x1008] sm:$0xff] }
  0x5e   : > { %491 = vst [vmem:[%s7121_s27 + $0x544] sm:$0xff] %v490_v22  ;;  %493 = vst [vmem:[%s7121_s27 + $0x54c] sm:$0xff] %v492_v23  ;;  %v496_v25 = vld [vmem:[%s7116_s26 + $0x1010] sm:$0xff]  ;;  %v498_v26 = vld [vmem:[%s7116_s26 + $0x1018] sm:$0xff] }
  0x5f   : > { %495 = vst [vmem:[%s7121_s27 + $0x558] sm:$0xff] %v494_v24  ;;  %v500_v27 = vld [vmem:[%s7116_s26 + $0x1020] sm:$0xff]  ;;  %497 = vst [vmem:[%s7121_s27 + $0x560] sm:$0xff] %v496_v25  ;;  %v502_v28 = vld [vmem:[%s7116_s26 + $0x1074] sm:$0xff] }
  0x60   : > { %499 = vst [vmem:[%s7121_s27 + $0x568] sm:$0xff] %v498_v26  ;;  %501 = vst [vmem:[%s7121_s27 + $0x570] sm:$0xff] %v500_v27  ;;  %v504_v29 = vld [vmem:[%s7116_s26 + $0x107c] sm:$0xff]  ;;  %v506_v30 = vld [vmem:[%s7116_s26 + $0x1084] sm:$0xff] }
  0x61   : > { %503 = vst [vmem:[%s7121_s27 + $0x57c] sm:$0xff] %v502_v28  ;;  %505 = vst [vmem:[%s7121_s27 + $0x584] sm:$0xff] %v504_v29  ;;  %v508_v31 = vld [vmem:[%s7116_s26 + $0x108c] sm:$0xff]  ;;  %v510_v32 = vld [vmem:[%s7116_s26 + $0x10e0] sm:$0xff] }
  0x62   : > { %507 = vst [vmem:[%s7121_s27 + $0x58c] sm:$0xff] %v506_v30  ;;  %v512_v33 = vld [vmem:[%s7116_s26 + $0x10e8] sm:$0xff]  ;;  %509 = vst [vmem:[%s7121_s27 + $0x594] sm:$0xff] %v508_v31  ;;  %v514_v34 = vld [vmem:[%s7116_s26 + $0x10f0] sm:$0xff] }
  0x63   : > { %511 = vst [vmem:[%s7121_s27 + $0x5a0] sm:$0xff] %v510_v32  ;;  %513 = vst [vmem:[%s7121_s27 + $0x5a8] sm:$0xff] %v512_v33  ;;  %v516_v35 = vld [vmem:[%s7116_s26 + $0x10f8] sm:$0xff]  ;;  %v518_v36 = vld [vmem:[%s7116_s26 + $0x114c] sm:$0xff] }
  0x64   : > { %515 = vst [vmem:[%s7121_s27 + $0x5b0] sm:$0xff] %v514_v34  ;;  %517 = vst [vmem:[%s7121_s27 + $0x5b8] sm:$0xff] %v516_v35  ;;  %v520_v37 = vld [vmem:[%s7116_s26 + $0x1154] sm:$0xff]  ;;  %v522_v38 = vld [vmem:[%s7116_s26 + $0x115c] sm:$0xff] }
  0x65   : > { %519 = vst [vmem:[%s7121_s27 + $0x5c4] sm:$0xff] %v518_v36  ;;  %v524_v39 = vld [vmem:[%s7116_s26 + $0x1164] sm:$0xff]  ;;  %521 = vst [vmem:[%s7121_s27 + $0x5cc] sm:$0xff] %v520_v37  ;;  %v526_v40 = vld [vmem:[%s7116_s26 + $0x11b8] sm:$0xff] }
  0x66   : > { %523 = vst [vmem:[%s7121_s27 + $0x5d4] sm:$0xff] %v522_v38  ;;  %525 = vst [vmem:[%s7121_s27 + $0x5dc] sm:$0xff] %v524_v39  ;;  %v528_v41 = vld [vmem:[%s7116_s26 + $0x11c0] sm:$0xff]  ;;  %v530_v42 = vld [vmem:[%s7116_s26 + $0x11c8] sm:$0xff] }
  0x67   : > { %527 = vst [vmem:[%s7121_s27 + $0x5e8] sm:$0xff] %v526_v40  ;;  %529 = vst [vmem:[%s7121_s27 + $0x5f0] sm:$0xff] %v528_v41  ;;  %v532_v43 = vld [vmem:[%s7116_s26 + $0x11d0] sm:$0xff]  ;;  %v534_v44 = vld [vmem:[%s7116_s26 + $0x1224] sm:$0xff] }
  0x68   : > { %531 = vst [vmem:[%s7121_s27 + $0x5f8] sm:$0xff] %v530_v42  ;;  %v536_v45 = vld [vmem:[%s7116_s26 + $0x122c] sm:$0xff]  ;;  %533 = vst [vmem:[%s7121_s27 + $0x600] sm:$0xff] %v532_v43  ;;  %v538_v46 = vld [vmem:[%s7116_s26 + $0x1234] sm:$0xff] }
  0x69   : > { %535 = vst [vmem:[%s7121_s27 + $0x60c] sm:$0xff] %v534_v44  ;;  %537 = vst [vmem:[%s7121_s27 + $0x614] sm:$0xff] %v536_v45  ;;  %v540_v47 = vld [vmem:[%s7116_s26 + $0x123c] sm:$0xff]  ;;  %v542_v48 = vld [vmem:[%s7116_s26 + $0x1290] sm:$0xff] }
  0x6a   : > { %539 = vst [vmem:[%s7121_s27 + $0x61c] sm:$0xff] %v538_v46  ;;  %541 = vst [vmem:[%s7121_s27 + $0x624] sm:$0xff] %v540_v47  ;;  %v544_v49 = vld [vmem:[%s7116_s26 + $0x1298] sm:$0xff]  ;;  %v546_v50 = vld [vmem:[%s7116_s26 + $0x12a0] sm:$0xff] }
  0x6b   : > { %543 = vst [vmem:[%s7121_s27 + $0x630] sm:$0xff] %v542_v48  ;;  %v548_v51 = vld [vmem:[%s7116_s26 + $0x12a8] sm:$0xff]  ;;  %545 = vst [vmem:[%s7121_s27 + $0x638] sm:$0xff] %v544_v49  ;;  %v550_v52 = vld [vmem:[%s7116_s26 + $0x12fc] sm:$0xff] }
  0x6c   : > { %547 = vst [vmem:[%s7121_s27 + $0x640] sm:$0xff] %v546_v50  ;;  %549 = vst [vmem:[%s7121_s27 + $0x648] sm:$0xff] %v548_v51  ;;  %v552_v53 = vld [vmem:[%s7116_s26 + $0x1304] sm:$0xff]  ;;  %v554_v54 = vld [vmem:[%s7116_s26 + $0x130c] sm:$0xff] }
  0x6d   : > { %551 = vst [vmem:[%s7121_s27 + $0x654] sm:$0xff] %v550_v52  ;;  %553 = vst [vmem:[%s7121_s27 + $0x65c] sm:$0xff] %v552_v53  ;;  %v556_v55 = vld [vmem:[%s7116_s26 + $0x1314] sm:$0xff]  ;;  %v558_v56 = vld [vmem:[%s7116_s26 + $0x1368] sm:$0xff] }
  0x6e   : > { %555 = vst [vmem:[%s7121_s27 + $0x664] sm:$0xff] %v554_v54  ;;  %v560_v57 = vld [vmem:[%s7116_s26 + $0x1370] sm:$0xff]  ;;  %557 = vst [vmem:[%s7121_s27 + $0x66c] sm:$0xff] %v556_v55  ;;  %v562_v58 = vld [vmem:[%s7116_s26 + $0x1378] sm:$0xff] }
  0x6f   : > { %559 = vst [vmem:[%s7121_s27 + $0x678] sm:$0xff] %v558_v56  ;;  %561 = vst [vmem:[%s7121_s27 + $0x680] sm:$0xff] %v560_v57  ;;  %v564_v59 = vld [vmem:[%s7116_s26 + $0x1380] sm:$0xff]  ;;  %v566_v60 = vld [vmem:[%s7116_s26 + $0x13d4] sm:$0xff] }
  0x70   : > { %563 = vst [vmem:[%s7121_s27 + $0x688] sm:$0xff] %v562_v58  ;;  %565 = vst [vmem:[%s7121_s27 + $0x690] sm:$0xff] %v564_v59  ;;  %v568_v61 = vld [vmem:[%s7116_s26 + $0x13dc] sm:$0xff]  ;;  %v570_v62 = vld [vmem:[%s7116_s26 + $0x13e4] sm:$0xff] }
  0x71   : > { %567 = vst [vmem:[%s7121_s27 + $0x69c] sm:$0xff] %v566_v60  ;;  %v572_v63 = vld [vmem:[%s7116_s26 + $0x13ec] sm:$0xff]  ;;  %569 = vst [vmem:[%s7121_s27 + $0x6a4] sm:$0xff] %v568_v61  ;;  %v574_v0 = vld [vmem:[%s7116_s26 + $0x1440] sm:$0xff] }
  0x72   : > { %571 = vst [vmem:[%s7121_s27 + $0x6ac] sm:$0xff] %v570_v62  ;;  %573 = vst [vmem:[%s7121_s27 + $0x6b4] sm:$0xff] %v572_v63  ;;  %v576_v1 = vld [vmem:[%s7116_s26 + $0x1448] sm:$0xff]  ;;  %v578_v2 = vld [vmem:[%s7116_s26 + $0x1450] sm:$0xff] }
  0x73   : > { %575 = vst [vmem:[%s7121_s27 + $0x6c0] sm:$0xff] %v574_v0  ;;  %577 = vst [vmem:[%s7121_s27 + $0x6c8] sm:$0xff] %v576_v1  ;;  %v580_v3 = vld [vmem:[%s7116_s26 + $0x1458] sm:$0xff]  ;;  %v582_v4 = vld [vmem:[%s7116_s26 + $0x14ac] sm:$0xff] }
  0x74   : > { %579 = vst [vmem:[%s7121_s27 + $0x6d0] sm:$0xff] %v578_v2  ;;  %v584_v5 = vld [vmem:[%s7116_s26 + $0x14b4] sm:$0xff]  ;;  %581 = vst [vmem:[%s7121_s27 + $0x6d8] sm:$0xff] %v580_v3  ;;  %v586_v6 = vld [vmem:[%s7116_s26 + $0x14bc] sm:$0xff] }
  0x75   : > { %583 = vst [vmem:[%s7121_s27 + $0x6e4] sm:$0xff] %v582_v4  ;;  %585 = vst [vmem:[%s7121_s27 + $0x6ec] sm:$0xff] %v584_v5  ;;  %v588_v7 = vld [vmem:[%s7116_s26 + $0x14c4] sm:$0xff]  ;;  %v590_v8 = vld [vmem:[%s7116_s26 + $0x1518] sm:$0xff] }
  0x76   : > { %587 = vst [vmem:[%s7121_s27 + $0x6f4] sm:$0xff] %v586_v6  ;;  %589 = vst [vmem:[%s7121_s27 + $0x6fc] sm:$0xff] %v588_v7  ;;  %v592_v9 = vld [vmem:[%s7116_s26 + $0x1520] sm:$0xff]  ;;  %v594_v10 = vld [vmem:[%s7116_s26 + $0x1528] sm:$0xff] }
  0x77   : > { %591 = vst [vmem:[%s7121_s27 + $0x708] sm:$0xff] %v590_v8  ;;  %v596_v11 = vld [vmem:[%s7116_s26 + $0x1530] sm:$0xff]  ;;  %593 = vst [vmem:[%s7121_s27 + $0x710] sm:$0xff] %v592_v9  ;;  %v598_v12 = vld [vmem:[%s7116_s26 + $0x1584] sm:$0xff] }
  0x78   : > { %595 = vst [vmem:[%s7121_s27 + $0x718] sm:$0xff] %v594_v10  ;;  %597 = vst [vmem:[%s7121_s27 + $0x720] sm:$0xff] %v596_v11  ;;  %v600_v13 = vld [vmem:[%s7116_s26 + $0x158c] sm:$0xff]  ;;  %v602_v14 = vld [vmem:[%s7116_s26 + $0x1594] sm:$0xff] }
  0x79   : > { %599 = vst [vmem:[%s7121_s27 + $0x72c] sm:$0xff] %v598_v12  ;;  %601 = vst [vmem:[%s7121_s27 + $0x734] sm:$0xff] %v600_v13  ;;  %v604_v15 = vld [vmem:[%s7116_s26 + $0x159c] sm:$0xff]  ;;  %v606_v16 = vld [vmem:[%s7116_s26 + $0x15f0] sm:$0xff] }
  0x7a   : > { %603 = vst [vmem:[%s7121_s27 + $0x73c] sm:$0xff] %v602_v14  ;;  %v608_v17 = vld [vmem:[%s7116_s26 + $0x15f8] sm:$0xff]  ;;  %605 = vst [vmem:[%s7121_s27 + $0x744] sm:$0xff] %v604_v15  ;;  %v610_v18 = vld [vmem:[%s7116_s26 + $0x1600] sm:$0xff] }
  0x7b   : > { %607 = vst [vmem:[%s7121_s27 + $0x750] sm:$0xff] %v606_v16  ;;  %609 = vst [vmem:[%s7121_s27 + $0x758] sm:$0xff] %v608_v17  ;;  %v612_v19 = vld [vmem:[%s7116_s26 + $0x1608] sm:$0xff]  ;;  %v614_v20 = vld [vmem:[%s7116_s26 + $0x165c] sm:$0xff] }
  0x7c   : > { %611 = vst [vmem:[%s7121_s27 + $0x760] sm:$0xff] %v610_v18  ;;  %613 = vst [vmem:[%s7121_s27 + $0x768] sm:$0xff] %v612_v19  ;;  %v616_v21 = vld [vmem:[%s7116_s26 + $0x1664] sm:$0xff]  ;;  %v618_v22 = vld [vmem:[%s7116_s26 + $0x166c] sm:$0xff] }
  0x7d   : > { %615 = vst [vmem:[%s7121_s27 + $0x774] sm:$0xff] %v614_v20  ;;  %v620_v23 = vld [vmem:[%s7116_s26 + $0x1674] sm:$0xff]  ;;  %617 = vst [vmem:[%s7121_s27 + $0x77c] sm:$0xff] %v616_v21  ;;  %v622_v24 = vld [vmem:[%s7116_s26 + $0x16c8] sm:$0xff] }
  0x7e   : > { %619 = vst [vmem:[%s7121_s27 + $0x784] sm:$0xff] %v618_v22  ;;  %621 = vst [vmem:[%s7121_s27 + $0x78c] sm:$0xff] %v620_v23  ;;  %v624_v25 = vld [vmem:[%s7116_s26 + $0x16d0] sm:$0xff]  ;;  %v626_v26 = vld [vmem:[%s7116_s26 + $0x16d8] sm:$0xff] }
  0x7f   : > { %623 = vst [vmem:[%s7121_s27 + $0x798] sm:$0xff] %v622_v24  ;;  %625 = vst [vmem:[%s7121_s27 + $0x7a0] sm:$0xff] %v624_v25  ;;  %v628_v27 = vld [vmem:[%s7116_s26 + $0x16e0] sm:$0xff]  ;;  %v630_v28 = vld [vmem:[%s7116_s26 + $0x1734] sm:$0xff] }
  0x80   : > { %627 = vst [vmem:[%s7121_s27 + $0x7a8] sm:$0xff] %v626_v26  ;;  %v632_v29 = vld [vmem:[%s7116_s26 + $0x173c] sm:$0xff]  ;;  %629 = vst [vmem:[%s7121_s27 + $0x7b0] sm:$0xff] %v628_v27  ;;  %v634_v30 = vld [vmem:[%s7116_s26 + $0x1744] sm:$0xff] }
  0x81   : > { %631 = vst [vmem:[%s7121_s27 + $0x7bc] sm:$0xff] %v630_v28  ;;  %633 = vst [vmem:[%s7121_s27 + $0x7c4] sm:$0xff] %v632_v29  ;;  %v636_v31 = vld [vmem:[%s7116_s26 + $0x174c] sm:$0xff]  ;;  %v638_v32 = vld [vmem:[%s7116_s26 + $0x17a0] sm:$0xff] }
  0x82   : > { %635 = vst [vmem:[%s7121_s27 + $0x7cc] sm:$0xff] %v634_v30  ;;  %637 = vst [vmem:[%s7121_s27 + $0x7d4] sm:$0xff] %v636_v31  ;;  %v640_v33 = vld [vmem:[%s7116_s26 + $0x17a8] sm:$0xff]  ;;  %v642_v34 = vld [vmem:[%s7116_s26 + $0x17b0] sm:$0xff] }
  0x83   : > { %639 = vst [vmem:[%s7121_s27 + $0x7e0] sm:$0xff] %v638_v32  ;;  %v644_v35 = vld [vmem:[%s7116_s26 + $0x17b8] sm:$0xff]  ;;  %641 = vst [vmem:[%s7121_s27 + $0x7e8] sm:$0xff] %v640_v33  ;;  %v646_v36 = vld [vmem:[%s7116_s26 + $0x180c] sm:$0xff] }
  0x84   : > { %643 = vst [vmem:[%s7121_s27 + $0x7f0] sm:$0xff] %v642_v34  ;;  %645 = vst [vmem:[%s7121_s27 + $0x7f8] sm:$0xff] %v644_v35  ;;  %v648_v37 = vld [vmem:[%s7116_s26 + $0x1814] sm:$0xff]  ;;  %v650_v38 = vld [vmem:[%s7116_s26 + $0x181c] sm:$0xff] }
  0x85   : > { %647 = vst [vmem:[%s7121_s27 + $0x804] sm:$0xff] %v646_v36  ;;  %649 = vst [vmem:[%s7121_s27 + $0x80c] sm:$0xff] %v648_v37  ;;  %v652_v39 = vld [vmem:[%s7116_s26 + $0x1824] sm:$0xff]  ;;  %v654_v40 = vld [vmem:[%s7116_s26 + $0x1878] sm:$0xff] }
  0x86   : > { %651 = vst [vmem:[%s7121_s27 + $0x814] sm:$0xff] %v650_v38  ;;  %v656_v41 = vld [vmem:[%s7116_s26 + $0x1880] sm:$0xff]  ;;  %653 = vst [vmem:[%s7121_s27 + $0x81c] sm:$0xff] %v652_v39  ;;  %v658_v42 = vld [vmem:[%s7116_s26 + $0x1888] sm:$0xff] }
  0x87   : > { %655 = vst [vmem:[%s7121_s27 + $0x828] sm:$0xff] %v654_v40  ;;  %657 = vst [vmem:[%s7121_s27 + $0x830] sm:$0xff] %v656_v41  ;;  %v660_v43 = vld [vmem:[%s7116_s26 + $0x1890] sm:$0xff]  ;;  %v662_v44 = vld [vmem:[%s7116_s26 + $0x18e4] sm:$0xff] }
  0x88   : > { %659 = vst [vmem:[%s7121_s27 + $0x838] sm:$0xff] %v658_v42  ;;  %661 = vst [vmem:[%s7121_s27 + $0x840] sm:$0xff] %v660_v43  ;;  %v664_v45 = vld [vmem:[%s7116_s26 + $0x18ec] sm:$0xff]  ;;  %v666_v46 = vld [vmem:[%s7116_s26 + $0x18f4] sm:$0xff] }
  0x89   : > { %663 = vst [vmem:[%s7121_s27 + $0x84c] sm:$0xff] %v662_v44  ;;  %v668_v47 = vld [vmem:[%s7116_s26 + $0x18fc] sm:$0xff]  ;;  %665 = vst [vmem:[%s7121_s27 + $0x854] sm:$0xff] %v664_v45  ;;  %v670_v48 = vld [vmem:[%s7116_s26 + $0x1950] sm:$0xff] }
  0x8a   : > { %667 = vst [vmem:[%s7121_s27 + $0x85c] sm:$0xff] %v666_v46  ;;  %669 = vst [vmem:[%s7121_s27 + $0x864] sm:$0xff] %v668_v47  ;;  %v672_v49 = vld [vmem:[%s7116_s26 + $0x1958] sm:$0xff]  ;;  %v674_v50 = vld [vmem:[%s7116_s26 + $0x1960] sm:$0xff] }
  0x8b   : > { %671 = vst [vmem:[%s7121_s27 + $0x870] sm:$0xff] %v670_v48  ;;  %673 = vst [vmem:[%s7121_s27 + $0x878] sm:$0xff] %v672_v49  ;;  %v676_v51 = vld [vmem:[%s7116_s26 + $0x1968] sm:$0xff]  ;;  %v678_v52 = vld [vmem:[%s7116_s26 + $0x19bc] sm:$0xff] }
  0x8c   : > { %675 = vst [vmem:[%s7121_s27 + $0x880] sm:$0xff] %v674_v50  ;;  %v680_v53 = vld [vmem:[%s7116_s26 + $0x19c4] sm:$0xff]  ;;  %677 = vst [vmem:[%s7121_s27 + $0x888] sm:$0xff] %v676_v51  ;;  %v682_v54 = vld [vmem:[%s7116_s26 + $0x19cc] sm:$0xff] }
  0x8d   : > { %679 = vst [vmem:[%s7121_s27 + $0x894] sm:$0xff] %v678_v52  ;;  %681 = vst [vmem:[%s7121_s27 + $0x89c] sm:$0xff] %v680_v53  ;;  %v684_v55 = vld [vmem:[%s7116_s26 + $0x19d4] sm:$0xff]  ;;  %v686_v56 = vld [vmem:[%s7116_s26 + $0x1a28] sm:$0xff] }
  0x8e   : > { %683 = vst [vmem:[%s7121_s27 + $0x8a4] sm:$0xff] %v682_v54  ;;  %685 = vst [vmem:[%s7121_s27 + $0x8ac] sm:$0xff] %v684_v55  ;;  %v688_v57 = vld [vmem:[%s7116_s26 + $0x1a30] sm:$0xff]  ;;  %v690_v58 = vld [vmem:[%s7116_s26 + $0x1a38] sm:$0xff] }
  0x8f   : > { %687 = vst [vmem:[%s7121_s27 + $0x8b8] sm:$0xff] %v686_v56  ;;  %v692_v59 = vld [vmem:[%s7116_s26 + $0x1a40] sm:$0xff]  ;;  %689 = vst [vmem:[%s7121_s27 + $0x8c0] sm:$0xff] %v688_v57  ;;  %v694_v60 = vld [vmem:[%s7116_s26 + $0x1a94] sm:$0xff] }
  0x90   : > { %691 = vst [vmem:[%s7121_s27 + $0x8c8] sm:$0xff] %v690_v58  ;;  %693 = vst [vmem:[%s7121_s27 + $0x8d0] sm:$0xff] %v692_v59  ;;  %v696_v61 = vld [vmem:[%s7116_s26 + $0x1a9c] sm:$0xff]  ;;  %v698_v62 = vld [vmem:[%s7116_s26 + $0x1aa4] sm:$0xff] }
  0x91   : > { %695 = vst [vmem:[%s7121_s27 + $0x8dc] sm:$0xff] %v694_v60  ;;  %697 = vst [vmem:[%s7121_s27 + $0x8e4] sm:$0xff] %v696_v61  ;;  %v700_v63 = vld [vmem:[%s7116_s26 + $0x1aac] sm:$0xff]  ;;  %v5381_v0 = vld [vmem:[%s7116_s26 + $0x20] sm:$0xf] }
  0x92   : > { %699 = vst [vmem:[%s7121_s27 + $0x8ec] sm:$0xff] %v698_v62  ;;  %v5383_v1 = vld [vmem:[%s7116_s26 + $0x8c] sm:$0xf]  ;;  %701 = vst [vmem:[%s7121_s27 + $0x8f4] sm:$0xff] %v700_v63  ;;  %v5385_v2 = vld [vmem:[%s7116_s26 + $0xf8] sm:$0xf] }
  0x93   : > { %5382 = vst [vmem:[%s7121_s27 + $0x20] sm:$0xf] %v5381_v0  ;;  %5384 = vst [vmem:[%s7121_s27 + $0x44] sm:$0xf] %v5383_v1  ;;  %v5387_v3 = vld [vmem:[%s7116_s26 + $0x164] sm:$0xf] }
  0x94   : > { %v5389_v4 = vld [vmem:[%s7116_s26 + $0x1d0] sm:$0xf]  ;;  %5386 = vst [vmem:[%s7121_s27 + $0x68] sm:$0xf] %v5385_v2  ;;  %5388 = vst [vmem:[%s7121_s27 + $0x8c] sm:$0xf] %v5387_v3 }
  0x95   : > { %5390 = vst [vmem:[%s7121_s27 + $0xb0] sm:$0xf] %v5389_v4  ;;  %v5391_v5 = vld [vmem:[%s7116_s26 + $0x23c] sm:$0xf]  ;;  %v5393_v6 = vld [vmem:[%s7116_s26 + $0x2a8] sm:$0xf] }
  0x96   : > { %v5395_v7 = vld [vmem:[%s7116_s26 + $0x314] sm:$0xf]  ;;  %5392 = vst [vmem:[%s7121_s27 + $0xd4] sm:$0xf] %v5391_v5  ;;  %5394 = vst [vmem:[%s7121_s27 + $0xf8] sm:$0xf] %v5393_v6 }
  0x97   : > { %5396 = vst [vmem:[%s7121_s27 + $0x11c] sm:$0xf] %v5395_v7  ;;  %v5397_v8 = vld [vmem:[%s7116_s26 + $0x380] sm:$0xf]  ;;  %v5399_v9 = vld [vmem:[%s7116_s26 + $0x3ec] sm:$0xf] }
  0x98   : > { %v5401_v10 = vld [vmem:[%s7116_s26 + $0x458] sm:$0xf]  ;;  %5398 = vst [vmem:[%s7121_s27 + $0x140] sm:$0xf] %v5397_v8  ;;  %5400 = vst [vmem:[%s7121_s27 + $0x164] sm:$0xf] %v5399_v9 }
  0x99   : > { %5402 = vst [vmem:[%s7121_s27 + $0x188] sm:$0xf] %v5401_v10  ;;  %v5403_v11 = vld [vmem:[%s7116_s26 + $0x4c4] sm:$0xf]  ;;  %v5405_v12 = vld [vmem:[%s7116_s26 + $0x530] sm:$0xf] }
  0x9a   : > { %v5407_v13 = vld [vmem:[%s7116_s26 + $0x59c] sm:$0xf]  ;;  %5404 = vst [vmem:[%s7121_s27 + $0x1ac] sm:$0xf] %v5403_v11  ;;  %5406 = vst [vmem:[%s7121_s27 + $0x1d0] sm:$0xf] %v5405_v12 }
  0x9b   : > { %5408 = vst [vmem:[%s7121_s27 + $0x1f4] sm:$0xf] %v5407_v13  ;;  %v5409_v14 = vld [vmem:[%s7116_s26 + $0x608] sm:$0xf]  ;;  %v5411_v15 = vld [vmem:[%s7116_s26 + $0x674] sm:$0xf] }
  0x9c   : > { %v5413_v16 = vld [vmem:[%s7116_s26 + $0x6e0] sm:$0xf]  ;;  %5410 = vst [vmem:[%s7121_s27 + $0x218] sm:$0xf] %v5409_v14  ;;  %5412 = vst [vmem:[%s7121_s27 + $0x23c] sm:$0xf] %v5411_v15 }
  0x9d   : > { %5414 = vst [vmem:[%s7121_s27 + $0x260] sm:$0xf] %v5413_v16  ;;  %v5415_v17 = vld [vmem:[%s7116_s26 + $0x74c] sm:$0xf]  ;;  %v5417_v18 = vld [vmem:[%s7116_s26 + $0x7b8] sm:$0xf] }
  0x9e   : > { %v5419_v19 = vld [vmem:[%s7116_s26 + $0x824] sm:$0xf]  ;;  %5416 = vst [vmem:[%s7121_s27 + $0x284] sm:$0xf] %v5415_v17  ;;  %5418 = vst [vmem:[%s7121_s27 + $0x2a8] sm:$0xf] %v5417_v18 }
  0x9f   : > { %5420 = vst [vmem:[%s7121_s27 + $0x2cc] sm:$0xf] %v5419_v19  ;;  %v5421_v20 = vld [vmem:[%s7116_s26 + $0x890] sm:$0xf]  ;;  %v5423_v21 = vld [vmem:[%s7116_s26 + $0x8fc] sm:$0xf] }
  0xa0   : > { %v5425_v22 = vld [vmem:[%s7116_s26 + $0x968] sm:$0xf]  ;;  %5422 = vst [vmem:[%s7121_s27 + $0x2f0] sm:$0xf] %v5421_v20  ;;  %5424 = vst [vmem:[%s7121_s27 + $0x314] sm:$0xf] %v5423_v21 }
  0xa1   : > { %5426 = vst [vmem:[%s7121_s27 + $0x338] sm:$0xf] %v5425_v22  ;;  %v5427_v23 = vld [vmem:[%s7116_s26 + $0x9d4] sm:$0xf]  ;;  %v5429_v24 = vld [vmem:[%s7116_s26 + $0xa40] sm:$0xf] }
  0xa2   : > { %v5431_v25 = vld [vmem:[%s7116_s26 + $0xaac] sm:$0xf]  ;;  %5428 = vst [vmem:[%s7121_s27 + $0x35c] sm:$0xf] %v5427_v23  ;;  %5430 = vst [vmem:[%s7121_s27 + $0x380] sm:$0xf] %v5429_v24 }
  0xa3   : > { %5432 = vst [vmem:[%s7121_s27 + $0x3a4] sm:$0xf] %v5431_v25  ;;  %v5433_v26 = vld [vmem:[%s7116_s26 + $0xb18] sm:$0xf]  ;;  %v5435_v27 = vld [vmem:[%s7116_s26 + $0xb84] sm:$0xf] }
  0xa4   : > { %v5437_v28 = vld [vmem:[%s7116_s26 + $0xbf0] sm:$0xf]  ;;  %5434 = vst [vmem:[%s7121_s27 + $0x3c8] sm:$0xf] %v5433_v26  ;;  %5436 = vst [vmem:[%s7121_s27 + $0x3ec] sm:$0xf] %v5435_v27 }
  0xa5   : > { %5438 = vst [vmem:[%s7121_s27 + $0x410] sm:$0xf] %v5437_v28  ;;  %v5439_v29 = vld [vmem:[%s7116_s26 + $0xc5c] sm:$0xf]  ;;  %v5441_v30 = vld [vmem:[%s7116_s26 + $0xcc8] sm:$0xf] }
  0xa6   : > { %v5443_v31 = vld [vmem:[%s7116_s26 + $0xd34] sm:$0xf]  ;;  %5440 = vst [vmem:[%s7121_s27 + $0x434] sm:$0xf] %v5439_v29  ;;  %5442 = vst [vmem:[%s7121_s27 + $0x458] sm:$0xf] %v5441_v30 }
  0xa7   : > { %5444 = vst [vmem:[%s7121_s27 + $0x47c] sm:$0xf] %v5443_v31  ;;  %v5445_v32 = vld [vmem:[%s7116_s26 + $0xda0] sm:$0xf]  ;;  %v5447_v33 = vld [vmem:[%s7116_s26 + $0xe0c] sm:$0xf] }
  0xa8   : > { %v5449_v34 = vld [vmem:[%s7116_s26 + $0xe78] sm:$0xf]  ;;  %5446 = vst [vmem:[%s7121_s27 + $0x4a0] sm:$0xf] %v5445_v32  ;;  %5448 = vst [vmem:[%s7121_s27 + $0x4c4] sm:$0xf] %v5447_v33 }
  0xa9   : > { %5450 = vst [vmem:[%s7121_s27 + $0x4e8] sm:$0xf] %v5449_v34  ;;  %v5451_v35 = vld [vmem:[%s7116_s26 + $0xee4] sm:$0xf]  ;;  %v5453_v36 = vld [vmem:[%s7116_s26 + $0xf50] sm:$0xf] }
  0xaa   : > { %v5455_v37 = vld [vmem:[%s7116_s26 + $0xfbc] sm:$0xf]  ;;  %5452 = vst [vmem:[%s7121_s27 + $0x50c] sm:$0xf] %v5451_v35  ;;  %5454 = vst [vmem:[%s7121_s27 + $0x530] sm:$0xf] %v5453_v36 }
  0xab   : > { %5456 = vst [vmem:[%s7121_s27 + $0x554] sm:$0xf] %v5455_v37  ;;  %v5457_v38 = vld [vmem:[%s7116_s26 + $0x1028] sm:$0xf]  ;;  %v5459_v39 = vld [vmem:[%s7116_s26 + $0x1094] sm:$0xf] }
  0xac   : > { %v5461_v40 = vld [vmem:[%s7116_s26 + $0x1100] sm:$0xf]  ;;  %5458 = vst [vmem:[%s7121_s27 + $0x578] sm:$0xf] %v5457_v38  ;;  %5460 = vst [vmem:[%s7121_s27 + $0x59c] sm:$0xf] %v5459_v39 }
  0xad   : > { %5462 = vst [vmem:[%s7121_s27 + $0x5c0] sm:$0xf] %v5461_v40  ;;  %v5463_v41 = vld [vmem:[%s7116_s26 + $0x116c] sm:$0xf]  ;;  %v5465_v42 = vld [vmem:[%s7116_s26 + $0x11d8] sm:$0xf] }
  0xae   : > { %v5467_v43 = vld [vmem:[%s7116_s26 + $0x1244] sm:$0xf]  ;;  %5464 = vst [vmem:[%s7121_s27 + $0x5e4] sm:$0xf] %v5463_v41  ;;  %5466 = vst [vmem:[%s7121_s27 + $0x608] sm:$0xf] %v5465_v42 }
  0xaf   : > { %5468 = vst [vmem:[%s7121_s27 + $0x62c] sm:$0xf] %v5467_v43  ;;  %v5469_v44 = vld [vmem:[%s7116_s26 + $0x12b0] sm:$0xf]  ;;  %v5471_v45 = vld [vmem:[%s7116_s26 + $0x131c] sm:$0xf] }
  0xb0   : > { %v5473_v46 = vld [vmem:[%s7116_s26 + $0x1388] sm:$0xf]  ;;  %5470 = vst [vmem:[%s7121_s27 + $0x650] sm:$0xf] %v5469_v44  ;;  %5472 = vst [vmem:[%s7121_s27 + $0x674] sm:$0xf] %v5471_v45 }
  0xb1   : > { %5474 = vst [vmem:[%s7121_s27 + $0x698] sm:$0xf] %v5473_v46  ;;  %v5475_v47 = vld [vmem:[%s7116_s26 + $0x13f4] sm:$0xf]  ;;  %v5477_v48 = vld [vmem:[%s7116_s26 + $0x1460] sm:$0xf] }
  0xb2   : > { %v5479_v49 = vld [vmem:[%s7116_s26 + $0x14cc] sm:$0xf]  ;;  %5476 = vst [vmem:[%s7121_s27 + $0x6bc] sm:$0xf] %v5475_v47  ;;  %5478 = vst [vmem:[%s7121_s27 + $0x6e0] sm:$0xf] %v5477_v48 }
  0xb3   : > { %5480 = vst [vmem:[%s7121_s27 + $0x704] sm:$0xf] %v5479_v49  ;;  %v5481_v50 = vld [vmem:[%s7116_s26 + $0x1538] sm:$0xf]  ;;  %v5483_v51 = vld [vmem:[%s7116_s26 + $0x15a4] sm:$0xf] }
  0xb4   : > { %v5485_v52 = vld [vmem:[%s7116_s26 + $0x1610] sm:$0xf]  ;;  %5482 = vst [vmem:[%s7121_s27 + $0x728] sm:$0xf] %v5481_v50  ;;  %5484 = vst [vmem:[%s7121_s27 + $0x74c] sm:$0xf] %v5483_v51 }
  0xb5   : > { %5486 = vst [vmem:[%s7121_s27 + $0x770] sm:$0xf] %v5485_v52  ;;  %v5487_v53 = vld [vmem:[%s7116_s26 + $0x167c] sm:$0xf]  ;;  %v5489_v54 = vld [vmem:[%s7116_s26 + $0x16e8] sm:$0xf] }
  0xb6   : > { %v5491_v55 = vld [vmem:[%s7116_s26 + $0x1754] sm:$0xf]  ;;  %5488 = vst [vmem:[%s7121_s27 + $0x794] sm:$0xf] %v5487_v53  ;;  %5490 = vst [vmem:[%s7121_s27 + $0x7b8] sm:$0xf] %v5489_v54 }
  0xb7   : > { %5492 = vst [vmem:[%s7121_s27 + $0x7dc] sm:$0xf] %v5491_v55  ;;  %v5493_v56 = vld [vmem:[%s7116_s26 + $0x17c0] sm:$0xf]  ;;  %v5495_v57 = vld [vmem:[%s7116_s26 + $0x182c] sm:$0xf] }
  0xb8   : > { %v5497_v58 = vld [vmem:[%s7116_s26 + $0x1898] sm:$0xf]  ;;  %5494 = vst [vmem:[%s7121_s27 + $0x800] sm:$0xf] %v5493_v56  ;;  %5496 = vst [vmem:[%s7121_s27 + $0x824] sm:$0xf] %v5495_v57 }
  0xb9   : > { %5498 = vst [vmem:[%s7121_s27 + $0x848] sm:$0xf] %v5497_v58  ;;  %v5499_v59 = vld [vmem:[%s7116_s26 + $0x1904] sm:$0xf]  ;;  %v5501_v60 = vld [vmem:[%s7116_s26 + $0x1970] sm:$0xf] }
  0xba   : > { %v5503_v61 = vld [vmem:[%s7116_s26 + $0x19dc] sm:$0xf]  ;;  %5500 = vst [vmem:[%s7121_s27 + $0x86c] sm:$0xf] %v5499_v59  ;;  %5502 = vst [vmem:[%s7121_s27 + $0x890] sm:$0xf] %v5501_v60 }
  0xbb   : > { %5504 = vst [vmem:[%s7121_s27 + $0x8b4] sm:$0xf] %v5503_v61  ;;  %v5505_v62 = vld [vmem:[%s7116_s26 + $0x1a48] sm:$0xf]  ;;  %v5507_v63 = vld [vmem:[%s7116_s26 + $0x1ab4] sm:$0xf] }
  0xbc   : > { %5506 = vst [vmem:[%s7121_s27 + $0x8d8] sm:$0xf] %v5505_v62  ;;  %5508 = vst [vmem:[%s7121_s27 + $0x8fc] sm:$0xf] %v5507_v63 }
  0xbd PF: > { %p5509_p6 = scmp.ge.s32.totalorder %s7049_s16, 1  ;;  %p853_p7 = scmp.lt.s32.totalorder %s7049_s16, 4 }
  0xbf   : > { %p854_p8 = pnand %p5509_p6, %p853_p7 }
  0xc1   : > { %857 = sbr.rel (%p854_p8) target bundleno = 1148 (0x47c), region = 54 }
  0xc8   : > { %s860_s28 = sand.u32 1, %s7033_s12   ;;  %s899_s29 = smul.u32 144, %s7041_s14 }
  0xc9   : > { %s6352_s30 = smul.u32 2304, %s860_s28  ;;  %p5511_p10 = scmp.ne.s32.totalorder %s7041_s14, 0 }
  0xca   : > { %p900_p9 = scmp.lt.s32.totalorder %s899_s29, 431  ;;  %v7051_v0 = vmov (!%p5511_p10), 0.0  }
  0xcb   : > { %s7769_s8 = scalar_lea.vmem [#allocation3], %s6352_s30  ;;  %924 = sbr.rel (%p5511_p10) target bundleno = 235 (0xeb), region = 62  ;;  %925 = vst [vmem:[#allocation2] sm:$0xff] (!%p5511_p10), %v7051_v0  ;;  %926 = vst [vmem:[#allocation2 + $0x8] sm:$0xff] (!%p5511_p10), %v7051_v0 }
  0xcc   : > { %s9022_s29 = smov (!%p900_p9, %s899_s29), 431  ;;  %927 = vst [vmem:[#allocation2 + $0x10] sm:$0xff] (!%p5511_p10), %v7051_v0  ;;  %928 = vst [vmem:[#allocation2 + $0x18] sm:$0xff] (!%p5511_p10), %v7051_v0 }
  0xcd   : > { %s5510_s4 = sshll.u32 %s9022_s29, 2  ;;  %929 = vst [vmem:[#allocation2 + $0x20] sm:$0xff] (!%p5511_p10), %v7051_v0  ;;  %930 = vst [vmem:[#allocation2 + $0x28] sm:$0xff] (!%p5511_p10), %v7051_v0 }
  0xce   : > { %s7767_s7 = scalar_lea.vmem %s8976_s1, %s5510_s4  ;;  %931 = vst [vmem:[#allocation2 + $0x30] sm:$0xff] (!%p5511_p10), %v7051_v0  ;;  %932 = vst [vmem:[#allocation2 + $0x38] sm:$0xff] (!%p5511_p10), %v7051_v0 }
  0xcf   : > { %933 = vst [vmem:[#allocation2 + $0x40] sm:$0xff] (!%p5511_p10), %v7051_v0  ;;  %934 = vst [vmem:[#allocation2 + $0x48] sm:$0xff] (!%p5511_p10), %v7051_v0 }
  0xd0   : > { %935 = vst [vmem:[#allocation2 + $0x50] sm:$0xff] (!%p5511_p10), %v7051_v0  ;;  %936 = vst [vmem:[#allocation2 + $0x58] sm:$0xff] (!%p5511_p10), %v7051_v0 }
  0xd1   : > { %937 = vst [vmem:[#allocation2 + $0x60] sm:$0xff] (!%p5511_p10), %v7051_v0  ;;  %938 = vst [vmem:[#allocation2 + $0x68] sm:$0xff] (!%p5511_p10), %v7051_v0 }
  0xd2   : > { %939 = vst [vmem:[#allocation2 + $0x70] sm:$0xff] %v7051_v0  ;;  %940 = vst [vmem:[#allocation2 + $0x78] sm:$0xff] %v7051_v0 }
  0xd3   : > { %941 = vst [vmem:[#allocation2 + $0x80] sm:$0xff] %v7051_v0  ;;  %942 = vst [vmem:[#allocation2 + $0x88] sm:$0xff] %v7051_v0 }
  0xd4   : > { %943 = vst [vmem:[#allocation2 + $0x90] sm:$0xff] %v7051_v0  ;;  %944 = vst [vmem:[#allocation2 + $0x98] sm:$0xff] %v7051_v0 }
  0xd5   : > { %945 = vst [vmem:[#allocation2 + $0xa0] sm:$0xff] %v7051_v0  ;;  %946 = vst [vmem:[#allocation2 + $0xa8] sm:$0xff] %v7051_v0 }
  0xd6   : > { %947 = vst [vmem:[#allocation2 + $0xb0] sm:$0xff] %v7051_v0  ;;  %948 = vst [vmem:[#allocation2 + $0xb8] sm:$0xff] %v7051_v0 }
  0xd7   : > { %949 = vst [vmem:[#allocation2 + $0xc0] sm:$0xff] %v7051_v0  ;;  %950 = vst [vmem:[#allocation2 + $0xc8] sm:$0xff] %v7051_v0 }
  0xd8   : > { %951 = vst [vmem:[#allocation2 + $0xd0] sm:$0xff] %v7051_v0  ;;  %952 = vst [vmem:[#allocation2 + $0xd8] sm:$0xff] %v7051_v0 }
  0xd9   : > { %953 = vst [vmem:[#allocation2 + $0xe0] sm:$0xff] %v7051_v0  ;;  %954 = vst [vmem:[#allocation2 + $0xe8] sm:$0xff] %v7051_v0 }
  0xda   : > { %955 = vst [vmem:[#allocation2 + $0xf0] sm:$0xff] %v7051_v0  ;;  %956 = vst [vmem:[#allocation2 + $0xf8] sm:$0xff] %v7051_v0 }
  0xdb   : > { %957 = vst [vmem:[#allocation2 + $0x100] sm:$0xff] %v7051_v0  ;;  %958 = vst [vmem:[#allocation2 + $0x108] sm:$0xff] %v7051_v0 }
  0xdc   : > { %959 = vst [vmem:[#allocation2 + $0x110] sm:$0xff] %v7051_v0  ;;  %960 = vst [vmem:[#allocation2 + $0x118] sm:$0xff] %v7051_v0 }
  0xdd   : > { %961 = vst [vmem:[#allocation2 + $0x120] sm:$0xff] %v7051_v0  ;;  %962 = vst [vmem:[#allocation2 + $0x128] sm:$0xff] %v7051_v0 }
  0xde   : > { %963 = vst [vmem:[#allocation2 + $0x130] sm:$0xff] %v7051_v0  ;;  %964 = vst [vmem:[#allocation2 + $0x138] sm:$0xff] %v7051_v0 }
  0xdf   : > { %965 = vst [vmem:[#allocation2 + $0x140] sm:$0xff] %v7051_v0  ;;  %966 = vst [vmem:[#allocation2 + $0x148] sm:$0xff] %v7051_v0 }
  0xe0   : > { %967 = vst [vmem:[#allocation2 + $0x150] sm:$0xff] %v7051_v0  ;;  %968 = vst [vmem:[#allocation2 + $0x158] sm:$0xff] %v7051_v0 }
  0xe1   : > { %969 = vst [vmem:[#allocation2 + $0x160] sm:$0xff] %v7051_v0  ;;  %970 = vst [vmem:[#allocation2 + $0x168] sm:$0xff] %v7051_v0 }
  0xe2   : > { %971 = vst [vmem:[#allocation2 + $0x170] sm:$0xff] %v7051_v0  ;;  %972 = vst [vmem:[#allocation2 + $0x178] sm:$0xff] %v7051_v0 }
  0xe3   : > { %973 = vst [vmem:[#allocation2 + $0x180] sm:$0xff] %v7051_v0  ;;  %974 = vst [vmem:[#allocation2 + $0x188] sm:$0xff] %v7051_v0 }
  0xe4   : > { %975 = vst [vmem:[#allocation2 + $0x190] sm:$0xff] %v7051_v0  ;;  %976 = vst [vmem:[#allocation2 + $0x198] sm:$0xff] %v7051_v0 }
  0xe5   : > { %977 = vst [vmem:[#allocation2 + $0x1a0] sm:$0xff] %v7051_v0  ;;  %978 = vst [vmem:[#allocation2 + $0x1a8] sm:$0xff] %v7051_v0 }
  0xe6   : > { %979 = vst [vmem:[#allocation2 + $0x1b0] sm:$0xff] %v7051_v0  ;;  %980 = vst [vmem:[#allocation2 + $0x1b8] sm:$0xff] %v7051_v0 }
  0xe7   : > { %981 = vst [vmem:[#allocation2 + $0x1c0] sm:$0xff] %v7051_v0  ;;  %982 = vst [vmem:[#allocation2 + $0x1c8] sm:$0xff] %v7051_v0 }
  0xe8   : > { %983 = vst [vmem:[#allocation2 + $0x1d0] sm:$0xff] %v7051_v0  ;;  %984 = vst [vmem:[#allocation2 + $0x1d8] sm:$0xff] %v7051_v0 }
  0xe9   : > { %985 = vst [vmem:[#allocation2 + $0x1e0] sm:$0xff] %v7051_v0  ;;  %986 = vst [vmem:[#allocation2 + $0x1e8] sm:$0xff] %v7051_v0 }
  0xea   : > { %987 = vst [vmem:[#allocation2 + $0x1f0] sm:$0xff] %v7051_v0  ;;  %988 = vst [vmem:[#allocation2 + $0x1f8] sm:$0xff] %v7051_v0 }
  0xeb PF: > { %v6395_v1 = vld [vmem:[%s7767_s7] sm:$0xff]   ;;  %v7052_v2 = vmov 0   ;;  %v6397_v4 = vld [vmem:[%s7767_s7 + $0x8] sm:$0xff]   ;;  %v6399_v6 = vld [vmem:[%s7767_s7 + $0x10] sm:$0xff]   ;;  %p5872_p11 = scmp.ne.s32.totalorder %s7041_s14, 2 }
  0xec   : > { %3421 = vmatprep.subr.bf16.mxu1 %v7052_v2  ;;  %3710 = vmatprep.subr.bf16.mxu0 %v7052_v2  ;;  %v7840_v3 = vld [vmem:[%s7767_s7 + $0x80] sm:$0xff]   ;;  %v7846_v5 = vld [vmem:[%s7767_s7 + $0x88] sm:$0xff]   ;;  %v7853_v7 = vld [vmem:[%s7767_s7 + $0x90] sm:$0xff]  }
  0xed   : > { %3422 = vmatpush1.bf16.msra.mxu1 %v6395_v1  ;;  %3711 = vmatpush1.bf16.msra.mxu0 %v7840_v3  ;;  %v6401_v8 = vld [vmem:[%s7767_s7 + $0x18] sm:$0xff]   ;;  %v6403_v10 = vld [vmem:[%s7767_s7 + $0x20] sm:$0xff]   ;;  %v6405_v12 = vld [vmem:[%s7767_s7 + $0x28] sm:$0xff]  }
  0xee   : > { %3423 = vmatprep.subr.bf16.mxu1 %v7052_v2  ;;  %3712 = vmatprep.subr.bf16.mxu0 %v7052_v2  ;;  %v7860_v9 = vld [vmem:[%s7767_s7 + $0x98] sm:$0xff]   ;;  %v7867_v11 = vld [vmem:[%s7767_s7 + $0xa0] sm:$0xff]   ;;  %v7874_v13 = vld [vmem:[%s7767_s7 + $0xa8] sm:$0xff]  }
  0xef   : > { %v6407_v14 = vld [vmem:[%s7767_s7 + $0x30] sm:$0xff]   ;;  %v6409_v16 = vld [vmem:[%s7767_s7 + $0x38] sm:$0xff]   ;;  %v6411_v18 = vld [vmem:[%s7767_s7 + $0x40] sm:$0xff]  }
  0xf0   : > { %v7881_v15 = vld [vmem:[%s7767_s7 + $0xb0] sm:$0xff]   ;;  %v7888_v17 = vld [vmem:[%s7767_s7 + $0xb8] sm:$0xff]   ;;  %v7895_v19 = vld [vmem:[%s7767_s7 + $0xc0] sm:$0xff]  }
  0xf1   : > { %3424 = vmatpush1.bf16.msra.mxu1 %v6397_v4  ;;  %3713 = vmatpush1.bf16.msra.mxu0 %v7846_v5  ;;  %v6429_v20 = vld [vmem:[%s7769_s8 + $0x4] ss:$36 sps:$4 sm:$0xff]   ;;  %v6432_v22 = vld [vmem:[%s7769_s8 + $0xc] ss:$36 sps:$4 sm:$0xff]   ;;  %v6417_v26 = vld [vmem:[%s7767_s7 + $0x58] sm:$0xff]  }
  0xf2   : > { %3425 = vmatprep.subr.bf16.mxu1 %v7052_v2  ;;  %3714 = vmatprep.subr.bf16.mxu0 %v7052_v2  ;;  %v6413_v21 = vld [vmem:[%s7767_s7 + $0x48] sm:$0xff]   ;;  %v6415_v24 = vld [vmem:[%s7767_s7 + $0x50] sm:$0xff]   ;;  %v7918_v27 = vld [vmem:[%s7767_s7 + $0xd8] sm:$0xff]  }
  0xf3   : > { %v7904_v23 = vld [vmem:[%s7767_s7 + $0xc8] sm:$0xff]   ;;  %3453 = vmatprep.mubr.bf16.mxu1 %v6429_v20  ;;  %3742 = vmatprep.mubr.bf16.mxu0 %v6432_v22  ;;  %v7911_v25 = vld [vmem:[%s7767_s7 + $0xd0] sm:$0xff]   ;;  %v6419_v28 = vld [vmem:[%s7767_s7 + $0x60] sm:$0xff]  }
  0xf4   : > { %v7925_v29 = vld [vmem:[%s7767_s7 + $0xe0] sm:$0xff]   ;;  %v6421_v30 = vld [vmem:[%s7767_s7 + $0x68] sm:$0xff]   ;;  %v6423_v32 = vld [vmem:[%s7767_s7 + $0x70] sm:$0xff]  }
  0xf5   : > { %3426 = vmatpush1.bf16.msra.mxu1 %v6399_v6  ;;  %3715 = vmatpush1.bf16.msra.mxu0 %v7853_v7  ;;  %v7932_v31 = vld [vmem:[%s7767_s7 + $0xe8] sm:$0xff]   ;;  %v7939_v33 = vld [vmem:[%s7767_s7 + $0xf0] sm:$0xff]   ;;  %v6425_v34 = vld [vmem:[%s7767_s7 + $0x78] sm:$0xff]  }
  0xf6   : > { %3427 = vmatprep.subr.bf16.mxu1 %v7052_v2  ;;  %3716 = vmatprep.subr.bf16.mxu0 %v7052_v2  ;;  %v7946_v35 = vld [vmem:[%s7767_s7 + $0xf8] sm:$0xff]   ;;  %v6427_v36 = vld [vmem:[%s7769_s8] ss:$36 sps:$4 sm:$0xff]   ;;  %v6430_v37 = vld [vmem:[%s7769_s8 + $0x8] ss:$36 sps:$4 sm:$0xff]  }
  0xf7   : > { %v6433_v38 = vld [vmem:[%s7767_s7 + $0x100] sm:$0xff]   ;;  %v6435_v39 = vld [vmem:[%s7769_s8 + $0x4c] ss:$36 sps:$4 sm:$0xff]   ;;  %v6437_v40 = vld [vmem:[%s7769_s8 + $0x54] ss:$36 sps:$4 sm:$0xff]  }
  0xf8   : > { %v6434_v41 = vld [vmem:[%s7767_s7 + $0x108] sm:$0xff]   ;;  %v6440_v43 = vld [vmem:[%s7769_s8 + $0x50] ss:$36 sps:$4 sm:$0xff]   ;;  %v6445_v46 = vld [vmem:[%s7769_s8 + $0x9c] ss:$36 sps:$4 sm:$0xff]  }
  0xf9   : > { %3428 = vmatpush1.bf16.msra.mxu1 %v6401_v8  ;;  %3717 = vmatpush1.bf16.msra.mxu0 %v7860_v9  ;;  %v6439_v42 = vld [vmem:[%s7769_s8 + $0x48] ss:$36 sps:$4 sm:$0xff]   ;;  %v6443_v44 = vld [vmem:[%s7769_s8 + $0x94] ss:$36 sps:$4 sm:$0xff]   ;;  %v6449_v50 = vld [vmem:[%s7767_s7 + $0x120] sm:$0xff]  }
  0xfa   : > { %3429 = vmatprep.subr.bf16.mxu1 %v7052_v2  ;;  %3718 = vmatprep.subr.bf16.mxu0 %v7052_v2  ;;  %v6441_v45 = vld [vmem:[%s7767_s7 + $0x110] sm:$0xff]   ;;  %v6442_v47 = vld [vmem:[%s7767_s7 + $0x118] sm:$0xff]   ;;  %v6453_v52 = vld [vmem:[%s7769_s8 + $0xe4] ss:$36 sps:$4 sm:$0xff]  }
  0xfb   : > { %v6447_v48 = vld [vmem:[%s7769_s8 + $0x90] ss:$36 sps:$4 sm:$0xff]   ;;  %v6448_v49 = vld [vmem:[%s7769_s8 + $0x98] ss:$36 sps:$4 sm:$0xff]   ;;  %v6450_v53 = vld [vmem:[%s7767_s7 + $0x128] sm:$0xff]  }
  0xfc   : > { %v6451_v51 = vld [vmem:[%s7769_s8 + $0xdc] ss:$36 sps:$4 sm:$0xff]   ;;  %v6459_v56 = vld [vmem:[%s7769_s8 + $0x124] ss:$36 sps:$4 sm:$0xff]   ;;  %v6457_v57 = vld [vmem:[%s7767_s7 + $0x130] sm:$0xff]  }
  0xfd   : > { %3430 = vmatpush1.bf16.msra.mxu1 %v6403_v10  ;;  %3719 = vmatpush1.bf16.msra.mxu0 %v7867_v11  ;;  %v6455_v54 = vld [vmem:[%s7769_s8 + $0xd8] ss:$36 sps:$4 sm:$0xff]   ;;  %v6456_v55 = vld [vmem:[%s7769_s8 + $0xe0] ss:$36 sps:$4 sm:$0xff]   ;;  %v6461_v58 = vld [vmem:[%s7769_s8 + $0x12c] ss:$36 sps:$4 sm:$0xff]  }
  0xfe   : > { %3431 = vmatprep.subr.bf16.mxu1 %v7052_v2  ;;  %3720 = vmatprep.subr.bf16.mxu0 %v7052_v2  ;;  %v6458_v59 = vld [vmem:[%s7767_s7 + $0x138] sm:$0xff]   ;;  %v6463_v60 = vld [vmem:[%s7769_s8 + $0x120] ss:$36 sps:$4 sm:$0xff]   ;;  %v6464_v61 = vld [vmem:[%s7769_s8 + $0x128] ss:$36 sps:$4 sm:$0xff]  }
  0xff   : > { %v6465_v62 = vld [vmem:[%s7767_s7 + $0x140] sm:$0xff]   ;;  %v6467_v63 = vld [vmem:[%s7769_s8 + $0x16c] ss:$36 sps:$4 sm:$0xff]   ;;  %v6469_v0 = vld [vmem:[%s7769_s8 + $0x174] ss:$36 sps:$4 sm:$0xff]  }
 0x100   : > { %v6466_v1 = vld [vmem:[%s7767_s7 + $0x148] sm:$0xff]   ;;  %v6472_v4 = vld [vmem:[%s7769_s8 + $0x170] ss:$36 sps:$4 sm:$0xff]   ;;  %v6474_v8 = vld [vmem:[%s7767_s7 + $0x158] sm:$0xff]  }
 0x101   : > { %3432 = vmatpush1.bf16.msra.mxu1 %v6405_v12  ;;  %3721 = vmatpush1.bf16.msra.mxu0 %v7874_v13  ;;  %v6473_v6 = vld [vmem:[%s7767_s7 + $0x150] sm:$0xff]   ;;  %v6480_v10 = vld [vmem:[%s7769_s8 + $0x1b8] ss:$36 sps:$4 sm:$0xff]  }
 0x102   : > { %3433 = vmatprep.subr.bf16.mxu1 %v7052_v2  ;;  %3722 = vmatprep.subr.bf16.mxu0 %v7052_v2  ;;  %v6483_v12 = vld [vmem:[%s7769_s8 + $0x1fc] ss:$36 sps:$4 sm:$0xff]   ;;  %v6493_v22 = vld [vmem:[%s7769_s8 + $0x10] ss:$36 sps:$4 sm:$0xff]  }
 0x103   : > { %v6490_v20 = vld [vmem:[%s7767_s7 + $0x178] sm:$0xff]  }
 0x105   : > { %3434 = vmatpush1.bf16.msra.mxu1 %v6407_v14  ;;  %3723 = vmatpush1.bf16.msra.mxu0 %v7881_v15  ;;  %v6482_v14 = vld [vmem:[%s7767_s7 + $0x168] sm:$0xff]  }
 0x106   : > { %3435 = vmatprep.subr.bf16.mxu1 %v7052_v2  ;;  %3724 = vmatprep.subr.bf16.mxu0 %v7052_v2 }
 0x109   : > { %3436 = vmatpush1.bf16.msra.mxu1 %v6409_v16  ;;  %3725 = vmatpush1.bf16.msra.mxu0 %v7888_v17  ;;  %v6488_v16 = vld [vmem:[%s7769_s8 + $0x200] ss:$36 sps:$4 sm:$0xff]  }
 0x10a   : > { %3437 = vmatprep.subr.bf16.mxu1 %v7052_v2  ;;  %3726 = vmatprep.subr.bf16.mxu0 %v7052_v2 }
 0x10d   : > { %3438 = vmatpush1.bf16.msra.mxu1 %v6411_v18  ;;  %3727 = vmatpush1.bf16.msra.mxu0 %v7895_v19  ;;  %v6489_v18 = vld [vmem:[%s7767_s7 + $0x170] sm:$0xff]  }
 0x10e   : > { %3439 = vmatprep.subr.bf16.mxu1 %v7052_v2  ;;  %3728 = vmatprep.subr.bf16.mxu0 %v7052_v2 }
 0x111   : > { %3440 = vmatpush1.bf16.msra.mxu1 %v6413_v21  ;;  %3729 = vmatpush1.bf16.msra.mxu0 %v7904_v23  ;;  %v6496_v21 = vld [vmem:[%s7769_s8 + $0x240] ss:$36 sps:$4 sm:$0xff]  }
 0x112   : > { %3441 = vmatprep.subr.bf16.mxu1 %v7052_v2  ;;  %3730 = vmatprep.subr.bf16.mxu0 %v7052_v2 }
 0x115   : > { %3442 = vmatpush1.bf16.msra.mxu1 %v6415_v24  ;;  %3731 = vmatpush1.bf16.msra.mxu0 %v7911_v25  ;;  %v6497_v24 = vld [vmem:[%s7767_s7 + $0x180] sm:$0xff]  }
 0x116   : > { %3443 = vmatprep.subr.bf16.mxu1 %v7052_v2  ;;  %3732 = vmatprep.subr.bf16.mxu0 %v7052_v2 }
 0x119   : > { %3444 = vmatpush1.bf16.msra.mxu1 %v6417_v26  ;;  %3733 = vmatpush1.bf16.msra.mxu0 %v7918_v27  ;;  %v6502_v26 = vld [vmem:[%s7769_s8 + $0x288] ss:$36 sps:$4 sm:$0xff]  }
 0x11a   : > { %3445 = vmatprep.subr.bf16.mxu1 %v7052_v2  ;;  %3734 = vmatprep.subr.bf16.mxu0 %v7052_v2 }
 0x11d   : > { %3446 = vmatpush1.bf16.msra.mxu1 %v6419_v28  ;;  %3735 = vmatpush1.bf16.msra.mxu0 %v7925_v29  ;;  %v6503_v28 = vld [vmem:[%s7769_s8 + $0x58] ss:$36 sps:$4 sm:$0xff]  }
 0x11e   : > { %3447 = vmatprep.subr.bf16.mxu1 %v7052_v2  ;;  %3736 = vmatprep.subr.bf16.mxu0 %v7052_v2 }
 0x121   : > { %3448 = vmatpush1.bf16.msra.mxu1 %v6421_v30  ;;  %3737 = vmatpush1.bf16.msra.mxu0 %v7932_v31  ;;  %v6506_v30 = vld [vmem:[%s7769_s8 + $0xa4] ss:$36 sps:$4 sm:$0xff]  }
 0x122   : > { %3449 = vmatprep.subr.bf16.mxu1 %v7052_v2  ;;  %3738 = vmatprep.subr.bf16.mxu0 %v7052_v2 }
 0x125   : > { %3450 = vmatpush1.bf16.msra.mxu1 %v6423_v32  ;;  %3739 = vmatpush1.bf16.msra.mxu0 %v7939_v33  ;;  %v6508_v32 = vld [vmem:[%s7769_s8 + $0x2d0] ss:$36 sps:$4 sm:$0xff]  }
 0x126   : > { %3451 = vmatprep.subr.bf16.mxu1 %v7052_v2  ;;  %3740 = vmatprep.subr.bf16.mxu0 %v7052_v2 }
 0x129   : > { %3452 = vmatpush1.bf16.msra.mxu1 %v6425_v34  ;;  %3741 = vmatpush1.bf16.msra.mxu0 %v7946_v35  ;;  %v6509_v34 = vld [vmem:[%s7769_s8 + $0xa0] ss:$36 sps:$4 sm:$0xff]  }
 0x12a   : > { %5999 = vmatprep.subr.bf16.mxu1 %v7052_v2  ;;  %3999 = vmatprep.subr.bf16.mxu0 %v7052_v2 }
 0x12c   : > { %3454 = vmatmul.mubr.bf16.vlgmr.msra.gmra.mrb[0].mxu1 %v6427_v36  ;;  %3743 = vmatmul.mubr.bf16.vlgmr.msra.gmra.mrb[0].mxu0 %v6430_v37  ;;  %v6513_v36 = vld [vmem:[%s7769_s8 + $0xec] ss:$36 sps:$4 sm:$0xff]   ;;  %v6549_v37 = vld [vmem:[%s7767_s7 + $0x1a0] sm:$0xff]  }
 0x12d   : > { %6015 = vmatpush1.bf16.msra.mxu1 %v7840_v3  ;;  %4000 = vmatpush1.bf16.msra.mxu0 %v6433_v38  ;;  %v6471_v3 = vld [vmem:[%s7769_s8 + $0x168] ss:$36 sps:$4 sm:$0xff]  }
 0x12e   : > { %3461 = vmatprep.mubr.bf16.mxu1 %v6435_v39  ;;  %4001 = vmatprep.subr.bf16.mxu0 %v7052_v2  ;;  %v6562_v38 = vld [vmem:[%s7767_s7 + $0x1a8] sm:$0xff]   ;;  %v6515_v39 = vld [vmem:[%s7769_s8 + $0x318] ss:$36 sps:$4 sm:$0xff]  }
 0x12f   : > { %3750 = vmatprep.mubr.bf16.mxu0 %v6437_v40  ;;  %6000 = vmatprep.subr.bf16.mxu1 %v7052_v2  ;;  %v6516_v40 = vld [vmem:[%s7769_s8 + $0xe8] ss:$36 sps:$4 sm:$0xff]  }
 0x131   : > { %6016 = vmatpush1.bf16.msra.mxu1 %v7846_v5  ;;  %4002 = vmatpush1.bf16.msra.mxu0 %v6434_v41  ;;  %v6475_v5 = vld [vmem:[%s7769_s8 + $0x1b4] ss:$36 sps:$4 sm:$0xff]   ;;  %v6517_v41 = vld [vmem:[%s7769_s8 + $0x364] ss:$36 sps:$4 sm:$0xff]  }
 0x132   : > { %6001 = vmatprep.subr.bf16.mxu1 %v7052_v2  ;;  %4003 = vmatprep.subr.bf16.mxu0 %v7052_v2 }
 0x134   : > { %3462 = vmatmul.mubr.bf16.gmra.mrb[4].mxu1 %v6439_v42  ;;  %3751 = vmatmul.mubr.bf16.gmra.mrb[4].mxu0 %v6440_v43  ;;  %v6519_v42 = vld [vmem:[%s7769_s8 + $0x134] ss:$36 sps:$4 sm:$0xff]  }
 0x135   : > { %3469 = vmatprep.mubr.bf16.mxu1 %v6443_v44  ;;  %4004 = vmatpush1.bf16.msra.mxu0 %v6441_v45  ;;  %v6575_v43 = vld [vmem:[%s7767_s7 + $0x1b0] sm:$0xff]   ;;  %v6588_v44 = vld [vmem:[%s7767_s7 + $0x1b8] sm:$0xff]   ;;  %v6521_v45 = vld [vmem:[%s7769_s8 + $0x360] ss:$36 sps:$4 sm:$0xff]  }
 0x136   : > { %3758 = vmatprep.mubr.bf16.mxu0 %v6445_v46  ;;  %4005 = vmatprep.subr.bf16.mxu0 %v7052_v2  ;;  %v6522_v46 = vld [vmem:[%s7769_s8 + $0x130] ss:$36 sps:$4 sm:$0xff]  }
 0x137   : > { %6017 = vmatpush1.bf16.msra.mxu1 %v7853_v7  ;;  %v6477_v7 = vld [vmem:[%s7769_s8 + $0x1bc] ss:$36 sps:$4 sm:$0xff]  }
 0x138   : > { %6002 = vmatprep.subr.bf16.mxu1 %v7052_v2 }
 0x139   : > { %4006 = vmatpush1.bf16.msra.mxu0 %v6442_v47  ;;  %v6524_v47 = vld [vmem:[%s7769_s8 + $0x3ac] ss:$36 sps:$4 sm:$0xff]  }
 0x13a   : > { %4007 = vmatprep.subr.bf16.mxu0 %v7052_v2 }
 0x13b   : > { %6018 = vmatpush1.bf16.msra.mxu1 %v7860_v9  ;;  %v6479_v9 = vld [vmem:[%s7769_s8 + $0x1b0] ss:$36 sps:$4 sm:$0xff]  }
 0x13c   : > { %3470 = vmatmul.mubr.bf16.gmra.mrb[8].mxu1 %v6447_v48  ;;  %6003 = vmatprep.subr.bf16.mxu1 %v7052_v2  ;;  %v6526_v48 = vld [vmem:[%s7769_s8 + $0x17c] ss:$36 sps:$4 sm:$0xff]  }
 0x13d   : > { %3759 = vmatmul.mubr.bf16.gmra.mrb[8].mxu0 %v6448_v49  ;;  %3477 = vmatprep.mubr.bf16.mxu1 %v6451_v51  ;;  %v6601_v49 = vld [vmem:[%s7767_s7 + $0x1c0] sm:$0xff]   ;;  %v6528_v51 = vld [vmem:[%s7769_s8 + $0x3a8] ss:$36 sps:$4 sm:$0xff]  }
 0x13e   : > { %4008 = vmatpush1.bf16.msra.mxu0 %v6449_v50  ;;  %3766 = vmatprep.mubr.bf16.mxu0 %v6453_v52  ;;  %v6614_v50 = vld [vmem:[%s7767_s7 + $0x1c8] sm:$0xff]   ;;  %v6529_v52 = vld [vmem:[%s7769_s8 + $0x178] ss:$36 sps:$4 sm:$0xff]  }
 0x13f   : > { %4009 = vmatprep.subr.bf16.mxu0 %v7052_v2  ;;  %6019 = vmatpush1.bf16.msra.mxu1 %v7867_v11  ;;  %v6481_v11 = vld [vmem:[%s7767_s7 + $0x160] sm:$0xff]  }
 0x140   : > { %6004 = vmatprep.subr.bf16.mxu1 %v7052_v2 }
 0x142   : > { %4010 = vmatpush1.bf16.msra.mxu0 %v6450_v53  ;;  %v6530_v53 = vld [vmem:[%s7769_s8 + $0x3f4] ss:$36 sps:$4 sm:$0xff]  }
 0x143   : > { %4011 = vmatprep.subr.bf16.mxu0 %v7052_v2  ;;  %6020 = vmatpush1.bf16.msra.mxu1 %v7874_v13  ;;  %v6485_v13 = vld [vmem:[%s7769_s8 + $0x204] ss:$36 sps:$4 sm:$0xff]  }
 0x144   : > { %3478 = vmatmul.mubr.bf16.gmra.mrb[12].mxu1 %v6455_v54  ;;  %6005 = vmatprep.subr.bf16.mxu1 %v7052_v2  ;;  %v6532_v54 = vld [vmem:[%s7769_s8 + $0x1c4] ss:$36 sps:$4 sm:$0xff]  }
 0x145   : > { %3767 = vmatmul.mubr.bf16.gmra.mrb[12].mxu0 %v6456_v55  ;;  %3485 = vmatprep.mubr.bf16.mxu1 %v6459_v56  ;;  %v6627_v55 = vld [vmem:[%s7767_s7 + $0x1d0] sm:$0xff]  }
 0x146   : > { %4012 = vmatpush1.bf16.msra.mxu0 %v6457_v57  ;;  %3774 = vmatprep.mubr.bf16.mxu0 %v6461_v58  ;;  %v6534_v56 = vld [vmem:[%s7769_s8 + $0x3f0] ss:$36 sps:$4 sm:$0xff]   ;;  %v6535_v57 = vld [vmem:[%s7769_s8 + $0x1c0] ss:$36 sps:$4 sm:$0xff]  }
 0x147   : > { %4013 = vmatprep.subr.bf16.mxu0 %v7052_v2  ;;  %6021 = vmatpush1.bf16.msra.mxu1 %v7881_v15  ;;  %v6487_v15 = vld [vmem:[%s7769_s8 + $0x1f8] ss:$36 sps:$4 sm:$0xff]  }
 0x148   : > { %6006 = vmatprep.subr.bf16.mxu1 %v7052_v2  ;;  %v6537_v58 = vld [vmem:[%s7769_s8 + $0x43c] ss:$36 sps:$4 sm:$0xff]  }
 0x14a   : > { %4014 = vmatpush1.bf16.msra.mxu0 %v6458_v59  ;;  %v6539_v59 = vld [vmem:[%s7769_s8 + $0x20c] ss:$36 sps:$4 sm:$0xff]  }
 0x14b   : > { %4015 = vmatprep.subr.bf16.mxu0 %v7052_v2  ;;  %6022 = vmatpush1.bf16.msra.mxu1 %v7888_v17  ;;  %v6491_v17 = vld [vmem:[%s7769_s8 + $0x244] ss:$36 sps:$4 sm:$0xff]  }
 0x14c   : > { %3486 = vmatmul.mubr.bf16.gmra.mrb[16].mxu1 %v6463_v60  ;;  %6007 = vmatprep.subr.bf16.mxu1 %v7052_v2  ;;  %v6640_v60 = vld [vmem:[%s7767_s7 + $0x1d8] sm:$0xff]  }
 0x14d   : > { %3775 = vmatmul.mubr.bf16.gmra.mrb[16].mxu0 %v6464_v61  ;;  %3493 = vmatprep.mubr.bf16.mxu1 %v6467_v63  ;;  %v6541_v61 = vld [vmem:[%s7769_s8 + $0x438] ss:$36 sps:$4 sm:$0xff]   ;;  %v6543_v63 = vld [vmem:[%s7769_s8 + $0x484] ss:$36 sps:$4 sm:$0xff]  }
 0x14e   : > { %4016 = vmatpush1.bf16.msra.mxu0 %v6465_v62  ;;  %3782 = vmatprep.mubr.bf16.mxu0 %v6469_v0  ;;  %v6542_v62 = vld [vmem:[%s7769_s8 + $0x208] ss:$36 sps:$4 sm:$0xff]   ;;  %v6545_v0 = vld [vmem:[%s7769_s8 + $0x254] ss:$36 sps:$4 sm:$0xff]  }
 0x14f   : > { %4017 = vmatprep.subr.bf16.mxu0 %v7052_v2  ;;  %6023 = vmatpush1.bf16.msra.mxu1 %v7895_v19  ;;  %v6495_v19 = vld [vmem:[%s7769_s8 + $0x14] ss:$36 sps:$4 sm:$0xff]  }
 0x150   : > { %6008 = vmatprep.subr.bf16.mxu1 %v7052_v2 }
 0x152   : > { %4018 = vmatpush1.bf16.msra.mxu0 %v6466_v1  ;;  %v6547_v1 = vld [vmem:[%s7769_s8 + $0x480] ss:$36 sps:$4 sm:$0xff]  }
 0x153   : > { %4019 = vmatprep.subr.bf16.mxu0 %v7052_v2  ;;  %6024 = vmatpush1.bf16.msra.mxu1 %v7904_v23  ;;  %v6498_v23 = vld [vmem:[%s7769_s8 + $0x28c] ss:$36 sps:$4 sm:$0xff]  }
 0x154   : > { %3494 = vmatmul.mubr.bf16.gmra.mrb[20].mxu1 %v6471_v3  ;;  %6009 = vmatprep.subr.bf16.mxu1 %v7052_v2  ;;  %v6548_v3 = vld [vmem:[%s7769_s8 + $0x250] ss:$36 sps:$4 sm:$0xff]  }
 0x155   : > { %3783 = vmatmul.mubr.bf16.gmra.mrb[20].mxu0 %v6472_v4  ;;  %3501 = vmatprep.mubr.bf16.mxu1 %v6475_v5  ;;  %v6550_v4 = vld [vmem:[%s7769_s8 + $0x4cc] ss:$36 sps:$4 sm:$0xff]   ;;  %v6552_v5 = vld [vmem:[%s7769_s8 + $0x29c] ss:$36 sps:$4 sm:$0xff]  }
 0x156   : > { %4020 = vmatpush1.bf16.msra.mxu0 %v6473_v6  ;;  %3790 = vmatprep.mubr.bf16.mxu0 %v6477_v7  ;;  %v6653_v6 = vld [vmem:[%s7767_s7 + $0x1e0] sm:$0xff]  }
 0x157   : > { %4021 = vmatprep.subr.bf16.mxu0 %v7052_v2  ;;  %6025 = vmatpush1.bf16.msra.mxu1 %v7911_v25  ;;  %v6500_v25 = vld [vmem:[%s7769_s8 + $0x5c] ss:$36 sps:$4 sm:$0xff]  }
 0x158   : > { %6010 = vmatprep.subr.bf16.mxu1 %v7052_v2  ;;  %v8109_v7 = vld [vmem:[%s7767_s7 + $0x200] sm:$0xff]  }
 0x15a   : > { %4022 = vmatpush1.bf16.msra.mxu0 %v6474_v8  ;;  %v6554_v8 = vld [vmem:[%s7769_s8 + $0x4c8] ss:$36 sps:$4 sm:$0xff]  }
 0x15b   : > { %4023 = vmatprep.subr.bf16.mxu0 %v7052_v2  ;;  %6026 = vmatpush1.bf16.msra.mxu1 %v7918_v27  ;;  %v6510_v27 = vld [vmem:[%s7767_s7 + $0x188] sm:$0xff]  }
 0x15c   : > { %3502 = vmatmul.mubr.bf16.gmra.mrb[24].mxu1 %v6479_v9  ;;  %6011 = vmatprep.subr.bf16.mxu1 %v7052_v2  ;;  %v6555_v9 = vld [vmem:[%s7769_s8 + $0x298] ss:$36 sps:$4 sm:$0xff]  }
 0x15d   : > { %3791 = vmatmul.mubr.bf16.gmra.mrb[24].mxu0 %v6480_v10  ;;  %3509 = vmatprep.mubr.bf16.mxu1 %v6483_v12  ;;  %v6556_v10 = vld [vmem:[%s7769_s8 + $0x514] ss:$36 sps:$4 sm:$0xff]  }
 0x15e   : > { %4024 = vmatpush1.bf16.msra.mxu0 %v6481_v11  ;;  %3798 = vmatprep.mubr.bf16.mxu0 %v6485_v13  ;;  %v6558_v11 = vld [vmem:[%s7769_s8 + $0x2e4] ss:$36 sps:$4 sm:$0xff]   ;;  %v6560_v12 = vld [vmem:[%s7769_s8 + $0x510] ss:$36 sps:$4 sm:$0xff]  }
 0x15f   : > { %4025 = vmatprep.subr.bf16.mxu0 %v7052_v2  ;;  %6027 = vmatpush1.bf16.msra.mxu1 %v7925_v29  ;;  %v6504_v29 = vld [vmem:[%s7769_s8 + $0x2d4] ss:$36 sps:$4 sm:$0xff]   ;;  %v6561_v13 = vld [vmem:[%s7769_s8 + $0x2e0] ss:$36 sps:$4 sm:$0xff]  }
 0x160   : > { %6012 = vmatprep.subr.bf16.mxu1 %v7052_v2 }
 0x162   : > { %4026 = vmatpush1.bf16.msra.mxu0 %v6482_v14  ;;  %v6563_v14 = vld [vmem:[%s7769_s8 + $0x55c] ss:$36 sps:$4 sm:$0xff]  }
 0x163   : > { %4027 = vmatprep.subr.bf16.mxu0 %v7052_v2  ;;  %6028 = vmatpush1.bf16.msra.mxu1 %v7932_v31  ;;  %v6523_v31 = vld [vmem:[%s7767_s7 + $0x190] sm:$0xff]  }
 0x164   : > { %3510 = vmatmul.mubr.bf16.gmra.mrb[28].mxu1 %v6487_v15  ;;  %6013 = vmatprep.subr.bf16.mxu1 %v7052_v2  ;;  %v6565_v15 = vld [vmem:[%s7769_s8 + $0x32c] ss:$36 sps:$4 sm:$0xff]  }
 0x165   : > { %3799 = vmatmul.mubr.bf16.gmra.mrb[28].mxu0 %v6488_v16  ;;  %3517 = vmatprep.mubr.bf16.mxu1 %v6491_v17  ;;  %v6667_v16 = vld [vmem:[%s7767_s7 + $0x1e8] sm:$0xff]   ;;  %v6567_v17 = vld [vmem:[%s7769_s8 + $0x558] ss:$36 sps:$4 sm:$0xff]  }
 0x166   : > { %4028 = vmatpush1.bf16.msra.mxu0 %v6489_v18  ;;  %4031 = vmatprep.mubr.bf16.mxu0 %v6495_v19  ;;  %v6568_v18 = vld [vmem:[%s7769_s8 + $0x328] ss:$36 sps:$4 sm:$0xff]  }
 0x167   : > { %4029 = vmatprep.subr.bf16.mxu0 %v7052_v2  ;;  %6029 = vmatpush1.bf16.msra.mxu1 %v7939_v33  ;;  %v6536_v33 = vld [vmem:[%s7767_s7 + $0x198] sm:$0xff]   ;;  %v6569_v19 = vld [vmem:[%s7769_s8 + $0x5a4] ss:$36 sps:$4 sm:$0xff]  }
 0x168   : > { %6014 = vmatprep.subr.bf16.mxu1 %v7052_v2 }
 0x16a   : > { %4030 = vmatpush1.bf16.msra.mxu0 %v6490_v20  ;;  %v6571_v20 = vld [vmem:[%s7769_s8 + $0x374] ss:$36 sps:$4 sm:$0xff]  }
 0x16b   : > { %4288 = vmatprep.subr.bf16.mxu0 %v7052_v2  ;;  %6030 = vmatpush1.bf16.msra.mxu1 %v7946_v35  ;;  %v6511_v35 = vld [vmem:[%s7769_s8 + $0x31c] ss:$36 sps:$4 sm:$0xff]  }
 0x16c   : > { %3518 = vmatmul.mubr.bf16.gmra.mrb[32].mxu1 %v6496_v21  ;;  %5919 = vmatprep.subr.bf16.mxu1 %v8109_v7  ;;  %v6573_v21 = vld [vmem:[%s7769_s8 + $0x5a0] ss:$36 sps:$4 sm:$0xff]  }
 0x16d   : > { %4032 = vmatmul.mubr.bf16.vlgmr.msra.gmra.mrb[0].mxu0 %v6493_v22  ;;  %3525 = vmatprep.mubr.bf16.mxu1 %v6498_v23  ;;  %v6574_v22 = vld [vmem:[%s7769_s8 + $0x370] ss:$36 sps:$4 sm:$0xff]  }
 0x16e   : > { %4289 = vmatpush1.bf16.msra.mxu0 %v6497_v24  ;;  %4039 = vmatprep.mubr.bf16.mxu0 %v6500_v25  ;;  %v6576_v23 = vld [vmem:[%s7769_s8 + $0x5ec] ss:$36 sps:$4 sm:$0xff]   ;;  %v6578_v24 = vld [vmem:[%s7769_s8 + $0x3bc] ss:$36 sps:$4 sm:$0xff]  }
 0x16f   : > { %4290 = vmatprep.subr.bf16.mxu0 %v7052_v2  ;;  %v6681_v25 = vld [vmem:[%s7767_s7 + $0x1f0] sm:$0xff]  }
 0x172   : > { %4291 = vmatpush1.bf16.msra.mxu0 %v6510_v27  ;;  %v6581_v27 = vld [vmem:[%s7769_s8 + $0x3b8] ss:$36 sps:$4 sm:$0xff]  }
 0x173   : > { %4292 = vmatprep.subr.bf16.mxu0 %v7052_v2 }
 0x174   : > { %3526 = vmatmul.mubr.bf16.gmra.mrb[36].mxu1 %v6502_v26  ;;  %v6580_v26 = vld [vmem:[%s7769_s8 + $0x5e8] ss:$36 sps:$4 sm:$0xff]  }
 0x175   : > { %4040 = vmatmul.mubr.bf16.gmra.mrb[4].mxu0 %v6503_v28  ;;  %3533 = vmatprep.mubr.bf16.mxu1 %v6504_v29  ;;  %v6582_v28 = vld [vmem:[%s7769_s8 + $0x634] ss:$36 sps:$4 sm:$0xff]   ;;  %v6584_v29 = vld [vmem:[%s7769_s8 + $0x404] ss:$36 sps:$4 sm:$0xff]  }
 0x176   : > { %4047 = vmatprep.mubr.bf16.mxu0 %v6506_v30  ;;  %4293 = vmatpush1.bf16.msra.mxu0 %v6523_v31  ;;  %v6586_v30 = vld [vmem:[%s7769_s8 + $0x630] ss:$36 sps:$4 sm:$0xff]   ;;  %v6587_v31 = vld [vmem:[%s7769_s8 + $0x400] ss:$36 sps:$4 sm:$0xff]  }
 0x177   : > { %4294 = vmatprep.subr.bf16.mxu0 %v7052_v2 }
 0x17a   : > { %4295 = vmatpush1.bf16.msra.mxu0 %v6536_v33  ;;  %v6591_v33 = vld [vmem:[%s7769_s8 + $0x44c] ss:$36 sps:$4 sm:$0xff]  }
 0x17b   : > { %4296 = vmatprep.subr.bf16.mxu0 %v7052_v2 }
 0x17c   : > { %3534 = vmatmul.mubr.bf16.gmra.mrb[40].mxu1 %v6508_v32  ;;  %v6589_v32 = vld [vmem:[%s7769_s8 + $0x67c] ss:$36 sps:$4 sm:$0xff]  }
 0x17d   : > { %4048 = vmatmul.mubr.bf16.gmra.mrb[8].mxu0 %v6509_v34  ;;  %3541 = vmatprep.mubr.bf16.mxu1 %v6511_v35  ;;  %v6593_v34 = vld [vmem:[%s7769_s8 + $0x678] ss:$36 sps:$4 sm:$0xff]   ;;  %v6594_v35 = vld [vmem:[%s7769_s8 + $0x448] ss:$36 sps:$4 sm:$0xff]  }
 0x17e   : > { %4055 = vmatprep.mubr.bf16.mxu0 %v6513_v36  ;;  %4297 = vmatpush1.bf16.msra.mxu0 %v6549_v37  ;;  %v6595_v36 = vld [vmem:[%s7769_s8 + $0x6c4] ss:$36 sps:$4 sm:$0xff]   ;;  %v6597_v37 = vld [vmem:[%s7769_s8 + $0x494] ss:$36 sps:$4 sm:$0xff]  }
 0x17f   : > { %4298 = vmatprep.subr.bf16.mxu0 %v7052_v2 }
 0x182   : > { %4299 = vmatpush1.bf16.msra.mxu0 %v6562_v38  ;;  %v6599_v38 = vld [vmem:[%s7769_s8 + $0x6c0] ss:$36 sps:$4 sm:$0xff]  }
 0x183   : > { %4300 = vmatprep.subr.bf16.mxu0 %v7052_v2 }
 0x184   : > { %3542 = vmatmul.mubr.bf16.gmra.mrb[44].mxu1 %v6515_v39  ;;  %v6600_v39 = vld [vmem:[%s7769_s8 + $0x490] ss:$36 sps:$4 sm:$0xff]  }
 0x185   : > { %4056 = vmatmul.mubr.bf16.gmra.mrb[12].mxu0 %v6516_v40  ;;  %3549 = vmatprep.mubr.bf16.mxu1 %v6517_v41  ;;  %v6602_v40 = vld [vmem:[%s7769_s8 + $0x70c] ss:$36 sps:$4 sm:$0xff]   ;;  %v6604_v41 = vld [vmem:[%s7769_s8 + $0x4dc] ss:$36 sps:$4 sm:$0xff]  }
 0x186   : > { %4063 = vmatprep.mubr.bf16.mxu0 %v6519_v42  ;;  %4301 = vmatpush1.bf16.msra.mxu0 %v6575_v43  ;;  %v6606_v42 = vld [vmem:[%s7769_s8 + $0x708] ss:$36 sps:$4 sm:$0xff]   ;;  %v6607_v43 = vld [vmem:[%s7769_s8 + $0x4d8] ss:$36 sps:$4 sm:$0xff]  }
 0x187   : > { %4302 = vmatprep.subr.bf16.mxu0 %v7052_v2 }
 0x18a   : > { %4303 = vmatpush1.bf16.msra.mxu0 %v6588_v44  ;;  %v6608_v44 = vld [vmem:[%s7769_s8 + $0x754] ss:$36 sps:$4 sm:$0xff]  }
 0x18b   : > { %4304 = vmatprep.subr.bf16.mxu0 %v7052_v2 }
 0x18c   : > { %3550 = vmatmul.mubr.bf16.gmra.mrb[48].mxu1 %v6521_v45  ;;  %v6610_v45 = vld [vmem:[%s7769_s8 + $0x524] ss:$36 sps:$4 sm:$0xff]  }
 0x18d   : > { %4064 = vmatmul.mubr.bf16.gmra.mrb[16].mxu0 %v6522_v46  ;;  %3557 = vmatprep.mubr.bf16.mxu1 %v6524_v47  ;;  %v6612_v46 = vld [vmem:[%s7769_s8 + $0x750] ss:$36 sps:$4 sm:$0xff]   ;;  %v6613_v47 = vld [vmem:[%s7769_s8 + $0x520] ss:$36 sps:$4 sm:$0xff]  }
 0x18e   : > { %4071 = vmatprep.mubr.bf16.mxu0 %v6526_v48  ;;  %4305 = vmatpush1.bf16.msra.mxu0 %v6601_v49  ;;  %v6615_v48 = vld [vmem:[%s7769_s8 + $0x79c] ss:$36 sps:$4 sm:$0xff]   ;;  %v6617_v49 = vld [vmem:[%s7769_s8 + $0x56c] ss:$36 sps:$4 sm:$0xff]  }
 0x18f   : > { %4306 = vmatprep.subr.bf16.mxu0 %v7052_v2 }
 0x192   : > { %4307 = vmatpush1.bf16.msra.mxu0 %v6614_v50 }
 0x193   : > { %4308 = vmatprep.subr.bf16.mxu0 %v7052_v2 }
 0x194   : > { %3558 = vmatmul.mubr.bf16.gmra.mrb[52].mxu1 %v6528_v51 }
 0x195   : > { %4072 = vmatmul.mubr.bf16.gmra.mrb[20].mxu0 %v6529_v52  ;;  %3565 = vmatprep.mubr.bf16.mxu1 %v6530_v53  ;;  %v6619_v52 = vld [vmem:[%s7769_s8 + $0x798] ss:$36 sps:$4 sm:$0xff]  }
 0x196   : > { %4079 = vmatprep.mubr.bf16.mxu0 %v6532_v54  ;;  %4309 = vmatpush1.bf16.msra.mxu0 %v6627_v55  ;;  %v6620_v54 = vld [vmem:[%s7769_s8 + $0x568] ss:$36 sps:$4 sm:$0xff]  }
 0x197   : > { %4310 = vmatprep.subr.bf16.mxu0 %v7052_v2  ;;  %v6621_v55 = vld [vmem:[%s7769_s8 + $0x7e4] ss:$36 sps:$4 sm:$0xff]  }
 0x19a   : > { %4311 = vmatpush1.bf16.msra.mxu0 %v6640_v60  ;;  %v6625_v60 = vld [vmem:[%s7769_s8 + $0x7e0] ss:$36 sps:$4 sm:$0xff]  }
 0x19b   : > { %4312 = vmatprep.subr.bf16.mxu0 %v7052_v2 }
 0x19c   : > { %3566 = vmatmul.mubr.bf16.gmra.mrb[56].mxu1 %v6534_v56 }
 0x19d   : > { %4080 = vmatmul.mubr.bf16.gmra.mrb[24].mxu0 %v6535_v57  ;;  %3573 = vmatprep.mubr.bf16.mxu1 %v6537_v58  ;;  %v6623_v57 = vld [vmem:[%s7769_s8 + $0x5b4] ss:$36 sps:$4 sm:$0xff]  }
 0x19e   : > { %4087 = vmatprep.mubr.bf16.mxu0 %v6539_v59  ;;  %4313 = vmatpush1.bf16.msra.mxu0 %v6653_v6 }
 0x19f   : > { %4314 = vmatprep.subr.bf16.mxu0 %v7052_v2 }
 0x1a2   : > { %4315 = vmatpush1.bf16.msra.mxu0 %v6667_v16  ;;  %v6639_v16 = vld [vmem:[%s7769_s8 + $0x640] ss:$36 sps:$4 sm:$0xff]  }
 0x1a3   : > { %4316 = vmatprep.subr.bf16.mxu0 %v7052_v2 }
 0x1a4   : > { %3574 = vmatmul.mubr.bf16.gmra.mrb[60].mxu1 %v6541_v61 }
 0x1a5   : > { %4088 = vmatmul.mubr.bf16.gmra.mrb[28].mxu0 %v6542_v62  ;;  %3581 = vmatprep.mubr.bf16.mxu1 %v6543_v63  ;;  %v6626_v62 = vld [vmem:[%s7769_s8 + $0x5b0] ss:$36 sps:$4 sm:$0xff]  }
 0x1a6   : > { %4095 = vmatprep.mubr.bf16.mxu0 %v6545_v0  ;;  %4317 = vmatpush1.bf16.msra.mxu0 %v6681_v25  ;;  %v6628_v63 = vld [vmem:[%s7769_s8 + $0x82c] ss:$36 sps:$4 sm:$0xff]  }
 0x1a7   : > { %4318 = vmatprep.subr.bf16.mxu0 %v7052_v2  ;;  %v6694_v2 = vld [vmem:[%s7767_s7 + $0x1f8] sm:$0xff]   ;;  %v6649_v25 = vld [vmem:[%s7769_s8 + $0x24c] ss:$36 sps:$4 sm:$0xff]  }
 0x1aa   : > { %4319 = vmatpush1.bf16.msra.mxu0 %v6694_v2  ;;  %v6655_v2 = vld [vmem:[%s7769_s8 + $0x294] ss:$36 sps:$4 sm:$0xff]  }
 0x1ac   : > { %3582 = vmatmul.mubr.bf16.gmra.mrb[64].mxu1 %v6547_v1  ;;  %v6630_v1 = vld [vmem:[%s7769_s8 + $0x5fc] ss:$36 sps:$4 sm:$0xff]  }
 0x1ad   : > { %4096 = vmatmul.mubr.bf16.gmra.mrb[32].mxu0 %v6548_v3  ;;  %3589 = vmatprep.mubr.bf16.mxu1 %v6550_v4 }
 0x1ae   : > { %4103 = vmatprep.mubr.bf16.mxu0 %v6552_v5  ;;  %v6632_v5 = vld [vmem:[%s7769_s8 + $0x828] ss:$36 sps:$4 sm:$0xff]  }
 0x1b4   : > { %3590 = vmatmul.mubr.bf16.gmra.mrb[68].mxu1 %v6554_v8  ;;  %v6633_v8 = vld [vmem:[%s7769_s8 + $0x5f8] ss:$36 sps:$4 sm:$0xff]  }
 0x1b5   : > { %4104 = vmatmul.mubr.bf16.gmra.mrb[36].mxu0 %v6555_v9  ;;  %3597 = vmatprep.mubr.bf16.mxu1 %v6556_v10  ;;  %v6634_v9 = vld [vmem:[%s7769_s8 + $0x874] ss:$36 sps:$4 sm:$0xff]  }
 0x1b6   : > { %4111 = vmatprep.mubr.bf16.mxu0 %v6558_v11  ;;  %v6636_v11 = vld [vmem:[%s7769_s8 + $0x644] ss:$36 sps:$4 sm:$0xff]  }
 0x1bc   : > { %3598 = vmatmul.mubr.bf16.gmra.mrb[72].mxu1 %v6560_v12 }
 0x1bd   : > { %4112 = vmatmul.mubr.bf16.gmra.mrb[40].mxu0 %v6561_v13  ;;  %3605 = vmatprep.mubr.bf16.mxu1 %v6563_v14  ;;  %v6638_v14 = vld [vmem:[%s7769_s8 + $0x870] ss:$36 sps:$4 sm:$0xff]  }
 0x1be   : > { %4119 = vmatprep.mubr.bf16.mxu0 %v6565_v15 }
 0x1c4   : > { %3606 = vmatmul.mubr.bf16.gmra.mrb[76].mxu1 %v6567_v17  ;;  %v6641_v17 = vld [vmem:[%s7769_s8 + $0x8bc] ss:$36 sps:$4 sm:$0xff]  }
 0x1c5   : > { %4120 = vmatmul.mubr.bf16.gmra.mrb[44].mxu0 %v6568_v18  ;;  %3613 = vmatprep.mubr.bf16.mxu1 %v6569_v19  ;;  %v6643_v19 = vld [vmem:[%s7769_s8 + $0x68c] ss:$36 sps:$4 sm:$0xff]  }
 0x1c6   : > { %4127 = vmatprep.mubr.bf16.mxu0 %v6571_v20 }
 0x1cc   : > { %3614 = vmatmul.mubr.bf16.gmra.mrb[80].mxu1 %v6573_v21 }
 0x1cd   : > { %4128 = vmatmul.mubr.bf16.gmra.mrb[48].mxu0 %v6574_v22  ;;  %3621 = vmatprep.mubr.bf16.mxu1 %v6576_v23  ;;  %v6645_v22 = vld [vmem:[%s7769_s8 + $0x8b8] ss:$36 sps:$4 sm:$0xff]  }
 0x1ce   : > { %4135 = vmatprep.mubr.bf16.mxu0 %v6578_v24  ;;  %v6646_v24 = vld [vmem:[%s7769_s8 + $0x688] ss:$36 sps:$4 sm:$0xff]  }
 0x1d4   : > { %3622 = vmatmul.mubr.bf16.gmra.mrb[84].mxu1 %v6580_v26 }
 0x1d5   : > { %4136 = vmatmul.mubr.bf16.gmra.mrb[52].mxu0 %v6581_v27  ;;  %3629 = vmatprep.mubr.bf16.mxu1 %v6582_v28  ;;  %v6650_v27 = vld [vmem:[%s7769_s8 + $0x6d4] ss:$36 sps:$4 sm:$0xff]  }
 0x1d6   : > { %4143 = vmatprep.mubr.bf16.mxu0 %v6584_v29 }
 0x1dc   : > { %3630 = vmatmul.mubr.bf16.gmra.mrb[88].mxu1 %v6586_v30  ;;  %v6647_v30 = vld [vmem:[%s7769_s8 + $0x248] ss:$36 sps:$4 sm:$0xff]  }
 0x1dd   : > { %4144 = vmatmul.mubr.bf16.gmra.mrb[56].mxu0 %v6587_v31  ;;  %3637 = vmatprep.mubr.bf16.mxu1 %v6589_v32  ;;  %v6652_v32 = vld [vmem:[%s7769_s8 + $0x6d0] ss:$36 sps:$4 sm:$0xff]  }
 0x1de   : > { %4151 = vmatprep.mubr.bf16.mxu0 %v6591_v33 }
 0x1e4   : > { %3638 = vmatmul.mubr.bf16.gmra.mrb[92].mxu1 %v6593_v34  ;;  %v6657_v34 = vld [vmem:[%s7769_s8 + $0x71c] ss:$36 sps:$4 sm:$0xff]  }
 0x1e5   : > { %4152 = vmatmul.mubr.bf16.gmra.mrb[60].mxu0 %v6594_v35  ;;  %3645 = vmatprep.mubr.bf16.mxu1 %v6595_v36  ;;  %v6674_v35 = vld [vmem:[%s7767_s7 + $0x208] sm:$0xff]   ;;  %v6695_v36 = vld [vmem:[%s7767_s7 + $0x210] sm:$0xff]  }
 0x1e6   : > { %4159 = vmatprep.mubr.bf16.mxu0 %v6597_v37 }
 0x1ec   : > { %3646 = vmatmul.mubr.bf16.gmra.mrb[96].mxu1 %v6599_v38 }
 0x1ed   : > { %4160 = vmatmul.mubr.bf16.gmra.mrb[64].mxu0 %v6600_v39  ;;  %3653 = vmatprep.mubr.bf16.mxu1 %v6602_v40  ;;  %v6659_v39 = vld [vmem:[%s7769_s8 + $0x290] ss:$36 sps:$4 sm:$0xff]  }
 0x1ee   : > { %4167 = vmatprep.mubr.bf16.mxu0 %v6604_v41  ;;  %v6660_v41 = vld [vmem:[%s7769_s8 + $0x718] ss:$36 sps:$4 sm:$0xff]  }
 0x1f4   : > { %3654 = vmatmul.mubr.bf16.gmra.mrb[100].mxu1 %v6606_v42  ;;  %v6661_v42 = vld [vmem:[%s7769_s8 + $0x2dc] ss:$36 sps:$4 sm:$0xff]  }
 0x1f5   : > { %4168 = vmatmul.mubr.bf16.gmra.mrb[68].mxu0 %v6607_v43  ;;  %3661 = vmatprep.mubr.bf16.mxu1 %v6608_v44  ;;  %v6663_v44 = vld [vmem:[%s7769_s8 + $0x764] ss:$36 sps:$4 sm:$0xff]  }
 0x1f6   : > { %4175 = vmatprep.mubr.bf16.mxu0 %v6610_v45 }
 0x1fc   : > { %3662 = vmatmul.mubr.bf16.gmra.mrb[104].mxu1 %v6612_v46  ;;  %v6733_v46 = vld [vmem:[%s7767_s7 + $0x220] sm:$0xff]  }
 0x1fd   : > { %4176 = vmatmul.mubr.bf16.gmra.mrb[72].mxu0 %v6613_v47  ;;  %3669 = vmatprep.mubr.bf16.mxu1 %v6615_v48  ;;  %v6665_v48 = vld [vmem:[%s7769_s8 + $0x2d8] ss:$36 sps:$4 sm:$0xff]  }
 0x1fe   : > { %4183 = vmatprep.mubr.bf16.mxu0 %v6617_v49 }
 0x1ff   : > { %v8158_v50 = vpop.f32.mrb[0].mxu1 }
 0x200   : > { %v3457_v51 = vpop.f32.mrb[1].mxu1 }
 0x201   : > { %v8161_v53 = vpop.f32.mrb[2].mxu1  ;;  %v6666_v51 = vld [vmem:[%s7769_s8 + $0x760] ss:$36 sps:$4 sm:$0xff]  }
 0x202   : > { %v3460_v56 = vpop.f32.mrb[3].mxu1 }
 0x203   : > { %v6752_v56 = vld [vmem:[%s7767_s7 + $0x228] sm:$0xff]  }
 0x204   : > { %3670 = vmatmul.mubr.bf16.gmra.mrb[108].mxu1 %v6619_v52  ;;  %v6668_v52 = vld [vmem:[%s7769_s8 + $0x324] ss:$36 sps:$4 sm:$0xff]  }
 0x205   : > { %4184 = vmatmul.mubr.bf16.gmra.mrb[76].mxu0 %v6620_v54  ;;  %3677 = vmatprep.mubr.bf16.mxu1 %v6621_v55  ;;  %v6670_v55 = vld [vmem:[%s7769_s8 + $0x7ac] ss:$36 sps:$4 sm:$0xff]  }
 0x206   : > { %4191 = vmatprep.mubr.bf16.mxu0 %v6623_v57  ;;  %v6771_v57 = vld [vmem:[%s7767_s7 + $0x230] sm:$0xff]  }
 0x207   : > { %v8166_v58 = vpop.f32.mrb[4].mxu1 }
 0x208   : > { %v3465_v59 = vpop.f32.mrb[5].mxu1 }
 0x209   : > { %v8169_v61 = vpop.f32.mrb[6].mxu1  ;;  %v6672_v59 = vld [vmem:[%s7769_s8 + $0x320] ss:$36 sps:$4 sm:$0xff]  }
 0x20a   : > { %v3468_v0 = vpop.f32.mrb[7].mxu1 }
 0x20b   : > { %v6679_v0 = vld [vmem:[%s7769_s8 + $0x368] ss:$36 sps:$4 sm:$0xff]  }
 0x20c   : > { %3678 = vmatmul.mubr.bf16.gmra.mrb[112].mxu1 %v6625_v60  ;;  %v6673_v60 = vld [vmem:[%s7769_s8 + $0x7a8] ss:$36 sps:$4 sm:$0xff]  }
 0x20d   : > { %4192 = vmatmul.mubr.bf16.gmra.mrb[80].mxu0 %v6626_v62  ;;  %3685 = vmatprep.mubr.bf16.mxu1 %v6628_v63  ;;  %v6675_v62 = vld [vmem:[%s7769_s8 + $0x36c] ss:$36 sps:$4 sm:$0xff]   ;;  %v6677_v63 = vld [vmem:[%s7769_s8 + $0x7f4] ss:$36 sps:$4 sm:$0xff]  }
 0x20e   : > { %4199 = vmatprep.mubr.bf16.mxu0 %v6630_v1  ;;  %v6680_v1 = vld [vmem:[%s7769_s8 + $0x7f0] ss:$36 sps:$4 sm:$0xff]  }
 0x20f   : > { %v8174_v3 = vpop.f32.mrb[8].mxu1 }
 0x210   : > { %v3473_v4 = vpop.f32.mrb[9].mxu1 }
 0x211   : > { %v8177_v6 = vpop.f32.mrb[10].mxu1  ;;  %v6682_v4 = vld [vmem:[%s7769_s8 + $0x3b4] ss:$36 sps:$4 sm:$0xff]  }
 0x212   : > { %v3476_v10 = vpop.f32.mrb[11].mxu1 }
 0x213   : > { %v6688_v10 = vld [vmem:[%s7769_s8 + $0x3fc] ss:$36 sps:$4 sm:$0xff]  }
 0x214   : > { %3686 = vmatmul.mubr.bf16.gmra.mrb[116].mxu1 %v6632_v5  ;;  %v6684_v5 = vld [vmem:[%s7769_s8 + $0x83c] ss:$36 sps:$4 sm:$0xff]  }
 0x215   : > { %4200 = vmatmul.mubr.bf16.gmra.mrb[84].mxu0 %v6633_v8  ;;  %3693 = vmatprep.mubr.bf16.mxu1 %v6634_v9  ;;  %v6686_v8 = vld [vmem:[%s7769_s8 + $0x3b0] ss:$36 sps:$4 sm:$0xff]   ;;  %v6687_v9 = vld [vmem:[%s7769_s8 + $0x838] ss:$36 sps:$4 sm:$0xff]  }
 0x216   : > { %4207 = vmatprep.mubr.bf16.mxu0 %v6636_v11  ;;  %v6690_v11 = vld [vmem:[%s7769_s8 + $0x884] ss:$36 sps:$4 sm:$0xff]  }
 0x217   : > { %v8182_v12 = vpop.f32.mrb[12].mxu1 }
 0x218   : > { %v3481_v13 = vpop.f32.mrb[13].mxu1 }
 0x219   : > { %v8185_v15 = vpop.f32.mrb[14].mxu1  ;;  %v6790_v13 = vld [vmem:[%s7767_s7 + $0x238] sm:$0xff]  }
 0x21a   : > { %v3484_v18 = vpop.f32.mrb[15].mxu1 }
 0x21b   : > { %v6698_v18 = vld [vmem:[%s7769_s8 + $0x8cc] ss:$36 sps:$4 sm:$0xff]  }
 0x21c   : > { %3694 = vmatmul.mubr.bf16.gmra.mrb[120].mxu1 %v6638_v14  ;;  %v6692_v14 = vld [vmem:[%s7769_s8 + $0x3f8] ss:$36 sps:$4 sm:$0xff]  }
 0x21d   : > { %4208 = vmatmul.mubr.bf16.gmra.mrb[88].mxu0 %v6639_v16  ;;  %3701 = vmatprep.mubr.bf16.mxu1 %v6641_v17  ;;  %v6693_v16 = vld [vmem:[%s7769_s8 + $0x880] ss:$36 sps:$4 sm:$0xff]  }
 0x21e   : > { %4215 = vmatprep.mubr.bf16.mxu0 %v6643_v19  ;;  %v6696_v17 = vld [vmem:[%s7769_s8 + $0x444] ss:$36 sps:$4 sm:$0xff]  }
 0x21f   : > { %v8190_v20 = vpop.f32.mrb[16].mxu1  ;;  %v6700_v19 = vld [vmem:[%s7769_s8 + $0x440] ss:$36 sps:$4 sm:$0xff]  }
 0x220   : > { %v3489_v21 = vpop.f32.mrb[17].mxu1 }
 0x221   : > { %v8193_v23 = vpop.f32.mrb[18].mxu1  ;;  %v6701_v21 = vld [vmem:[%s7769_s8 + $0x8c8] ss:$36 sps:$4 sm:$0xff]  }
 0x222   : > { %v3492_v26 = vpop.f32.mrb[19].mxu1 }
 0x223   : > { %v6704_v26 = vld [vmem:[%s7769_s8 + $0x18] ss:$36 sps:$4 sm:$0xff]  }
 0x224   : > { %3702 = vmatmul.mubr.bf16.gmra.mrb[124].mxu1 %v6645_v22  ;;  %v6702_v22 = vld [vmem:[%s7769_s8 + $0x48c] ss:$36 sps:$4 sm:$0xff]  }
 0x225   : > { %4216 = vmatmul.mubr.bf16.gmra.mrb[92].mxu0 %v6646_v24  ;;  %3806 = vmatprep.mubr.bf16.mxu1 %v6649_v25  ;;  %v6706_v24 = vld [vmem:[%s7769_s8 + $0x1c] ss:$36 sps:$4 sm:$0xff]   ;;  %v6707_v25 = vld [vmem:[%s7769_s8 + $0x488] ss:$36 sps:$4 sm:$0xff]  }
 0x226   : > { %4223 = vmatprep.mubr.bf16.mxu0 %v6650_v27  ;;  %v6708_v27 = vld [vmem:[%s7769_s8 + $0x4d4] ss:$36 sps:$4 sm:$0xff]  }
 0x227   : > { %v8198_v28 = vpop.f32.mrb[20].mxu1 }
 0x228   : > { %v3497_v29 = vpop.f32.mrb[21].mxu1 }
 0x229   : > { %v8201_v31 = vpop.f32.mrb[22].mxu1  ;;  %v6710_v29 = vld [vmem:[%s7769_s8 + $0x64] ss:$36 sps:$4 sm:$0xff]  }
 0x22a   : > { %v3500_v33 = vpop.f32.mrb[23].mxu1 }
 0x22b   : > { %v6715_v33 = vld [vmem:[%s7769_s8 + $0x51c] ss:$36 sps:$4 sm:$0xff]  }
 0x22c   : > { %3807 = vmatmul.mubr.bf16.vlgmr.msra.gmra.mrb[32].mxu1 %v6647_v30  ;;  %v6712_v30 = vld [vmem:[%s7769_s8 + $0x4d0] ss:$36 sps:$4 sm:$0xff]  }
 0x22d   : > { %4224 = vmatmul.mubr.bf16.gmra.mrb[96].mxu0 %v6652_v32  ;;  %5920 = vmatpush3.bf16.msra.mxu1 %v8109_v7  ;;  %v6714_v7 = vld [vmem:[%s7767_s7 + $0x218] sm:$0xff]   ;;  %v6713_v32 = vld [vmem:[%s7769_s8 + $0x60] ss:$36 sps:$4 sm:$0xff]  }
 0x22e   : > { %3814 = vmatprep.mubr.bf16.mxu1 %v6655_v2  ;;  %4231 = vmatprep.mubr.bf16.mxu0 %v6657_v34  ;;  %v6717_v2 = vld [vmem:[%s7769_s8 + $0xac] ss:$36 sps:$4 sm:$0xff]   ;;  %v6719_v34 = vld [vmem:[%s7769_s8 + $0x518] ss:$36 sps:$4 sm:$0xff]  }
 0x22f   : > { %v8209_v37 = vpop.f32.mrb[24].mxu1  ;;  %5921 = vmatprep.subr.bf16.mxu1 %v6674_v35 }
 0x230   : > { %v3505_v38 = vpop.f32.mrb[25].mxu1 }
 0x231   : > { %v8212_v40 = vpop.f32.mrb[26].mxu1  ;;  %5922 = vmatpush3.bf16.msra.mxu1 %v6674_v35  ;;  %v6720_v35 = vld [vmem:[%s7769_s8 + $0xa8] ss:$36 sps:$4 sm:$0xff]   ;;  %v6723_v38 = vld [vmem:[%s7769_s8 + $0xf4] ss:$36 sps:$4 sm:$0xff]  }
 0x232   : > { %v3508_v43 = vpop.f32.mrb[27].mxu1  ;;  %5923 = vmatprep.subr.bf16.mxu1 %v6695_v36 }
 0x233   : > { %v6729_v43 = vld [vmem:[%s7769_s8 + $0x13c] ss:$36 sps:$4 sm:$0xff]  }
 0x234   : > { %3815 = vmatmul.mubr.bf16.gmra.mrb[36].mxu1 %v6659_v39  ;;  %v6725_v39 = vld [vmem:[%s7769_s8 + $0x560] ss:$36 sps:$4 sm:$0xff]  }
 0x235   : > { %4232 = vmatmul.mubr.bf16.gmra.mrb[100].mxu0 %v6660_v41  ;;  %3822 = vmatprep.mubr.bf16.mxu1 %v6661_v42  ;;  %v6726_v41 = vld [vmem:[%s7769_s8 + $0xf0] ss:$36 sps:$4 sm:$0xff]  }
 0x236   : > { %4239 = vmatprep.mubr.bf16.mxu0 %v6663_v44  ;;  %5924 = vmatpush3.bf16.msra.mxu1 %v6695_v36  ;;  %v6721_v36 = vld [vmem:[%s7769_s8 + $0x564] ss:$36 sps:$4 sm:$0xff]   ;;  %v6727_v42 = vld [vmem:[%s7769_s8 + $0x5ac] ss:$36 sps:$4 sm:$0xff]  }
 0x237   : > { %v8218_v45 = vpop.f32.mrb[28].mxu1  ;;  %5925 = vmatprep.subr.bf16.mxu1 %v6714_v7  ;;  %v6731_v44 = vld [vmem:[%s7769_s8 + $0x5a8] ss:$36 sps:$4 sm:$0xff]  }
 0x238   : > { %v3513_v47 = vpop.f32.mrb[29].mxu1 }
 0x239   : > { %v8222_v49 = vpop.f32.mrb[30].mxu1  ;;  %v6736_v47 = vld [vmem:[%s7769_s8 + $0x184] ss:$36 sps:$4 sm:$0xff]  }
 0x23a   : > { %v3516_v54 = vpop.f32.mrb[31].mxu1  ;;  %5926 = vmatpush3.bf16.msra.mxu1 %v6714_v7  ;;  %v6732_v7 = vld [vmem:[%s7769_s8 + $0x138] ss:$36 sps:$4 sm:$0xff]  }
 0x23b   : > { %5927 = vmatprep.subr.bf16.mxu1 %v6733_v46  ;;  %v6742_v54 = vld [vmem:[%s7769_s8 + $0x1cc] ss:$36 sps:$4 sm:$0xff]  }
 0x23c   : > { %3823 = vmatmul.mubr.bf16.gmra.mrb[40].mxu1 %v6665_v48  ;;  %v6738_v48 = vld [vmem:[%s7769_s8 + $0x5f0] ss:$36 sps:$4 sm:$0xff]  }
 0x23d   : > { %4240 = vmatmul.mubr.bf16.gmra.mrb[104].mxu0 %v6666_v51  ;;  %3830 = vmatprep.mubr.bf16.mxu1 %v6668_v52  ;;  %v6739_v51 = vld [vmem:[%s7769_s8 + $0x180] ss:$36 sps:$4 sm:$0xff]  }
 0x23e   : > { %4247 = vmatprep.mubr.bf16.mxu0 %v6670_v55  ;;  %5928 = vmatpush3.bf16.msra.mxu1 %v6733_v46  ;;  %v6734_v46 = vld [vmem:[%s7769_s8 + $0x5f4] ss:$36 sps:$4 sm:$0xff]   ;;  %v6740_v52 = vld [vmem:[%s7769_s8 + $0x63c] ss:$36 sps:$4 sm:$0xff]  }
 0x23f   : > { %5929 = vmatprep.subr.bf16.mxu1 %v6752_v56  ;;  %v6744_v55 = vld [vmem:[%s7769_s8 + $0x638] ss:$36 sps:$4 sm:$0xff]  }
 0x242   : > { %5930 = vmatpush3.bf16.msra.mxu1 %v6752_v56  ;;  %v6745_v56 = vld [vmem:[%s7769_s8 + $0x1c8] ss:$36 sps:$4 sm:$0xff]  }
 0x243   : > { %5931 = vmatprep.subr.bf16.mxu1 %v6771_v57 }
 0x244   : > { %3831 = vmatmul.mubr.bf16.gmra.mrb[44].mxu1 %v6672_v59  ;;  %v6748_v59 = vld [vmem:[%s7769_s8 + $0x214] ss:$36 sps:$4 sm:$0xff]  }
 0x245   : > { %4248 = vmatmul.mubr.bf16.gmra.mrb[108].mxu0 %v6673_v60  ;;  %3838 = vmatprep.mubr.bf16.mxu1 %v6675_v62  ;;  %v6750_v60 = vld [vmem:[%s7769_s8 + $0x680] ss:$36 sps:$4 sm:$0xff]   ;;  %v6751_v62 = vld [vmem:[%s7769_s8 + $0x210] ss:$36 sps:$4 sm:$0xff]  }
 0x246   : > { %4255 = vmatprep.mubr.bf16.mxu0 %v6677_v63  ;;  %5932 = vmatpush3.bf16.msra.mxu1 %v6771_v57  ;;  %v6746_v57 = vld [vmem:[%s7769_s8 + $0x684] ss:$36 sps:$4 sm:$0xff]   ;;  %v6753_v63 = vld [vmem:[%s7769_s8 + $0x6cc] ss:$36 sps:$4 sm:$0xff]  }
 0x247   : > { %5933 = vmatprep.subr.bf16.mxu1 %v6790_v13 }
 0x24a   : > { %5934 = vmatpush3.bf16.msra.mxu1 %v6790_v13  ;;  %v6767_v13 = vld [vmem:[%s7769_s8 + $0x2ec] ss:$36 sps:$4 sm:$0xff]  }
 0x24c   : > { %3839 = vmatmul.mubr.bf16.gmra.mrb[48].mxu1 %v6679_v0  ;;  %v6755_v0 = vld [vmem:[%s7769_s8 + $0x25c] ss:$36 sps:$4 sm:$0xff]  }
 0x24d   : > { %4256 = vmatmul.mubr.bf16.gmra.mrb[112].mxu0 %v6680_v1  ;;  %3846 = vmatprep.mubr.bf16.mxu1 %v6682_v4  ;;  %v6757_v1 = vld [vmem:[%s7769_s8 + $0x6c8] ss:$36 sps:$4 sm:$0xff]   ;;  %v6758_v4 = vld [vmem:[%s7769_s8 + $0x258] ss:$36 sps:$4 sm:$0xff]  }
 0x24e   : > { %4263 = vmatprep.mubr.bf16.mxu0 %v6684_v5  ;;  %v6759_v5 = vld [vmem:[%s7769_s8 + $0x714] ss:$36 sps:$4 sm:$0xff]  }
 0x254   : > { %3847 = vmatmul.mubr.bf16.gmra.mrb[52].mxu1 %v6686_v8  ;;  %v6761_v8 = vld [vmem:[%s7769_s8 + $0x2a4] ss:$36 sps:$4 sm:$0xff]  }
 0x255   : > { %4264 = vmatmul.mubr.bf16.gmra.mrb[116].mxu0 %v6687_v9  ;;  %3854 = vmatprep.mubr.bf16.mxu1 %v6688_v10  ;;  %v6763_v9 = vld [vmem:[%s7769_s8 + $0x710] ss:$36 sps:$4 sm:$0xff]   ;;  %v6764_v10 = vld [vmem:[%s7769_s8 + $0x2a0] ss:$36 sps:$4 sm:$0xff]  }
 0x256   : > { %4271 = vmatprep.mubr.bf16.mxu0 %v6690_v11  ;;  %v6765_v11 = vld [vmem:[%s7769_s8 + $0x75c] ss:$36 sps:$4 sm:$0xff]  }
 0x25c   : > { %3855 = vmatmul.mubr.bf16.gmra.mrb[56].mxu1 %v6692_v14  ;;  %v6769_v14 = vld [vmem:[%s7769_s8 + $0x758] ss:$36 sps:$4 sm:$0xff]  }
 0x25d   : > { %4272 = vmatmul.mubr.bf16.gmra.mrb[120].mxu0 %v6693_v16  ;;  %3862 = vmatprep.mubr.bf16.mxu1 %v6696_v17  ;;  %v6770_v16 = vld [vmem:[%s7769_s8 + $0x2e8] ss:$36 sps:$4 sm:$0xff]  }
 0x25e   : > { %4279 = vmatprep.mubr.bf16.mxu0 %v6698_v18  ;;  %v6772_v17 = vld [vmem:[%s7769_s8 + $0x7a4] ss:$36 sps:$4 sm:$0xff]   ;;  %v6774_v18 = vld [vmem:[%s7769_s8 + $0x334] ss:$36 sps:$4 sm:$0xff]  }
 0x264   : > { %3863 = vmatmul.mubr.bf16.gmra.mrb[60].mxu1 %v6700_v19  ;;  %v6776_v19 = vld [vmem:[%s7769_s8 + $0x7a0] ss:$36 sps:$4 sm:$0xff]  }
 0x265   : > { %4280 = vmatmul.mubr.bf16.gmra.mrb[124].mxu0 %v6701_v21  ;;  %3870 = vmatprep.mubr.bf16.mxu1 %v6702_v22  ;;  %v6777_v21 = vld [vmem:[%s7769_s8 + $0x330] ss:$36 sps:$4 sm:$0xff]  }
 0x266   : > { %4320 = vmatprep.mubr.bf16.mxu0 %v6706_v24  ;;  %v6778_v22 = vld [vmem:[%s7769_s8 + $0x7ec] ss:$36 sps:$4 sm:$0xff]   ;;  %v6780_v24 = vld [vmem:[%s7769_s8 + $0x37c] ss:$36 sps:$4 sm:$0xff]  }
 0x26c   : > { %3871 = vmatmul.mubr.bf16.gmra.mrb[64].mxu1 %v6707_v25  ;;  %v6782_v25 = vld [vmem:[%s7769_s8 + $0x7e8] ss:$36 sps:$4 sm:$0xff]  }
 0x26d   : > { %4321 = vmatmul.mubr.bf16.vlgmr.msra.gmra.mrb[0].mxu0 %v6704_v26  ;;  %3878 = vmatprep.mubr.bf16.mxu1 %v6708_v27  ;;  %v6783_v26 = vld [vmem:[%s7769_s8 + $0x378] ss:$36 sps:$4 sm:$0xff]  }
 0x26e   : > { %4328 = vmatprep.mubr.bf16.mxu0 %v6710_v29  ;;  %v6784_v27 = vld [vmem:[%s7769_s8 + $0x834] ss:$36 sps:$4 sm:$0xff]   ;;  %v6786_v29 = vld [vmem:[%s7769_s8 + $0x3c4] ss:$36 sps:$4 sm:$0xff]  }
 0x274   : > { %3879 = vmatmul.mubr.bf16.gmra.mrb[68].mxu1 %v6712_v30  ;;  %v6788_v30 = vld [vmem:[%s7769_s8 + $0x830] ss:$36 sps:$4 sm:$0xff]  }
 0x275   : > { %4329 = vmatmul.mubr.bf16.gmra.mrb[4].mxu0 %v6713_v32  ;;  %3886 = vmatprep.mubr.bf16.mxu1 %v6715_v33  ;;  %v6789_v32 = vld [vmem:[%s7769_s8 + $0x3c0] ss:$36 sps:$4 sm:$0xff]  }
 0x276   : > { %4336 = vmatprep.mubr.bf16.mxu0 %v6717_v2  ;;  %v6791_v33 = vld [vmem:[%s7769_s8 + $0x87c] ss:$36 sps:$4 sm:$0xff]   ;;  %v6793_v2 = vld [vmem:[%s7769_s8 + $0x40c] ss:$36 sps:$4 sm:$0xff]  }
 0x27c   : > { %3887 = vmatmul.mubr.bf16.gmra.mrb[72].mxu1 %v6719_v34  ;;  %v6795_v34 = vld [vmem:[%s7769_s8 + $0x878] ss:$36 sps:$4 sm:$0xff]  }
 0x27d   : > { %4337 = vmatmul.mubr.bf16.gmra.mrb[8].mxu0 %v6720_v35  ;;  %3894 = vmatprep.mubr.bf16.mxu1 %v6721_v36  ;;  %v6796_v35 = vld [vmem:[%s7769_s8 + $0x408] ss:$36 sps:$4 sm:$0xff]  }
 0x27e   : > { %4344 = vmatprep.mubr.bf16.mxu0 %v6723_v38  ;;  %v6797_v36 = vld [vmem:[%s7769_s8 + $0x8c4] ss:$36 sps:$4 sm:$0xff]   ;;  %v6799_v38 = vld [vmem:[%s7769_s8 + $0x454] ss:$36 sps:$4 sm:$0xff]  }
 0x284   : > { %3895 = vmatmul.mubr.bf16.gmra.mrb[76].mxu1 %v6725_v39  ;;  %v6801_v39 = vld [vmem:[%s7769_s8 + $0x8c0] ss:$36 sps:$4 sm:$0xff]  }
 0x285   : > { %4345 = vmatmul.mubr.bf16.gmra.mrb[12].mxu0 %v6726_v41  ;;  %3902 = vmatprep.mubr.bf16.mxu1 %v6727_v42  ;;  %v6802_v41 = vld [vmem:[%s7769_s8 + $0x450] ss:$36 sps:$4 sm:$0xff]   ;;  %v6805_v42 = vld [vmem:[%s7769_s8 + $0x20] ss:$36 sps:$4 sm:$0xff]  }
 0x286   : > { %4352 = vmatprep.mubr.bf16.mxu0 %v6729_v43  ;;  %v6803_v43 = vld [vmem:[%s7769_s8 + $0x49c] ss:$36 sps:$4 sm:$0xff]  }
 0x28c   : > { %3903 = vmatmul.mubr.bf16.gmra.mrb[80].mxu1 %v6731_v44  ;;  %v6807_v44 = vld [vmem:[%s7769_s8 + $0x68] ss:$36 sps:$4 sm:$0xff]  }
 0x28d   : > { %4353 = vmatmul.mubr.bf16.gmra.mrb[16].mxu0 %v6732_v7  ;;  %3910 = vmatprep.mubr.bf16.mxu1 %v6734_v46  ;;  %v6806_v7 = vld [vmem:[%s7769_s8 + $0x498] ss:$36 sps:$4 sm:$0xff]   ;;  %v6810_v46 = vld [vmem:[%s7769_s8 + $0xb0] ss:$36 sps:$4 sm:$0xff]  }
 0x28e   : > { %4360 = vmatprep.mubr.bf16.mxu0 %v6736_v47  ;;  %v6808_v47 = vld [vmem:[%s7769_s8 + $0x4e4] ss:$36 sps:$4 sm:$0xff]  }
 0x294   : > { %3911 = vmatmul.mubr.bf16.gmra.mrb[84].mxu1 %v6738_v48  ;;  %v6812_v48 = vld [vmem:[%s7769_s8 + $0xf8] ss:$36 sps:$4 sm:$0xff]  }
 0x295   : > { %4361 = vmatmul.mubr.bf16.gmra.mrb[20].mxu0 %v6739_v51  ;;  %3918 = vmatprep.mubr.bf16.mxu1 %v6740_v52  ;;  %v6811_v51 = vld [vmem:[%s7769_s8 + $0x4e0] ss:$36 sps:$4 sm:$0xff]  }
 0x296   : > { %4368 = vmatprep.mubr.bf16.mxu0 %v6742_v54  ;;  %v6815_v52 = vld [vmem:[%s7769_s8 + $0x140] ss:$36 sps:$4 sm:$0xff]   ;;  %v6813_v54 = vld [vmem:[%s7769_s8 + $0x52c] ss:$36 sps:$4 sm:$0xff]  }
 0x29c   : > { %3919 = vmatmul.mubr.bf16.gmra.mrb[88].mxu1 %v6744_v55  ;;  %v6817_v55 = vld [vmem:[%s7769_s8 + $0x188] ss:$36 sps:$4 sm:$0xff]  }
 0x29d   : > { %4369 = vmatmul.mubr.bf16.gmra.mrb[24].mxu0 %v6745_v56  ;;  %3926 = vmatprep.mubr.bf16.mxu1 %v6746_v57  ;;  %v6816_v56 = vld [vmem:[%s7769_s8 + $0x528] ss:$36 sps:$4 sm:$0xff]   ;;  %v6820_v57 = vld [vmem:[%s7769_s8 + $0x1d0] ss:$36 sps:$4 sm:$0xff]  }
 0x29e   : > { %4376 = vmatprep.mubr.bf16.mxu0 %v6748_v59  ;;  %v6818_v59 = vld [vmem:[%s7769_s8 + $0x574] ss:$36 sps:$4 sm:$0xff]  }
 0x2a4   : > { %3927 = vmatmul.mubr.bf16.gmra.mrb[92].mxu1 %v6750_v60 }
 0x2a5   : > { %4377 = vmatmul.mubr.bf16.gmra.mrb[28].mxu0 %v6751_v62  ;;  %3934 = vmatprep.mubr.bf16.mxu1 %v6753_v63  ;;  %v6822_v63 = vld [vmem:[%s7769_s8 + $0x218] ss:$36 sps:$4 sm:$0xff]  }
 0x2a6   : > { %4384 = vmatprep.mubr.bf16.mxu0 %v6755_v0 }
 0x2ac   : > { %3935 = vmatmul.mubr.bf16.gmra.mrb[96].mxu1 %v6757_v1  ;;  %v6821_v1 = vld [vmem:[%s7769_s8 + $0x570] ss:$36 sps:$4 sm:$0xff]  }
 0x2ad   : > { %4385 = vmatmul.mubr.bf16.gmra.mrb[32].mxu0 %v6758_v4  ;;  %3942 = vmatprep.mubr.bf16.mxu1 %v6759_v5  ;;  %v6825_v4 = vld [vmem:[%s7769_s8 + $0x260] ss:$36 sps:$4 sm:$0xff]  }
 0x2ae   : > { %4392 = vmatprep.mubr.bf16.mxu0 %v6761_v8  ;;  %v6823_v8 = vld [vmem:[%s7769_s8 + $0x5bc] ss:$36 sps:$4 sm:$0xff]  }
 0x2b4   : > { %3943 = vmatmul.mubr.bf16.gmra.mrb[100].mxu1 %v6763_v9 }
 0x2b5   : > { %4393 = vmatmul.mubr.bf16.gmra.mrb[36].mxu0 %v6764_v10  ;;  %3950 = vmatprep.mubr.bf16.mxu1 %v6765_v11  ;;  %v6827_v11 = vld [vmem:[%s7769_s8 + $0x2a8] ss:$36 sps:$4 sm:$0xff]  }
 0x2b6   : > { %4400 = vmatprep.mubr.bf16.mxu0 %v6767_v13 }
 0x2bc   : > { %3951 = vmatmul.mubr.bf16.gmra.mrb[104].mxu1 %v6769_v14  ;;  %v6826_v14 = vld [vmem:[%s7769_s8 + $0x5b8] ss:$36 sps:$4 sm:$0xff]  }
 0x2bd   : > { %4401 = vmatmul.mubr.bf16.gmra.mrb[40].mxu0 %v6770_v16  ;;  %3958 = vmatprep.mubr.bf16.mxu1 %v6772_v17  ;;  %v6830_v16 = vld [vmem:[%s7769_s8 + $0x2f0] ss:$36 sps:$4 sm:$0xff]  }
 0x2be   : > { %4408 = vmatprep.mubr.bf16.mxu0 %v6774_v18  ;;  %v6828_v18 = vld [vmem:[%s7769_s8 + $0x604] ss:$36 sps:$4 sm:$0xff]  }
 0x2c4   : > { %3959 = vmatmul.mubr.bf16.gmra.mrb[108].mxu1 %v6776_v19 }
 0x2c5   : > { %4409 = vmatmul.mubr.bf16.gmra.mrb[44].mxu0 %v6777_v21  ;;  %3966 = vmatprep.mubr.bf16.mxu1 %v6778_v22  ;;  %v6832_v22 = vld [vmem:[%s7769_s8 + $0x338] ss:$36 sps:$4 sm:$0xff]  }
 0x2c6   : > { %4416 = vmatprep.mubr.bf16.mxu0 %v6780_v24 }
 0x2cc   : > { %3967 = vmatmul.mubr.bf16.gmra.mrb[112].mxu1 %v6782_v25  ;;  %v6831_v25 = vld [vmem:[%s7769_s8 + $0x600] ss:$36 sps:$4 sm:$0xff]  }
 0x2cd   : > { %4417 = vmatmul.mubr.bf16.gmra.mrb[48].mxu0 %v6783_v26  ;;  %3974 = vmatprep.mubr.bf16.mxu1 %v6784_v27  ;;  %v6835_v26 = vld [vmem:[%s7769_s8 + $0x380] ss:$36 sps:$4 sm:$0xff]  }
 0x2ce   : > { %4424 = vmatprep.mubr.bf16.mxu0 %v6786_v29  ;;  %v6833_v29 = vld [vmem:[%s7769_s8 + $0x64c] ss:$36 sps:$4 sm:$0xff]  }
 0x2d4   : > { %3975 = vmatmul.mubr.bf16.gmra.mrb[116].mxu1 %v6788_v30 }
 0x2d5   : > { %4425 = vmatmul.mubr.bf16.gmra.mrb[52].mxu0 %v6789_v32  ;;  %3982 = vmatprep.mubr.bf16.mxu1 %v6791_v33  ;;  %v6837_v33 = vld [vmem:[%s7769_s8 + $0x3c8] ss:$36 sps:$4 sm:$0xff]  }
 0x2d6   : > { %4432 = vmatprep.mubr.bf16.mxu0 %v6793_v2 }
 0x2dc   : > { %3983 = vmatmul.mubr.bf16.gmra.mrb[120].mxu1 %v6795_v34  ;;  %v6836_v34 = vld [vmem:[%s7769_s8 + $0x648] ss:$36 sps:$4 sm:$0xff]  }
 0x2dd   : > { %4433 = vmatmul.mubr.bf16.gmra.mrb[56].mxu0 %v6796_v35  ;;  %3990 = vmatprep.mubr.bf16.mxu1 %v6797_v36  ;;  %v6840_v35 = vld [vmem:[%s7769_s8 + $0x410] ss:$36 sps:$4 sm:$0xff]  }
 0x2de   : > { %4440 = vmatprep.mubr.bf16.mxu0 %v6799_v38  ;;  %v6838_v38 = vld [vmem:[%s7769_s8 + $0x694] ss:$36 sps:$4 sm:$0xff]  }
 0x2e4   : > { %3991 = vmatmul.mubr.bf16.gmra.mrb[124].mxu1 %v6801_v39 }
 0x2e5   : > { %4441 = vmatmul.mubr.bf16.gmra.mrb[60].mxu0 %v6802_v41  ;;  %5935 = vmatprep.mubr.bf16.mxu1 %v6805_v42  ;;  %v6842_v42 = vld [vmem:[%s7769_s8 + $0x458] ss:$36 sps:$4 sm:$0xff]  }
 0x2e6   : > { %4448 = vmatprep.mubr.bf16.mxu0 %v6803_v43 }
 0x2ec   : > { %5936 = vmatmul.mubr.bf16.vlgmr.msra.gmra.mrb[128].mxu1 %v6807_v44  ;;  %v6841_v44 = vld [vmem:[%s7769_s8 + $0x690] ss:$36 sps:$4 sm:$0xff]  }
 0x2ed   : > { %4449 = vmatmul.mubr.bf16.gmra.mrb[64].mxu0 %v6806_v7  ;;  %5939 = vmatprep.mubr.bf16.mxu1 %v6810_v46  ;;  %v6845_v7 = vld [vmem:[%s7769_s8 + $0x4a0] ss:$36 sps:$4 sm:$0xff]  }
 0x2ee   : > { %4456 = vmatprep.mubr.bf16.mxu0 %v6808_v47  ;;  %v6843_v47 = vld [vmem:[%s7769_s8 + $0x6dc] ss:$36 sps:$4 sm:$0xff]  }
 0x2f4   : > { %5940 = vmatmul.mubr.bf16.gmra.mrb[132].mxu1 %v6812_v48 }
 0x2f5   : > { %4457 = vmatmul.mubr.bf16.gmra.mrb[68].mxu0 %v6811_v51  ;;  %5943 = vmatprep.mubr.bf16.mxu1 %v6815_v52  ;;  %v6847_v52 = vld [vmem:[%s7769_s8 + $0x4e8] ss:$36 sps:$4 sm:$0xff]  }
 0x2f6   : > { %4464 = vmatprep.mubr.bf16.mxu0 %v6813_v54 }
 0x2fc   : > { %5944 = vmatmul.mubr.bf16.gmra.mrb[136].mxu1 %v6817_v55  ;;  %v6846_v55 = vld [vmem:[%s7769_s8 + $0x6d8] ss:$36 sps:$4 sm:$0xff]  }
 0x2fd   : > { %4465 = vmatmul.mubr.bf16.gmra.mrb[72].mxu0 %v6816_v56  ;;  %5947 = vmatprep.mubr.bf16.mxu1 %v6820_v57  ;;  %v6850_v56 = vld [vmem:[%s7769_s8 + $0x530] ss:$36 sps:$4 sm:$0xff]  }
 0x2fe   : > { %4472 = vmatprep.mubr.bf16.mxu0 %v6818_v59  ;;  %v6848_v59 = vld [vmem:[%s7769_s8 + $0x724] ss:$36 sps:$4 sm:$0xff]  }
 0x2ff   : > { %v8326_v60 = vpop.f32.mrb[32].mxu1 }
 0x300   : > { %v3810_v62 = vpop.f32.mrb[33].mxu1 }
 0x301   : > { %v8329_v0 = vpop.f32.mrb[34].mxu1 }
 0x302   : > { %v3813_v5 = vpop.f32.mrb[35].mxu1 }
 0x303   : > { %v6851_v5 = vld [vmem:[%s7769_s8 + $0x720] ss:$36 sps:$4 sm:$0xff]  }
 0x304   : > { %5948 = vmatmul.mubr.bf16.gmra.mrb[140].mxu1 %v6822_v63 }
 0x305   : > { %4473 = vmatmul.mubr.bf16.gmra.mrb[76].mxu0 %v6821_v1  ;;  %5951 = vmatprep.mubr.bf16.mxu1 %v6825_v4  ;;  %v6852_v1 = vld [vmem:[%s7769_s8 + $0x578] ss:$36 sps:$4 sm:$0xff]  }
 0x306   : > { %4480 = vmatprep.mubr.bf16.mxu0 %v6823_v8  ;;  %v6855_v8 = vld [vmem:[%s7769_s8 + $0x5c0] ss:$36 sps:$4 sm:$0xff]  }
 0x307   : > { %v8334_v9 = vpop.f32.mrb[36].mxu1 }
 0x308   : > { %v3818_v10 = vpop.f32.mrb[37].mxu1 }
 0x309   : > { %v8337_v13 = vpop.f32.mrb[38].mxu1 }
 0x30a   : > { %v3821_v17 = vpop.f32.mrb[39].mxu1 }
 0x30b   : > { %v6857_v17 = vld [vmem:[%s7769_s8 + $0x608] ss:$36 sps:$4 sm:$0xff]  }
 0x30c   : > { %5952 = vmatmul.mubr.bf16.gmra.mrb[144].mxu1 %v6827_v11  ;;  %v6853_v11 = vld [vmem:[%s7769_s8 + $0x76c] ss:$36 sps:$4 sm:$0xff]  }
 0x30d   : > { %4481 = vmatmul.mubr.bf16.gmra.mrb[80].mxu0 %v6826_v14  ;;  %5955 = vmatprep.mubr.bf16.mxu1 %v6830_v16 }
 0x30e   : > { %4488 = vmatprep.mubr.bf16.mxu0 %v6828_v18 }
 0x30f   : > { %v8342_v19 = vpop.f32.mrb[40].mxu1 }
 0x310   : > { %v3826_v21 = vpop.f32.mrb[41].mxu1 }
 0x311   : > { %v8345_v24 = vpop.f32.mrb[42].mxu1  ;;  %v6856_v21 = vld [vmem:[%s7769_s8 + $0x768] ss:$36 sps:$4 sm:$0xff]  }
 0x312   : > { %v3829_v27 = vpop.f32.mrb[43].mxu1 }
 0x314   : > { %5956 = vmatmul.mubr.bf16.gmra.mrb[148].mxu1 %v6832_v22  ;;  %v6860_v22 = vld [vmem:[%s7769_s8 + $0x650] ss:$36 sps:$4 sm:$0xff]  }
 0x315   : > { %4489 = vmatmul.mubr.bf16.gmra.mrb[84].mxu0 %v6831_v25  ;;  %5959 = vmatprep.mubr.bf16.mxu1 %v6835_v26  ;;  %v6858_v26 = vld [vmem:[%s7769_s8 + $0x7b4] ss:$36 sps:$4 sm:$0xff]  }
 0x316   : > { %4496 = vmatprep.mubr.bf16.mxu0 %v6833_v29 }
 0x317   : > { %v8350_v30 = vpop.f32.mrb[44].mxu1 }
 0x318   : > { %v3834_v32 = vpop.f32.mrb[45].mxu1 }
 0x319   : > { %v8353_v2 = vpop.f32.mrb[46].mxu1 }
 0x31a   : > { %v3837_v36 = vpop.f32.mrb[47].mxu1 }
 0x31c   : > { %5960 = vmatmul.mubr.bf16.gmra.mrb[152].mxu1 %v6837_v33  ;;  %v6862_v33 = vld [vmem:[%s7769_s8 + $0x698] ss:$36 sps:$4 sm:$0xff]  }
 0x31d   : > { %4497 = vmatmul.mubr.bf16.gmra.mrb[88].mxu0 %v6836_v34  ;;  %5963 = vmatprep.mubr.bf16.mxu1 %v6840_v35 }
 0x31e   : > { %4504 = vmatprep.mubr.bf16.mxu0 %v6838_v38  ;;  %v6861_v38 = vld [vmem:[%s7769_s8 + $0x7b0] ss:$36 sps:$4 sm:$0xff]  }
 0x31f   : > { %v8358_v39 = vpop.f32.mrb[48].mxu1 }
 0x320   : > { %v3842_v41 = vpop.f32.mrb[49].mxu1 }
 0x321   : > { %v8361_v43 = vpop.f32.mrb[50].mxu1  ;;  %v6865_v41 = vld [vmem:[%s7769_s8 + $0x6e0] ss:$36 sps:$4 sm:$0xff]  }
 0x322   : > { %v3845_v46 = vpop.f32.mrb[51].mxu1 }
 0x324   : > { %5964 = vmatmul.mubr.bf16.gmra.mrb[156].mxu1 %v6842_v42 }
 0x325   : > { %4505 = vmatmul.mubr.bf16.gmra.mrb[92].mxu0 %v6841_v44  ;;  %5967 = vmatprep.mubr.bf16.mxu1 %v6845_v7  ;;  %v6863_v7 = vld [vmem:[%s7769_s8 + $0x7fc] ss:$36 sps:$4 sm:$0xff]  }
 0x326   : > { %4512 = vmatprep.mubr.bf16.mxu0 %v6843_v47 }
 0x327   : > { %v8366_v48 = vpop.f32.mrb[52].mxu1 }
 0x328   : > { %v3850_v51 = vpop.f32.mrb[53].mxu1 }
 0x329   : > { %v8369_v54 = vpop.f32.mrb[54].mxu1 }
 0x32a   : > { %v3853_v57 = vpop.f32.mrb[55].mxu1 }
 0x32c   : > { %5968 = vmatmul.mubr.bf16.gmra.mrb[160].mxu1 %v6847_v52 }
 0x32d   : > { %4513 = vmatmul.mubr.bf16.gmra.mrb[96].mxu0 %v6846_v55  ;;  %5971 = vmatprep.mubr.bf16.mxu1 %v6850_v56  ;;  %v6867_v55 = vld [vmem:[%s7769_s8 + $0x728] ss:$36 sps:$4 sm:$0xff]  }
 0x32e   : > { %4520 = vmatprep.mubr.bf16.mxu0 %v6848_v59 }
 0x32f   : > { %v8374_v62 = vpop.f32.mrb[56].mxu1 }
 0x330   : > { %v3858_v63 = vpop.f32.mrb[57].mxu1 }
 0x331   : > { %v8377_v4 = vpop.f32.mrb[58].mxu1  ;;  %v6870_v63 = vld [vmem:[%s7769_s8 + $0x770] ss:$36 sps:$4 sm:$0xff]  }
 0x332   : > { %v3861_v10 = vpop.f32.mrb[59].mxu1 }
 0x334   : > { %5972 = vmatmul.mubr.bf16.gmra.mrb[164].mxu1 %v6852_v1 }
 0x335   : > { %4521 = vmatmul.mubr.bf16.gmra.mrb[100].mxu0 %v6851_v5  ;;  %5975 = vmatprep.mubr.bf16.mxu1 %v6855_v8  ;;  %v6868_v8 = vld [vmem:[%s7769_s8 + $0x844] ss:$36 sps:$4 sm:$0xff]  }
 0x336   : > { %4528 = vmatprep.mubr.bf16.mxu0 %v6853_v11 }
 0x337   : > { %v8382_v14 = vpop.f32.mrb[60].mxu1 }
 0x338   : > { %v3866_v16 = vpop.f32.mrb[61].mxu1 }
 0x339   : > { %v8385_v18 = vpop.f32.mrb[62].mxu1 }
 0x33a   : > { %v3869_v25 = vpop.f32.mrb[63].mxu1 }
 0x33c   : > { %5976 = vmatmul.mubr.bf16.gmra.mrb[168].mxu1 %v6857_v17 }
 0x33d   : > { %4529 = vmatmul.mubr.bf16.gmra.mrb[104].mxu0 %v6856_v21  ;;  %5979 = vmatprep.mubr.bf16.mxu1 %v6860_v22  ;;  %v6872_v21 = vld [vmem:[%s7769_s8 + $0x7b8] ss:$36 sps:$4 sm:$0xff]  }
 0x33e   : > { %4536 = vmatprep.mubr.bf16.mxu0 %v6858_v26 }
 0x33f   : > { %v8390_v27 = vpop.f32.mrb[64].mxu1 }
 0x340   : > { %v4322_v29 = vpop.f32.mrb[0].mxu0  ;;  %v3874_v32 = vpop.f32.mrb[65].mxu1 }
 0x341   : > { %v8394_v34 = vadd.f32 %v4322_v29, %v8158_v50  ;;  %v4324_v35 = vpop.f32.mrb[1].mxu0  ;;  %v8396_v36 = vpop.f32.mrb[66].mxu1  ;;  %v6875_v29 = vld [vmem:[%s7769_s8 + $0x800] ss:$36 sps:$4 sm:$0xff]  }
 0x342   : > { %v4325_v42 = vpop.f32.mrb[2].mxu0  ;;  %v3877_v44 = vpop.f32.mrb[67].mxu1  ;;  %v6873_v35 = vld [vmem:[%s7769_s8 + $0x88c] ss:$36 sps:$4 sm:$0xff]  }
 0x343   : > { %v8402_v46 = vadd.f32 %v4325_v42, %v8161_v53  ;;  %v4327_v47 = vpop.f32.mrb[3].mxu0  ;;  %v6866_v53 = vld [vmem:[%s7769_s8 + $0x7f8] ss:$36 sps:$4 sm:$0xff]  }
 0x344   : > { %5980 = vmatmul.mubr.bf16.gmra.mrb[172].mxu1 %v6862_v33 }
 0x345   : > { %4537 = vmatmul.mubr.bf16.gmra.mrb[108].mxu0 %v6861_v38  ;;  %5983 = vmatprep.mubr.bf16.mxu1 %v6865_v41 }
 0x346   : > { %4544 = vmatprep.mubr.bf16.mxu0 %v6863_v7  ;;  %v6877_v7 = vld [vmem:[%s7769_s8 + $0x848] ss:$36 sps:$4 sm:$0xff]  }
 0x347   : > { %v8404_v50 = vpop.f32.mrb[68].mxu1 }
 0x348   : > { %v4330_v51 = vpop.f32.mrb[4].mxu0  ;;  %v3882_v52 = vpop.f32.mrb[69].mxu1 }
 0x349   : > { %v8408_v56 = vadd.f32 %v4330_v51, %v8166_v58  ;;  %v4332_v57 = vpop.f32.mrb[5].mxu0  ;;  %v8410_v59 = vpop.f32.mrb[70].mxu1 }
 0x34a   : > { %v4333_v1 = vpop.f32.mrb[6].mxu0  ;;  %v3885_v5 = vpop.f32.mrb[71].mxu1 }
 0x34b   : > { %v8416_v10 = vadd.f32 %v4333_v1, %v8169_v61  ;;  %v4335_v11 = vpop.f32.mrb[7].mxu0  ;;  %v6871_v61 = vld [vmem:[%s7769_s8 + $0x840] ss:$36 sps:$4 sm:$0xff]  }
 0x34c   : > { %5984 = vmatmul.mubr.bf16.gmra.mrb[176].mxu1 %v6867_v55  ;;  %v6880_v55 = vld [vmem:[%s7769_s8 + $0x890] ss:$36 sps:$4 sm:$0xff]  }
 0x34d   : > { %4545 = vmatmul.mubr.bf16.gmra.mrb[112].mxu0 %v6866_v53  ;;  %5987 = vmatprep.mubr.bf16.mxu1 %v6870_v63  ;;  %v6878_v63 = vld [vmem:[%s7769_s8 + $0x8d4] ss:$36 sps:$4 sm:$0xff]  }
 0x34e   : > { %4552 = vmatprep.mubr.bf16.mxu0 %v6868_v8 }
 0x34f   : > { %v8418_v58 = vpop.f32.mrb[72].mxu1 }
 0x350   : > { %v4338_v16 = vpop.f32.mrb[8].mxu0  ;;  %v3890_v17 = vpop.f32.mrb[73].mxu1 }
 0x351   : > { %v8422_v22 = vadd.f32 %v4338_v16, %v8174_v3  ;;  %v4340_v25 = vpop.f32.mrb[9].mxu0  ;;  %v8424_v26 = vpop.f32.mrb[74].mxu1  ;;  %v6882_v16 = vld [vmem:[%s7769_s8 + $0x8d8] ss:$36 sps:$4 sm:$0xff]  }
 0x352   : > { %v4341_v32 = vpop.f32.mrb[10].mxu0  ;;  %v3893_v33 = vpop.f32.mrb[75].mxu1 }
 0x353   : > { %v8430_v38 = vadd.f32 %v4341_v32, %v8177_v6  ;;  %v4343_v41 = vpop.f32.mrb[11].mxu0  ;;  %v6876_v6 = vld [vmem:[%s7769_s8 + $0x888] ss:$36 sps:$4 sm:$0xff]  }
 0x354   : > { %5988 = vmatmul.mubr.bf16.gmra.mrb[180].mxu1 %v6872_v21 }
 0x355   : > { %4553 = vmatmul.mubr.bf16.gmra.mrb[116].mxu0 %v6871_v61  ;;  %5991 = vmatprep.mubr.bf16.mxu1 %v6875_v29  ;;  %v6881_v61 = vld [vmem:[%s7769_s8 + $0x8d0] ss:$36 sps:$4 sm:$0xff]  }
 0x356   : > { %4560 = vmatprep.mubr.bf16.mxu0 %v6873_v35 }
 0x357   : > { %v8432_v3 = vpop.f32.mrb[76].mxu1 }
 0x358   : > { %v4346_v42 = vpop.f32.mrb[12].mxu0  ;;  %v3898_v44 = vpop.f32.mrb[77].mxu1 }
 0x359   : > { %v8436_v47 = vadd.f32 %v4346_v42, %v8182_v12  ;;  %v4348_v51 = vpop.f32.mrb[13].mxu0  ;;  %v8438_v52 = vpop.f32.mrb[78].mxu1 }
 0x35a   : > { %v4349_v57 = vpop.f32.mrb[14].mxu0  ;;  %v3901_v53 = vpop.f32.mrb[79].mxu1 }
 0x35b   : > { %v8444_v1 = vadd.f32 %v4349_v57, %v8185_v15  ;;  %v4351_v5 = vpop.f32.mrb[15].mxu0 }
 0x35c   : > { %5992 = vmatmul.mubr.bf16.gmra.mrb[184].mxu1 %v6877_v7 }
 0x35d   : > { %4561 = vmatmul.mubr.bf16.gmra.mrb[120].mxu0 %v6876_v6  ;;  %5995 = vmatprep.mubr.bf16.mxu1 %v6880_v55 }
 0x35e   : > { %4568 = vmatprep.mubr.bf16.mxu0 %v6878_v63 }
 0x35f   : > { %v8446_v12 = vpop.f32.mrb[80].mxu1 }
 0x360   : > { %v4354_v8 = vpop.f32.mrb[16].mxu0  ;;  %v3906_v11 = vpop.f32.mrb[81].mxu1 }
 0x361   : > { %v8450_v17 = vadd.f32 %v4354_v8, %v8190_v20  ;;  %v4356_v21 = vpop.f32.mrb[17].mxu0  ;;  %v8452_v25 = vpop.f32.mrb[82].mxu1 }
 0x362   : > { %v4357_v29 = vpop.f32.mrb[18].mxu0  ;;  %v3909_v15 = vpop.f32.mrb[83].mxu1 }
 0x363   : > { %v8456_v32 = vadd.f32 %v4357_v29, %v8193_v23  ;;  %v4359_v33 = vpop.f32.mrb[19].mxu0 }
 0x364   : > { %5996 = vmatmul.mubr.bf16.gmra.mrb[188].mxu1 %v6882_v16 }
 0x365   : > { %4569 = vmatmul.mubr.bf16.gmra.mrb[124].mxu0 %v6881_v61 }
 0x367   : > { %v8458_v35 = vpop.f32.mrb[84].mxu1 }
 0x368   : > { %v4362_v41 = vpop.f32.mrb[20].mxu0  ;;  %v3914_v42 = vpop.f32.mrb[85].mxu1 }
 0x369   : > { %v8461_v44 = vadd.f32 %v4362_v41, %v8198_v28  ;;  %v4364_v20 = vpop.f32.mrb[21].mxu0  ;;  %v8463_v7 = vpop.f32.mrb[86].mxu1 }
 0x36a   : > { %v4365_v51 = vpop.f32.mrb[22].mxu0  ;;  %v3917_v6 = vpop.f32.mrb[87].mxu1 }
 0x36b   : > { %v8466_v55 = vadd.f32 %v4365_v51, %v8201_v31  ;;  %v4367_v23 = vpop.f32.mrb[23].mxu0 }
 0x36f   : > { %v8468_v57 = vpop.f32.mrb[88].mxu1 }
 0x370   : > { %v4370_v53 = vpop.f32.mrb[24].mxu0  ;;  %v3922_v63 = vpop.f32.mrb[89].mxu1 }
 0x371   : > { %v8471_v5 = vadd.f32 %v4370_v53, %v8209_v37  ;;  %v4372_v8 = vpop.f32.mrb[25].mxu0  ;;  %v8473_v11 = vpop.f32.mrb[90].mxu1 }
 0x372   : > { %v4373_v28 = vpop.f32.mrb[26].mxu0  ;;  %v3925_v16 = vpop.f32.mrb[91].mxu1 }
 0x373   : > { %v8476_v21 = vadd.f32 %v4373_v28, %v8212_v40  ;;  %v4375_v61 = vpop.f32.mrb[27].mxu0 }
 0x377   : > { %v8478_v29 = vpop.f32.mrb[92].mxu1 }
 0x378   : > { %v4378_v31 = vpop.f32.mrb[28].mxu0  ;;  %v3930_v15 = vpop.f32.mrb[93].mxu1 }
 0x379   : > { %v8481_v33 = vadd.f32 %v4378_v31, %v8218_v45  ;;  %v4380_v41 = vpop.f32.mrb[29].mxu0  ;;  %v8483_v42 = vpop.f32.mrb[94].mxu1 }
 0x37a   : > { %8979 = vst [vmem:[#allocation4_spill] sm:$0xff] %v8483_v42  ;;  %v4381_v37 = vpop.f32.mrb[30].mxu0  ;;  %v3933_v20 = vpop.f32.mrb[95].mxu1 }
 0x37b   : > { %v8486_v51 = vadd.f32 %v4381_v37, %v8222_v49  ;;  %v4383_v6 = vpop.f32.mrb[31].mxu0 }
 0x37f   : > { %v8488_v23 = vpop.f32.mrb[96].mxu1 }
 0x380   : > { %8980 = vst [vmem:[#allocation5_spill] sm:$0xff] %v8488_v23  ;;  %v4386_v40 = vpop.f32.mrb[32].mxu0  ;;  %v3938_v53 = vpop.f32.mrb[97].mxu1 }
 0x381   : > { %v8491_v63 = vadd.f32 %v4386_v40, %v8326_v60  ;;  %v4388_v8 = vpop.f32.mrb[33].mxu0  ;;  %v8493_v28 = vpop.f32.mrb[98].mxu1 }
 0x382   : > { %8981 = vst [vmem:[#allocation6_spill] sm:$0xff] %v8493_v28  ;;  %v4389_v45 = vpop.f32.mrb[34].mxu0  ;;  %v3941_v16 = vpop.f32.mrb[99].mxu1 }
 0x383   : > { %v8496_v61 = vadd.f32 %v4389_v45, %v8329_v0  ;;  %v4391_v31 = vpop.f32.mrb[35].mxu0 }
 0x387   : > { %v8498_v15 = vpop.f32.mrb[100].mxu1 }
 0x388   : > { %8982 = vst [vmem:[#allocation7_spill] sm:$0xff] %v8498_v15  ;;  %v4394_v49 = vpop.f32.mrb[36].mxu0  ;;  %v3946_v41 = vpop.f32.mrb[101].mxu1 }
 0x389   : > { %v8501_v37 = vadd.f32 %v4394_v49, %v8334_v9  ;;  %v4396_v20 = vpop.f32.mrb[37].mxu0  ;;  %v8503_v6 = vpop.f32.mrb[102].mxu1 }
 0x38a   : > { %8983 = vst [vmem:[#allocation8_spill] sm:$0xff] %v8503_v6  ;;  %v4397_v60 = vpop.f32.mrb[38].mxu0  ;;  %v3949_v40 = vpop.f32.mrb[103].mxu1 }
 0x38b   : > { %v8506_v53 = vadd.f32 %v4397_v60, %v8337_v13  ;;  %v4399_v8 = vpop.f32.mrb[39].mxu0 }
 0x38f   : > { %v8508_v16 = vpop.f32.mrb[104].mxu1 }
 0x390   : > { %8984 = vst [vmem:[#allocation9_spill] sm:$0xff] %v8508_v16  ;;  %v4402_v0 = vpop.f32.mrb[40].mxu0  ;;  %v3954_v45 = vpop.f32.mrb[105].mxu1 }
 0x391   : > { %v8511_v31 = vadd.f32 %v4402_v0, %v8342_v19  ;;  %v4404_v41 = vpop.f32.mrb[41].mxu0  ;;  %v8513_v15 = vpop.f32.mrb[106].mxu1 }
 0x392   : > { %8985 = vst [vmem:[#allocation10_spill] sm:$0xff] %v8513_v15  ;;  %v4405_v9 = vpop.f32.mrb[42].mxu0  ;;  %v3957_v49 = vpop.f32.mrb[107].mxu1 }
 0x393   : > { %v8516_v20 = vadd.f32 %v4405_v9, %v8345_v24  ;;  %v4407_v40 = vpop.f32.mrb[43].mxu0 }
 0x397   : > { %v8518_v6 = vpop.f32.mrb[108].mxu1 }
 0x398   : > { %8986 = vst [vmem:[#allocation11_spill] sm:$0xff] %v8518_v6  ;;  %v4410_v13 = vpop.f32.mrb[44].mxu0  ;;  %v3962_v60 = vpop.f32.mrb[109].mxu1 }
 0x399   : > { %v8521_v8 = vadd.f32 %v4410_v13, %v8350_v30  ;;  %v4412_v45 = vpop.f32.mrb[45].mxu0  ;;  %v8523_v16 = vpop.f32.mrb[110].mxu1 }
 0x39a   : > { %8987 = vst [vmem:[#allocation12_spill] sm:$0xff] %v8523_v16  ;;  %v4413_v19 = vpop.f32.mrb[46].mxu0  ;;  %v3965_v0 = vpop.f32.mrb[111].mxu1 }
 0x39b   : > { %v8526_v41 = vadd.f32 %v4413_v19, %v8353_v2  ;;  %v4415_v49 = vpop.f32.mrb[47].mxu0 }
 0x39f   : > { %v8528_v15 = vpop.f32.mrb[112].mxu1 }
 0x3a0   : > { %8988 = vst [vmem:[#allocation13_spill] sm:$0xff] %v8528_v15  ;;  %v4418_v24 = vpop.f32.mrb[48].mxu0  ;;  %v3970_v9 = vpop.f32.mrb[113].mxu1 }
 0x3a1   : > { %v8531_v40 = vadd.f32 %v4418_v24, %v8358_v39  ;;  %v4420_v60 = vpop.f32.mrb[49].mxu0  ;;  %v8533_v6 = vpop.f32.mrb[114].mxu1 }
 0x3a2   : > { %8989 = vst [vmem:[#allocation14_spill] sm:$0xff] %v8533_v6  ;;  %v4421_v30 = vpop.f32.mrb[50].mxu0  ;;  %v3973_v13 = vpop.f32.mrb[115].mxu1 }
 0x3a3   : > { %v8536_v45 = vadd.f32 %v4421_v30, %v8361_v43  ;;  %v4423_v0 = vpop.f32.mrb[51].mxu0 }
 0x3a7   : > { %v8538_v16 = vpop.f32.mrb[116].mxu1 }
 0x3a8   : > { %8990 = vst [vmem:[#allocation15_spill] sm:$0xff] %v8538_v16  ;;  %v4426_v2 = vpop.f32.mrb[52].mxu0  ;;  %v3978_v19 = vpop.f32.mrb[117].mxu1 }
 0x3a9   : > { %v8541_v49 = vadd.f32 %v4426_v2, %v8366_v48  ;;  %v4428_v9 = vpop.f32.mrb[53].mxu0  ;;  %v8543_v15 = vpop.f32.mrb[118].mxu1 }
 0x3aa   : > { %8991 = vst [vmem:[#allocation16_spill] sm:$0xff] %v8543_v15  ;;  %v4429_v39 = vpop.f32.mrb[54].mxu0  ;;  %v3981_v24 = vpop.f32.mrb[119].mxu1 }
 0x3ab   : > { %v8546_v60 = vadd.f32 %v4429_v39, %v8369_v54  ;;  %v4431_v13 = vpop.f32.mrb[55].mxu0 }
 0x3af   : > { %v8548_v6 = vpop.f32.mrb[120].mxu1 }
 0x3b0   : > { %8992 = vst [vmem:[#allocation17_spill] sm:$0xff] %v8548_v6  ;;  %v4434_v43 = vpop.f32.mrb[56].mxu0  ;;  %v3986_v30 = vpop.f32.mrb[121].mxu1 }
 0x3b1   : > { %v8551_v0 = vadd.f32 %v4434_v43, %v8374_v62  ;;  %v4436_v19 = vpop.f32.mrb[57].mxu0  ;;  %v8553_v16 = vpop.f32.mrb[122].mxu1 }
 0x3b2   : > { %8993 = vst [vmem:[#allocation18_spill] sm:$0xff] %v8553_v16  ;;  %v4437_v48 = vpop.f32.mrb[58].mxu0  ;;  %v3989_v2 = vpop.f32.mrb[123].mxu1  ;;  %v991_v16 = vld [vmem:[#allocation2 + $0x10] sm:$0xff] }
 0x3b3   : > { %v8556_v9 = vadd.f32 %v4437_v48, %v8377_v4  ;;  %v4439_v24 = vpop.f32.mrb[59].mxu0 }
 0x3b5   : > { %8994 = vst [vmem:[#allocation19_spill] sm:$0xff] %v8556_v9 }
 0x3b7   : > { %v8558_v15 = vpop.f32.mrb[124].mxu1 }
 0x3b8   : > { %8995 = vst [vmem:[#allocation20_spill] sm:$0xff] %v8558_v15  ;;  %v4442_v54 = vpop.f32.mrb[60].mxu0  ;;  %v3994_v39 = vpop.f32.mrb[125].mxu1  ;;  %v989_v15 = vld [vmem:[#allocation2] sm:$0xff] }
 0x3b9   : > { %v8561_v13 = vadd.f32 %v4442_v54, %v8382_v14  ;;  %v4444_v30 = vpop.f32.mrb[61].mxu0  ;;  %v8563_v6 = vpop.f32.mrb[126].mxu1 }
 0x3ba   : > { %8996 = vst [vmem:[#allocation21_spill] sm:$0xff] %v8563_v6  ;;  %v4445_v62 = vpop.f32.mrb[62].mxu0  ;;  %v3997_v43 = vpop.f32.mrb[127].mxu1  ;;  %v992_v30 = vld [vmem:[#allocation2 + $0x18] sm:$0xff] }
 0x3bb   : > { %v8566_v19 = vadd.f32 %v4445_v62, %v8385_v18  ;;  %v4447_v2 = vpop.f32.mrb[63].mxu0  ;;  %v990_v62 = vld [vmem:[#allocation2 + $0x8] sm:$0xff] }
 0x3bf   : > { %v5937_v4 = vpop.f32.mrb[128].mxu1 }
 0x3c0   : > { %v4450_v48 = vpop.f32.mrb[64].mxu0  ;;  %v4620_v24 = vadd.f32 %v8408_v56, %v5937_v4  ;;  %v4611_v28 = vpop.f32.mrb[129].mxu1 }
 0x3c1   : > { %v8570_v39 = vadd.f32 %v4450_v48, %v8390_v27  ;;  %v4452_v14 = vpop.f32.mrb[65].mxu0  ;;  %v4612_v54 = vadd.f32 %v8394_v34, %v4611_v28  ;;  %v5938_v6 = vpop.f32.mrb[130].mxu1  ;;  %v995_v34 = vld [vmem:[#allocation2 + $0x30] sm:$0xff] }
 0x3c2   : > { %v4868_v43 = vadd.f32 %v4620_v24, %v991_v16  ;;  %v4453_v23 = vpop.f32.mrb[66].mxu0  ;;  %v4623_v18 = vadd.f32 %v8416_v10, %v5938_v6  ;;  %v4614_v2 = vpop.f32.mrb[131].mxu1  ;;  %v993_v6 = vld [vmem:[#allocation2 + $0x20] sm:$0xff] }
 0x3c3   : > { %v4866_v9 = vadd.f32 %v4612_v54, %v989_v15  ;;  %v8575_v42 = vadd.f32 %v4453_v23, %v8396_v36  ;;  %v4455_v56 = vpop.f32.mrb[67].mxu0  ;;  %v4615_v4 = vadd.f32 %v8402_v46, %v4614_v2  ;;  %v996_v46 = vld [vmem:[#allocation2 + $0x38] sm:$0xff] }
 0x3c4   : > { %4932 = vst [vmem:[#allocation2 + $0x10] sm:$0xff] %v4868_v43  ;;  %v4869_v27 = vadd.f32 %v4623_v18, %v992_v30  ;;  %v994_v43 = vld [vmem:[#allocation2 + $0x28] sm:$0xff] }
 0x3c5   : > { %4930 = vst [vmem:[#allocation2] sm:$0xff] %v4866_v9  ;;  %v4867_v48 = vadd.f32 %v4615_v4, %v990_v62 }
 0x3c6   : > { %4933 = vst [vmem:[#allocation2 + $0x18] sm:$0xff] %v4869_v27 }
 0x3c7   : > { %4931 = vst [vmem:[#allocation2 + $0x8] sm:$0xff] %v4867_v48  ;;  %v5941_v28 = vpop.f32.mrb[132].mxu1 }
 0x3c8   : > { %v4458_v16 = vpop.f32.mrb[68].mxu0  ;;  %v4636_v10 = vadd.f32 %v8436_v47, %v5941_v28  ;;  %v4627_v24 = vpop.f32.mrb[133].mxu1 }
 0x3c9   : > { %v8580_v15 = vadd.f32 %v4458_v16, %v8404_v50  ;;  %v4460_v36 = vpop.f32.mrb[69].mxu0  ;;  %v4628_v23 = vadd.f32 %v8422_v22, %v4627_v24  ;;  %v5942_v14 = vpop.f32.mrb[134].mxu1  ;;  %v999_v22 = vld [vmem:[#allocation2 + $0x50] sm:$0xff] }
 0x3ca   : > { %v4872_v54 = vadd.f32 %v4636_v10, %v995_v34  ;;  %v4461_v9 = vpop.f32.mrb[70].mxu0  ;;  %v4639_v30 = vadd.f32 %v8444_v1, %v5942_v14  ;;  %v4630_v18 = vpop.f32.mrb[135].mxu1  ;;  %v997_v34 = vld [vmem:[#allocation2 + $0x40] sm:$0xff] }
 0x3cb   : > { %v4870_v62 = vadd.f32 %v4628_v23, %v993_v6  ;;  %v8585_v2 = vadd.f32 %v4461_v9, %v8410_v59  ;;  %v4463_v47 = vpop.f32.mrb[71].mxu0  ;;  %v4631_v56 = vadd.f32 %v8430_v38, %v4630_v18  ;;  %v1000_v38 = vld [vmem:[#allocation2 + $0x58] sm:$0xff] }
 0x3cc   : > { %4936 = vst [vmem:[#allocation2 + $0x30] sm:$0xff] %v4872_v54  ;;  %v4873_v50 = vadd.f32 %v4639_v30, %v996_v46  ;;  %v998_v46 = vld [vmem:[#allocation2 + $0x48] sm:$0xff]  ;;  %v1001_v47 = vld [vmem:[#allocation2 + $0x60] sm:$0xff] }
 0x3cd   : > { %4934 = vst [vmem:[#allocation2 + $0x20] sm:$0xff] %v4870_v62  ;;  %v4871_v4 = vadd.f32 %v4631_v56, %v994_v43 }
 0x3ce   : > { %4937 = vst [vmem:[#allocation2 + $0x38] sm:$0xff] %v4873_v50 }
 0x3cf   : > { %4935 = vst [vmem:[#allocation2 + $0x28] sm:$0xff] %v4871_v4  ;;  %v5945_v27 = vpop.f32.mrb[136].mxu1 }
 0x3d0   : > { %v4466_v48 = vpop.f32.mrb[72].mxu0  ;;  %v4652_v1 = vadd.f32 %v8461_v44, %v5945_v27  ;;  %v4643_v28 = vpop.f32.mrb[137].mxu1 }
 0x3d1   : > { %v8590_v16 = vadd.f32 %v4466_v48, %v8418_v58  ;;  %v4468_v59 = vpop.f32.mrb[73].mxu0  ;;  %v4644_v10 = vadd.f32 %v8450_v17, %v4643_v28  ;;  %v5946_v6 = vpop.f32.mrb[138].mxu1  ;;  %v1003_v17 = vld [vmem:[#allocation2 + $0x70] sm:$0xff] }
 0x3d2   : > { %v4876_v24 = vadd.f32 %v4652_v1, %v999_v22  ;;  %v4469_v36 = vpop.f32.mrb[74].mxu0  ;;  %v4655_v23 = vadd.f32 %v8466_v55, %v5946_v6  ;;  %v4646_v14 = vpop.f32.mrb[139].mxu1 }
 0x3d3   : > { %v4874_v54 = vadd.f32 %v4644_v10, %v997_v34  ;;  %v8595_v9 = vadd.f32 %v4469_v36, %v8424_v26  ;;  %v4471_v44 = vpop.f32.mrb[75].mxu0  ;;  %v4647_v30 = vadd.f32 %v8456_v32, %v4646_v14  ;;  %v1004_v32 = vld [vmem:[#allocation2 + $0x78] sm:$0xff]  ;;  %v1002_v34 = vld [vmem:[#allocation2 + $0x68] sm:$0xff] }
 0x3d4   : > { %4940 = vst [vmem:[#allocation2 + $0x50] sm:$0xff] %v4876_v24  ;;  %v4877_v58 = vadd.f32 %v4655_v23, %v1000_v38  ;;  %v1005_v23 = vld [vmem:[#allocation2 + $0x80] sm:$0xff] }
 0x3d5   : > { %4938 = vst [vmem:[#allocation2 + $0x40] sm:$0xff] %v4874_v54  ;;  %v4875_v43 = vadd.f32 %v4647_v30, %v998_v46 }
 0x3d6   : > { %4941 = vst [vmem:[#allocation2 + $0x58] sm:$0xff] %v4877_v58 }
 0x3d7   : > { %4939 = vst [vmem:[#allocation2 + $0x48] sm:$0xff] %v4875_v43  ;;  %v5949_v18 = vpop.f32.mrb[140].mxu1 }
 0x3d8   : > { %v4474_v62 = vpop.f32.mrb[76].mxu0  ;;  %v4668_v55 = vadd.f32 %v8481_v33, %v5949_v18  ;;  %v4659_v56 = vpop.f32.mrb[141].mxu1 }
 0x3d9   : > { %v8600_v50 = vadd.f32 %v4474_v62, %v8432_v3  ;;  %v4476_v26 = vpop.f32.mrb[77].mxu0  ;;  %v4660_v4 = vadd.f32 %v8471_v5, %v4659_v56  ;;  %v5950_v22 = vpop.f32.mrb[142].mxu1  ;;  %v1007_v5 = vld [vmem:[#allocation2 + $0x90] sm:$0xff] }
 0x3da   : > { %v4880_v27 = vadd.f32 %v4668_v55, %v1003_v17  ;;  %v4477_v48 = vpop.f32.mrb[78].mxu0  ;;  %v4671_v1 = vadd.f32 %v8486_v51, %v5950_v22  ;;  %v4662_v28 = vpop.f32.mrb[143].mxu1  ;;  %v1006_v17 = vld [vmem:[#allocation2 + $0x88] sm:$0xff] }
 0x3db   : > { %v4878_v59 = vadd.f32 %v4660_v4, %v1001_v47  ;;  %v8605_v10 = vadd.f32 %v4477_v48, %v8438_v52  ;;  %v4479_v33 = vpop.f32.mrb[79].mxu0  ;;  %v4663_v38 = vadd.f32 %v8476_v21, %v4662_v28  ;;  %v1008_v21 = vld [vmem:[#allocation2 + $0x98] sm:$0xff] }
 0x3dc   : > { %4944 = vst [vmem:[#allocation2 + $0x70] sm:$0xff] %v4880_v27  ;;  %v4881_v3 = vadd.f32 %v4671_v1, %v1004_v32  ;;  %v1009_v32 = vld [vmem:[#allocation2 + $0xa0] sm:$0xff]  ;;  %v1010_v33 = vld [vmem:[#allocation2 + $0xa8] sm:$0xff] }
 0x3dd   : > { %4942 = vst [vmem:[#allocation2 + $0x60] sm:$0xff] %v4878_v59  ;;  %v4879_v6 = vadd.f32 %v4663_v38, %v1002_v34 }
 0x3de   : > { %4945 = vst [vmem:[#allocation2 + $0x78] sm:$0xff] %v4881_v3 }
 0x3df   : > { %4943 = vst [vmem:[#allocation2 + $0x68] sm:$0xff] %v4879_v6  ;;  %v5953_v24 = vpop.f32.mrb[144].mxu1 }
 0x3e0   : > { %v4482_v36 = vpop.f32.mrb[80].mxu0  ;;  %v4684_v51 = vadd.f32 %v8501_v37, %v5953_v24  ;;  %v4675_v46 = vpop.f32.mrb[145].mxu1 }
 0x3e1   : > { %v8610_v14 = vadd.f32 %v4482_v36, %v8446_v12  ;;  %v4484_v52 = vpop.f32.mrb[81].mxu0  ;;  %v4676_v54 = vadd.f32 %v8491_v63, %v4675_v46  ;;  %v5954_v44 = vpop.f32.mrb[146].mxu1  ;;  %v1011_v63 = vld [vmem:[#allocation2 + $0xb0] sm:$0xff] }
 0x3e2   : > { %v4884_v30 = vadd.f32 %v4684_v51, %v1007_v5  ;;  %v4485_v58 = vpop.f32.mrb[82].mxu0  ;;  %v4687_v43 = vadd.f32 %v8506_v53, %v5954_v44  ;;  %v4678_v18 = vpop.f32.mrb[147].mxu1 }
 0x3e3   : > { %v4882_v62 = vadd.f32 %v4676_v54, %v1005_v23  ;;  %v8615_v55 = vadd.f32 %v4485_v58, %v8452_v25  ;;  %v4487_v37 = vpop.f32.mrb[83].mxu0  ;;  %v4679_v47 = vadd.f32 %v8496_v61, %v4678_v18  ;;  %v1012_v61 = vld [vmem:[#allocation2 + $0xb8] sm:$0xff]  ;;  %v1013_v23 = vld [vmem:[#allocation2 + $0xc0] sm:$0xff] }
 0x3e4   : > { %4948 = vst [vmem:[#allocation2 + $0x90] sm:$0xff] %v4884_v30  ;;  %v4885_v12 = vadd.f32 %v4687_v43, %v1008_v21  ;;  %v1014_v43 = vld [vmem:[#allocation2 + $0xc8] sm:$0xff] }
 0x3e5   : > { %4946 = vst [vmem:[#allocation2 + $0x80] sm:$0xff] %v4882_v62  ;;  %v4883_v56 = vadd.f32 %v4679_v47, %v1006_v17 }
 0x3e6   : > { %4949 = vst [vmem:[#allocation2 + $0x98] sm:$0xff] %v4885_v12 }
 0x3e7   : > { %4947 = vst [vmem:[#allocation2 + $0x88] sm:$0xff] %v4883_v56  ;;  %v5957_v26 = vpop.f32.mrb[148].mxu1 }
 0x3e8   : > { %v4490_v4 = vpop.f32.mrb[84].mxu0  ;;  %v4700_v53 = vadd.f32 %v8521_v8, %v5957_v26  ;;  %v4691_v22 = vpop.f32.mrb[149].mxu1 }
 0x3e9   : > { %v8620_v27 = vadd.f32 %v4490_v4, %v8458_v35  ;;  %v4492_v25 = vpop.f32.mrb[85].mxu0  ;;  %v4692_v48 = vadd.f32 %v8511_v31, %v4691_v22  ;;  %v5958_v1 = vpop.f32.mrb[150].mxu1  ;;  %v1015_v31 = vld [vmem:[#allocation2 + $0xd0] sm:$0xff] }
 0x3ea   : > { %v4888_v34 = vadd.f32 %v4700_v53, %v1011_v63  ;;  %v4493_v28 = vpop.f32.mrb[86].mxu0  ;;  %v4703_v59 = vadd.f32 %v8526_v41, %v5958_v1  ;;  %v4694_v38 = vpop.f32.mrb[151].mxu1  ;;  %v1017_v63 = vld [vmem:[#allocation2 + $0xe0] sm:$0xff] }
 0x3eb   : > { %v4886_v3 = vadd.f32 %v4692_v48, %v1009_v32  ;;  %v8625_v6 = vadd.f32 %v4493_v28, %v8463_v7  ;;  %v4495_v8 = vpop.f32.mrb[87].mxu0  ;;  %v4695_v5 = vadd.f32 %v8516_v20, %v4694_v38  ;;  %v1016_v20 = vld [vmem:[#allocation2 + $0xd8] sm:$0xff]  ;;  %v8997_v28 = vld [vmem:[#allocation4_spill] sm:$0xff] }
 0x3ec   : > { %4952 = vst [vmem:[#allocation2 + $0xb0] sm:$0xff] %v4888_v34  ;;  %v4889_v35 = vadd.f32 %v4703_v59, %v1012_v61  ;;  %v1018_v61 = vld [vmem:[#allocation2 + $0xe8] sm:$0xff] }
 0x3ed   : > { %4950 = vst [vmem:[#allocation2 + $0xa0] sm:$0xff] %v4886_v3  ;;  %v4887_v24 = vadd.f32 %v4695_v5, %v1010_v33  ;;  %v8998_v33 = vld [vmem:[#allocation19_spill] sm:$0xff] }
 0x3ee   : > { %4953 = vst [vmem:[#allocation2 + $0xb8] sm:$0xff] %v4889_v35  ;;  %v1021_v35 = vld [vmem:[#allocation2 + $0x100] sm:$0xff] }
 0x3ef   : > { %4951 = vst [vmem:[#allocation2 + $0xa8] sm:$0xff] %v4887_v24  ;;  %v5961_v36 = vpop.f32.mrb[152].mxu1 }
 0x3f0   : > { %v4498_v51 = vpop.f32.mrb[88].mxu0  ;;  %v4716_v41 = vadd.f32 %v8541_v49, %v5961_v36  ;;  %v4707_v46 = vpop.f32.mrb[153].mxu1 }
 0x3f1   : > { %v8630_v52 = vadd.f32 %v4498_v51, %v8468_v57  ;;  %v4500_v7 = vpop.f32.mrb[89].mxu0  ;;  %v4708_v54 = vadd.f32 %v8531_v40, %v4707_v46  ;;  %v5962_v21 = vpop.f32.mrb[154].mxu1  ;;  %v1019_v40 = vld [vmem:[#allocation2 + $0xf0] sm:$0xff] }
 0x3f2   : > { %v4892_v44 = vadd.f32 %v4716_v41, %v1015_v31  ;;  %v4501_v30 = vpop.f32.mrb[90].mxu0  ;;  %v4719_v58 = vadd.f32 %v8546_v60, %v5962_v21  ;;  %v4710_v17 = vpop.f32.mrb[155].mxu1  ;;  %v8999_v31 = vld [vmem:[#allocation5_spill] sm:$0xff] }
 0x3f3   : > { %v4890_v18 = vadd.f32 %v4708_v54, %v1013_v23  ;;  %v8635_v62 = vadd.f32 %v4501_v30, %v8473_v11  ;;  %v4503_v49 = vpop.f32.mrb[91].mxu0  ;;  %v4711_v37 = vadd.f32 %v8536_v45, %v4710_v17  ;;  %v1020_v45 = vld [vmem:[#allocation2 + $0xf8] sm:$0xff]  ;;  %v1022_v21 = vld [vmem:[#allocation2 + $0x108] sm:$0xff] }
 0x3f4   : > { %4956 = vst [vmem:[#allocation2 + $0xd0] sm:$0xff] %v4892_v44  ;;  %v4893_v57 = vadd.f32 %v4719_v58, %v1016_v20  ;;  %v1024_v23 = vld [vmem:[#allocation2 + $0x118] sm:$0xff]  ;;  %v9000_v58 = vld [vmem:[#allocation6_spill] sm:$0xff] }
 0x3f5   : > { %4954 = vst [vmem:[#allocation2 + $0xc0] sm:$0xff] %v4890_v18  ;;  %v4891_v47 = vadd.f32 %v4711_v37, %v1014_v43 }
 0x3f6   : > { %4957 = vst [vmem:[#allocation2 + $0xd8] sm:$0xff] %v4893_v57 }
 0x3f7   : > { %4955 = vst [vmem:[#allocation2 + $0xc8] sm:$0xff] %v4891_v47  ;;  %v5965_v12 = vpop.f32.mrb[156].mxu1  ;;  %v1025_v47 = vld [vmem:[#allocation2 + $0x120] sm:$0xff] }
 0x3f8   : > { %v4506_v56 = vpop.f32.mrb[92].mxu0  ;;  %v4732_v60 = vadd.f32 %v8561_v13, %v5965_v12  ;;  %v4723_v26 = vpop.f32.mrb[157].mxu1  ;;  %v9001_v12 = vld [vmem:[#allocation7_spill] sm:$0xff] }
 0x3f9   : > { %v8640_v4 = vadd.f32 %v4506_v56, %v8478_v29  ;;  %v4508_v11 = vpop.f32.mrb[93].mxu0  ;;  %v4724_v53 = vadd.f32 %v8551_v0, %v4723_v26  ;;  %v5966_v32 = vpop.f32.mrb[158].mxu1  ;;  %v1023_v0 = vld [vmem:[#allocation2 + $0x110] sm:$0xff] }
 0x3fa   : > { %v4896_v22 = vadd.f32 %v4732_v60, %v1019_v40  ;;  %v4509_v25 = vpop.f32.mrb[94].mxu0  ;;  %v4735_v48 = vadd.f32 %v8566_v19, %v5966_v32  ;;  %v4726_v1 = vpop.f32.mrb[159].mxu1  ;;  %v1026_v32 = vld [vmem:[#allocation2 + $0x128] sm:$0xff] }
 0x3fb   : > { %v4894_v34 = vadd.f32 %v4724_v53, %v1017_v63  ;;  %v8645_v59 = vadd.f32 %v4509_v25, %v8997_v28  ;;  %v4511_v13 = vpop.f32.mrb[95].mxu0  ;;  %v4727_v38 = vadd.f32 %v8998_v33, %v4726_v1 }
 0x3fc   : > { %4960 = vst [vmem:[#allocation2 + $0xf0] sm:$0xff] %v4896_v22  ;;  %v4897_v29 = vadd.f32 %v4735_v48, %v1020_v45  ;;  %v9002_v48 = vld [vmem:[#allocation8_spill] sm:$0xff] }
 0x3fd   : > { %4958 = vst [vmem:[#allocation2 + $0xe0] sm:$0xff] %v4894_v34  ;;  %v4895_v3 = vadd.f32 %v4727_v38, %v1018_v61  ;;  %v1029_v38 = vld [vmem:[#allocation2 + $0x140] sm:$0xff] }
 0x3fe   : > { %4961 = vst [vmem:[#allocation2 + $0xf8] sm:$0xff] %v4897_v29 }
 0x3ff   : > { %4959 = vst [vmem:[#allocation2 + $0xe8] sm:$0xff] %v4895_v3  ;;  %v5969_v8 = vpop.f32.mrb[160].mxu1  ;;  %v9003_v3 = vld [vmem:[#allocation9_spill] sm:$0xff] }
 0x400   : > { %v4514_v5 = vpop.f32.mrb[96].mxu0  ;;  %v4748_v19 = vadd.f32 %v8580_v15, %v5969_v8  ;;  %v4739_v24 = vpop.f32.mrb[161].mxu1 }
 0x401   : > { %v8650_v36 = vadd.f32 %v4514_v5, %v8999_v31  ;;  %v4516_v51 = vpop.f32.mrb[97].mxu0  ;;  %v4740_v41 = vadd.f32 %v8570_v39, %v4739_v24  ;;  %v5970_v46 = vpop.f32.mrb[162].mxu1  ;;  %v1027_v39 = vld [vmem:[#allocation2 + $0x130] sm:$0xff] }
 0x402   : > { %v4900_v7 = vadd.f32 %v4748_v19, %v1023_v0  ;;  %v4517_v54 = vpop.f32.mrb[98].mxu0  ;;  %v4751_v20 = vadd.f32 %v8585_v2, %v5970_v46  ;;  %v4742_v44 = vpop.f32.mrb[163].mxu1  ;;  %v1030_v51 = vld [vmem:[#allocation2 + $0x148] sm:$0xff]  ;;  %v9004_v46 = vld [vmem:[#allocation10_spill] sm:$0xff] }
 0x403   : > { %v4898_v30 = vadd.f32 %v4740_v41, %v1021_v35  ;;  %v8655_v43 = vadd.f32 %v4517_v54, %v9000_v58  ;;  %v4519_v15 = vpop.f32.mrb[99].mxu0  ;;  %v4743_v17 = vadd.f32 %v8575_v42, %v4742_v44  ;;  %v1028_v42 = vld [vmem:[#allocation2 + $0x138] sm:$0xff]  ;;  %v1033_v58 = vld [vmem:[#allocation2 + $0x160] sm:$0xff] }
 0x404   : > { %4964 = vst [vmem:[#allocation2 + $0x110] sm:$0xff] %v4900_v7  ;;  %v4901_v18 = vadd.f32 %v4751_v20, %v1024_v23 }
 0x405   : > { %4962 = vst [vmem:[#allocation2 + $0x100] sm:$0xff] %v4898_v30  ;;  %v4899_v49 = vadd.f32 %v4743_v17, %v1022_v21  ;;  %v9005_v17 = vld [vmem:[#allocation11_spill] sm:$0xff] }
 0x406   : > { %4965 = vst [vmem:[#allocation2 + $0x118] sm:$0xff] %v4901_v18 }
 0x407   : > { %4963 = vst [vmem:[#allocation2 + $0x108] sm:$0xff] %v4899_v49  ;;  %v5973_v37 = vpop.f32.mrb[164].mxu1 }
 0x408   : > { %v4522_v57 = vpop.f32.mrb[100].mxu0  ;;  %v4764_v2 = vadd.f32 %v8600_v50, %v5973_v37  ;;  %v4755_v40 = vpop.f32.mrb[165].mxu1  ;;  %v1036_v37 = vld [vmem:[#allocation2 + $0x178] sm:$0xff] }
 0x409   : > { %v8660_v56 = vadd.f32 %v4522_v57, %v9001_v12  ;;  %v4524_v60 = vpop.f32.mrb[101].mxu0  ;;  %v4756_v63 = vadd.f32 %v8590_v16, %v4755_v40  ;;  %v5974_v26 = vpop.f32.mrb[166].mxu1  ;;  %v1031_v16 = vld [vmem:[#allocation2 + $0x150] sm:$0xff]  ;;  %v1034_v40 = vld [vmem:[#allocation2 + $0x168] sm:$0xff] }
 0x40a   : > { %v4904_v11 = vadd.f32 %v4764_v2, %v1027_v39  ;;  %v4525_v53 = vpop.f32.mrb[102].mxu0  ;;  %v4767_v45 = vadd.f32 %v8605_v10, %v5974_v26  ;;  %v4758_v22 = vpop.f32.mrb[167].mxu1 }
 0x40b   : > { %v4902_v25 = vadd.f32 %v4756_v63, %v1025_v47  ;;  %v8665_v61 = vadd.f32 %v4525_v53, %v9002_v48  ;;  %v4527_v50 = vpop.f32.mrb[103].mxu0  ;;  %v4759_v1 = vadd.f32 %v8595_v9, %v4758_v22  ;;  %v1032_v9 = vld [vmem:[#allocation2 + $0x158] sm:$0xff]  ;;  %v9006_v63 = vld [vmem:[#allocation12_spill] sm:$0xff]  ;;  %v9007_v48 = vld [vmem:[#allocation13_spill] sm:$0xff] }
 0x40c   : > { %4968 = vst [vmem:[#allocation2 + $0x130] sm:$0xff] %v4904_v11  ;;  %v4905_v34 = vadd.f32 %v4767_v45, %v1028_v42 }
 0x40d   : > { %4966 = vst [vmem:[#allocation2 + $0x120] sm:$0xff] %v4902_v25  ;;  %v4903_v28 = vadd.f32 %v4759_v1, %v1026_v32 }
 0x40e   : > { %4969 = vst [vmem:[#allocation2 + $0x138] sm:$0xff] %v4905_v34 }
 0x40f   : > { %4967 = vst [vmem:[#allocation2 + $0x128] sm:$0xff] %v4903_v28  ;;  %v5977_v13 = vpop.f32.mrb[168].mxu1  ;;  %v1040_v28 = vld [vmem:[#allocation2 + $0x198] sm:$0xff] }
 0x410   : > { %v4530_v33 = vpop.f32.mrb[104].mxu0  ;;  %v4780_v10 = vadd.f32 %v8620_v27, %v5977_v13  ;;  %v4771_v29 = vpop.f32.mrb[169].mxu1 }
 0x411   : > { %v8670_v0 = vadd.f32 %v4530_v33, %v9003_v3  ;;  %v4532_v8 = vpop.f32.mrb[105].mxu0  ;;  %v4772_v5 = vadd.f32 %v8610_v14, %v4771_v29  ;;  %v5978_v19 = vpop.f32.mrb[170].mxu1  ;;  %v1035_v14 = vld [vmem:[#allocation2 + $0x170] sm:$0xff] }
 0x412   : > { %v4908_v35 = vadd.f32 %v4780_v10, %v1031_v16  ;;  %v4533_v24 = vpop.f32.mrb[106].mxu0  ;;  %v4783_v31 = vadd.f32 %v8625_v6, %v5978_v19  ;;  %v4774_v41 = vpop.f32.mrb[171].mxu1  ;;  %v1038_v10 = vld [vmem:[#allocation2 + $0x188] sm:$0xff]  ;;  %v9008_v3 = vld [vmem:[#allocation14_spill] sm:$0xff] }
 0x413   : > { %v4906_v23 = vadd.f32 %v4772_v5, %v1029_v38  ;;  %v8675_v7 = vadd.f32 %v4533_v24, %v9004_v46  ;;  %v4535_v27 = vpop.f32.mrb[107].mxu0  ;;  %v4775_v54 = vadd.f32 %v8615_v55, %v4774_v41  ;;  %v9009_v41 = vld [vmem:[#allocation15_spill] sm:$0xff] }
 0x414   : > { %4972 = vst [vmem:[#allocation2 + $0x150] sm:$0xff] %v4908_v35  ;;  %v4909_v20 = vadd.f32 %v4783_v31, %v1032_v9 }
 0x415   : > { %4970 = vst [vmem:[#allocation2 + $0x140] sm:$0xff] %v4906_v23  ;;  %v4907_v21 = vadd.f32 %v4775_v54, %v1030_v51  ;;  %v1041_v51 = vld [vmem:[#allocation2 + $0x1a0] sm:$0xff]  ;;  %v1044_v54 = vld [vmem:[#allocation2 + $0x1b8] sm:$0xff] }
 0x416   : > { %4973 = vst [vmem:[#allocation2 + $0x158] sm:$0xff] %v4909_v20 }
 0x417   : > { %4971 = vst [vmem:[#allocation2 + $0x148] sm:$0xff] %v4907_v21  ;;  %v5981_v44 = vpop.f32.mrb[172].mxu1 }
 0x418   : > { %v4538_v30 = vpop.f32.mrb[108].mxu0  ;;  %v4796_v6 = vadd.f32 %v8640_v4, %v5981_v44  ;;  %v4787_v15 = vpop.f32.mrb[173].mxu1  ;;  %v1042_v44 = vld [vmem:[#allocation2 + $0x1a8] sm:$0xff] }
 0x419   : > { %v6085_v18 = vadd.f32 %v4538_v30, %v9005_v17  ;;  %v4540_v49 = vpop.f32.mrb[109].mxu0  ;;  %v4788_v39 = vadd.f32 %v8630_v52, %v4787_v15  ;;  %v5982_v55 = vpop.f32.mrb[174].mxu1  ;;  %v1039_v52 = vld [vmem:[#allocation2 + $0x190] sm:$0xff] }
 0x41a   : > { %v4912_v57 = vadd.f32 %v4796_v6, %v1035_v14  ;;  %v4541_v2 = vpop.f32.mrb[110].mxu0  ;;  %v4799_v47 = vadd.f32 %v8645_v59, %v5982_v55  ;;  %v4790_v12 = vpop.f32.mrb[175].mxu1  ;;  %v1037_v59 = vld [vmem:[#allocation2 + $0x180] sm:$0xff] }
 0x41b   : > { %v4910_v60 = vadd.f32 %v4788_v39, %v1033_v58  ;;  %v6086_v42 = vadd.f32 %v4541_v2, %v9006_v63  ;;  %v4543_v26 = vpop.f32.mrb[111].mxu0  ;;  %v4791_v4 = vadd.f32 %v8635_v62, %v4790_v12  ;;  %v9010_v58 = vld [vmem:[#allocation16_spill] sm:$0xff] }
 0x41c   : > { %4976 = vst [vmem:[#allocation2 + $0x170] sm:$0xff] %v4912_v57  ;;  %v4913_v11 = vadd.f32 %v4799_v47, %v1036_v37  ;;  %v1045_v2 = vld [vmem:[#allocation2 + $0x1c0] sm:$0xff] }
 0x41d   : > { %4974 = vst [vmem:[#allocation2 + $0x160] sm:$0xff] %v4910_v60  ;;  %v4911_v53 = vadd.f32 %v4791_v4, %v1034_v40  ;;  %v9011_v40 = vld [vmem:[#allocation17_spill] sm:$0xff] }
 0x41e   : > { %4977 = vst [vmem:[#allocation2 + $0x178] sm:$0xff] %v4913_v11 }
 0x41f   : > { %4975 = vst [vmem:[#allocation2 + $0x168] sm:$0xff] %v4911_v53  ;;  %v5985_v45 = vpop.f32.mrb[176].mxu1  ;;  %v1046_v53 = vld [vmem:[#allocation2 + $0x1c8] sm:$0xff] }
 0x420   : > { %v4546_v32 = vpop.f32.mrb[112].mxu0  ;;  %v4812_v22 = vadd.f32 %v8660_v56, %v5985_v45  ;;  %v4803_v25 = vpop.f32.mrb[177].mxu1 }
 0x421   : > { %v6087_v50 = vadd.f32 %v4546_v32, %v9007_v48  ;;  %v4548_v1 = vpop.f32.mrb[113].mxu0  ;;  %v4804_v34 = vadd.f32 %v8650_v36, %v4803_v25  ;;  %v5986_v62 = vpop.f32.mrb[178].mxu1  ;;  %v1043_v36 = vld [vmem:[#allocation2 + $0x1b0] sm:$0xff] }
 0x422   : > { %v4916_v16 = vadd.f32 %v4812_v22, %v1039_v52  ;;  %v4549_v13 = vpop.f32.mrb[114].mxu0  ;;  %v4815_v33 = vadd.f32 %v8665_v61, %v5986_v62  ;;  %v4806_v38 = vpop.f32.mrb[179].mxu1  ;;  %v9012_v32 = vld [vmem:[#allocation18_spill] sm:$0xff] }
 0x423   : > { %v4914_v29 = vadd.f32 %v4804_v34, %v1037_v59  ;;  %v6088_v8 = vadd.f32 %v4549_v13, %v9008_v3  ;;  %v4551_v5 = vpop.f32.mrb[115].mxu0  ;;  %v4807_v56 = vadd.f32 %v8655_v43, %v4806_v38 }
 0x424   : > { %4980 = vst [vmem:[#allocation2 + $0x190] sm:$0xff] %v4916_v16  ;;  %v4917_v9 = vadd.f32 %v4815_v33, %v1040_v28  ;;  %v1049_v28 = vld [vmem:[#allocation2 + $0x1e0] sm:$0xff]  ;;  %v1050_v5 = vld [vmem:[#allocation2 + $0x1e8] sm:$0xff] }
 0x425   : > { %4978 = vst [vmem:[#allocation2 + $0x180] sm:$0xff] %v4914_v29  ;;  %v4915_v19 = vadd.f32 %v4807_v56, %v1038_v10  ;;  %v9013_v16 = vld [vmem:[#allocation20_spill] sm:$0xff]  ;;  %v1051_v29 = vld [vmem:[#allocation2 + $0x1f0] sm:$0xff] }
 0x426   : > { %4981 = vst [vmem:[#allocation2 + $0x198] sm:$0xff] %v4917_v9 }
 0x427   : > { %4979 = vst [vmem:[#allocation2 + $0x188] sm:$0xff] %v4915_v19  ;;  %v5989_v35 = vpop.f32.mrb[180].mxu1  ;;  %v9014_v19 = vld [vmem:[#allocation21_spill] sm:$0xff] }
 0x428   : > { %v4554_v24 = vpop.f32.mrb[116].mxu0  ;;  %v4828_v31 = vadd.f32 %v6085_v18, %v5989_v35  ;;  %v4819_v61 = vpop.f32.mrb[181].mxu1 }
 0x429   : > { %v6089_v23 = vadd.f32 %v4554_v24, %v9009_v41  ;;  %v4556_v46 = vpop.f32.mrb[117].mxu0  ;;  %v4820_v27 = vadd.f32 %v8670_v0, %v4819_v61  ;;  %v5990_v20 = vpop.f32.mrb[182].mxu1  ;;  %v1047_v0 = vld [vmem:[#allocation2 + $0x1d0] sm:$0xff] }
 0x42a   : > { %v4920_v43 = vadd.f32 %v4828_v31, %v1043_v36  ;;  %v4557_v21 = vpop.f32.mrb[118].mxu0  ;;  %v4831_v14 = vadd.f32 %v6086_v42, %v5990_v20  ;;  %v4822_v30 = vpop.f32.mrb[183].mxu1  ;;  %v1048_v42 = vld [vmem:[#allocation2 + $0x1d8] sm:$0xff]  ;;  %v4998_v46 = vld [vmem:[#allocation2] sm:$0xff] (!%p5872_p11) }
 0x42b   : > { %v4918_v6 = vadd.f32 %v4820_v27, %v1041_v51  ;;  %v6090_v15 = vadd.f32 %v4557_v21, %v9010_v58  ;;  %v4559_v17 = vpop.f32.mrb[119].mxu0  ;;  %v4823_v18 = vadd.f32 %v8675_v7, %v4822_v30  ;;  %v1052_v31 = vld [vmem:[#allocation2 + $0x1f8] sm:$0xff]  ;;  %v8702_v27 = vld [vmem:[%s8977_s2] ss:$0 sm:$0xff] (!%p5872_p11)  ;;  %v5000_v21 = vld [vmem:[#allocation2 + $0x10] sm:$0xff] (!%p5872_p11) }
 0x42c   : > { %4984 = vst [vmem:[#allocation2 + $0x1b0] sm:$0xff] %v4920_v43  ;;  %v4921_v49 = vadd.f32 %v4831_v14, %v1044_v54  ;;  %v4999_v54 = vld [vmem:[#allocation2 + $0x8] sm:$0xff] (!%p5872_p11)  ;;  %v5069_v20 = vadd.f32 (!%p5872_p11), %v8702_v27, %v4998_v46  ;;  %v5001_v14 = vld [vmem:[#allocation2 + $0x18] sm:$0xff] (!%p5872_p11)  ;;  %v5071_v30 = vadd.f32 (!%p5872_p11), %v8702_v27, %v5000_v21 }
 0x42d   : > { %4982 = vst [vmem:[#allocation2 + $0x1a0] sm:$0xff] %v4918_v6  ;;  %v4919_v39 = vadd.f32 %v4823_v18, %v1042_v44  ;;  %v5070_v43 = vadd.f32 (!%p5872_p11), %v8702_v27, %v4999_v54  ;;  %v5002_v44 = vld [vmem:[#allocation2 + $0x20] sm:$0xff] (!%p5872_p11)  ;;  %v5072_v6 = vadd.f32 (!%p5872_p11), %v8702_v27, %v5001_v14  ;;  %v5003_v58 = vld [vmem:[#allocation2 + $0x28] sm:$0xff] (!%p5872_p11)  ;;  %v5005_v18 = vld [vmem:[#allocation2 + $0x38] sm:$0xff] (!%p5872_p11) }
 0x42e   : > { %4985 = vst [vmem:[#allocation2 + $0x1b8] sm:$0xff] %v4921_v49  ;;  %6883 = vtanh.f32 (!%p5872_p11), %v5069_v20  ;;  %v5073_v17 = vadd.f32 (!%p5872_p11), %v8702_v27, %v5002_v44  ;;  %v5074_v49 = vadd.f32 (!%p5872_p11), %v8702_v27, %v5003_v58  ;;  %v5025_v46 = vld [vmem:[#allocation2 + $0xd8] sm:$0xff] (!%p5872_p11)  ;;  %v5027_v44 = vld [vmem:[#allocation2 + $0xe8] sm:$0xff] (!%p5872_p11)  ;;  %v5028_v58 = vld [vmem:[#allocation2 + $0xf0] sm:$0xff] (!%p5872_p11) }
 0x42f   : > { %4983 = vst [vmem:[#allocation2 + $0x1a8] sm:$0xff] %v4919_v39  ;;  %v5993_v37 = vpop.f32.mrb[184].mxu1  ;;  %6885 = vtanh.f32 (!%p5872_p11), %v5070_v43  ;;  %v5006_v39 = vld [vmem:[#allocation2 + $0x40] sm:$0xff] (!%p5872_p11) }
 0x430   : > { %v4562_v55 = vpop.f32.mrb[120].mxu0  ;;  %v4844_v57 = vadd.f32 %v6089_v23, %v5993_v37  ;;  %v4835_v47 = vpop.f32.mrb[185].mxu1  ;;  %6887 = vtanh.f32 (!%p5872_p11), %v5071_v30  ;;  %v5007_v37 = vld [vmem:[#allocation2 + $0x48] sm:$0xff] (!%p5872_p11)  ;;  %v5026_v43 = vld [vmem:[#allocation2 + $0xe0] sm:$0xff] (!%p5872_p11) }
 0x431   : > { %v6091_v12 = vadd.f32 %v4562_v55, %v9011_v40  ;;  %v4564_v60 = vpop.f32.mrb[121].mxu0  ;;  %v4836_v63 = vadd.f32 %v6087_v50, %v4835_v47  ;;  %v5994_v26 = vpop.f32.mrb[186].mxu1  ;;  %6889 = vtanh.f32 (!%p5872_p11), %v5072_v6  ;;  %v5076_v55 = vadd.f32 (!%p5872_p11), %v8702_v27, %v5005_v18  ;;  %v5009_v47 = vld [vmem:[#allocation2 + $0x58] sm:$0xff] (!%p5872_p11) }
 0x432   : > { %v4924_v4 = vadd.f32 %v4844_v57, %v1047_v0  ;;  %v4565_v7 = vpop.f32.mrb[122].mxu0  ;;  %v4847_v11 = vadd.f32 %v6090_v15, %v5994_v26  ;;  %v4838_v52 = vpop.f32.mrb[187].mxu1  ;;  %v5004_v15 = vld [vmem:[#allocation2 + $0x30] sm:$0xff] (!%p5872_p11)  ;;  %6891 = vtanh.f32 (!%p5872_p11), %v5073_v17  ;;  %v5078_v40 = vadd.f32 (!%p5872_p11), %v8702_v27, %v5007_v37  ;;  %v5029_v18 = vld [vmem:[#allocation2 + $0xf8] sm:$0xff] (!%p5872_p11) }
 0x433   : > { %v4922_v45 = vadd.f32 %v4836_v63, %v1045_v2  ;;  %v6092_v22 = vadd.f32 %v4565_v7, %v9012_v32  ;;  %v4567_v59 = vpop.f32.mrb[123].mxu0  ;;  %v4839_v25 = vadd.f32 %v6088_v8, %v4838_v52  ;;  %v5075_v0 = vadd.f32 (!%p5872_p11), %v8702_v27, %v5004_v15  ;;  %v5008_v57 = vld [vmem:[#allocation2 + $0x50] sm:$0xff] (!%p5872_p11)  ;;  %v5011_v63 = vld [vmem:[#allocation2 + $0x68] sm:$0xff] (!%p5872_p11)  ;;  %v5013_v7 = vld [vmem:[#allocation2 + $0x78] sm:$0xff] (!%p5872_p11) }
 0x434   : > { %4988 = vst [vmem:[#allocation2 + $0x1d0] sm:$0xff] %v4924_v4  ;;  %v4925_v48 = vadd.f32 %v4847_v11, %v1048_v42  ;;  %v5077_v2 = vadd.f32 (!%p5872_p11), %v8702_v27, %v5006_v39  ;;  %6893 = vtanh.f32 (!%p5872_p11), %v5074_v49  ;;  %v5079_v60 = vadd.f32 (!%p5872_p11), %v8702_v27, %v5008_v57  ;;  %v5012_v26 = vld [vmem:[#allocation2 + $0x70] sm:$0xff] (!%p5872_p11)  ;;  %v5015_v32 = vld [vmem:[#allocation2 + $0x88] sm:$0xff] (!%p5872_p11) }
 0x435   : > { %4986 = vst [vmem:[#allocation2 + $0x1c0] sm:$0xff] %v4922_v45  ;;  %v4923_v1 = vadd.f32 %v4839_v25, %v1046_v53  ;;  %6895 = vtanh.f32 (!%p5872_p11), %v5075_v0  ;;  %v5080_v42 = vadd.f32 (!%p5872_p11), %v8702_v27, %v5009_v47  ;;  %v5082_v11 = vadd.f32 (!%p5872_p11), %v8702_v27, %v5011_v63  ;;  %v5014_v53 = vld [vmem:[#allocation2 + $0x80] sm:$0xff] (!%p5872_p11)  ;;  %v5016_v25 = vld [vmem:[#allocation2 + $0x90] sm:$0xff] (!%p5872_p11)  ;;  %v5031_v57 = vld [vmem:[#allocation2 + $0x108] sm:$0xff] (!%p5872_p11) }
 0x436   : > { %4989 = vst [vmem:[#allocation2 + $0x1d8] sm:$0xff] %v4925_v48  ;;  %6897 = vtanh.f32 (!%p5872_p11), %v5076_v55  ;;  %v5083_v45 = vadd.f32 (!%p5872_p11), %v8702_v27, %v5012_v26  ;;  %v5084_v59 = vadd.f32 (!%p5872_p11), %v8702_v27, %v5013_v7  ;;  %v5096_v6 = vadd.f32 (!%p5872_p11), %v8702_v27, %v5025_v46  ;;  %v5030_v0 = vld [vmem:[#allocation2 + $0x100] sm:$0xff] (!%p5872_p11)  ;;  %v5033_v63 = vld [vmem:[#allocation2 + $0x118] sm:$0xff] (!%p5872_p11) }
 0x437   : > { %4987 = vst [vmem:[#allocation2 + $0x1c8] sm:$0xff] %v4923_v1  ;;  %v5997_v34 = vpop.f32.mrb[188].mxu1  ;;  %6899 = vtanh.f32 (!%p5872_p11), %v5077_v2  ;;  %v5085_v1 = vadd.f32 (!%p5872_p11), %v8702_v27, %v5014_v53  ;;  %v5097_v17 = vadd.f32 (!%p5872_p11), %v8702_v27, %v5026_v43  ;;  %v5098_v39 = vadd.f32 (!%p5872_p11), %v8702_v27, %v5027_v44  ;;  %v5035_v53 = vld [vmem:[#allocation2 + $0x128] sm:$0xff] (!%p5872_p11)  ;;  %v5046_v46 = vld [vmem:[#allocation2 + $0x180] sm:$0xff] (!%p5872_p11)  ;;  %v5048_v44 = vld [vmem:[#allocation2 + $0x190] sm:$0xff] (!%p5872_p11) }
 0x438   : > { %v4570_v50 = vpop.f32.mrb[124].mxu0  ;;  %v4851_v62 = vpop.f32.mrb[189].mxu1  ;;  %6901 = vtanh.f32 (!%p5872_p11), %v5078_v40  ;;  %v5099_v55 = vadd.f32 (!%p5872_p11), %v8702_v27, %v5028_v58  ;;  %v5100_v47 = vadd.f32 (!%p5872_p11), %v8702_v27, %v5029_v18  ;;  %v5032_v40 = vld [vmem:[#allocation2 + $0x110] sm:$0xff] (!%p5872_p11)  ;;  %v5102_v26 = vadd.f32 (!%p5872_p11), %v8702_v27, %v5031_v57  ;;  %v5047_v43 = vld [vmem:[#allocation2 + $0x188] sm:$0xff] (!%p5872_p11)  ;;  %v5049_v58 = vld [vmem:[#allocation2 + $0x198] sm:$0xff] (!%p5872_p11) }
 0x439   : > { %v6093_v13 = vadd.f32 %v4570_v50, %v9013_v16  ;;  %v4572_v33 = vpop.f32.mrb[125].mxu0  ;;  %v4852_v10 = vadd.f32 %v6091_v12, %v4851_v62  ;;  %v5998_v38 = vpop.f32.mrb[190].mxu1  ;;  %v5010_v12 = vld [vmem:[#allocation2 + $0x60] sm:$0xff] (!%p5872_p11)  ;;  %6903 = vtanh.f32 (!%p5872_p11), %v5079_v60  ;;  %v5101_v60 = vadd.f32 (!%p5872_p11), %v8702_v27, %v5030_v0  ;;  %v5051_v0 = vld [vmem:[#allocation2 + $0x1a8] sm:$0xff] (!%p5872_p11)  ;;  %v5052_v57 = vld [vmem:[#allocation2 + $0x1b0] sm:$0xff] (!%p5872_p11) }
 0x43a   : > { %v4573_v3 = vpop.f32.mrb[126].mxu0  ;;  %v4854_v56 = vpop.f32.mrb[191].mxu1  ;;  %v5081_v4 = vadd.f32 (!%p5872_p11), %v8702_v27, %v5010_v12  ;;  %6905 = vtanh.f32 (!%p5872_p11), %v5080_v42  ;;  %v5018_v62 = vld [vmem:[#allocation2 + $0xa0] sm:$0xff] (!%p5872_p11)  ;;  %v5019_v33 = vld [vmem:[#allocation2 + $0xa8] sm:$0xff] (!%p5872_p11) }
 0x43b   : > { %v4860_v8 = vadd.f32 %v6093_v13, %v5997_v34  ;;  %v4926_v9 = vadd.f32 %v4852_v10, %v1049_v28  ;;  %v6094_v36 = vadd.f32 %v4573_v3, %v9014_v19  ;;  %v4575_v35 = vpop.f32.mrb[127].mxu0  ;;  %v4855_v24 = vadd.f32 %v6092_v22, %v4854_v56  ;;  %4997 = sbr.rel (%p5872_p11) target bundleno = 1148 (0x47c), region = 66  ;;  %v6884_v52 = vpop.eup (!%p5872_p11), %6883  ;;  %v5017_v34 = vld [vmem:[#allocation2 + $0x98] sm:$0xff] (!%p5872_p11)  ;;  %v5022_v19 = vld [vmem:[#allocation2 + $0xc0] sm:$0xff] (!%p5872_p11) }
 0x43c   : > { %v6886_v22 = vpop.eup (!%p5872_p11), %6885  ;;  %5197 = vst [vmem:[%s8978_s3] sm:$0xff] (!%p5872_p11), %v6884_v52  ;;  %6907 = vtanh.f32 (!%p5872_p11), %v5081_v4  ;;  %v5086_v28 = vadd.f32 (!%p5872_p11), %v8702_v27, %v5015_v32  ;;  %v5087_v13 = vadd.f32 (!%p5872_p11), %v8702_v27, %v5016_v25  ;;  %v5021_v56 = vld [vmem:[#allocation2 + $0xb8] sm:$0xff] (!%p5872_p11)  ;;  %v5034_v4 = vld [vmem:[#allocation2 + $0x120] sm:$0xff] (!%p5872_p11)  ;;  %v5036_v32 = vld [vmem:[#allocation2 + $0x130] sm:$0xff] (!%p5872_p11) }
 0x43d   : > { %v4928_v51 = vadd.f32 %v4860_v8, %v1051_v29  ;;  %4990 = vst [vmem:[#allocation2 + $0x1e0] sm:$0xff] %v4926_v9  ;;  %v4863_v61 = vadd.f32 %v6094_v36, %v5998_v38  ;;  %v4927_v41 = vadd.f32 %v4855_v24, %v1050_v5  ;;  %v6888_v48 = vpop.eup (!%p5872_p11), %6887  ;;  %5198 = vst [vmem:[%s8978_s3 + $0x8] sm:$0xff] (!%p5872_p11), %v6886_v22  ;;  %6909 = vtanh.f32 (!%p5872_p11), %v5082_v11  ;;  %v5020_v29 = vld [vmem:[#allocation2 + $0xb0] sm:$0xff] (!%p5872_p11)  ;;  %v5023_v24 = vld [vmem:[#allocation2 + $0xc8] sm:$0xff] (!%p5872_p11) }
 0x43e   : > { %v6890_v50 = vpop.eup (!%p5872_p11), %6889  ;;  %5199 = vst [vmem:[%s8978_s3 + $0x10] sm:$0xff] (!%p5872_p11), %v6888_v48  ;;  %6911 = vtanh.f32 (!%p5872_p11), %v5083_v45  ;;  %v5088_v38 = vadd.f32 (!%p5872_p11), %v8702_v27, %v5017_v34  ;;  %v5089_v5 = vadd.f32 (!%p5872_p11), %v8702_v27, %v5018_v62  ;;  %v5090_v9 = vadd.f32 (!%p5872_p11), %v8702_v27, %v5019_v33  ;;  %v5037_v25 = vld [vmem:[#allocation2 + $0x138] sm:$0xff] (!%p5872_p11)  ;;  %v5038_v34 = vld [vmem:[#allocation2 + $0x140] sm:$0xff] (!%p5872_p11)  ;;  %v5039_v62 = vld [vmem:[#allocation2 + $0x148] sm:$0xff] (!%p5872_p11) }
 0x43f   : > { %4992 = vst [vmem:[#allocation2 + $0x1f0] sm:$0xff] %v4928_v51  ;;  %v4929_v23 = vadd.f32 %v4863_v61, %v1052_v31  ;;  %4991 = vst [vmem:[#allocation2 + $0x1e8] sm:$0xff] %v4927_v41  ;;  %v6892_v16 = vpop.eup (!%p5872_p11), %6891  ;;  %6913 = vtanh.f32 (!%p5872_p11), %v5084_v59  ;;  %v5091_v35 = vadd.f32 (!%p5872_p11), %v8702_v27, %v5020_v29  ;;  %v5092_v51 = vadd.f32 (!%p5872_p11), %v8702_v27, %v5021_v56  ;;  %v5024_v61 = vld [vmem:[#allocation2 + $0xd0] sm:$0xff] (!%p5872_p11)  ;;  %v5041_v29 = vld [vmem:[#allocation2 + $0x158] sm:$0xff] (!%p5872_p11) }
 0x440   : > { %5200 = vst [vmem:[%s8978_s3 + $0x18] sm:$0xff] (!%p5872_p11), %v6890_v50  ;;  %v6894_v10 = vpop.eup (!%p5872_p11), %6893  ;;  %5201 = vst [vmem:[%s8978_s3 + $0x20] sm:$0xff] (!%p5872_p11), %v6892_v16  ;;  %6915 = vtanh.f32 (!%p5872_p11), %v5085_v1  ;;  %v5094_v20 = vadd.f32 (!%p5872_p11), %v8702_v27, %v5023_v24  ;;  %v5095_v14 = vadd.f32 (!%p5872_p11), %v8702_v27, %v5024_v61  ;;  %v5103_v11 = vadd.f32 (!%p5872_p11), %v8702_v27, %v5032_v40  ;;  %v5040_v33 = vld [vmem:[#allocation2 + $0x150] sm:$0xff] (!%p5872_p11)  ;;  %v5042_v56 = vld [vmem:[#allocation2 + $0x160] sm:$0xff] (!%p5872_p11) }
 0x441   : > { %4993 = vst [vmem:[#allocation2 + $0x1f8] sm:$0xff] %v4929_v23  ;;  %v6896_v3 = vpop.eup (!%p5872_p11), %6895  ;;  %5202 = vst [vmem:[%s8978_s3 + $0x28] sm:$0xff] (!%p5872_p11), %v6894_v10  ;;  %6917 = vtanh.f32 (!%p5872_p11), %v5086_v28  ;;  %v5093_v23 = vadd.f32 (!%p5872_p11), %v8702_v27, %v5022_v19  ;;  %v5104_v45 = vadd.f32 (!%p5872_p11), %v8702_v27, %v5033_v63  ;;  %v5105_v59 = vadd.f32 (!%p5872_p11), %v8702_v27, %v5034_v4  ;;  %v5043_v19 = vld [vmem:[#allocation2 + $0x168] sm:$0xff] (!%p5872_p11)  ;;  %v5044_v24 = vld [vmem:[#allocation2 + $0x170] sm:$0xff] (!%p5872_p11) }
 0x442   : > { %v6898_v8 = vpop.eup %6897  ;;  %5203 = vst [vmem:[%s8978_s3 + $0x30] sm:$0xff] %v6896_v3  ;;  %6919 = vtanh.f32 %v5087_v13  ;;  %v5106_v1 = vadd.f32 %v8702_v27, %v5035_v53  ;;  %v5107_v28 = vadd.f32 %v8702_v27, %v5036_v32  ;;  %v5108_v13 = vadd.f32 %v8702_v27, %v5037_v25  ;;  %v5045_v61 = vld [vmem:[#allocation2 + $0x178] sm:$0xff]  ;;  %v5050_v18 = vld [vmem:[#allocation2 + $0x1a0] sm:$0xff]  ;;  %v5055_v4 = vld [vmem:[#allocation2 + $0x1c8] sm:$0xff] }
 0x443   : > { %v6900_v36 = vpop.eup %6899  ;;  %5204 = vst [vmem:[%s8978_s3 + $0x38] sm:$0xff] %v6898_v8  ;;  %6921 = vtanh.f32 %v5088_v38  ;;  %v5109_v38 = vadd.f32 %v8702_v27, %v5038_v34  ;;  %v5053_v40 = vld [vmem:[#allocation2 + $0x1b8] sm:$0xff]  ;;  %v5054_v63 = vld [vmem:[#allocation2 + $0x1c0] sm:$0xff]  ;;  %v5056_v53 = vld [vmem:[#allocation2 + $0x1d0] sm:$0xff] }
 0x444   : > { %v6902_v31 = vpop.eup %6901  ;;  %5205 = vst [vmem:[%s8978_s3 + $0x40] sm:$0xff] %v6900_v36  ;;  %6923 = vtanh.f32 %v5089_v5  ;;  %v5110_v5 = vadd.f32 %v8702_v27, %v5039_v62  ;;  %v5057_v32 = vld [vmem:[#allocation2 + $0x1d8] sm:$0xff]  ;;  %v5058_v25 = vld [vmem:[#allocation2 + $0x1e0] sm:$0xff] }
 0x445   : > { %v6904_v41 = vpop.eup %6903  ;;  %5206 = vst [vmem:[%s8978_s3 + $0x48] sm:$0xff] %v6902_v31  ;;  %6925 = vtanh.f32 %v5090_v9  ;;  %v5111_v9 = vadd.f32 %v8702_v27, %v5040_v33 }
 0x446   : > { %v6906_v54 = vpop.eup %6905  ;;  %5207 = vst [vmem:[%s8978_s3 + $0x50] sm:$0xff] %v6904_v41  ;;  %6927 = vtanh.f32 %v5091_v35  ;;  %v5112_v35 = vadd.f32 %v8702_v27, %v5041_v29  ;;  %v5059_v34 = vld [vmem:[#allocation2 + $0x1e8] sm:$0xff]  ;;  %v5060_v62 = vld [vmem:[#allocation2 + $0x1f0] sm:$0xff] }
 0x447   : > { %v6908_v21 = vpop.eup %6907  ;;  %5208 = vst [vmem:[%s8978_s3 + $0x58] sm:$0xff] %v6906_v54  ;;  %6929 = vtanh.f32 %v5092_v51  ;;  %v5113_v51 = vadd.f32 %v8702_v27, %v5042_v56 }
 0x448   : > { %v6910_v30 = vpop.eup %6909  ;;  %5209 = vst [vmem:[%s8978_s3 + $0x60] sm:$0xff] %v6908_v21  ;;  %6931 = vtanh.f32 %v5093_v23  ;;  %v5114_v23 = vadd.f32 %v8702_v27, %v5043_v19  ;;  %v5061_v33 = vld [vmem:[#allocation2 + $0x1f8] sm:$0xff] }
 0x449   : > { %v6912_v15 = vpop.eup %6911  ;;  %5210 = vst [vmem:[%s8978_s3 + $0x68] sm:$0xff] %v6910_v30  ;;  %6933 = vtanh.f32 %v5094_v20  ;;  %v5115_v20 = vadd.f32 %v8702_v27, %v5044_v24  ;;  %v5132_v56 = vadd.f32 %v8702_v27, %v5061_v33 }
 0x44a   : > { %v6914_v49 = vpop.eup %6913  ;;  %5211 = vst [vmem:[%s8978_s3 + $0x70] sm:$0xff] %v6912_v15  ;;  %6935 = vtanh.f32 %v5095_v14  ;;  %v5116_v14 = vadd.f32 %v8702_v27, %v5045_v61 }
 0x44b   : > { %v6916_v37 = vpop.eup %6915  ;;  %5212 = vst [vmem:[%s8978_s3 + $0x78] sm:$0xff] %v6914_v49  ;;  %6937 = vtanh.f32 %v5096_v6  ;;  %v5117_v6 = vadd.f32 %v8702_v27, %v5046_v46 }
 0x44c   : > { %v6918_v2 = vpop.eup %6917  ;;  %5213 = vst [vmem:[%s8978_s3 + $0x80] sm:$0xff] %v6916_v37  ;;  %6939 = vtanh.f32 %v5097_v17  ;;  %v5118_v17 = vadd.f32 %v8702_v27, %v5047_v43 }
 0x44d   : > { %v6920_v12 = vpop.eup %6919  ;;  %5214 = vst [vmem:[%s8978_s3 + $0x88] sm:$0xff] %v6918_v2  ;;  %6941 = vtanh.f32 %v5098_v39  ;;  %v5119_v39 = vadd.f32 %v8702_v27, %v5048_v44 }
 0x44e   : > { %v6922_v42 = vpop.eup %6921  ;;  %5215 = vst [vmem:[%s8978_s3 + $0x90] sm:$0xff] %v6920_v12  ;;  %6943 = vtanh.f32 %v5099_v55  ;;  %v5120_v55 = vadd.f32 %v8702_v27, %v5049_v58 }
 0x44f   : > { %v6924_v7 = vpop.eup %6923  ;;  %5216 = vst [vmem:[%s8978_s3 + $0x98] sm:$0xff] %v6922_v42  ;;  %6945 = vtanh.f32 %v5100_v47  ;;  %v5121_v47 = vadd.f32 %v8702_v27, %v5050_v18 }
 0x450   : > { %v6926_v52 = vpop.eup %6925  ;;  %5217 = vst [vmem:[%s8978_s3 + $0xa0] sm:$0xff] %v6924_v7  ;;  %6947 = vtanh.f32 %v5101_v60  ;;  %v5122_v60 = vadd.f32 %v8702_v27, %v5051_v0 }
 0x451   : > { %v6928_v22 = vpop.eup %6927  ;;  %5218 = vst [vmem:[%s8978_s3 + $0xa8] sm:$0xff] %v6926_v52  ;;  %6949 = vtanh.f32 %v5102_v26  ;;  %v5123_v26 = vadd.f32 %v8702_v27, %v5052_v57 }
 0x452   : > { %v6930_v48 = vpop.eup %6929  ;;  %5219 = vst [vmem:[%s8978_s3 + $0xb0] sm:$0xff] %v6928_v22  ;;  %6951 = vtanh.f32 %v5103_v11  ;;  %v5124_v11 = vadd.f32 %v8702_v27, %v5053_v40 }
 0x453   : > { %v6932_v50 = vpop.eup %6931  ;;  %5220 = vst [vmem:[%s8978_s3 + $0xb8] sm:$0xff] %v6930_v48  ;;  %6953 = vtanh.f32 %v5104_v45  ;;  %v5125_v45 = vadd.f32 %v8702_v27, %v5054_v63 }
 0x454   : > { %v6934_v16 = vpop.eup %6933  ;;  %5221 = vst [vmem:[%s8978_s3 + $0xc0] sm:$0xff] %v6932_v50  ;;  %6955 = vtanh.f32 %v5105_v59  ;;  %v5126_v59 = vadd.f32 %v8702_v27, %v5055_v4 }
 0x455   : > { %v6936_v10 = vpop.eup %6935  ;;  %5222 = vst [vmem:[%s8978_s3 + $0xc8] sm:$0xff] %v6934_v16  ;;  %6957 = vtanh.f32 %v5106_v1  ;;  %v5127_v1 = vadd.f32 %v8702_v27, %v5056_v53 }
 0x456   : > { %v6938_v3 = vpop.eup %6937  ;;  %5223 = vst [vmem:[%s8978_s3 + $0xd0] sm:$0xff] %v6936_v10  ;;  %6959 = vtanh.f32 %v5107_v28  ;;  %v5128_v28 = vadd.f32 %v8702_v27, %v5057_v32 }
 0x457   : > { %v6940_v8 = vpop.eup %6939  ;;  %5224 = vst [vmem:[%s8978_s3 + $0xd8] sm:$0xff] %v6938_v3  ;;  %6961 = vtanh.f32 %v5108_v13  ;;  %v5129_v13 = vadd.f32 %v8702_v27, %v5058_v25  ;;  %v5131_v3 = vadd.f32 %v8702_v27, %v5060_v62 }
 0x458   : > { %v6942_v36 = vpop.eup %6941  ;;  %5225 = vst [vmem:[%s8978_s3 + $0xe0] sm:$0xff] %v6940_v8  ;;  %6963 = vtanh.f32 %v5109_v38  ;;  %v5130_v38 = vadd.f32 %v8702_v27, %v5059_v34 }
 0x459   : > { %v6944_v31 = vpop.eup %6943  ;;  %5226 = vst [vmem:[%s8978_s3 + $0xe8] sm:$0xff] %v6942_v36  ;;  %6965 = vtanh.f32 %v5110_v5 }
 0x45a   : > { %v6946_v41 = vpop.eup %6945  ;;  %5227 = vst [vmem:[%s8978_s3 + $0xf0] sm:$0xff] %v6944_v31  ;;  %6967 = vtanh.f32 %v5111_v9 }
 0x45b   : > { %v6948_v54 = vpop.eup %6947  ;;  %5228 = vst [vmem:[%s8978_s3 + $0xf8] sm:$0xff] %v6946_v41  ;;  %6969 = vtanh.f32 %v5112_v35 }
 0x45c   : > { %v6950_v21 = vpop.eup %6949  ;;  %5229 = vst [vmem:[%s8978_s3 + $0x100] sm:$0xff] %v6948_v54  ;;  %6971 = vtanh.f32 %v5113_v51 }
 0x45d   : > { %v6952_v30 = vpop.eup %6951  ;;  %5230 = vst [vmem:[%s8978_s3 + $0x108] sm:$0xff] %v6950_v21  ;;  %6973 = vtanh.f32 %v5114_v23 }
 0x45e   : > { %v6954_v15 = vpop.eup %6953  ;;  %5231 = vst [vmem:[%s8978_s3 + $0x110] sm:$0xff] %v6952_v30  ;;  %6975 = vtanh.f32 %v5115_v20 }
 0x45f   : > { %v6956_v49 = vpop.eup %6955  ;;  %5232 = vst [vmem:[%s8978_s3 + $0x118] sm:$0xff] %v6954_v15  ;;  %6977 = vtanh.f32 %v5116_v14 }
 0x460   : > { %v6958_v37 = vpop.eup %6957  ;;  %5233 = vst [vmem:[%s8978_s3 + $0x120] sm:$0xff] %v6956_v49  ;;  %6979 = vtanh.f32 %v5117_v6 }
 0x461   : > { %v6960_v2 = vpop.eup %6959  ;;  %5234 = vst [vmem:[%s8978_s3 + $0x128] sm:$0xff] %v6958_v37  ;;  %6981 = vtanh.f32 %v5118_v17 }
 0x462   : > { %v6962_v12 = vpop.eup %6961  ;;  %5235 = vst [vmem:[%s8978_s3 + $0x130] sm:$0xff] %v6960_v2  ;;  %6983 = vtanh.f32 %v5119_v39 }
 0x463   : > { %v6964_v42 = vpop.eup %6963  ;;  %5236 = vst [vmem:[%s8978_s3 + $0x138] sm:$0xff] %v6962_v12  ;;  %6985 = vtanh.f32 %v5120_v55 }
 0x464   : > { %v6966_v7 = vpop.eup %6965  ;;  %5237 = vst [vmem:[%s8978_s3 + $0x140] sm:$0xff] %v6964_v42  ;;  %6987 = vtanh.f32 %v5121_v47 }
 0x465   : > { %v6968_v52 = vpop.eup %6967  ;;  %5238 = vst [vmem:[%s8978_s3 + $0x148] sm:$0xff] %v6966_v7  ;;  %6989 = vtanh.f32 %v5122_v60 }
 0x466   : > { %v6970_v22 = vpop.eup %6969  ;;  %5239 = vst [vmem:[%s8978_s3 + $0x150] sm:$0xff] %v6968_v52  ;;  %6991 = vtanh.f32 %v5123_v26 }
 0x467   : > { %v6972_v48 = vpop.eup %6971  ;;  %5240 = vst [vmem:[%s8978_s3 + $0x158] sm:$0xff] %v6970_v22  ;;  %6993 = vtanh.f32 %v5124_v11 }
 0x468   : > { %v6974_v50 = vpop.eup %6973  ;;  %5241 = vst [vmem:[%s8978_s3 + $0x160] sm:$0xff] %v6972_v48  ;;  %6995 = vtanh.f32 %v5125_v45 }
 0x469   : > { %v6976_v16 = vpop.eup %6975  ;;  %5242 = vst [vmem:[%s8978_s3 + $0x168] sm:$0xff] %v6974_v50  ;;  %6997 = vtanh.f32 %v5126_v59 }
 0x46a   : > { %v6978_v10 = vpop.eup %6977  ;;  %5243 = vst [vmem:[%s8978_s3 + $0x170] sm:$0xff] %v6976_v16  ;;  %6999 = vtanh.f32 %v5127_v1 }
 0x46b   : > { %v6980_v29 = vpop.eup %6979  ;;  %5244 = vst [vmem:[%s8978_s3 + $0x178] sm:$0xff] %v6978_v10  ;;  %7001 = vtanh.f32 %v5128_v28 }
 0x46c   : > { %v6982_v5 = vpop.eup %6981  ;;  %5245 = vst [vmem:[%s8978_s3 + $0x180] sm:$0xff] %v6980_v29  ;;  %7003 = vtanh.f32 %v5129_v13 }
 0x46d   : > { %v6984_v8 = vpop.eup %6983  ;;  %5246 = vst [vmem:[%s8978_s3 + $0x188] sm:$0xff] %v6982_v5  ;;  %7005 = vtanh.f32 %v5130_v38 }
 0x46e   : > { %v6986_v9 = vpop.eup %6985  ;;  %5247 = vst [vmem:[%s8978_s3 + $0x190] sm:$0xff] %v6984_v8  ;;  %7007 = vtanh.f32 %v5131_v3 }
 0x46f   : > { %v6988_v19 = vpop.eup %6987  ;;  %5248 = vst [vmem:[%s8978_s3 + $0x198] sm:$0xff] %v6986_v9  ;;  %7009 = vtanh.f32 %v5132_v56 }
 0x470   : > { %v6990_v36 = vpop.eup %6989  ;;  %5249 = vst [vmem:[%s8978_s3 + $0x1a0] sm:$0xff] %v6988_v19 }
 0x471   : > { %v6992_v27 = vpop.eup %6991  ;;  %5250 = vst [vmem:[%s8978_s3 + $0x1a8] sm:$0xff] %v6990_v36 }
 0x472   : > { %v6994_v35 = vpop.eup %6993  ;;  %5251 = vst [vmem:[%s8978_s3 + $0x1b0] sm:$0xff] %v6992_v27 }
 0x473   : > { %v6996_v24 = vpop.eup %6995  ;;  %5252 = vst [vmem:[%s8978_s3 + $0x1b8] sm:$0xff] %v6994_v35 }
 0x474   : > { %v6998_v31 = vpop.eup %6997  ;;  %5253 = vst [vmem:[%s8978_s3 + $0x1c0] sm:$0xff] %v6996_v24 }
 0x475   : > { %v7000_v51 = vpop.eup %6999  ;;  %5254 = vst [vmem:[%s8978_s3 + $0x1c8] sm:$0xff] %v6998_v31 }
 0x476   : > { %v7002_v61 = vpop.eup %7001  ;;  %5255 = vst [vmem:[%s8978_s3 + $0x1d0] sm:$0xff] %v7000_v51 }
 0x477   : > { %v7004_v41 = vpop.eup %7003  ;;  %5256 = vst [vmem:[%s8978_s3 + $0x1d8] sm:$0xff] %v7002_v61 }
 0x478   : > { %v7006_v23 = vpop.eup %7005  ;;  %5257 = vst [vmem:[%s8978_s3 + $0x1e0] sm:$0xff] %v7004_v41 }
 0x479   : > { %v7008_v46 = vpop.eup %7007  ;;  %5258 = vst [vmem:[%s8978_s3 + $0x1e8] sm:$0xff] %v7006_v23 }
 0x47a   : > { %v7010_v54 = vpop.eup %7009  ;;  %5259 = vst [vmem:[%s8978_s3 + $0x1f0] sm:$0xff] %v7008_v46 }
 0x47b   : > { %5260 = vst [vmem:[%s8978_s3 + $0x1f8] sm:$0xff] %v7010_v54 }
 0x47c PF: > { %s13_s16 = sadd.s32 1, %s7049_s16   ;;  %s9015_s12 = smov %s7037_s13 }
 0x47d   : > { %p10_p12 = scmp.ge.s32.totalorder %s13_s16, 5   ;;  %s9016_s13 = smov %s7108_s20 }
 0x47e   : > { %s9017_s14 = smov %s7045_s15  ;;  %s9018_s15 = smov %s9020_s17 }
 0x47f   :  { %12 = sbr.rel (!%p10_p12) target bundleno = 3 (0x3), region = 113 }

</bundles_post_ra>
